<compile_context>
chip_gen: v7x
topology: tpu7x:2x2x1
jax: 0.10.0
libtpu: 0.0.40
codegen_flags: <defaults>
</compile_context>

<pallas_src>
import jax
import jax.numpy as jnp
from jax.experimental import pallas as pl
from jax.experimental.pallas import tpu as pltpu


# ------------------------------ Pallas kernels -------------------------------

def _conv_pool_kernel(x0_ref, x1_ref, x2_ref, x3_ref, w_ref, b_ref, o_ref):
    """relu(maxpool2x2(conv(x)+b)): the 4 pool-quadrant patch matrices share
    one weight; max of the 4 MXU results == maxpool, then bias + ReLU."""
    w = w_ref[...]
    m = jnp.dot(x0_ref[...], w, preferred_element_type=jnp.float32)
    m = jnp.maximum(m, jnp.dot(x1_ref[...], w, preferred_element_type=jnp.float32))
    m = jnp.maximum(m, jnp.dot(x2_ref[...], w, preferred_element_type=jnp.float32))
    m = jnp.maximum(m, jnp.dot(x3_ref[...], w, preferred_element_type=jnp.float32))
    o_ref[...] = jnp.maximum(m + b_ref[...], 0.0)


def _conv_relu_kernel(x_ref, w_ref, b_ref, o_ref):
    """relu(x @ w + b)   (conv1-of-block, BN folded into w/b)."""
    acc = jnp.dot(x_ref[...], w_ref[...], preferred_element_type=jnp.float32)
    o_ref[...] = jnp.maximum(acc + b_ref[...], 0.0)


def _conv_res_kernel(x_ref, w_ref, b_ref, res_ref, o_ref):
    """relu(x @ w + b + residual)   (conv2-of-block, identity shortcut fused)."""
    acc = jnp.dot(x_ref[...], w_ref[...], preferred_element_type=jnp.float32)
    o_ref[...] = jnp.maximum(acc + b_ref[...] + res_ref[...], 0.0)


def _conv_down_kernel(x_ref, w_ref, b_ref, xd_ref, wd_ref, bd_ref, o_ref):
    """relu((x @ w + b) + (xd @ wd + bd))  (conv2 + 1x1 downsample fused)."""
    acc = jnp.dot(x_ref[...], w_ref[...], preferred_element_type=jnp.float32) + b_ref[...]
    acc = acc + jnp.dot(xd_ref[...], wd_ref[...],
                        preferred_element_type=jnp.float32) + bd_ref[...]
    o_ref[...] = jnp.maximum(acc, 0.0)


def _head_kernel(x_ref, p_ref, w1_ref, b1_ref, w2_ref, b2_ref, w3t_ref, b3_ref,
                 o_ref):
    """AdaptiveAvgPool (as a tiny matmul) + fc1/ReLU + fc2/ReLU + fc3/Sigmoid,
    all in one call. fc3 (out width 1) is done as mul+lane-reduce."""
    pooled = jnp.dot(p_ref[...], x_ref[...], preferred_element_type=jnp.float32)
    h = jnp.dot(pooled.astype(jnp.bfloat16), w1_ref[...],
                preferred_element_type=jnp.float32) + b1_ref[...]
    h = jnp.maximum(h, 0.0)
    h = jnp.dot(h.astype(jnp.bfloat16), w2_ref[...],
                preferred_element_type=jnp.float32) + b2_ref[...]
    h = jnp.maximum(h, 0.0)
    z = jnp.sum(h * w3t_ref[...], axis=1, keepdims=True) + b3_ref[...]
    o_ref[...] = 1.0 / (1.0 + jnp.exp(-z))


# ------------------------------ call wrappers --------------------------------

def _conv_pool_call(quads, w, b):
    """Fused conv + bias + ReLU + 2x2 maxpool on 4 quadrant patch matrices."""
    M, K = quads[0].shape
    Nc = w.shape[1]
    tm = 112
    if M % tm == 0 and M // tm > 1:
        # Grid over rows so v7x can shard across both TensorCores.
        x_spec = pl.BlockSpec((tm, K), lambda i: (i, 0))
        return pl.pallas_call(
            _conv_pool_kernel,
            out_shape=jax.ShapeDtypeStruct((M, Nc), jnp.float32),
            grid=(M // tm,),
            in_specs=[x_spec, x_spec, x_spec, x_spec,
                      pl.BlockSpec((K, Nc), lambda i: (0, 0)),
                      pl.BlockSpec((1, Nc), lambda i: (0, 0))],
            out_specs=pl.BlockSpec((tm, Nc), lambda i: (i, 0)),
            compiler_params=pltpu.CompilerParams(
                dimension_semantics=("parallel",)),
        )(*quads, w, b)
    # Tiny M: single full-array VMEM block, no grid, no padding round-trips.
    return pl.pallas_call(
        _conv_pool_kernel,
        out_shape=jax.ShapeDtypeStruct((M, Nc), jnp.float32),
    )(*quads, w, b)


# ------------------------------ XLA-side glue ---------------------------------

def _im2col(x, kh, kw, stride, pad):
    """x: [N,H,W,C] -> bf16 patches [N*OH*OW, kh*kw*C] (pure slicing glue that
    XLA fuses with the bf16 cast)."""
    if pad:
        x = jnp.pad(x, ((0, 0), (pad, pad), (pad, pad), (0, 0)))
    n, h, w, c = x.shape
    oh = (h - kh) // stride + 1
    ow = (w - kw) // stride + 1
    taps = []
    for ki in range(kh):
        for kj in range(kw):
            taps.append(x[:, ki:ki + stride * (oh - 1) + 1:stride,
                          kj:kj + stride * (ow - 1) + 1:stride, :])
    p = jnp.stack(taps, axis=3)                      # [N, OH, OW, kh*kw, C]
    return p.reshape(n * oh * ow, kh * kw * c).astype(jnp.bfloat16), (n, oh, ow)


def _pool_quadrant_patches(x, kh, kw, pad):
    """Patches for conv(stride 1) followed by 2x2/2 maxpool: one im2col matrix
    per pool quadrant, each [N*PH*PW, kh*kw*C] (bf16)."""
    if pad:
        x = jnp.pad(x, ((0, 0), (pad, pad), (pad, pad), (0, 0)))
    n, hp, wp, c = x.shape
    ph = (hp - kh + 1) // 2
    pw = (wp - kw + 1) // 2
    quads = []
    for a in range(2):
        for b in range(2):
            taps = []
            for ki in range(kh):
                for kj in range(kw):
                    taps.append(x[:, a + ki: a + ki + 2 * (ph - 1) + 1: 2,
                                  b + kj: b + kj + 2 * (pw - 1) + 1: 2, :])
            p = jnp.stack(taps, axis=3).reshape(n * ph * pw, kh * kw * c)
            quads.append(p.astype(jnp.bfloat16))
    return quads, (n, ph, pw)


def _residual_block(x_nhwc, blk):
    n, h, w, cin = x_nhwc.shape
    stride = 2 if "wd" in blk else 1   # downsample <=> stride-2 block here
    cout = blk["w1"].shape[1]

    # conv1 + BN + ReLU (one fused call)
    p1, (_, oh, ow) = _im2col(x_nhwc, 3, 3, stride, 1)
    y = pl.pallas_call(
        _conv_relu_kernel,
        out_shape=jax.ShapeDtypeStruct((n * oh * ow, cout), jnp.float32),
    )(p1, blk["w1"], blk["b1"])

    # conv2 + BN (+ downsample) + residual add + ReLU (one fused call)
    p2, _ = _im2col(y.reshape(n, oh, ow, cout), 3, 3, 1, 1)
    if "wd" in blk:
        xd = x_nhwc[:, ::stride, ::stride, :].reshape(n * oh * ow, cin)
        out = pl.pallas_call(
            _conv_down_kernel,
            out_shape=jax.ShapeDtypeStruct((n * oh * ow, cout), jnp.float32),
        )(p2, blk["w2"], blk["b2"], xd.astype(jnp.bfloat16),
          blk["wd"], blk["bd"])
    else:
        identity = x_nhwc.reshape(n * h * w, cin)    # stride 1, cin == cout
        out = pl.pallas_call(
            _conv_res_kernel,
            out_shape=jax.ShapeDtypeStruct((n * oh * ow, cout), jnp.float32),
        )(p2, blk["w2"], blk["b2"], identity)
    return out.reshape(n, oh, ow, cout)


def _forward_once(x_nhwc, P):
    # conv0 5x5 pad 2 + ReLU + maxpool 2x2  (fused, 28x28 -> 14x14x32)
    quads, (n, ph, pw) = _pool_quadrant_patches(x_nhwc, 5, 5, pad=2)
    h = _conv_pool_call(quads, P["conv0_w"], P["conv0_b"])
    h = h.reshape(n, ph, pw, P["conv0_w"].shape[1])

    # conv1 5x5 valid + ReLU + maxpool 2x2  (fused, 14x14 -> 5x5x64)
    quads, (n, ph, pw) = _pool_quadrant_patches(h, 5, 5, pad=0)
    h = _conv_pool_call(quads, P["conv1_w"], P["conv1_b"])
    h = h.reshape(n, ph, pw, P["conv1_w"].shape[1])

    # residual stages (2 fused calls per block)
    for blk in P["layer1"] + P["layer2"] + P["layer3"]:
        h = _residual_block(h, blk)

    # AdaptiveAvgPool((1,1)) + Dropout(eval) + fc head (single fused call)
    nb, hh, ww, c = h.shape
    x2d = h.reshape(nb * hh * ww, c)
    pmat = jnp.kron(jnp.eye(nb, dtype=jnp.float32),
                    jnp.ones((1, hh * ww), jnp.float32)) / float(hh * ww)
    # TODO(synk): nn.Dropout(p=0.5) is stochastic in train mode; eval-mode identity here.
    return pl.pallas_call(
        _head_kernel,
        out_shape=jax.ShapeDtypeStruct((nb, 1), jnp.float32),
    )(x2d, pmat, P["fc1_w"], P["fc1_b"], P["fc2_w"], P["fc2_b"],
      P["fc3_wt"], P["fc3_b"])


def siamese_forward(x_nchw, params):
    x1 = x_nchw[:, :, :, :28]
    x2 = x_nchw[:, :, :, 28:]
    # Batch the two branches so the whole network runs once.
    xb = jnp.transpose(jnp.concatenate([x1, x2], axis=0), (0, 2, 3, 1))  # NHWC
    out = _forward_once(xb, params)                  # [2B, 1]
    b = x_nchw.shape[0]
    return 1.0 - jnp.abs(out[:b] - out[b:])


# --------------------- parameter init + one-time folding ---------------------

def init_params(key):
    keys = iter(jax.random.split(key, 256))
    nk = lambda: next(keys)

    def conv_w(cout, cin, kh, kw):
        fan_in = cin * kh * kw
        return (jax.random.normal(nk(), (cout, cin, kh, kw), jnp.float32)
                / jnp.sqrt(fan_in))

    def bn(c):
        return {"gamma": 1.0 + 0.1 * jax.random.normal(nk(), (c,), jnp.float32),
                "beta": 0.1 * jax.random.normal(nk(), (c,), jnp.float32),
                "mean": 0.1 * jax.random.normal(nk(), (c,), jnp.float32),
                "var": 1.0 + 0.1 * jax.random.uniform(nk(), (c,), jnp.float32)}

    def res_block(cin, cout, stride):
        p = {"conv1": conv_w(cout, cin, 3, 3), "bn1": bn(cout),
             "conv2": conv_w(cout, cout, 3, 3), "bn2": bn(cout)}
        if stride != 1 or cin != cout:
            p["down_conv"] = conv_w(cout, cin, 1, 1)
            p["down_bn"] = bn(cout)
        return p

    def linear(cin, cout):
        w = jax.random.normal(nk(), (cin, cout), jnp.float32) / jnp.sqrt(cin)
        b = 0.1 * jax.random.normal(nk(), (cout,), jnp.float32)
        return w, b

    params = {
        "conv0_w": conv_w(32, 1, 5, 5),
        "conv0_b": 0.1 * jax.random.normal(nk(), (32,), jnp.float32),
        "conv1_w": conv_w(64, 32, 5, 5),
        "conv1_b": 0.1 * jax.random.normal(nk(), (64,), jnp.float32),
        "layer1": [res_block(64, 64, 1), res_block(64, 64, 1)],
        "layer2": [res_block(64, 128, 2), res_block(128, 128, 1)],
        "layer3": [res_block(128, 256, 2), res_block(256, 256, 1)],
    }
    params["fc1_w"], params["fc1_b"] = linear(256, 500)
    params["fc2_w"], params["fc2_b"] = linear(500, 10)
    params["fc3_w"], params["fc3_b"] = linear(10, 1)
    return params


def prepare_params(raw, eps=1e-5):
    """One-time transform: fold BN (inference mode) into conv weights, reshape
    OIHW -> [kh*kw*Cin, Cout], cast matmul operands to bf16 (fold in f32 first),
    keep biases / epilogue terms in f32."""
    def fold_conv(w_oihw, bias=None, bn=None):
        cout, cin, kh, kw = w_oihw.shape
        w = jnp.transpose(w_oihw, (2, 3, 1, 0)).reshape(kh * kw * cin, cout)
        if bn is not None:
            scale = bn["gamma"] / jnp.sqrt(bn["var"] + eps)
            b = bn["beta"] - bn["mean"] * scale
            w = w * scale[None, :]
        else:
            b = bias
        return w.astype(jnp.bfloat16), b.reshape(1, cout).astype(jnp.float32)

    def fold_block(blk):
        out = {}
        out["w1"], out["b1"] = fold_conv(blk["conv1"], bn=blk["bn1"])
        out["w2"], out["b2"] = fold_conv(blk["conv2"], bn=blk["bn2"])
        if "down_conv" in blk:
            out["wd"], out["bd"] = fold_conv(blk["down_conv"], bn=blk["down_bn"])
        return out

    p = {}
    p["conv0_w"], p["conv0_b"] = fold_conv(raw["conv0_w"], bias=raw["conv0_b"])
    p["conv1_w"], p["conv1_b"] = fold_conv(raw["conv1_w"], bias=raw["conv1_b"])
    for name in ("layer1", "layer2", "layer3"):
        p[name] = [fold_block(b) for b in raw[name]]
    p["fc1_w"] = raw["fc1_w"].astype(jnp.bfloat16)
    p["fc1_b"] = raw["fc1_b"].reshape(1, -1).astype(jnp.float32)
    p["fc2_w"] = raw["fc2_w"].astype(jnp.bfloat16)
    p["fc2_b"] = raw["fc2_b"].reshape(1, -1).astype(jnp.float32)
    p["fc3_wt"] = raw["fc3_w"].reshape(1, -1).astype(jnp.float32)   # [1, 10]
    p["fc3_b"] = raw["fc3_b"].reshape(1, 1).astype(jnp.float32)
    return p


if __name__ == "__main__":
    key = jax.random.PRNGKey(0)
    k_param, k_in = jax.random.split(key)
    params = prepare_params(init_params(k_param))
    # PyTorch-style NCHW input: batch=2, 1 channel, 28x56 (two 28x28 halves).
    x = jax.random.normal(k_in, (2, 1, 28, 56), jnp.float32)
    fwd = jax.jit(siamese_forward)
    out = jax.block_until_ready(fwd(x, params))
    assert out.shape == (2, 1)
    assert bool(jnp.all(jnp.isfinite(out)))
    print("KERNEL_OK")
</pallas_src>

<mosaic_0001>
module attributes {stable_mosaic.version = 11 : i64} {
  func.func @_conv_pool_kernel(%arg0: i32, %arg1: memref<112x25xbf16, #tpu.memory_space<vmem>>, %arg2: memref<112x25xbf16, #tpu.memory_space<vmem>>, %arg3: memref<112x25xbf16, #tpu.memory_space<vmem>>, %arg4: memref<112x25xbf16, #tpu.memory_space<vmem>>, %arg5: memref<25x32xbf16, #tpu.memory_space<vmem>>, %arg6: memref<1x32xf32, #tpu.memory_space<vmem>>, %arg7: memref<112x32xf32, #tpu.memory_space<vmem>>) attributes {dimension_semantics = [#tpu.dimension_semantics<parallel>], iteration_bounds = array<i64: 7>, scalar_prefetch = 0 : i64, scratch_operands = 0 : i64, tpu.core_type = #tpu.core_type<tc>, window_params = [{transform_indices = @transform_0, window_bounds = array<i64: 112, 25>}, {transform_indices = @transform_1, window_bounds = array<i64: 112, 25>}, {transform_indices = @transform_2, window_bounds = array<i64: 112, 25>}, {transform_indices = @transform_3, window_bounds = array<i64: 112, 25>}, {pipeline_mode = #tpu.pipeline_mode<synchronous>, transform_indices = @transform_4, window_bounds = array<i64: 25, 32>}, {pipeline_mode = #tpu.pipeline_mode<synchronous>, transform_indices = @transform_5, window_bounds = array<i64: 1, 32>}, {transform_indices = @transform_6, window_bounds = array<i64: 112, 32>}]} {
    %c0 = arith.constant 0 : index
    %c0_0 = arith.constant 0 : index
    %0 = vector.load %arg5[%c0, %c0_0] : memref<25x32xbf16, #tpu.memory_space<vmem>>, vector<25x32xbf16>
    %c0_1 = arith.constant 0 : index
    %c0_2 = arith.constant 0 : index
    %1 = vector.load %arg1[%c0_1, %c0_2] : memref<112x25xbf16, #tpu.memory_space<vmem>>, vector<112x25xbf16>
    %cst = arith.constant dense<0.000000e+00> : vector<112x32xf32>
    %2 = tpu.matmul %1, %0, %cst {dimension_numbers = #tpu.dot_dimension_numbers<[1], [0], [0], [1], [0, 0, 1, 1], [], []>} : vector<112x25xbf16>, vector<25x32xbf16>, vector<112x32xf32> -> vector<112x32xf32>
    %c0_3 = arith.constant 0 : index
    %c0_4 = arith.constant 0 : index
    %3 = vector.load %arg2[%c0_3, %c0_4] : memref<112x25xbf16, #tpu.memory_space<vmem>>, vector<112x25xbf16>
    %cst_5 = arith.constant dense<0.000000e+00> : vector<112x32xf32>
    %4 = tpu.matmul %3, %0, %cst_5 {dimension_numbers = #tpu.dot_dimension_numbers<[1], [0], [0], [1], [0, 0, 1, 1], [], []>} : vector<112x25xbf16>, vector<25x32xbf16>, vector<112x32xf32> -> vector<112x32xf32>
    %5 = arith.maximumf %2, %4 : vector<112x32xf32>
    %c0_6 = arith.constant 0 : index
    %c0_7 = arith.constant 0 : index
    %6 = vector.load %arg3[%c0_6, %c0_7] : memref<112x25xbf16, #tpu.memory_space<vmem>>, vector<112x25xbf16>
    %cst_8 = arith.constant dense<0.000000e+00> : vector<112x32xf32>
    %7 = tpu.matmul %6, %0, %cst_8 {dimension_numbers = #tpu.dot_dimension_numbers<[1], [0], [0], [1], [0, 0, 1, 1], [], []>} : vector<112x25xbf16>, vector<25x32xbf16>, vector<112x32xf32> -> vector<112x32xf32>
    %8 = arith.maximumf %5, %7 : vector<112x32xf32>
    %c0_9 = arith.constant 0 : index
    %c0_10 = arith.constant 0 : index
    %9 = vector.load %arg4[%c0_9, %c0_10] : memref<112x25xbf16, #tpu.memory_space<vmem>>, vector<112x25xbf16>
    %cst_11 = arith.constant dense<0.000000e+00> : vector<112x32xf32>
    %10 = tpu.matmul %9, %0, %cst_11 {dimension_numbers = #tpu.dot_dimension_numbers<[1], [0], [0], [1], [0, 0, 1, 1], [], []>} : vector<112x25xbf16>, vector<25x32xbf16>, vector<112x32xf32> -> vector<112x32xf32>
    %11 = arith.maximumf %8, %10 : vector<112x32xf32>
    %c0_12 = arith.constant 0 : index
    %c0_13 = arith.constant 0 : index
    %12 = vector.load %arg6[%c0_12, %c0_13] : memref<1x32xf32, #tpu.memory_space<vmem>>, vector<1x32xf32>
    %13 = vector.broadcast %12 : vector<1x32xf32> to vector<112x32xf32>
    %14 = arith.addf %11, %13 : vector<112x32xf32>
    %cst_14 = arith.constant 0.000000e+00 : f32
    %15 = vector.broadcast %cst_14 : f32 to vector<112x32xf32>
    %16 = arith.maximumf %14, %15 : vector<112x32xf32>
    %c0_15 = arith.constant 0 : index
    %c0_16 = arith.constant 0 : index
    %17 = vector.load %arg7[%c0_15, %c0_16] : memref<112x32xf32, #tpu.memory_space<vmem>>, vector<112x32xf32>
    tpu.vector_store %arg7[%c0_15, %c0_16], %16 {strides = array<i32>} : memref<112x32xf32, #tpu.memory_space<vmem>>, vector<112x32xf32>,
    return
  }
  func.func @transform_0(%arg0: i32) -> (i32, i32) {
    %c0_i32 = arith.constant 0 : i32
    %c0_i32_0 = arith.constant 0 : i32
    return %arg0, %c0_i32 : i32, i32
  }
  func.func @transform_1(%arg0: i32) -> (i32, i32) {
    %c0_i32 = arith.constant 0 : i32
    %c0_i32_0 = arith.constant 0 : i32
    return %arg0, %c0_i32 : i32, i32
  }
  func.func @transform_2(%arg0: i32) -> (i32, i32) {
    %c0_i32 = arith.constant 0 : i32
    %c0_i32_0 = arith.constant 0 : i32
    return %arg0, %c0_i32 : i32, i32
  }
  func.func @transform_3(%arg0: i32) -> (i32, i32) {
    %c0_i32 = arith.constant 0 : i32
    %c0_i32_0 = arith.constant 0 : i32
    return %arg0, %c0_i32 : i32, i32
  }
  func.func @transform_4(%arg0: i32) -> (i32, i32) {
    %c0_i32 = arith.constant 0 : i32
    %c0_i32_0 = arith.constant 0 : i32
    %c0_i32_1 = arith.constant 0 : i32
    return %c0_i32, %c0_i32_0 : i32, i32
  }
  func.func @transform_5(%arg0: i32) -> (i32, i32) {
    %c0_i32 = arith.constant 0 : i32
    %c0_i32_0 = arith.constant 0 : i32
    %c0_i32_1 = arith.constant 0 : i32
    return %c0_i32, %c0_i32_0 : i32, i32
  }
  func.func @transform_6(%arg0: i32) -> (i32, i32) {
    %c0_i32 = arith.constant 0 : i32
    %c0_i32_0 = arith.constant 0 : i32
    return %arg0, %c0_i32 : i32, i32
  }
}

module attributes {stable_mosaic.version = 11 : i64} {
  func.func @_conv_pool_kernel(%arg0: memref<100x800xbf16, #tpu.memory_space<vmem>>, %arg1: memref<100x800xbf16, #tpu.memory_space<vmem>>, %arg2: memref<100x800xbf16, #tpu.memory_space<vmem>>, %arg3: memref<100x800xbf16, #tpu.memory_space<vmem>>, %arg4: memref<800x64xbf16, #tpu.memory_space<vmem>>, %arg5: memref<1x64xf32, #tpu.memory_space<vmem>>, %arg6: memref<100x64xf32, #tpu.memory_space<vmem>>) attributes {dimension_semantics = [], scalar_prefetch = 0 : i64, scratch_operands = 0 : i64, tpu.core_type = #tpu.core_type<tc>} {
    %c0 = arith.constant 0 : index
    %c0_0 = arith.constant 0 : index
    %0 = vector.load %arg4[%c0, %c0_0] : memref<800x64xbf16, #tpu.memory_space<vmem>>, vector<800x64xbf16>
    %c0_1 = arith.constant 0 : index
    %c0_2 = arith.constant 0 : index
    %1 = vector.load %arg0[%c0_1, %c0_2] : memref<100x800xbf16, #tpu.memory_space<vmem>>, vector<100x800xbf16>
    %cst = arith.constant dense<0.000000e+00> : vector<100x64xf32>
    %2 = tpu.matmul %1, %0, %cst {dimension_numbers = #tpu.dot_dimension_numbers<[1], [0], [0], [1], [0, 0, 1, 1], [], []>} : vector<100x800xbf16>, vector<800x64xbf16>, vector<100x64xf32> -> vector<100x64xf32>
    %c0_3 = arith.constant 0 : index
    %c0_4 = arith.constant 0 : index
    %3 = vector.load %arg1[%c0_3, %c0_4] : memref<100x800xbf16, #tpu.memory_space<vmem>>, vector<100x800xbf16>
    %cst_5 = arith.constant dense<0.000000e+00> : vector<100x64xf32>
    %4 = tpu.matmul %3, %0, %cst_5 {dimension_numbers = #tpu.dot_dimension_numbers<[1], [0], [0], [1], [0, 0, 1, 1], [], []>} : vector<100x800xbf16>, vector<800x64xbf16>, vector<100x64xf32> -> vector<100x64xf32>
    %5 = arith.maximumf %2, %4 : vector<100x64xf32>
    %c0_6 = arith.constant 0 : index
    %c0_7 = arith.constant 0 : index
    %6 = vector.load %arg2[%c0_6, %c0_7] : memref<100x800xbf16, #tpu.memory_space<vmem>>, vector<100x800xbf16>
    %cst_8 = arith.constant dense<0.000000e+00> : vector<100x64xf32>
    %7 = tpu.matmul %6, %0, %cst_8 {dimension_numbers = #tpu.dot_dimension_numbers<[1], [0], [0], [1], [0, 0, 1, 1], [], []>} : vector<100x800xbf16>, vector<800x64xbf16>, vector<100x64xf32> -> vector<100x64xf32>
    %8 = arith.maximumf %5, %7 : vector<100x64xf32>
    %c0_9 = arith.constant 0 : index
    %c0_10 = arith.constant 0 : index
    %9 = vector.load %arg3[%c0_9, %c0_10] : memref<100x800xbf16, #tpu.memory_space<vmem>>, vector<100x800xbf16>
    %cst_11 = arith.constant dense<0.000000e+00> : vector<100x64xf32>
    %10 = tpu.matmul %9, %0, %cst_11 {dimension_numbers = #tpu.dot_dimension_numbers<[1], [0], [0], [1], [0, 0, 1, 1], [], []>} : vector<100x800xbf16>, vector<800x64xbf16>, vector<100x64xf32> -> vector<100x64xf32>
    %11 = arith.maximumf %8, %10 : vector<100x64xf32>
    %c0_12 = arith.constant 0 : index
    %c0_13 = arith.constant 0 : index
    %12 = vector.load %arg5[%c0_12, %c0_13] : memref<1x64xf32, #tpu.memory_space<vmem>>, vector<1x64xf32>
    %13 = vector.broadcast %12 : vector<1x64xf32> to vector<100x64xf32>
    %14 = arith.addf %11, %13 : vector<100x64xf32>
    %cst_14 = arith.constant 0.000000e+00 : f32
    %15 = vector.broadcast %cst_14 : f32 to vector<100x64xf32>
    %16 = arith.maximumf %14, %15 : vector<100x64xf32>
    %c0_15 = arith.constant 0 : index
    %c0_16 = arith.constant 0 : index
    %17 = vector.load %arg6[%c0_15, %c0_16] : memref<100x64xf32, #tpu.memory_space<vmem>>, vector<100x64xf32>
    tpu.vector_store %arg6[%c0_15, %c0_16], %16 {strides = array<i32>} : memref<100x64xf32, #tpu.memory_space<vmem>>, vector<100x64xf32>,
    return
  }
}

module attributes {stable_mosaic.version = 11 : i64} {
  func.func @_conv_relu_kernel(%arg0: memref<100x576xbf16, #tpu.memory_space<vmem>>, %arg1: memref<576x64xbf16, #tpu.memory_space<vmem>>, %arg2: memref<1x64xf32, #tpu.memory_space<vmem>>, %arg3: memref<100x64xf32, #tpu.memory_space<vmem>>) attributes {dimension_semantics = [], scalar_prefetch = 0 : i64, scratch_operands = 0 : i64, tpu.core_type = #tpu.core_type<tc>} {
    %c0 = arith.constant 0 : index
    %c0_0 = arith.constant 0 : index
    %0 = vector.load %arg0[%c0, %c0_0] : memref<100x576xbf16, #tpu.memory_space<vmem>>, vector<100x576xbf16>
    %c0_1 = arith.constant 0 : index
    %c0_2 = arith.constant 0 : index
    %1 = vector.load %arg1[%c0_1, %c0_2] : memref<576x64xbf16, #tpu.memory_space<vmem>>, vector<576x64xbf16>
    %cst = arith.constant dense<0.000000e+00> : vector<100x64xf32>
    %2 = tpu.matmul %0, %1, %cst {dimension_numbers = #tpu.dot_dimension_numbers<[1], [0], [0], [1], [0, 0, 1, 1], [], []>} : vector<100x576xbf16>, vector<576x64xbf16>, vector<100x64xf32> -> vector<100x64xf32>
    %c0_3 = arith.constant 0 : index
    %c0_4 = arith.constant 0 : index
    %3 = vector.load %arg2[%c0_3, %c0_4] : memref<1x64xf32, #tpu.memory_space<vmem>>, vector<1x64xf32>
    %4 = vector.broadcast %3 : vector<1x64xf32> to vector<100x64xf32>
    %5 = arith.addf %2, %4 : vector<100x64xf32>
    %cst_5 = arith.constant 0.000000e+00 : f32
    %6 = vector.broadcast %cst_5 : f32 to vector<100x64xf32>
    %7 = arith.maximumf %5, %6 : vector<100x64xf32>
    %c0_6 = arith.constant 0 : index
    %c0_7 = arith.constant 0 : index
    %8 = vector.load %arg3[%c0_6, %c0_7] : memref<100x64xf32, #tpu.memory_space<vmem>>, vector<100x64xf32>
    tpu.vector_store %arg3[%c0_6, %c0_7], %7 {strides = array<i32>} : memref<100x64xf32, #tpu.memory_space<vmem>>, vector<100x64xf32>,
    return
  }
}

module attributes {stable_mosaic.version = 11 : i64} {
  func.func @_conv_res_kernel(%arg0: memref<100x576xbf16, #tpu.memory_space<vmem>>, %arg1: memref<576x64xbf16, #tpu.memory_space<vmem>>, %arg2: memref<1x64xf32, #tpu.memory_space<vmem>>, %arg3: memref<100x64xf32, #tpu.memory_space<vmem>>, %arg4: memref<100x64xf32, #tpu.memory_space<vmem>>) attributes {dimension_semantics = [], scalar_prefetch = 0 : i64, scratch_operands = 0 : i64, tpu.core_type = #tpu.core_type<tc>} {
    %c0 = arith.constant 0 : index
    %c0_0 = arith.constant 0 : index
    %0 = vector.load %arg0[%c0, %c0_0] : memref<100x576xbf16, #tpu.memory_space<vmem>>, vector<100x576xbf16>
    %c0_1 = arith.constant 0 : index
    %c0_2 = arith.constant 0 : index
    %1 = vector.load %arg1[%c0_1, %c0_2] : memref<576x64xbf16, #tpu.memory_space<vmem>>, vector<576x64xbf16>
    %cst = arith.constant dense<0.000000e+00> : vector<100x64xf32>
    %2 = tpu.matmul %0, %1, %cst {dimension_numbers = #tpu.dot_dimension_numbers<[1], [0], [0], [1], [0, 0, 1, 1], [], []>} : vector<100x576xbf16>, vector<576x64xbf16>, vector<100x64xf32> -> vector<100x64xf32>
    %c0_3 = arith.constant 0 : index
    %c0_4 = arith.constant 0 : index
    %3 = vector.load %arg2[%c0_3, %c0_4] : memref<1x64xf32, #tpu.memory_space<vmem>>, vector<1x64xf32>
    %4 = vector.broadcast %3 : vector<1x64xf32> to vector<100x64xf32>
    %5 = arith.addf %2, %4 : vector<100x64xf32>
    %c0_5 = arith.constant 0 : index
    %c0_6 = arith.constant 0 : index
    %6 = vector.load %arg3[%c0_5, %c0_6] : memref<100x64xf32, #tpu.memory_space<vmem>>, vector<100x64xf32>
    %7 = arith.addf %5, %6 : vector<100x64xf32>
    %cst_7 = arith.constant 0.000000e+00 : f32
    %8 = vector.broadcast %cst_7 : f32 to vector<100x64xf32>
    %9 = arith.maximumf %7, %8 : vector<100x64xf32>
    %c0_8 = arith.constant 0 : index
    %c0_9 = arith.constant 0 : index
    %10 = vector.load %arg4[%c0_8, %c0_9] : memref<100x64xf32, #tpu.memory_space<vmem>>, vector<100x64xf32>
    tpu.vector_store %arg4[%c0_8, %c0_9], %9 {strides = array<i32>} : memref<100x64xf32, #tpu.memory_space<vmem>>, vector<100x64xf32>,
    return
  }
}

module attributes {stable_mosaic.version = 11 : i64} {
  func.func @_conv_relu_kernel(%arg0: memref<36x576xbf16, #tpu.memory_space<vmem>>, %arg1: memref<576x128xbf16, #tpu.memory_space<vmem>>, %arg2: memref<1x128xf32, #tpu.memory_space<vmem>>, %arg3: memref<36x128xf32, #tpu.memory_space<vmem>>) attributes {dimension_semantics = [], scalar_prefetch = 0 : i64, scratch_operands = 0 : i64, tpu.core_type = #tpu.core_type<tc>} {
    %c0 = arith.constant 0 : index
    %c0_0 = arith.constant 0 : index
    %0 = vector.load %arg0[%c0, %c0_0] : memref<36x576xbf16, #tpu.memory_space<vmem>>, vector<36x576xbf16>
    %c0_1 = arith.constant 0 : index
    %c0_2 = arith.constant 0 : index
    %1 = vector.load %arg1[%c0_1, %c0_2] : memref<576x128xbf16, #tpu.memory_space<vmem>>, vector<576x128xbf16>
    %cst = arith.constant dense<0.000000e+00> : vector<36x128xf32>
    %2 = tpu.matmul %0, %1, %cst {dimension_numbers = #tpu.dot_dimension_numbers<[1], [0], [0], [1], [0, 0, 1, 1], [], []>} : vector<36x576xbf16>, vector<576x128xbf16>, vector<36x128xf32> -> vector<36x128xf32>
    %c0_3 = arith.constant 0 : index
    %c0_4 = arith.constant 0 : index
    %3 = vector.load %arg2[%c0_3, %c0_4] : memref<1x128xf32, #tpu.memory_space<vmem>>, vector<1x128xf32>
    %4 = vector.broadcast %3 : vector<1x128xf32> to vector<36x128xf32>
    %5 = arith.addf %2, %4 : vector<36x128xf32>
    %cst_5 = arith.constant 0.000000e+00 : f32
    %6 = vector.broadcast %cst_5 : f32 to vector<36x128xf32>
    %7 = arith.maximumf %5, %6 : vector<36x128xf32>
    %c0_6 = arith.constant 0 : index
    %c0_7 = arith.constant 0 : index
    %8 = vector.load %arg3[%c0_6, %c0_7] : memref<36x128xf32, #tpu.memory_space<vmem>>, vector<36x128xf32>
    tpu.vector_store %arg3[%c0_6, %c0_7], %7 {strides = array<i32>} : memref<36x128xf32, #tpu.memory_space<vmem>>, vector<36x128xf32>,
    return
  }
}

module attributes {stable_mosaic.version = 11 : i64} {
  func.func @_conv_down_kernel(%arg0: memref<36x1152xbf16, #tpu.memory_space<vmem>>, %arg1: memref<1152x128xbf16, #tpu.memory_space<vmem>>, %arg2: memref<1x128xf32, #tpu.memory_space<vmem>>, %arg3: memref<36x64xbf16, #tpu.memory_space<vmem>>, %arg4: memref<64x128xbf16, #tpu.memory_space<vmem>>, %arg5: memref<1x128xf32, #tpu.memory_space<vmem>>, %arg6: memref<36x128xf32, #tpu.memory_space<vmem>>) attributes {dimension_semantics = [], scalar_prefetch = 0 : i64, scratch_operands = 0 : i64, tpu.core_type = #tpu.core_type<tc>} {
    %c0 = arith.constant 0 : index
    %c0_0 = arith.constant 0 : index
    %0 = vector.load %arg0[%c0, %c0_0] : memref<36x1152xbf16, #tpu.memory_space<vmem>>, vector<36x1152xbf16>
    %c0_1 = arith.constant 0 : index
    %c0_2 = arith.constant 0 : index
    %1 = vector.load %arg1[%c0_1, %c0_2] : memref<1152x128xbf16, #tpu.memory_space<vmem>>, vector<1152x128xbf16>
    %cst = arith.constant dense<0.000000e+00> : vector<36x128xf32>
    %2 = tpu.matmul %0, %1, %cst {dimension_numbers = #tpu.dot_dimension_numbers<[1], [0], [0], [1], [0, 0, 1, 1], [], []>} : vector<36x1152xbf16>, vector<1152x128xbf16>, vector<36x128xf32> -> vector<36x128xf32>
    %c0_3 = arith.constant 0 : index
    %c0_4 = arith.constant 0 : index
    %3 = vector.load %arg2[%c0_3, %c0_4] : memref<1x128xf32, #tpu.memory_space<vmem>>, vector<1x128xf32>
    %4 = vector.broadcast %3 : vector<1x128xf32> to vector<36x128xf32>
    %5 = arith.addf %2, %4 : vector<36x128xf32>
    %c0_5 = arith.constant 0 : index
    %c0_6 = arith.constant 0 : index
    %6 = vector.load %arg3[%c0_5, %c0_6] : memref<36x64xbf16, #tpu.memory_space<vmem>>, vector<36x64xbf16>
    %c0_7 = arith.constant 0 : index
    %c0_8 = arith.constant 0 : index
    %7 = vector.load %arg4[%c0_7, %c0_8] : memref<64x128xbf16, #tpu.memory_space<vmem>>, vector<64x128xbf16>
    %cst_9 = arith.constant dense<0.000000e+00> : vector<36x128xf32>
    %8 = tpu.matmul %6, %7, %cst_9 {dimension_numbers = #tpu.dot_dimension_numbers<[1], [0], [0], [1], [0, 0, 1, 1], [], []>} : vector<36x64xbf16>, vector<64x128xbf16>, vector<36x128xf32> -> vector<36x128xf32>
    %9 = arith.addf %5, %8 : vector<36x128xf32>
    %c0_10 = arith.constant 0 : index
    %c0_11 = arith.constant 0 : index
    %10 = vector.load %arg5[%c0_10, %c0_11] : memref<1x128xf32, #tpu.memory_space<vmem>>, vector<1x128xf32>
    %11 = vector.broadcast %10 : vector<1x128xf32> to vector<36x128xf32>
    %12 = arith.addf %9, %11 : vector<36x128xf32>
    %cst_12 = arith.constant 0.000000e+00 : f32
    %13 = vector.broadcast %cst_12 : f32 to vector<36x128xf32>
    %14 = arith.maximumf %12, %13 : vector<36x128xf32>
    %c0_13 = arith.constant 0 : index
    %c0_14 = arith.constant 0 : index
    %15 = vector.load %arg6[%c0_13, %c0_14] : memref<36x128xf32, #tpu.memory_space<vmem>>, vector<36x128xf32>
    tpu.vector_store %arg6[%c0_13, %c0_14], %14 {strides = array<i32>} : memref<36x128xf32, #tpu.memory_space<vmem>>, vector<36x128xf32>,
    return
  }
}

module attributes {stable_mosaic.version = 11 : i64} {
  func.func @_conv_res_kernel(%arg0: memref<36x1152xbf16, #tpu.memory_space<vmem>>, %arg1: memref<1152x128xbf16, #tpu.memory_space<vmem>>, %arg2: memref<1x128xf32, #tpu.memory_space<vmem>>, %arg3: memref<36x128xf32, #tpu.memory_space<vmem>>, %arg4: memref<36x128xf32, #tpu.memory_space<vmem>>) attributes {dimension_semantics = [], scalar_prefetch = 0 : i64, scratch_operands = 0 : i64, tpu.core_type = #tpu.core_type<tc>} {
    %c0 = arith.constant 0 : index
    %c0_0 = arith.constant 0 : index
    %0 = vector.load %arg0[%c0, %c0_0] : memref<36x1152xbf16, #tpu.memory_space<vmem>>, vector<36x1152xbf16>
    %c0_1 = arith.constant 0 : index
    %c0_2 = arith.constant 0 : index
    %1 = vector.load %arg1[%c0_1, %c0_2] : memref<1152x128xbf16, #tpu.memory_space<vmem>>, vector<1152x128xbf16>
    %cst = arith.constant dense<0.000000e+00> : vector<36x128xf32>
    %2 = tpu.matmul %0, %1, %cst {dimension_numbers = #tpu.dot_dimension_numbers<[1], [0], [0], [1], [0, 0, 1, 1], [], []>} : vector<36x1152xbf16>, vector<1152x128xbf16>, vector<36x128xf32> -> vector<36x128xf32>
    %c0_3 = arith.constant 0 : index
    %c0_4 = arith.constant 0 : index
    %3 = vector.load %arg2[%c0_3, %c0_4] : memref<1x128xf32, #tpu.memory_space<vmem>>, vector<1x128xf32>
    %4 = vector.broadcast %3 : vector<1x128xf32> to vector<36x128xf32>
    %5 = arith.addf %2, %4 : vector<36x128xf32>
    %c0_5 = arith.constant 0 : index
    %c0_6 = arith.constant 0 : index
    %6 = vector.load %arg3[%c0_5, %c0_6] : memref<36x128xf32, #tpu.memory_space<vmem>>, vector<36x128xf32>
    %7 = arith.addf %5, %6 : vector<36x128xf32>
    %cst_7 = arith.constant 0.000000e+00 : f32
    %8 = vector.broadcast %cst_7 : f32 to vector<36x128xf32>
    %9 = arith.maximumf %7, %8 : vector<36x128xf32>
    %c0_8 = arith.constant 0 : index
    %c0_9 = arith.constant 0 : index
    %10 = vector.load %arg4[%c0_8, %c0_9] : memref<36x128xf32, #tpu.memory_space<vmem>>, vector<36x128xf32>
    tpu.vector_store %arg4[%c0_8, %c0_9], %9 {strides = array<i32>} : memref<36x128xf32, #tpu.memory_space<vmem>>, vector<36x128xf32>,
    return
  }
}

module attributes {stable_mosaic.version = 11 : i64} {
  func.func @_conv_relu_kernel(%arg0: memref<36x1152xbf16, #tpu.memory_space<vmem>>, %arg1: memref<1152x128xbf16, #tpu.memory_space<vmem>>, %arg2: memref<1x128xf32, #tpu.memory_space<vmem>>, %arg3: memref<36x128xf32, #tpu.memory_space<vmem>>) attributes {dimension_semantics = [], scalar_prefetch = 0 : i64, scratch_operands = 0 : i64, tpu.core_type = #tpu.core_type<tc>} {
    %c0 = arith.constant 0 : index
    %c0_0 = arith.constant 0 : index
    %0 = vector.load %arg0[%c0, %c0_0] : memref<36x1152xbf16, #tpu.memory_space<vmem>>, vector<36x1152xbf16>
    %c0_1 = arith.constant 0 : index
    %c0_2 = arith.constant 0 : index
    %1 = vector.load %arg1[%c0_1, %c0_2] : memref<1152x128xbf16, #tpu.memory_space<vmem>>, vector<1152x128xbf16>
    %cst = arith.constant dense<0.000000e+00> : vector<36x128xf32>
    %2 = tpu.matmul %0, %1, %cst {dimension_numbers = #tpu.dot_dimension_numbers<[1], [0], [0], [1], [0, 0, 1, 1], [], []>} : vector<36x1152xbf16>, vector<1152x128xbf16>, vector<36x128xf32> -> vector<36x128xf32>
    %c0_3 = arith.constant 0 : index
    %c0_4 = arith.constant 0 : index
    %3 = vector.load %arg2[%c0_3, %c0_4] : memref<1x128xf32, #tpu.memory_space<vmem>>, vector<1x128xf32>
    %4 = vector.broadcast %3 : vector<1x128xf32> to vector<36x128xf32>
    %5 = arith.addf %2, %4 : vector<36x128xf32>
    %cst_5 = arith.constant 0.000000e+00 : f32
    %6 = vector.broadcast %cst_5 : f32 to vector<36x128xf32>
    %7 = arith.maximumf %5, %6 : vector<36x128xf32>
    %c0_6 = arith.constant 0 : index
    %c0_7 = arith.constant 0 : index
    %8 = vector.load %arg3[%c0_6, %c0_7] : memref<36x128xf32, #tpu.memory_space<vmem>>, vector<36x128xf32>
    tpu.vector_store %arg3[%c0_6, %c0_7], %7 {strides = array<i32>} : memref<36x128xf32, #tpu.memory_space<vmem>>, vector<36x128xf32>,
    return
  }
}

module attributes {stable_mosaic.version = 11 : i64} {
  func.func @_conv_relu_kernel(%arg0: memref<16x1152xbf16, #tpu.memory_space<vmem>>, %arg1: memref<1152x256xbf16, #tpu.memory_space<vmem>>, %arg2: memref<1x256xf32, #tpu.memory_space<vmem>>, %arg3: memref<16x256xf32, #tpu.memory_space<vmem>>) attributes {dimension_semantics = [], scalar_prefetch = 0 : i64, scratch_operands = 0 : i64, tpu.core_type = #tpu.core_type<tc>} {
    %c0 = arith.constant 0 : index
    %c0_0 = arith.constant 0 : index
    %0 = vector.load %arg0[%c0, %c0_0] : memref<16x1152xbf16, #tpu.memory_space<vmem>>, vector<16x1152xbf16>
    %c0_1 = arith.constant 0 : index
    %c0_2 = arith.constant 0 : index
    %1 = vector.load %arg1[%c0_1, %c0_2] : memref<1152x256xbf16, #tpu.memory_space<vmem>>, vector<1152x256xbf16>
    %cst = arith.constant dense<0.000000e+00> : vector<16x256xf32>
    %2 = tpu.matmul %0, %1, %cst {dimension_numbers = #tpu.dot_dimension_numbers<[1], [0], [0], [1], [0, 0, 1, 1], [], []>} : vector<16x1152xbf16>, vector<1152x256xbf16>, vector<16x256xf32> -> vector<16x256xf32>
    %c0_3 = arith.constant 0 : index
    %c0_4 = arith.constant 0 : index
    %3 = vector.load %arg2[%c0_3, %c0_4] : memref<1x256xf32, #tpu.memory_space<vmem>>, vector<1x256xf32>
    %4 = vector.broadcast %3 : vector<1x256xf32> to vector<16x256xf32>
    %5 = arith.addf %2, %4 : vector<16x256xf32>
    %cst_5 = arith.constant 0.000000e+00 : f32
    %6 = vector.broadcast %cst_5 : f32 to vector<16x256xf32>
    %7 = arith.maximumf %5, %6 : vector<16x256xf32>
    %c0_6 = arith.constant 0 : index
    %c0_7 = arith.constant 0 : index
    %8 = vector.load %arg3[%c0_6, %c0_7] : memref<16x256xf32, #tpu.memory_space<vmem>>, vector<16x256xf32>
    tpu.vector_store %arg3[%c0_6, %c0_7], %7 {strides = array<i32>} : memref<16x256xf32, #tpu.memory_space<vmem>>, vector<16x256xf32>,
    return
  }
}

module attributes {stable_mosaic.version = 11 : i64} {
  func.func @_conv_down_kernel(%arg0: memref<16x2304xbf16, #tpu.memory_space<vmem>>, %arg1: memref<2304x256xbf16, #tpu.memory_space<vmem>>, %arg2: memref<1x256xf32, #tpu.memory_space<vmem>>, %arg3: memref<16x128xbf16, #tpu.memory_space<vmem>>, %arg4: memref<128x256xbf16, #tpu.memory_space<vmem>>, %arg5: memref<1x256xf32, #tpu.memory_space<vmem>>, %arg6: memref<16x256xf32, #tpu.memory_space<vmem>>) attributes {dimension_semantics = [], scalar_prefetch = 0 : i64, scratch_operands = 0 : i64, tpu.core_type = #tpu.core_type<tc>} {
    %c0 = arith.constant 0 : index
    %c0_0 = arith.constant 0 : index
    %0 = vector.load %arg0[%c0, %c0_0] : memref<16x2304xbf16, #tpu.memory_space<vmem>>, vector<16x2304xbf16>
    %c0_1 = arith.constant 0 : index
    %c0_2 = arith.constant 0 : index
    %1 = vector.load %arg1[%c0_1, %c0_2] : memref<2304x256xbf16, #tpu.memory_space<vmem>>, vector<2304x256xbf16>
    %cst = arith.constant dense<0.000000e+00> : vector<16x256xf32>
    %2 = tpu.matmul %0, %1, %cst {dimension_numbers = #tpu.dot_dimension_numbers<[1], [0], [0], [1], [0, 0, 1, 1], [], []>} : vector<16x2304xbf16>, vector<2304x256xbf16>, vector<16x256xf32> -> vector<16x256xf32>
    %c0_3 = arith.constant 0 : index
    %c0_4 = arith.constant 0 : index
    %3 = vector.load %arg2[%c0_3, %c0_4] : memref<1x256xf32, #tpu.memory_space<vmem>>, vector<1x256xf32>
    %4 = vector.broadcast %3 : vector<1x256xf32> to vector<16x256xf32>
    %5 = arith.addf %2, %4 : vector<16x256xf32>
    %c0_5 = arith.constant 0 : index
    %c0_6 = arith.constant 0 : index
    %6 = vector.load %arg3[%c0_5, %c0_6] : memref<16x128xbf16, #tpu.memory_space<vmem>>, vector<16x128xbf16>
    %c0_7 = arith.constant 0 : index
    %c0_8 = arith.constant 0 : index
    %7 = vector.load %arg4[%c0_7, %c0_8] : memref<128x256xbf16, #tpu.memory_space<vmem>>, vector<128x256xbf16>
    %cst_9 = arith.constant dense<0.000000e+00> : vector<16x256xf32>
    %8 = tpu.matmul %6, %7, %cst_9 {dimension_numbers = #tpu.dot_dimension_numbers<[1], [0], [0], [1], [0, 0, 1, 1], [], []>} : vector<16x128xbf16>, vector<128x256xbf16>, vector<16x256xf32> -> vector<16x256xf32>
    %9 = arith.addf %5, %8 : vector<16x256xf32>
    %c0_10 = arith.constant 0 : index
    %c0_11 = arith.constant 0 : index
    %10 = vector.load %arg5[%c0_10, %c0_11] : memref<1x256xf32, #tpu.memory_space<vmem>>, vector<1x256xf32>
    %11 = vector.broadcast %10 : vector<1x256xf32> to vector<16x256xf32>
    %12 = arith.addf %9, %11 : vector<16x256xf32>
    %cst_12 = arith.constant 0.000000e+00 : f32
    %13 = vector.broadcast %cst_12 : f32 to vector<16x256xf32>
    %14 = arith.maximumf %12, %13 : vector<16x256xf32>
    %c0_13 = arith.constant 0 : index
    %c0_14 = arith.constant 0 : index
    %15 = vector.load %arg6[%c0_13, %c0_14] : memref<16x256xf32, #tpu.memory_space<vmem>>, vector<16x256xf32>
    tpu.vector_store %arg6[%c0_13, %c0_14], %14 {strides = array<i32>} : memref<16x256xf32, #tpu.memory_space<vmem>>, vector<16x256xf32>,
    return
  }
}

module attributes {stable_mosaic.version = 11 : i64} {
  func.func @_conv_relu_kernel(%arg0: memref<16x2304xbf16, #tpu.memory_space<vmem>>, %arg1: memref<2304x256xbf16, #tpu.memory_space<vmem>>, %arg2: memref<1x256xf32, #tpu.memory_space<vmem>>, %arg3: memref<16x256xf32, #tpu.memory_space<vmem>>) attributes {dimension_semantics = [], scalar_prefetch = 0 : i64, scratch_operands = 0 : i64, tpu.core_type = #tpu.core_type<tc>} {
    %c0 = arith.constant 0 : index
    %c0_0 = arith.constant 0 : index
    %0 = vector.load %arg0[%c0, %c0_0] : memref<16x2304xbf16, #tpu.memory_space<vmem>>, vector<16x2304xbf16>
    %c0_1 = arith.constant 0 : index
    %c0_2 = arith.constant 0 : index
    %1 = vector.load %arg1[%c0_1, %c0_2] : memref<2304x256xbf16, #tpu.memory_space<vmem>>, vector<2304x256xbf16>
    %cst = arith.constant dense<0.000000e+00> : vector<16x256xf32>
    %2 = tpu.matmul %0, %1, %cst {dimension_numbers = #tpu.dot_dimension_numbers<[1], [0], [0], [1], [0, 0, 1, 1], [], []>} : vector<16x2304xbf16>, vector<2304x256xbf16>, vector<16x256xf32> -> vector<16x256xf32>
    %c0_3 = arith.constant 0 : index
    %c0_4 = arith.constant 0 : index
    %3 = vector.load %arg2[%c0_3, %c0_4] : memref<1x256xf32, #tpu.memory_space<vmem>>, vector<1x256xf32>
    %4 = vector.broadcast %3 : vector<1x256xf32> to vector<16x256xf32>
    %5 = arith.addf %2, %4 : vector<16x256xf32>
    %cst_5 = arith.constant 0.000000e+00 : f32
    %6 = vector.broadcast %cst_5 : f32 to vector<16x256xf32>
    %7 = arith.maximumf %5, %6 : vector<16x256xf32>
    %c0_6 = arith.constant 0 : index
    %c0_7 = arith.constant 0 : index
    %8 = vector.load %arg3[%c0_6, %c0_7] : memref<16x256xf32, #tpu.memory_space<vmem>>, vector<16x256xf32>
    tpu.vector_store %arg3[%c0_6, %c0_7], %7 {strides = array<i32>} : memref<16x256xf32, #tpu.memory_space<vmem>>, vector<16x256xf32>,
    return
  }
}

module attributes {stable_mosaic.version = 11 : i64} {
  func.func @_conv_res_kernel(%arg0: memref<16x2304xbf16, #tpu.memory_space<vmem>>, %arg1: memref<2304x256xbf16, #tpu.memory_space<vmem>>, %arg2: memref<1x256xf32, #tpu.memory_space<vmem>>, %arg3: memref<16x256xf32, #tpu.memory_space<vmem>>, %arg4: memref<16x256xf32, #tpu.memory_space<vmem>>) attributes {dimension_semantics = [], scalar_prefetch = 0 : i64, scratch_operands = 0 : i64, tpu.core_type = #tpu.core_type<tc>} {
    %c0 = arith.constant 0 : index
    %c0_0 = arith.constant 0 : index
    %0 = vector.load %arg0[%c0, %c0_0] : memref<16x2304xbf16, #tpu.memory_space<vmem>>, vector<16x2304xbf16>
    %c0_1 = arith.constant 0 : index
    %c0_2 = arith.constant 0 : index
    %1 = vector.load %arg1[%c0_1, %c0_2] : memref<2304x256xbf16, #tpu.memory_space<vmem>>, vector<2304x256xbf16>
    %cst = arith.constant dense<0.000000e+00> : vector<16x256xf32>
    %2 = tpu.matmul %0, %1, %cst {dimension_numbers = #tpu.dot_dimension_numbers<[1], [0], [0], [1], [0, 0, 1, 1], [], []>} : vector<16x2304xbf16>, vector<2304x256xbf16>, vector<16x256xf32> -> vector<16x256xf32>
    %c0_3 = arith.constant 0 : index
    %c0_4 = arith.constant 0 : index
    %3 = vector.load %arg2[%c0_3, %c0_4] : memref<1x256xf32, #tpu.memory_space<vmem>>, vector<1x256xf32>
    %4 = vector.broadcast %3 : vector<1x256xf32> to vector<16x256xf32>
    %5 = arith.addf %2, %4 : vector<16x256xf32>
    %c0_5 = arith.constant 0 : index
    %c0_6 = arith.constant 0 : index
    %6 = vector.load %arg3[%c0_5, %c0_6] : memref<16x256xf32, #tpu.memory_space<vmem>>, vector<16x256xf32>
    %7 = arith.addf %5, %6 : vector<16x256xf32>
    %cst_7 = arith.constant 0.000000e+00 : f32
    %8 = vector.broadcast %cst_7 : f32 to vector<16x256xf32>
    %9 = arith.maximumf %7, %8 : vector<16x256xf32>
    %c0_8 = arith.constant 0 : index
    %c0_9 = arith.constant 0 : index
    %10 = vector.load %arg4[%c0_8, %c0_9] : memref<16x256xf32, #tpu.memory_space<vmem>>, vector<16x256xf32>
    tpu.vector_store %arg4[%c0_8, %c0_9], %9 {strides = array<i32>} : memref<16x256xf32, #tpu.memory_space<vmem>>, vector<16x256xf32>,
    return
  }
}

module attributes {stable_mosaic.version = 11 : i64} {
  func.func @_head_kernel(%arg0: memref<16x256xf32, #tpu.memory_space<vmem>>, %arg1: memref<4x16xf32, #tpu.memory_space<vmem>>, %arg2: memref<256x500xbf16, #tpu.memory_space<vmem>>, %arg3: memref<1x500xf32, #tpu.memory_space<vmem>>, %arg4: memref<500x10xbf16, #tpu.memory_space<vmem>>, %arg5: memref<1x10xf32, #tpu.memory_space<vmem>>, %arg6: memref<1x10xf32, #tpu.memory_space<vmem>>, %arg7: memref<1x1xf32, #tpu.memory_space<vmem>>, %arg8: memref<4x1xf32, #tpu.memory_space<vmem>>) attributes {dimension_semantics = [], scalar_prefetch = 0 : i64, scratch_operands = 0 : i64, tpu.core_type = #tpu.core_type<tc>} {
    %c0 = arith.constant 0 : index
    %c0_0 = arith.constant 0 : index
    %0 = vector.load %arg1[%c0, %c0_0] : memref<4x16xf32, #tpu.memory_space<vmem>>, vector<4x16xf32>
    %c0_1 = arith.constant 0 : index
    %c0_2 = arith.constant 0 : index
    %1 = vector.load %arg0[%c0_1, %c0_2] : memref<16x256xf32, #tpu.memory_space<vmem>>, vector<16x256xf32>
    %cst = arith.constant dense<0.000000e+00> : vector<4x256xf32>
    %2 = tpu.matmul %0, %1, %cst {dimension_numbers = #tpu.dot_dimension_numbers<[1], [0], [0], [1], [0, 0, 1, 1], [], []>} : vector<4x16xf32>, vector<16x256xf32>, vector<4x256xf32> -> vector<4x256xf32>
    %3 = arith.truncf %2 : vector<4x256xf32> to vector<4x256xbf16>
    %c0_3 = arith.constant 0 : index
    %c0_4 = arith.constant 0 : index
    %4 = vector.load %arg2[%c0_3, %c0_4] : memref<256x500xbf16, #tpu.memory_space<vmem>>, vector<256x500xbf16>
    %cst_5 = arith.constant dense<0.000000e+00> : vector<4x500xf32>
    %5 = tpu.matmul %3, %4, %cst_5 {dimension_numbers = #tpu.dot_dimension_numbers<[1], [0], [0], [1], [0, 0, 1, 1], [], []>} : vector<4x256xbf16>, vector<256x500xbf16>, vector<4x500xf32> -> vector<4x500xf32>
    %c0_6 = arith.constant 0 : index
    %c0_7 = arith.constant 0 : index
    %6 = vector.load %arg3[%c0_6, %c0_7] : memref<1x500xf32, #tpu.memory_space<vmem>>, vector<1x500xf32>
    %7 = vector.broadcast %6 : vector<1x500xf32> to vector<4x500xf32>
    %8 = arith.addf %5, %7 : vector<4x500xf32>
    %cst_8 = arith.constant 0.000000e+00 : f32
    %9 = vector.broadcast %cst_8 : f32 to vector<4x500xf32>
    %10 = arith.maximumf %8, %9 : vector<4x500xf32>
    %11 = arith.truncf %10 : vector<4x500xf32> to vector<4x500xbf16>
    %c0_9 = arith.constant 0 : index
    %c0_10 = arith.constant 0 : index
    %12 = vector.load %arg4[%c0_9, %c0_10] : memref<500x10xbf16, #tpu.memory_space<vmem>>, vector<500x10xbf16>
    %cst_11 = arith.constant dense<0.000000e+00> : vector<4x10xf32>
    %13 = tpu.matmul %11, %12, %cst_11 {dimension_numbers = #tpu.dot_dimension_numbers<[1], [0], [0], [1], [0, 0, 1, 1], [], []>} : vector<4x500xbf16>, vector<500x10xbf16>, vector<4x10xf32> -> vector<4x10xf32>
    %c0_12 = arith.constant 0 : index
    %c0_13 = arith.constant 0 : index
    %14 = vector.load %arg5[%c0_12, %c0_13] : memref<1x10xf32, #tpu.memory_space<vmem>>, vector<1x10xf32>
    %15 = vector.broadcast %14 : vector<1x10xf32> to vector<4x10xf32>
    %16 = arith.addf %13, %15 : vector<4x10xf32>
    %cst_14 = arith.constant 0.000000e+00 : f32
    %17 = vector.broadcast %cst_14 : f32 to vector<4x10xf32>
    %18 = arith.maximumf %16, %17 : vector<4x10xf32>
    %c0_15 = arith.constant 0 : index
    %c0_16 = arith.constant 0 : index
    %19 = vector.load %arg6[%c0_15, %c0_16] : memref<1x10xf32, #tpu.memory_space<vmem>>, vector<1x10xf32>
    %20 = vector.broadcast %19 : vector<1x10xf32> to vector<4x10xf32>
    %21 = arith.mulf %18, %20 : vector<4x10xf32>
    %cst_17 = arith.constant dense<0.000000e+00> : vector<4xf32>
    %22 = vector.multi_reduction <add>, %21, %cst_17 [1] : vector<4x10xf32> to vector<4xf32>
    %23 = vector.shape_cast %22 : vector<4xf32> to vector<4x1xf32>
    %c0_18 = arith.constant 0 : index
    %c0_19 = arith.constant 0 : index
    %24 = vector.load %arg7[%c0_18, %c0_19] : memref<1x1xf32, #tpu.memory_space<vmem>>, vector<1x1xf32>
    %25 = vector.broadcast %24 : vector<1x1xf32> to vector<4x1xf32>
    %26 = arith.addf %23, %25 : vector<4x1xf32>
    %cst_20 = arith.constant 0.000000e+00 : f32
    %27 = vector.broadcast %cst_20 : f32 to vector<4x1xf32>
    %28 = arith.subf %27, %26 : vector<4x1xf32>
    %29 = math.exp %28 : vector<4x1xf32>
    %cst_21 = arith.constant 1.000000e+00 : f32
    %30 = vector.broadcast %cst_21 : f32 to vector<4x1xf32>
    %31 = arith.addf %30, %29 : vector<4x1xf32>
    %cst_22 = arith.constant 1.000000e+00 : f32
    %32 = vector.broadcast %cst_22 : f32 to vector<4x1xf32>
    %33 = arith.divf %32, %31 : vector<4x1xf32>
    %c0_23 = arith.constant 0 : index
    %c0_24 = arith.constant 0 : index
    %34 = vector.load %arg8[%c0_23, %c0_24] : memref<4x1xf32, #tpu.memory_space<vmem>>, vector<4x1xf32>
    tpu.vector_store %arg8[%c0_23, %c0_24], %33 {strides = array<i32>} : memref<4x1xf32, #tpu.memory_space<vmem>>, vector<4x1xf32>,
    return
  }
}

</mosaic_0001>

<bundles_post_ra>
// kernel: siamese_forward.15
= control target key start
LH: loop header
LB: loop body
LE: loop exit
PB: predicated region body
PF: predicated region fallthrough
CT: control target
= control target key end

     0   :  { %s1487_s21 = smov 0   ;;  %s1826_s0 = inlined_call_operand.vmem [shape: bf16[784,25], index: 0, kind: input, shape index: {}]   ;;  %s1827_s1 = inlined_call_operand.vmem [shape: bf16[784,25], index: 1, kind: input, shape index: {}]   ;;  %s1828_s2 = inlined_call_operand.vmem [shape: bf16[784,25], index: 2, kind: input, shape index: {}]   ;;  %s1829_s3 = inlined_call_operand.vmem [shape: bf16[784,25], index: 3, kind: input, shape index: {}]   ;;  %s1830_s4 = inlined_call_operand.vmem [shape: bf16[25,32], index: 4, kind: input, shape index: {}]   ;;  %s1831_s5 = inlined_call_operand.vmem [shape: f32[1,32], index: 5, kind: input, shape index: {}]   ;;  %s1832_s6 = inlined_call_operand.vmem [shape: f32[784,32], index: 6, kind: output, shape index: {}]  }
   0x1 LB: > { %s1165_s22 = sadd.s32 4294967295, %s1447_s21   ;;  %p1169_p0 = scmp.ge.s32.totalorder %s1447_s21, 1  ;;  %s1447_s21 = sphi %s1487_s21, %s16_s21  }
   0x2   : > { %p246_p1 = scmp.lt.s32.totalorder %s1447_s21, 8 }
   0x4   : > { %p247_p2 = pnand %p1169_p0, %p246_p1 }
   0x5   : > { %v1411_v0 = vld [vmem:[%s1830_s4] sm:$0xff] (!%p247_p2)   ;;  %v1449_v1 = vmov (!%p247_p2), 0.0   ;;  %v1412_v2 = vld [vmem:[%s1830_s4 + $0x8] sm:$0x1f] (!%p247_p2)   ;;  %vm408_vm0 = vcmask (!%p247_p2), 1043456   ;;  %vm409_vm1 = vcmask (!%p247_p2), 1044480  }
   0x6   : > { %250 = sbr.rel (%p247_p2) target bundleno = 344 (0x158), region = 44  ;;  %1272 = vmatprep.subr.bf16.mxu0 (!%p247_p2), %v1449_v1  ;;  %1304 = vmatprep.subr.bf16.mxu1 (!%p247_p2), %v1449_v1  ;;  %v1450_v3 = vmov (!%p247_p2), 65535   ;;  %vm1451_vm2 = vmmov (!%p247_p2), 0   ;;  %vm386_vm3 = vcmask (!%p247_p2), 203776   ;;  %vm1058_vm4 = vcmask (!%p247_p2), 261120  }
   0x7   : > { %1273 = vmatpush3.bf16.msra.mxu0 (!%p247_p2), %v1411_v0  ;;  %1305 = vmatpush3.bf16.msra.mxu1 (!%p247_p2), %v1411_v0  ;;  %s291_s27 = smul.u32 (!%p247_p2), 14, %s1165_s22  ;;  %v410_v4 = vsel (!%p247_p2), %vm408_vm0, 4294967295, %v1450_v3 }
   0x8   : > { %1274 = vmatprep.subr.bf16.mxu0 (!%p247_p2), %v1449_v1  ;;  %1306 = vmatprep.subr.bf16.mxu1 (!%p247_p2), %v1449_v1  ;;  %v411_v5 = vsel (!%p247_p2), %vm409_vm1, %v410_v4, 0 }
   0x9   : > { %1276 = vmatprep.mubr.msk.bf16.mxu0 (!%p247_p2), %vm1451_vm2, %v1449_v1  ;;  %1308 = vmatprep.mubr.msk.bf16.mxu1 (!%p247_p2), %vm1451_vm2, %v1449_v1  ;;  %p292_p3 = scmp.lt.s32.totalorder (!%p247_p2), %s291_s27, 97  ;;  %v413_v6 = vand.u32 (!%p247_p2), %v1412_v2, %v411_v5 }
   0xb   : > { %1275 = vmatpush3.bf16.msra.mxu0 (!%p247_p2), %v413_v6  ;;  %1307 = vmatpush3.bf16.msra.mxu1 (!%p247_p2), %v413_v6 }
   0xc   : > { %1336 = vmatprep.subr.bf16.mxu0 (!%p247_p2), %v1449_v1  ;;  %1368 = vmatprep.subr.bf16.mxu1 (!%p247_p2), %v1449_v1 }
   0xd   : > { %s1834_s27 = smov (!%p292_p3, %s291_s27), 97 }
   0xe   : > { %s1170_s28 = sshll.u32 %s1834_s27, 2  ;;  %s1174_s19 = sshll.u32 %s1834_s27, 3 }
   0xf   : > { %s1517_s7 = scalar_lea.vmem %s1826_s0, %s1170_s28  ;;  %s1523_s10 = scalar_lea.vmem %s1827_s1, %s1170_s28 }
  0x10   : > { %v1413_v7 = vld [vmem:[%s1517_s7] sm:$0xff]   ;;  %v1415_v9 = vld [vmem:[%s1517_s7 + $0x8] sm:$0xff]   ;;  %s1545_s13 = scalar_lea.vmem %s1828_s2, %s1170_s28  ;;  %s1550_s16 = scalar_lea.vmem %s1829_s3, %s1170_s28  ;;  %v1417_v11 = vld [vmem:[%s1517_s7 + $0x10] sm:$0xff]  }
  0x11   : > { %v1414_v8 = vld [vmem:[%s1523_s10] sm:$0xff]   ;;  %1277 = vmatmul.mubr.msk.bf16.vlgmr.msra.gmra.mrb[0].mxu0 %vm386_vm3, %v1413_v7  ;;  %v1416_v10 = vld [vmem:[%s1523_s10 + $0x8] sm:$0xff]   ;;  %v1418_v12 = vld [vmem:[%s1523_s10 + $0x10] sm:$0xff]   ;;  %s1744_s23 = scalar_lea.vmem %s1832_s6, %s1174_s19 }
  0x12   : > { %1309 = vmatmul.mubr.msk.bf16.vlgmr.msra.gmra.mrb[0].mxu1 %vm386_vm3, %v1414_v8  ;;  %1337 = vmatpush3.bf16.msra.mxu0 %v1411_v0  ;;  %v1419_v13 = vld [vmem:[%s1517_s7 + $0x18] sm:$0xff]   ;;  %v1421_v15 = vld [vmem:[%s1517_s7 + $0x20] sm:$0xff]   ;;  %v1423_v17 = vld [vmem:[%s1517_s7 + $0x28] sm:$0xff]  }
  0x13   : > { %1369 = vmatpush3.bf16.msra.mxu1 %v1411_v0  ;;  %1280 = vmatprep.mubr.msk.bf16.mxu0 %vm1451_vm2, %v1449_v1  ;;  %v1420_v14 = vld [vmem:[%s1523_s10 + $0x18] sm:$0xff]   ;;  %v1422_v16 = vld [vmem:[%s1523_s10 + $0x20] sm:$0xff]   ;;  %v1424_v18 = vld [vmem:[%s1523_s10 + $0x28] sm:$0xff]  }
  0x14   : > { %1312 = vmatprep.mubr.msk.bf16.mxu1 %vm1451_vm2, %v1449_v1  ;;  %1338 = vmatprep.subr.bf16.mxu0 %v1449_v1  ;;  %v1425_v19 = vld [vmem:[%s1517_s7 + $0x30] sm:$0xff]   ;;  %v1427_v21 = vld [vmem:[%s1545_s13] sm:$0xff]   ;;  %v1429_v23 = vld [vmem:[%s1545_s13 + $0x8] sm:$0xff]  }
  0x15   : > { %1370 = vmatprep.subr.bf16.mxu1 %v1449_v1  ;;  %v1426_v20 = vld [vmem:[%s1523_s10 + $0x30] sm:$0xff]   ;;  %v1428_v22 = vld [vmem:[%s1550_s16] sm:$0xff]   ;;  %v1430_v24 = vld [vmem:[%s1550_s16 + $0x8] sm:$0xff]  }
  0x16   : > { %1339 = vmatpush3.bf16.msra.mxu0 %v413_v6  ;;  %v1431_v25 = vld [vmem:[%s1545_s13 + $0x10] sm:$0xff]   ;;  %v1433_v27 = vld [vmem:[%s1545_s13 + $0x18] sm:$0xff]   ;;  %v1435_v29 = vld [vmem:[%s1545_s13 + $0x20] sm:$0xff]  }
  0x17   : > { %1371 = vmatpush3.bf16.msra.mxu1 %v413_v6  ;;  %v1432_v26 = vld [vmem:[%s1550_s16 + $0x10] sm:$0xff]   ;;  %v1434_v28 = vld [vmem:[%s1550_s16 + $0x18] sm:$0xff]   ;;  %v1436_v30 = vld [vmem:[%s1550_s16 + $0x20] sm:$0xff]  }
  0x18   : > { %v1437_v31 = vld [vmem:[%s1545_s13 + $0x28] sm:$0xff]   ;;  %v1439_v33 = vld [vmem:[%s1545_s13 + $0x30] sm:$0xff]  }
  0x19   : > { %1281 = vmatmul.mubr.msk.bf16.gmra.mrb[4].mxu0 %vm386_vm3, %v1415_v9  ;;  %v1438_v32 = vld [vmem:[%s1550_s16 + $0x28] sm:$0xff]   ;;  %v1440_v34 = vld [vmem:[%s1550_s16 + $0x30] sm:$0xff]  }
  0x1a   : > { %1313 = vmatmul.mubr.msk.bf16.gmra.mrb[4].mxu1 %vm386_vm3, %v1416_v10  ;;  %1284 = vmatprep.mubr.msk.bf16.mxu0 %vm1451_vm2, %v1449_v1 }
  0x1b   : > { %1316 = vmatprep.mubr.msk.bf16.mxu1 %vm1451_vm2, %v1449_v1 }
  0x21   : > { %1285 = vmatmul.mubr.msk.bf16.gmra.mrb[8].mxu0 %vm386_vm3, %v1417_v11 }
  0x22   : > { %1317 = vmatmul.mubr.msk.bf16.gmra.mrb[8].mxu1 %vm386_vm3, %v1418_v12  ;;  %1288 = vmatprep.mubr.msk.bf16.mxu0 %vm1451_vm2, %v1449_v1 }
  0x23   : > { %1320 = vmatprep.mubr.msk.bf16.mxu1 %vm1451_vm2, %v1449_v1 }
  0x29   : > { %1289 = vmatmul.mubr.msk.bf16.gmra.mrb[12].mxu0 %vm386_vm3, %v1419_v13 }
  0x2a   : > { %1321 = vmatmul.mubr.msk.bf16.gmra.mrb[12].mxu1 %vm386_vm3, %v1420_v14  ;;  %1292 = vmatprep.mubr.msk.bf16.mxu0 %vm1451_vm2, %v1449_v1 }
  0x2b   : > { %1324 = vmatprep.mubr.msk.bf16.mxu1 %vm1451_vm2, %v1449_v1 }
  0x31   : > { %1293 = vmatmul.mubr.msk.bf16.gmra.mrb[16].mxu0 %vm386_vm3, %v1421_v15 }
  0x32   : > { %1325 = vmatmul.mubr.msk.bf16.gmra.mrb[16].mxu1 %vm386_vm3, %v1422_v16  ;;  %1296 = vmatprep.mubr.msk.bf16.mxu0 %vm1451_vm2, %v1449_v1 }
  0x33   : > { %1328 = vmatprep.mubr.msk.bf16.mxu1 %vm1451_vm2, %v1449_v1 }
  0x39   : > { %1297 = vmatmul.mubr.msk.bf16.gmra.mrb[20].mxu0 %vm386_vm3, %v1423_v17 }
  0x3a   : > { %1329 = vmatmul.mubr.msk.bf16.gmra.mrb[20].mxu1 %vm386_vm3, %v1424_v18  ;;  %1300 = vmatprep.mubr.msk.bf16.mxu0 %vm1451_vm2, %v1449_v1 }
  0x3b   : > { %1332 = vmatprep.mubr.msk.bf16.mxu1 %vm1451_vm2, %v1449_v1 }
  0x41   : > { %1301 = vmatmul.mubr.msk.bf16.gmra.mrb[24].mxu0 %vm386_vm3, %v1425_v19 }
  0x42   : > { %1333 = vmatmul.mubr.msk.bf16.gmra.mrb[24].mxu1 %vm386_vm3, %v1426_v20  ;;  %1340 = vmatprep.mubr.msk.bf16.mxu0 %vm1451_vm2, %v1449_v1 }
  0x43   : > { %1372 = vmatprep.mubr.msk.bf16.mxu1 %vm1451_vm2, %v1449_v1 }
  0x49   : > { %1341 = vmatmul.mubr.msk.bf16.vlgmr.msra.gmra.mrb[28].mxu0 %vm386_vm3, %v1427_v21 }
  0x4a   : > { %1373 = vmatmul.mubr.msk.bf16.vlgmr.msra.gmra.mrb[28].mxu1 %vm386_vm3, %v1428_v22  ;;  %1344 = vmatprep.mubr.msk.bf16.mxu0 %vm1451_vm2, %v1449_v1 }
  0x4b   : > { %1376 = vmatprep.mubr.msk.bf16.mxu1 %vm1451_vm2, %v1449_v1 }
  0x51   : > { %1345 = vmatmul.mubr.msk.bf16.gmra.mrb[32].mxu0 %vm386_vm3, %v1429_v23 }
  0x52   : > { %1377 = vmatmul.mubr.msk.bf16.gmra.mrb[32].mxu1 %vm386_vm3, %v1430_v24  ;;  %1348 = vmatprep.mubr.msk.bf16.mxu0 %vm1451_vm2, %v1449_v1 }
  0x53   : > { %1380 = vmatprep.mubr.msk.bf16.mxu1 %vm1451_vm2, %v1449_v1 }
  0x59   : > { %1349 = vmatmul.mubr.msk.bf16.gmra.mrb[36].mxu0 %vm386_vm3, %v1431_v25 }
  0x5a   : > { %1381 = vmatmul.mubr.msk.bf16.gmra.mrb[36].mxu1 %vm386_vm3, %v1432_v26  ;;  %1352 = vmatprep.mubr.msk.bf16.mxu0 %vm1451_vm2, %v1449_v1 }
  0x5b   : > { %1384 = vmatprep.mubr.msk.bf16.mxu1 %vm1451_vm2, %v1449_v1 }
  0x61   : > { %1353 = vmatmul.mubr.msk.bf16.gmra.mrb[40].mxu0 %vm386_vm3, %v1433_v27 }
  0x62   : > { %1385 = vmatmul.mubr.msk.bf16.gmra.mrb[40].mxu1 %vm386_vm3, %v1434_v28  ;;  %1356 = vmatprep.mubr.msk.bf16.mxu0 %vm1451_vm2, %v1449_v1 }
  0x63   : > { %1388 = vmatprep.mubr.msk.bf16.mxu1 %vm1451_vm2, %v1449_v1 }
  0x69   : > { %1357 = vmatmul.mubr.msk.bf16.gmra.mrb[44].mxu0 %vm386_vm3, %v1435_v29 }
  0x6a   : > { %1389 = vmatmul.mubr.msk.bf16.gmra.mrb[44].mxu1 %vm386_vm3, %v1436_v30  ;;  %1360 = vmatprep.mubr.msk.bf16.mxu0 %vm1451_vm2, %v1449_v1 }
  0x6b   : > { %1392 = vmatprep.mubr.msk.bf16.mxu1 %vm1451_vm2, %v1449_v1 }
  0x71   : > { %1361 = vmatmul.mubr.msk.bf16.gmra.mrb[48].mxu0 %vm386_vm3, %v1437_v31 }
  0x72   : > { %1393 = vmatmul.mubr.msk.bf16.gmra.mrb[48].mxu1 %vm386_vm3, %v1438_v32  ;;  %1364 = vmatprep.mubr.msk.bf16.mxu0 %vm1451_vm2, %v1449_v1 }
  0x73   : > { %1396 = vmatprep.mubr.msk.bf16.mxu1 %vm1451_vm2, %v1449_v1 }
  0x79   : > { %1365 = vmatmul.mubr.msk.bf16.gmra.mrb[52].mxu0 %vm386_vm3, %v1439_v33 }
  0x7a   : > { %1397 = vmatmul.mubr.msk.bf16.gmra.mrb[52].mxu1 %vm386_vm3, %v1440_v34 }
  0xe4   : > { %v1644_v35 = vpop.f32.mrb[0].mxu0 }
  0xe5   : > { %v1646_v36 = vpop.f32.mrb[0].mxu1  ;;  %v1278_v37 = vpop.f32.mrb[1].mxu0 }
  0xe6   : > { %v663_v38 = vmax.f32 %v1644_v35, %v1646_v36  ;;  %v1310_v39 = vpop.f32.mrb[1].mxu1  ;;  %v1650_v40 = vpop.f32.mrb[2].mxu0 }
  0xe7   : > { %v1652_v41 = vpop.f32.mrb[2].mxu1  ;;  %v1279_v42 = vpop.f32.mrb[3].mxu0 }
  0xe8   : > { %v664_v43 = vmax.f32 %v1650_v40, %v1652_v41  ;;  %v1311_v44 = vpop.f32.mrb[3].mxu1 }
  0xec   : > { %v1656_v45 = vpop.f32.mrb[4].mxu0 }
  0xed   : > { %v1658_v46 = vpop.f32.mrb[4].mxu1  ;;  %v1282_v47 = vpop.f32.mrb[5].mxu0 }
  0xee   : > { %v665_v48 = vmax.f32 %v1656_v45, %v1658_v46  ;;  %v1314_v49 = vpop.f32.mrb[5].mxu1  ;;  %v1662_v50 = vpop.f32.mrb[6].mxu0 }
  0xef   : > { %v1664_v51 = vpop.f32.mrb[6].mxu1  ;;  %v1283_v52 = vpop.f32.mrb[7].mxu0 }
  0xf0   : > { %v666_v53 = vmax.f32 %v1662_v50, %v1664_v51  ;;  %v1315_v54 = vpop.f32.mrb[7].mxu1 }
  0xf4   : > { %v1668_v55 = vpop.f32.mrb[8].mxu0 }
  0xf5   : > { %v1670_v56 = vpop.f32.mrb[8].mxu1  ;;  %v1286_v57 = vpop.f32.mrb[9].mxu0 }
  0xf6   : > { %v667_v58 = vmax.f32 %v1668_v55, %v1670_v56  ;;  %v1318_v59 = vpop.f32.mrb[9].mxu1  ;;  %v1674_v60 = vpop.f32.mrb[10].mxu0 }
  0xf7   : > { %v1676_v61 = vpop.f32.mrb[10].mxu1  ;;  %v1287_v62 = vpop.f32.mrb[11].mxu0 }
  0xf8   : > { %v668_v63 = vmax.f32 %v1674_v60, %v1676_v61  ;;  %v1319_v0 = vpop.f32.mrb[11].mxu1  ;;  %v1734_v62 = vld [vmem:[%s1831_s5] ss:$0 sm:$0xff] }
  0xfc   : > { %v1680_v1 = vpop.f32.mrb[12].mxu0 }
  0xfd   : > { %v1682_v2 = vpop.f32.mrb[12].mxu1  ;;  %v1290_v3 = vpop.f32.mrb[13].mxu0 }
  0xfe   : > { %v669_v4 = vmax.f32 %v1680_v1, %v1682_v2  ;;  %v1322_v5 = vpop.f32.mrb[13].mxu1  ;;  %v1686_v6 = vpop.f32.mrb[14].mxu0 }
  0xff   : > { %v1688_v7 = vpop.f32.mrb[14].mxu1  ;;  %v1291_v8 = vpop.f32.mrb[15].mxu0 }
 0x100   : > { %v670_v9 = vmax.f32 %v1686_v6, %v1688_v7  ;;  %v1323_v10 = vpop.f32.mrb[15].mxu1 }
 0x104   : > { %v1692_v11 = vpop.f32.mrb[16].mxu0 }
 0x105   : > { %v1694_v12 = vpop.f32.mrb[16].mxu1  ;;  %v1294_v13 = vpop.f32.mrb[17].mxu0 }
 0x106   : > { %v671_v14 = vmax.f32 %v1692_v11, %v1694_v12  ;;  %v1326_v15 = vpop.f32.mrb[17].mxu1  ;;  %v1698_v16 = vpop.f32.mrb[18].mxu0 }
 0x107   : > { %v1700_v17 = vpop.f32.mrb[18].mxu1  ;;  %v1295_v18 = vpop.f32.mrb[19].mxu0 }
 0x108   : > { %v672_v19 = vmax.f32 %v1698_v16, %v1700_v17  ;;  %v1327_v20 = vpop.f32.mrb[19].mxu1 }
 0x10c   : > { %v1704_v21 = vpop.f32.mrb[20].mxu0 }
 0x10d   : > { %v1706_v22 = vpop.f32.mrb[20].mxu1  ;;  %v1298_v23 = vpop.f32.mrb[21].mxu0 }
 0x10e   : > { %v673_v24 = vmax.f32 %v1704_v21, %v1706_v22  ;;  %v1330_v25 = vpop.f32.mrb[21].mxu1  ;;  %v1710_v26 = vpop.f32.mrb[22].mxu0 }
 0x10f   : > { %v1712_v27 = vpop.f32.mrb[22].mxu1  ;;  %v1299_v28 = vpop.f32.mrb[23].mxu0 }
 0x110   : > { %v674_v29 = vmax.f32 %v1710_v26, %v1712_v27  ;;  %v1331_v30 = vpop.f32.mrb[23].mxu1 }
 0x114   : > { %v1716_v31 = vpop.f32.mrb[24].mxu0 }
 0x115   : > { %v1718_v32 = vpop.f32.mrb[24].mxu1  ;;  %v1302_v33 = vpop.f32.mrb[25].mxu0 }
 0x116   : > { %v675_v34 = vmax.f32 %v1716_v31, %v1718_v32  ;;  %v1334_v37 = vpop.f32.mrb[25].mxu1  ;;  %v1722_v39 = vpop.f32.mrb[26].mxu0 }
 0x117   : > { %v1724_v42 = vpop.f32.mrb[26].mxu1  ;;  %v1303_v44 = vpop.f32.mrb[27].mxu0 }
 0x118   : > { %v676_v47 = vmax.f32 %v1722_v39, %v1724_v42  ;;  %v1335_v49 = vpop.f32.mrb[27].mxu1 }
 0x11c   : > { %v781_v52 = vpop.f32.mrb[28].mxu0 }
 0x11d   : > { %v836_v54 = vmax.f32 %v663_v38, %v781_v52  ;;  %v954_v57 = vpop.f32.mrb[28].mxu1  ;;  %v1342_v59 = vpop.f32.mrb[29].mxu0 }
 0x11e   : > { %v1374_v0 = vpop.f32.mrb[29].mxu1  ;;  %v784_v3 = vpop.f32.mrb[30].mxu0 }
 0x11f   : > { %v1009_v5 = vmax.f32 %v836_v54, %v954_v57  ;;  %v837_v8 = vmax.f32 %v664_v43, %v784_v3  ;;  %v957_v10 = vpop.f32.mrb[30].mxu1  ;;  %v1343_v13 = vpop.f32.mrb[31].mxu0 }
 0x120   : > { %v1375_v15 = vpop.f32.mrb[31].mxu1 }
 0x121   : > { %v1030_v35 = vadd.f32 %v1734_v62, %v1009_v5  ;;  %v1010_v36 = vmax.f32 %v837_v8, %v957_v10 }
 0x123   : > { %v1044_v38 = vmax.f32 %v1030_v35, 0.0  ;;  %v1031_v18 = vadd.f32 %v1734_v62, %v1010_v36 }
 0x124   : > { %v789_v20 = vpop.f32.mrb[32].mxu0 }
 0x125   : > { %1059 = vst.msk [vmem:[%s1744_s23] sm:$0xff] %vm1058_vm4, %v1044_v38  ;;  %v1045_v40 = vmax.f32 %v1031_v18, 0.0  ;;  %v838_v41 = vmax.f32 %v665_v48, %v789_v20  ;;  %v962_v43 = vpop.f32.mrb[32].mxu1  ;;  %v1346_v23 = vpop.f32.mrb[33].mxu0 }
 0x126   : > { %v1378_v25 = vpop.f32.mrb[33].mxu1  ;;  %v792_v28 = vpop.f32.mrb[34].mxu0 }
 0x127   : > { %1060 = vst.msk [vmem:[%s1744_s23 + $0x8] sm:$0xff] %vm1058_vm4, %v1045_v40  ;;  %v1011_v30 = vmax.f32 %v838_v41, %v962_v43  ;;  %v839_v33 = vmax.f32 %v666_v53, %v792_v28  ;;  %v965_v37 = vpop.f32.mrb[34].mxu1  ;;  %v1347_v44 = vpop.f32.mrb[35].mxu0 }
 0x128   : > { %v1379_v49 = vpop.f32.mrb[35].mxu1 }
 0x129   : > { %v1032_v52 = vadd.f32 %v1734_v62, %v1011_v30  ;;  %v1012_v45 = vmax.f32 %v839_v33, %v965_v37 }
 0x12b   : > { %v1046_v46 = vmax.f32 %v1032_v52, 0.0  ;;  %v1033_v48 = vadd.f32 %v1734_v62, %v1012_v45 }
 0x12c   : > { %v797_v54 = vpop.f32.mrb[36].mxu0 }
 0x12d   : > { %1061 = vst.msk [vmem:[%s1744_s23 + $0x10] sm:$0xff] %vm1058_vm4, %v1046_v46  ;;  %v1047_v57 = vmax.f32 %v1033_v48, 0.0  ;;  %v840_v59 = vmax.f32 %v667_v58, %v797_v54  ;;  %v970_v50 = vpop.f32.mrb[36].mxu1  ;;  %v1350_v51 = vpop.f32.mrb[37].mxu0 }
 0x12e   : > { %v1382_v53 = vpop.f32.mrb[37].mxu1  ;;  %v800_v0 = vpop.f32.mrb[38].mxu0 }
 0x12f   : > { %1062 = vst.msk [vmem:[%s1744_s23 + $0x18] sm:$0xff] %vm1058_vm4, %v1047_v57  ;;  %v1013_v3 = vmax.f32 %v840_v59, %v970_v50  ;;  %v841_v5 = vmax.f32 %v668_v63, %v800_v0  ;;  %v973_v8 = vpop.f32.mrb[38].mxu1  ;;  %v1351_v10 = vpop.f32.mrb[39].mxu0 }
 0x130   : > { %v1383_v13 = vpop.f32.mrb[39].mxu1 }
 0x131   : > { %v1034_v15 = vadd.f32 %v1734_v62, %v1013_v3  ;;  %v1014_v55 = vmax.f32 %v841_v5, %v973_v8 }
 0x133   : > { %v1048_v56 = vmax.f32 %v1034_v15, 0.0  ;;  %v1035_v58 = vadd.f32 %v1734_v62, %v1014_v55 }
 0x134   : > { %v805_v35 = vpop.f32.mrb[40].mxu0 }
 0x135   : > { %1063 = vst.msk [vmem:[%s1744_s23 + $0x20] sm:$0xff] %vm1058_vm4, %v1048_v56  ;;  %v1049_v36 = vmax.f32 %v1035_v58, 0.0  ;;  %v842_v38 = vmax.f32 %v669_v4, %v805_v35  ;;  %v978_v60 = vpop.f32.mrb[40].mxu1  ;;  %v1354_v61 = vpop.f32.mrb[41].mxu0 }
 0x136   : > { %v1386_v63 = vpop.f32.mrb[41].mxu1  ;;  %v808_v18 = vpop.f32.mrb[42].mxu0 }
 0x137   : > { %1064 = vst.msk [vmem:[%s1744_s23 + $0x28] sm:$0xff] %vm1058_vm4, %v1049_v36  ;;  %v1015_v20 = vmax.f32 %v842_v38, %v978_v60  ;;  %v843_v40 = vmax.f32 %v670_v9, %v808_v18  ;;  %v981_v41 = vpop.f32.mrb[42].mxu1  ;;  %v1355_v43 = vpop.f32.mrb[43].mxu0 }
 0x138   : > { %v1387_v23 = vpop.f32.mrb[43].mxu1 }
 0x139   : > { %v1036_v25 = vadd.f32 %v1734_v62, %v1015_v20  ;;  %v1016_v1 = vmax.f32 %v843_v40, %v981_v41 }
 0x13b   : > { %v1050_v2 = vmax.f32 %v1036_v25, 0.0  ;;  %v1037_v4 = vadd.f32 %v1734_v62, %v1016_v1 }
 0x13c   : > { %v813_v28 = vpop.f32.mrb[44].mxu0 }
 0x13d   : > { %1065 = vst.msk [vmem:[%s1744_s23 + $0x30] sm:$0xff] %vm1058_vm4, %v1050_v2  ;;  %v1051_v30 = vmax.f32 %v1037_v4, 0.0  ;;  %v844_v33 = vmax.f32 %v671_v14, %v813_v28  ;;  %v986_v6 = vpop.f32.mrb[44].mxu1  ;;  %v1358_v7 = vpop.f32.mrb[45].mxu0 }
 0x13e   : > { %v1390_v9 = vpop.f32.mrb[45].mxu1  ;;  %v816_v37 = vpop.f32.mrb[46].mxu0 }
 0x13f   : > { %1066 = vst.msk [vmem:[%s1744_s23 + $0x38] sm:$0xff] %vm1058_vm4, %v1051_v30  ;;  %v1017_v44 = vmax.f32 %v844_v33, %v986_v6  ;;  %v845_v49 = vmax.f32 %v672_v19, %v816_v37  ;;  %v989_v52 = vpop.f32.mrb[46].mxu1  ;;  %v1359_v45 = vpop.f32.mrb[47].mxu0 }
 0x140   : > { %v1391_v46 = vpop.f32.mrb[47].mxu1 }
 0x141   : > { %v1038_v48 = vadd.f32 %v1734_v62, %v1017_v44  ;;  %v1018_v11 = vmax.f32 %v845_v49, %v989_v52 }
 0x143   : > { %v1052_v12 = vmax.f32 %v1038_v48, 0.0  ;;  %v1039_v14 = vadd.f32 %v1734_v62, %v1018_v11 }
 0x144   : > { %v821_v54 = vpop.f32.mrb[48].mxu0 }
 0x145   : > { %1067 = vst.msk [vmem:[%s1744_s23 + $0x40] sm:$0xff] %vm1058_vm4, %v1052_v12  ;;  %v1053_v57 = vmax.f32 %v1039_v14, 0.0  ;;  %v846_v59 = vmax.f32 %v673_v24, %v821_v54  ;;  %v994_v16 = vpop.f32.mrb[48].mxu1  ;;  %v1362_v17 = vpop.f32.mrb[49].mxu0 }
 0x146   : > { %v1394_v19 = vpop.f32.mrb[49].mxu1  ;;  %v824_v50 = vpop.f32.mrb[50].mxu0 }
 0x147   : > { %1068 = vst.msk [vmem:[%s1744_s23 + $0x48] sm:$0xff] %vm1058_vm4, %v1053_v57  ;;  %v1019_v51 = vmax.f32 %v846_v59, %v994_v16  ;;  %v847_v53 = vmax.f32 %v674_v29, %v824_v50  ;;  %v997_v0 = vpop.f32.mrb[50].mxu1  ;;  %v1363_v3 = vpop.f32.mrb[51].mxu0 }
 0x148   : > { %v1395_v5 = vpop.f32.mrb[51].mxu1 }
 0x149   : > { %v1040_v8 = vadd.f32 %v1734_v62, %v1019_v51  ;;  %v1020_v21 = vmax.f32 %v847_v53, %v997_v0 }
 0x14b   : > { %v1054_v22 = vmax.f32 %v1040_v8, 0.0  ;;  %v1041_v24 = vadd.f32 %v1734_v62, %v1020_v21 }
 0x14c   : > { %v829_v10 = vpop.f32.mrb[52].mxu0 }
 0x14d   : > { %1069 = vst.msk [vmem:[%s1744_s23 + $0x50] sm:$0xff] %vm1058_vm4, %v1054_v22  ;;  %v1055_v13 = vmax.f32 %v1041_v24, 0.0  ;;  %v848_v26 = vmax.f32 %v675_v34, %v829_v10  ;;  %v1002_v27 = vpop.f32.mrb[52].mxu1  ;;  %v1366_v29 = vpop.f32.mrb[53].mxu0 }
 0x14e   : > { %v1398_v15 = vpop.f32.mrb[53].mxu1  ;;  %v832_v55 = vpop.f32.mrb[54].mxu0 }
 0x14f   : > { %1070 = vst.msk [vmem:[%s1744_s23 + $0x58] sm:$0xff] %vm1058_vm4, %v1055_v13  ;;  %v1021_v56 = vmax.f32 %v848_v26, %v1002_v27  ;;  %v849_v58 = vmax.f32 %v676_v47, %v832_v55  ;;  %v1005_v35 = vpop.f32.mrb[54].mxu1  ;;  %v1367_v36 = vpop.f32.mrb[55].mxu0 }
 0x150   : > { %v1399_v38 = vpop.f32.mrb[55].mxu1 }
 0x151   : > { %v1042_v60 = vadd.f32 %v1734_v62, %v1021_v56  ;;  %v1022_v31 = vmax.f32 %v849_v58, %v1005_v35 }
 0x153   : > { %v1056_v32 = vmax.f32 %v1042_v60, 0.0  ;;  %v1043_v34 = vadd.f32 %v1734_v62, %v1022_v31 }
 0x155   : > { %1071 = vst.msk [vmem:[%s1744_s23 + $0x60] sm:$0xff] %vm1058_vm4, %v1056_v32  ;;  %v1057_v61 = vmax.f32 %v1043_v34, 0.0 }
 0x157   : > { %1072 = vst.msk [vmem:[%s1744_s23 + $0x68] sm:$0xff] %vm1058_vm4, %v1057_v61 }
 0x158 PF: > { %s16_s21 = sadd.s32 1, %s1447_s21  }
 0x159   : > { %p13_p4 = scmp.ge.s32.totalorder %s16_s21, 9  }
 0x15b   :  { %15 = sbr.rel (!%p13_p4) target bundleno = 1 (0x1), region = 83 }

// kernel: siamese_forward.16
= control target key start
LH: loop header
LB: loop body
LE: loop exit
PB: predicated region body
PF: predicated region fallthrough
CT: control target
= control target key end

     0   :  { %v6423_v36 = vmov 0.0   ;;  %vm4658_vm0 = vmmov 0   ;;  %vm710_vm1 = vcmask 261120   ;;  %vm3133_vm2 = vcmask 523264   ;;  %s6416_s4 = inlined_call_operand.vmem [shape: bf16[800,64], index: 4, kind: input, shape index: {}]   ;;  %s6417_s0 = inlined_call_operand.vmem [shape: bf16[100,800], index: 0, kind: input, shape index: {}]   ;;  %s6418_s1 = inlined_call_operand.vmem [shape: bf16[100,800], index: 1, kind: input, shape index: {}]   ;;  %s6419_s2 = inlined_call_operand.vmem [shape: bf16[100,800], index: 2, kind: input, shape index: {}]   ;;  %s6420_s3 = inlined_call_operand.vmem [shape: bf16[100,800], index: 3, kind: input, shape index: {}]   ;;  %s6421_s5 = inlined_call_operand.vmem [shape: f32[1,64], index: 5, kind: input, shape index: {}]   ;;  %s6422_s6 = inlined_call_operand.vmem [shape: f32[100,64], index: 6, kind: output, shape index: {}]  }
   0x1   :  { %v4697_v0 = vld [vmem:[%s6416_s4 + $0x40] sm:$0xff]   ;;  %v4720_v4 = vld [vmem:[%s6416_s4 + $0x48] sm:$0xff]   ;;  %v4744_v8 = vld [vmem:[%s6416_s4 + $0x50] sm:$0xff]   ;;  %vm3146_vm3 = vcmask 519168  }
   0x2   :  { %v4702_v1 = vld [vmem:[%s6416_s4 + $0xc0] sm:$0xff]   ;;  %3427 = vmatprep.subr.bf16.mxu0 %v4697_v0  ;;  %v4726_v5 = vld [vmem:[%s6416_s4 + $0xc8] sm:$0xff]   ;;  %v4750_v9 = vld [vmem:[%s6416_s4 + $0xd0] sm:$0xff]  }
   0x3   :  { %v4708_v2 = vld [vmem:[%s6416_s4] sm:$0xff]   ;;  %3485 = vmatprep.subr.bf16.mxu1 %v4702_v1  ;;  %v4732_v6 = vld [vmem:[%s6416_s4 + $0x8] sm:$0xff]   ;;  %v4756_v10 = vld [vmem:[%s6416_s4 + $0x10] sm:$0xff]  }
   0x4   :  { %v4714_v3 = vld [vmem:[%s6416_s4 + $0x80] sm:$0xff]   ;;  %3428 = vmatpush3.bf16.msra.mxu0 %v4708_v2  ;;  %v4738_v7 = vld [vmem:[%s6416_s4 + $0x88] sm:$0xff]   ;;  %v4762_v11 = vld [vmem:[%s6416_s4 + $0x90] sm:$0xff]  }
   0x5   :  { %3486 = vmatpush3.bf16.msra.mxu1 %v4714_v3  ;;  %3429 = vmatprep.subr.bf16.mxu0 %v4720_v4  ;;  %v4768_v12 = vld [vmem:[%s6416_s4 + $0x58] sm:$0xff]   ;;  %v4792_v16 = vld [vmem:[%s6416_s4 + $0x60] sm:$0xff]   ;;  %v4816_v20 = vld [vmem:[%s6416_s4 + $0x68] sm:$0xff]  }
   0x6   :  { %3487 = vmatprep.subr.bf16.mxu1 %v4726_v5  ;;  %v4774_v13 = vld [vmem:[%s6416_s4 + $0xd8] sm:$0xff]   ;;  %v4798_v17 = vld [vmem:[%s6416_s4 + $0xe0] sm:$0xff]   ;;  %v4822_v21 = vld [vmem:[%s6416_s4 + $0xe8] sm:$0xff]  }
   0x7   :  { %v4780_v14 = vld [vmem:[%s6416_s4 + $0x18] sm:$0xff]   ;;  %v4804_v18 = vld [vmem:[%s6416_s4 + $0x20] sm:$0xff]   ;;  %v4828_v22 = vld [vmem:[%s6416_s4 + $0x28] sm:$0xff]  }
   0x8   :  { %3430 = vmatpush3.bf16.msra.mxu0 %v4732_v6  ;;  %v4786_v15 = vld [vmem:[%s6416_s4 + $0x98] sm:$0xff]   ;;  %v4810_v19 = vld [vmem:[%s6416_s4 + $0xa0] sm:$0xff]   ;;  %v4834_v23 = vld [vmem:[%s6416_s4 + $0xa8] sm:$0xff]  }
   0x9   :  { %3488 = vmatpush3.bf16.msra.mxu1 %v4738_v7  ;;  %3431 = vmatprep.subr.bf16.mxu0 %v4744_v8  ;;  %v4840_v24 = vld [vmem:[%s6416_s4 + $0x70] sm:$0xff]   ;;  %v4864_v28 = vld [vmem:[%s6416_s4 + $0x78] sm:$0xff]   ;;  %v4323_v33 = vld [vmem:[%s6417_s0 + $0x4] ss:$28 sps:$4 sm:$0xff]  }
   0xa   :  { %3489 = vmatprep.subr.bf16.mxu1 %v4750_v9  ;;  %v4846_v25 = vld [vmem:[%s6416_s4 + $0xf0] sm:$0xff]   ;;  %v4870_v29 = vld [vmem:[%s6416_s4 + $0xf8] sm:$0xff]   ;;  %v4324_v34 = vld [vmem:[%s6417_s0 + $0x8] ss:$28 sps:$4 sm:$0xff]   ;;  %764 = vmatprep.mubr.bf16.mxu0 %v4323_v33 }
   0xb   :  { %v4852_v26 = vld [vmem:[%s6416_s4 + $0x30] sm:$0xff]   ;;  %v4876_v30 = vld [vmem:[%s6416_s4 + $0x38] sm:$0xff]   ;;  %v4326_v35 = vld [vmem:[%s6417_s0 + $0xc] ss:$28 sps:$4 sm:$0xff]  }
   0xc   :  { %3432 = vmatpush3.bf16.msra.mxu0 %v4756_v10  ;;  %v4858_v27 = vld [vmem:[%s6416_s4 + $0xb0] sm:$0xff]   ;;  %v4882_v31 = vld [vmem:[%s6416_s4 + $0xb8] sm:$0xff]   ;;  %v4902_v37 = vld [vmem:[%s6416_s4 + $0x140] sm:$0xff]   ;;  %852 = vmatprep.mubr.bf16.mxu1 %v4326_v35 }
   0xd   :  { %3490 = vmatpush3.bf16.msra.mxu1 %v4762_v11  ;;  %3433 = vmatprep.subr.bf16.mxu0 %v4768_v12  ;;  %v4321_v32 = vld [vmem:[%s6417_s0] ss:$28 sps:$4 sm:$0xff]   ;;  %v4926_v42 = vld [vmem:[%s6416_s4 + $0x148] sm:$0xff]   ;;  %v4335_v43 = vld [vmem:[%s6417_s0 + $0x38] ss:$28 sps:$4 sm:$0xff]  }
   0xe   :  { %3491 = vmatprep.subr.bf16.mxu1 %v4774_v13  ;;  %v4907_v38 = vld [vmem:[%s6416_s4 + $0x100] sm:$0xff]   ;;  %v4330_v40 = vld [vmem:[%s6417_s0 + $0x3c] ss:$28 sps:$4 sm:$0xff]   ;;  %v4939_v45 = vld [vmem:[%s6416_s4 + $0x108] sm:$0xff]  }
   0xf   :  { %v4913_v39 = vld [vmem:[%s6416_s4 + $0x180] sm:$0xff]   ;;  %v4944_v46 = vld [vmem:[%s6416_s4 + $0x150] sm:$0xff]   ;;  %v4341_v48 = vld [vmem:[%s6417_s0 + $0x7c] ss:$28 sps:$4 sm:$0xff]  }
  0x10   :  { %3434 = vmatpush3.bf16.msra.mxu0 %v4780_v14  ;;  %v4332_v41 = vld [vmem:[%s6417_s0 + $0x44] ss:$28 sps:$4 sm:$0xff]   ;;  %v4339_v47 = vld [vmem:[%s6417_s0 + $0x74] ss:$28 sps:$4 sm:$0xff]   ;;  %v4968_v52 = vld [vmem:[%s6416_s4 + $0x158] sm:$0xff]  }
  0x11   :  { %3492 = vmatpush3.bf16.msra.mxu1 %v4786_v15  ;;  %3435 = vmatprep.subr.bf16.mxu0 %v4792_v16  ;;  %v4336_v44 = vld [vmem:[%s6417_s0 + $0x40] ss:$28 sps:$4 sm:$0xff]   ;;  %v4957_v49 = vld [vmem:[%s6416_s4 + $0x110] sm:$0xff]   ;;  %v4348_v54 = vld [vmem:[%s6417_s0 + $0xac] ss:$28 sps:$4 sm:$0xff]  }
  0x12   :  { %3493 = vmatprep.subr.bf16.mxu1 %v4798_v17  ;;  %v4344_v50 = vld [vmem:[%s6417_s0 + $0x70] ss:$28 sps:$4 sm:$0xff]   ;;  %v4345_v51 = vld [vmem:[%s6417_s0 + $0x78] ss:$28 sps:$4 sm:$0xff]   ;;  %v4986_v56 = vld [vmem:[%s6416_s4 + $0x160] sm:$0xff]  }
  0x13   :  { %v4973_v53 = vld [vmem:[%s6416_s4 + $0x118] sm:$0xff]   ;;  %v4350_v55 = vld [vmem:[%s6417_s0 + $0xb4] ss:$28 sps:$4 sm:$0xff]   ;;  %v4992_v57 = vld [vmem:[%s6416_s4 + $0x120] sm:$0xff]  }
  0x14   :  { %3436 = vmatpush3.bf16.msra.mxu0 %v4804_v18  ;;  %v4352_v58 = vld [vmem:[%s6417_s0 + $0xa8] ss:$28 sps:$4 sm:$0xff]   ;;  %v4353_v59 = vld [vmem:[%s6417_s0 + $0xb0] ss:$28 sps:$4 sm:$0xff]   ;;  %v4360_v33 = vld [vmem:[%s6417_s0 + $0xe0] ss:$28 sps:$4 sm:$0xff]  }
  0x15   :  { %3494 = vmatpush3.bf16.msra.mxu1 %v4810_v19  ;;  %3437 = vmatprep.subr.bf16.mxu0 %v4816_v20  ;;  %v4356_v60 = vld [vmem:[%s6417_s0 + $0xe4] ss:$28 sps:$4 sm:$0xff]   ;;  %v4358_v61 = vld [vmem:[%s6417_s0 + $0xec] ss:$28 sps:$4 sm:$0xff]  }
  0x16   :  { %3495 = vmatprep.subr.bf16.mxu1 %v4822_v21  ;;  %v5011_v62 = vld [vmem:[%s6416_s4 + $0x188] sm:$0xff]  }
  0x17   :  { %v5016_v63 = vld [vmem:[%s6416_s4 + $0x168] sm:$0xff]  }
  0x18   :  { %3438 = vmatpush3.bf16.msra.mxu0 %v4828_v22  ;;  %v4361_v35 = vld [vmem:[%s6417_s0 + $0xe8] ss:$28 sps:$4 sm:$0xff]  }
  0x19   :  { %3496 = vmatpush3.bf16.msra.mxu1 %v4834_v23  ;;  %3439 = vmatprep.subr.bf16.mxu0 %v4840_v24 }
  0x1a   :  { %3497 = vmatprep.subr.bf16.mxu1 %v4846_v25 }
  0x1c   :  { %3440 = vmatpush3.bf16.msra.mxu0 %v4852_v26 }
  0x1d   :  { %3498 = vmatpush3.bf16.msra.mxu1 %v4858_v27  ;;  %3441 = vmatprep.subr.bf16.mxu0 %v4864_v28 }
  0x1e   :  { %3499 = vmatprep.subr.bf16.mxu1 %v4870_v29 }
  0x20   :  { %3442 = vmatpush3.bf16.msra.mxu0 %v4876_v30 }
  0x21   :  { %3500 = vmatpush3.bf16.msra.mxu1 %v4882_v31  ;;  %3543 = vmatprep.subr.bf16.mxu0 %v4902_v37 }
  0x22   :  { %4159 = vmatprep.subr.bf16.mxu1 %v6423_v36 }
  0x23   :  { %765 = vmatmul.mubr.bf16.vlgmr.msra.gmra.mrb[0].mxu0 %v4321_v32  ;;  %v5022_v32 = vld [vmem:[%s6416_s4 + $0x128] sm:$0xff]  }
  0x24   :  { %853 = vmatmul.mubr.bf16.vlgmr.msra.gmra.mrb[0].mxu1 %v4324_v34  ;;  %3544 = vmatpush3.bf16.msra.mxu0 %v4907_v38  ;;  %v5032_v34 = vld [vmem:[%s6416_s4 + $0x170] sm:$0xff]  }
  0x25   :  { %4160 = vmatpush3.bf16.msra.mxu1 %v4913_v39  ;;  %772 = vmatprep.mubr.bf16.mxu0 %v4330_v40  ;;  %v5040_v40 = vld [vmem:[%s6416_s4 + $0x130] sm:$0xff]  }
  0x26   :  { %4161 = vmatprep.subr.bf16.mxu1 %v6423_v36  ;;  %860 = vmatprep.mubr.bf16.mxu1 %v4332_v41  ;;  %v4365_v41 = vld [vmem:[%s6417_s0 + $0x11c] ss:$28 sps:$4 sm:$0xff]  }
  0x27   :  { %3545 = vmatprep.subr.bf16.mxu0 %v4926_v42 }
  0x28   :  { %3546 = vmatpush3.bf16.msra.mxu0 %v4939_v45 }
  0x29   :  { %3547 = vmatprep.subr.bf16.mxu0 %v4944_v46  ;;  %4162 = vmatpush3.bf16.msra.mxu1 %v5011_v62 }
  0x2a   :  { %3668 = vmatprep.subr.bf16.mxu1 %v4702_v1  ;;  %v5059_v1 = vld [vmem:[%s6416_s4 + $0x138] sm:$0xff]  }
  0x2b   :  { %773 = vmatmul.mubr.bf16.gmra.mrb[4].mxu0 %v4335_v43  ;;  %v4367_v43 = vld [vmem:[%s6417_s0 + $0x124] ss:$28 sps:$4 sm:$0xff]  }
  0x2c   :  { %861 = vmatmul.mubr.bf16.gmra.mrb[4].mxu1 %v4336_v44  ;;  %780 = vmatprep.mubr.bf16.mxu0 %v4339_v47  ;;  %v5053_v44 = vld [vmem:[%s6416_s4 + $0x178] sm:$0xff]   ;;  %v172_v47 = vld [vmem:[%s6417_s0 + $0x150] sm:$0x33] }
  0x2d   :  { %868 = vmatprep.mubr.bf16.mxu1 %v4341_v48  ;;  %3548 = vmatpush3.bf16.msra.mxu0 %v4957_v49  ;;  %v173_v48 = vld [vmem:[%s6417_s0 + $0x158] sm:$0x33] }
  0x2e   :  { %3549 = vmatprep.subr.bf16.mxu0 %v4968_v52 }
  0x31   :  { %3550 = vmatpush3.bf16.msra.mxu0 %v4973_v53 }
  0x32   :  { %3551 = vmatprep.subr.bf16.mxu0 %v4986_v56 }
  0x33   :  { %781 = vmatmul.mubr.bf16.gmra.mrb[8].mxu0 %v4344_v50  ;;  %v4369_v50 = vld [vmem:[%s6417_s0 + $0x118] ss:$28 sps:$4 sm:$0xff]  }
  0x34   :  { %869 = vmatmul.mubr.bf16.gmra.mrb[8].mxu1 %v4345_v51  ;;  %788 = vmatprep.mubr.bf16.mxu0 %v4348_v54  ;;  %v4370_v51 = vld [vmem:[%s6417_s0 + $0x120] ss:$28 sps:$4 sm:$0xff]   ;;  %v3195_v54 = vcombine.high %v172_v47, %v172_v47 }
  0x35   :  { %876 = vmatprep.mubr.bf16.mxu1 %v4350_v55  ;;  %3552 = vmatpush3.bf16.msra.mxu0 %v4992_v57  ;;  %v3197_v55 = vcombine.high %v173_v48, %v173_v48 }
  0x36   :  { %3553 = vmatprep.subr.bf16.mxu0 %v5016_v63 }
  0x39   :  { %3554 = vmatpush3.bf16.msra.mxu0 %v5022_v32 }
  0x3a   :  { %3555 = vmatprep.subr.bf16.mxu0 %v5032_v34 }
  0x3b   :  { %789 = vmatmul.mubr.bf16.gmra.mrb[12].mxu0 %v4352_v58  ;;  %v3194_v58 = vcombine.low %v172_v47, %v172_v47  ;;  %v4448_v47 = vld [vmem:[%s6418_s1 + $0x14] ss:$28 sps:$4 sm:$0xff]  }
  0x3c   :  { %877 = vmatmul.mubr.bf16.gmra.mrb[12].mxu1 %v4353_v59  ;;  %796 = vmatprep.mubr.bf16.mxu0 %v4356_v60  ;;  %v3196_v59 = vcombine.low %v173_v48, %v173_v48  ;;  %v4379_v60 = vld [vmem:[%s6417_s0 + $0x10] ss:$28 sps:$4 sm:$0xff]  }
  0x3d   :  { %884 = vmatprep.mubr.bf16.mxu1 %v4358_v61  ;;  %3556 = vmatpush3.bf16.msra.mxu0 %v5040_v40  ;;  %v4382_v61 = vld [vmem:[%s6417_s0 + $0x18] ss:$28 sps:$4 sm:$0xff]   ;;  %v4446_v48 = vld [vmem:[%s6418_s1 + $0x10] ss:$28 sps:$4 sm:$0xff]  }
  0x3e   :  { %3557 = vmatprep.subr.bf16.mxu0 %v5053_v44 }
  0x41   :  { %3558 = vmatpush3.bf16.msra.mxu0 %v5059_v1 }
  0x42   :  { %3610 = vmatprep.subr.bf16.mxu0 %v4697_v0  ;;  %v4381_v0 = vld [vmem:[%s6417_s0 + $0x14] ss:$28 sps:$4 sm:$0xff]  }
  0x43   :  { %797 = vmatmul.mubr.bf16.gmra.mrb[16].mxu0 %v4360_v33  ;;  %v4383_v33 = vld [vmem:[%s6417_s0 + $0x4c] ss:$28 sps:$4 sm:$0xff]  }
  0x44   :  { %885 = vmatmul.mubr.bf16.gmra.mrb[16].mxu1 %v4361_v35  ;;  %804 = vmatprep.mubr.bf16.mxu0 %v4365_v41  ;;  %v4385_v35 = vld [vmem:[%s6417_s0 + $0x48] ss:$28 sps:$4 sm:$0xff]   ;;  %v4386_v41 = vld [vmem:[%s6417_s0 + $0x50] ss:$28 sps:$4 sm:$0xff]  }
  0x45   :  { %892 = vmatprep.mubr.bf16.mxu1 %v4367_v43 }
  0x4b   :  { %805 = vmatmul.mubr.bf16.gmra.mrb[20].mxu0 %v4369_v50  ;;  %v4449_v50 = vld [vmem:[%s6418_s1 + $0x18] ss:$28 sps:$4 sm:$0xff]  }
  0x4c   :  { %893 = vmatmul.mubr.bf16.gmra.mrb[20].mxu1 %v4370_v51  ;;  %812 = vmatprep.mubr.bf16.mxu0 %v3195_v54  ;;  %v4450_v51 = vld [vmem:[%s6418_s1 + $0x4c] ss:$28 sps:$4 sm:$0xff]   ;;  %v5315_v54 = vld [vmem:[%s6416_s4] sm:$0xff]  }
  0x4d   :  { %900 = vmatprep.mubr.bf16.mxu1 %v3197_v55  ;;  %v5321_v55 = vld [vmem:[%s6416_s4 + $0x80] sm:$0xff]  }
  0x53   :  { %813 = vmatmul.mubr.bf16.gmra.mrb[24].mxu0 %v3194_v58  ;;  %v5329_v58 = vld [vmem:[%s6416_s4 + $0x48] sm:$0xff]  }
  0x54   :  { %901 = vmatmul.mubr.bf16.gmra.mrb[24].mxu1 %v3196_v59  ;;  %940 = vmatprep.mubr.bf16.mxu0 %v4381_v0  ;;  %v4452_v59 = vld [vmem:[%s6418_s1 + $0x48] ss:$28 sps:$4 sm:$0xff]  }
  0x55   :  { %4163 = vmatprep.mubr.msk.bf16.mxu1 %vm4658_vm0, %v6423_v36  ;;  %v5338_v0 = vld [vmem:[%s6416_s4 + $0xc8] sm:$0xff]  }
  0x5b   :  { %941 = vmatmul.mubr.bf16.vlgmr.msra.gmra.mrb[28].mxu0 %v4379_v60  ;;  %v4453_v60 = vld [vmem:[%s6418_s1 + $0x50] ss:$28 sps:$4 sm:$0xff]  }
  0x5c   :  { %4164 = vmatmul.mubr.msk.bf16.vlgmr.msra.gmra.mrb[28].mxu1 %vm710_vm1, %v4382_v61  ;;  %3611 = vmatpush3.bf16.msra.mxu0 %v4708_v2  ;;  %v4387_v2 = vld [vmem:[%s6417_s0 + $0x84] ss:$28 sps:$4 sm:$0xff]   ;;  %v5347_v61 = vld [vmem:[%s6416_s4 + $0x8] sm:$0xff]  }
  0x5d   :  { %3669 = vmatpush3.bf16.msra.mxu1 %v4714_v3  ;;  %948 = vmatprep.mubr.bf16.mxu0 %v4383_v33  ;;  %v4389_v3 = vld [vmem:[%s6417_s0 + $0x80] ss:$28 sps:$4 sm:$0xff]  }
  0x5e   :  { %4167 = vmatprep.mubr.msk.bf16.mxu1 %vm4658_vm0, %v6423_v36  ;;  %3612 = vmatprep.subr.bf16.mxu0 %v4720_v4  ;;  %v4390_v4 = vld [vmem:[%s6417_s0 + $0x88] ss:$28 sps:$4 sm:$0xff]  }
  0x5f   :  { %3670 = vmatprep.subr.bf16.mxu1 %v4726_v5  ;;  %v4391_v5 = vld [vmem:[%s6417_s0 + $0xbc] ss:$28 sps:$4 sm:$0xff]   ;;  %v4454_v33 = vld [vmem:[%s6418_s1 + $0x84] ss:$28 sps:$4 sm:$0xff]  }
  0x60   :  { %3613 = vmatpush3.bf16.msra.mxu0 %v4732_v6  ;;  %v4393_v6 = vld [vmem:[%s6417_s0 + $0xb8] ss:$28 sps:$4 sm:$0xff]  }
  0x61   :  { %3671 = vmatpush3.bf16.msra.mxu1 %v4738_v7  ;;  %3614 = vmatprep.subr.bf16.mxu0 %v4744_v8  ;;  %v4394_v7 = vld [vmem:[%s6417_s0 + $0xc0] ss:$28 sps:$4 sm:$0xff]   ;;  %v4395_v8 = vld [vmem:[%s6417_s0 + $0xf4] ss:$28 sps:$4 sm:$0xff]  }
  0x62   :  { %3672 = vmatprep.subr.bf16.mxu1 %v4750_v9  ;;  %v4397_v9 = vld [vmem:[%s6417_s0 + $0xf0] ss:$28 sps:$4 sm:$0xff]  }
  0x63   :  { %949 = vmatmul.mubr.bf16.gmra.mrb[32].mxu0 %v4385_v35  ;;  %v5356_v35 = vld [vmem:[%s6416_s4 + $0x88] sm:$0xff]  }
  0x64   :  { %4168 = vmatmul.mubr.msk.bf16.gmra.mrb[32].mxu1 %vm710_vm1, %v4386_v41  ;;  %956 = vmatprep.mubr.bf16.mxu0 %v4387_v2  ;;  %v5362_v41 = vld [vmem:[%s6416_s4 + $0x50] sm:$0xff]  }
  0x65   :  { %4171 = vmatprep.mubr.msk.bf16.mxu1 %vm4658_vm0, %v6423_v36  ;;  %3615 = vmatpush3.bf16.msra.mxu0 %v4756_v10  ;;  %v4398_v10 = vld [vmem:[%s6417_s0 + $0xf8] ss:$28 sps:$4 sm:$0xff]  }
  0x66   :  { %3673 = vmatpush3.bf16.msra.mxu1 %v4762_v11  ;;  %3616 = vmatprep.subr.bf16.mxu0 %v4768_v12  ;;  %v4399_v11 = vld [vmem:[%s6417_s0 + $0x12c] ss:$28 sps:$4 sm:$0xff]   ;;  %v174_v12 = vld [vmem:[%s6417_s0 + $0x160] sm:$0x33]  ;;  %v5368_v2 = vld [vmem:[%s6416_s4 + $0xd0] sm:$0xff]  }
  0x67   :  { %3674 = vmatprep.subr.bf16.mxu1 %v4774_v13  ;;  %v4401_v13 = vld [vmem:[%s6417_s0 + $0x128] ss:$28 sps:$4 sm:$0xff]  }
  0x69   :  { %3617 = vmatpush3.bf16.msra.mxu0 %v4780_v14  ;;  %v4402_v14 = vld [vmem:[%s6417_s0 + $0x130] ss:$28 sps:$4 sm:$0xff]  }
  0x6a   :  { %3675 = vmatpush3.bf16.msra.mxu1 %v4786_v15  ;;  %3618 = vmatprep.subr.bf16.mxu0 %v4792_v16  ;;  %v3199_v15 = vcombine.high %v174_v12, %v174_v12  ;;  %v4405_v16 = vld [vmem:[%s6417_s0 + $0x168] ss:$0 sps:$4 sm:$0x33]  }
  0x6b   :  { %957 = vmatmul.mubr.bf16.gmra.mrb[36].mxu0 %v4389_v3  ;;  %3676 = vmatprep.subr.bf16.mxu1 %v4798_v17  ;;  %v4408_v17 = vld [vmem:[%s6418_s1 + $0x4] ss:$28 sps:$4 sm:$0xff]   ;;  %v5377_v3 = vld [vmem:[%s6416_s4 + $0x10] sm:$0xff]  }
  0x6c   :  { %4172 = vmatmul.mubr.msk.bf16.gmra.mrb[36].mxu1 %vm710_vm1, %v4390_v4  ;;  %964 = vmatprep.mubr.bf16.mxu0 %v4391_v5  ;;  %v5383_v4 = vld [vmem:[%s6416_s4 + $0x90] sm:$0xff]   ;;  %v5389_v5 = vld [vmem:[%s6416_s4 + $0x58] sm:$0xff]  }
  0x6d   :  { %4175 = vmatprep.mubr.msk.bf16.mxu1 %vm4658_vm0, %v6423_v36  ;;  %3619 = vmatpush3.bf16.msra.mxu0 %v4804_v18  ;;  %v3198_v18 = vcombine.low %v174_v12, %v174_v12  ;;  %v5422_v12 = vld [vmem:[%s6416_s4 + $0x60] sm:$0xff]  }
  0x6e   :  { %3677 = vmatpush3.bf16.msra.mxu1 %v4810_v19  ;;  %3620 = vmatprep.subr.bf16.mxu0 %v4816_v20  ;;  %v4411_v19 = vld [vmem:[%s6418_s1 + $0xc] ss:$28 sps:$4 sm:$0xff]   ;;  %v4406_v20 = vld [vmem:[%s6418_s1] ss:$28 sps:$4 sm:$0xff]  }
  0x6f   :  { %3678 = vmatprep.subr.bf16.mxu1 %v4822_v21  ;;  %v4409_v21 = vld [vmem:[%s6418_s1 + $0x8] ss:$28 sps:$4 sm:$0xff]  }
  0x71   :  { %3621 = vmatpush3.bf16.msra.mxu0 %v4828_v22  ;;  %v4412_v22 = vld [vmem:[%s6418_s1 + $0x3c] ss:$28 sps:$4 sm:$0xff]  }
  0x72   :  { %3679 = vmatpush3.bf16.msra.mxu1 %v4834_v23  ;;  %3622 = vmatprep.subr.bf16.mxu0 %v4840_v24  ;;  %v4414_v23 = vld [vmem:[%s6418_s1 + $0x44] ss:$28 sps:$4 sm:$0xff]   ;;  %v4416_v24 = vld [vmem:[%s6418_s1 + $0x38] ss:$28 sps:$4 sm:$0xff]  }
  0x73   :  { %965 = vmatmul.mubr.bf16.gmra.mrb[40].mxu0 %v4393_v6  ;;  %3680 = vmatprep.subr.bf16.mxu1 %v4846_v25  ;;  %v4417_v25 = vld [vmem:[%s6418_s1 + $0x40] ss:$28 sps:$4 sm:$0xff]  }
  0x74   :  { %4176 = vmatmul.mubr.msk.bf16.gmra.mrb[40].mxu1 %vm710_vm1, %v4394_v7  ;;  %972 = vmatprep.mubr.bf16.mxu0 %v4395_v8  ;;  %v4456_v6 = vld [vmem:[%s6418_s1 + $0x80] ss:$28 sps:$4 sm:$0xff]   ;;  %v4457_v8 = vld [vmem:[%s6418_s1 + $0x88] ss:$28 sps:$4 sm:$0xff]  }
  0x75   :  { %4179 = vmatprep.mubr.msk.bf16.mxu1 %vm4658_vm0, %v6423_v36  ;;  %3623 = vmatpush3.bf16.msra.mxu0 %v4852_v26  ;;  %v4418_v26 = vld [vmem:[%s6418_s1 + $0x74] ss:$28 sps:$4 sm:$0xff]   ;;  %v5398_v7 = vld [vmem:[%s6416_s4 + $0xd8] sm:$0xff]  }
  0x76   :  { %3681 = vmatpush3.bf16.msra.mxu1 %v4858_v27  ;;  %3624 = vmatprep.subr.bf16.mxu0 %v4864_v28  ;;  %v4420_v27 = vld [vmem:[%s6418_s1 + $0x7c] ss:$28 sps:$4 sm:$0xff]   ;;  %v5229_v28 = vld [vmem:[%s6416_s4 + $0xc0] sm:$0xff]  }
  0x77   :  { %3682 = vmatprep.subr.bf16.mxu1 %v4870_v29  ;;  %v4422_v29 = vld [vmem:[%s6418_s1 + $0x70] ss:$28 sps:$4 sm:$0xff]  }
  0x79   :  { %3625 = vmatpush3.bf16.msra.mxu0 %v4876_v30  ;;  %v4423_v30 = vld [vmem:[%s6418_s1 + $0x78] ss:$28 sps:$4 sm:$0xff]  }
  0x7a   :  { %3683 = vmatpush3.bf16.msra.mxu1 %v4882_v31  ;;  %3726 = vmatprep.subr.bf16.mxu0 %v4902_v37  ;;  %v4424_v31 = vld [vmem:[%s6418_s1 + $0xac] ss:$28 sps:$4 sm:$0xff]  }
  0x7b   :  { %973 = vmatmul.mubr.bf16.gmra.mrb[44].mxu0 %v4397_v9  ;;  %4191 = vmatprep.subr.bf16.mxu1 %v6423_v36  ;;  %v4458_v9 = vld [vmem:[%s6418_s1 + $0xbc] ss:$28 sps:$4 sm:$0xff]  }
  0x7c   :  { %4180 = vmatmul.mubr.msk.bf16.gmra.mrb[44].mxu1 %vm710_vm1, %v4398_v10  ;;  %980 = vmatprep.mubr.bf16.mxu0 %v4399_v11  ;;  %v5410_v10 = vld [vmem:[%s6416_s4 + $0x18] sm:$0xff]  }
  0x7d   :  { %4183 = vmatprep.mubr.msk.bf16.mxu1 %vm4658_vm0, %v6423_v36  ;;  %v5416_v11 = vld [vmem:[%s6416_s4 + $0x98] sm:$0xff]  }
  0x83   :  { %981 = vmatmul.mubr.bf16.gmra.mrb[48].mxu0 %v4401_v13  ;;  %v5428_v13 = vld [vmem:[%s6416_s4 + $0xe0] sm:$0xff]  }
  0x84   :  { %4184 = vmatmul.mubr.msk.bf16.gmra.mrb[48].mxu1 %vm710_vm1, %v4402_v14  ;;  %988 = vmatprep.mubr.bf16.mxu0 %v3199_v15  ;;  %v5437_v14 = vld [vmem:[%s6416_s4 + $0x20] sm:$0xff]  }
  0x85   :  { %4187 = vmatprep.mubr.msk.bf16.mxu1 %vm4658_vm0, %v6423_v36  ;;  %v5443_v15 = vld [vmem:[%s6416_s4 + $0xa0] sm:$0xff]  }
  0x8b   :  { %989 = vmatmul.mubr.bf16.gmra.mrb[52].mxu0 %v3198_v18  ;;  %v5458_v18 = vld [vmem:[%s6416_s4 + $0xe8] sm:$0xff]  }
  0x8c   :  { %4188 = vmatmul.mubr.msk.bf16.gmra.mrb[52].mxu1 %vm710_vm1, %v4405_v16  ;;  %1423 = vmatprep.mubr.bf16.mxu0 %v4408_v17  ;;  %v5449_v16 = vld [vmem:[%s6416_s4 + $0x68] sm:$0xff]   ;;  %v4460_v17 = vld [vmem:[%s6418_s1 + $0xb8] ss:$28 sps:$4 sm:$0xff]  }
  0x8d   :  { %1511 = vmatprep.mubr.bf16.mxu1 %v4411_v19  ;;  %v4461_v19 = vld [vmem:[%s6418_s1 + $0xc0] ss:$28 sps:$4 sm:$0xff]  }
  0x93   :  { %1424 = vmatmul.mubr.bf16.vlgmr.msra.gmra.mrb[56].mxu0 %v4406_v20  ;;  %v4462_v20 = vld [vmem:[%s6418_s1 + $0xf4] ss:$28 sps:$4 sm:$0xff]  }
  0x94   :  { %1512 = vmatmul.mubr.bf16.vlgmr.msra.gmra.mrb[56].mxu1 %v4409_v21  ;;  %3727 = vmatpush3.bf16.msra.mxu0 %v4907_v38  ;;  %v4426_v38 = vld [vmem:[%s6418_s1 + $0xb4] ss:$28 sps:$4 sm:$0xff]   ;;  %v5470_v21 = vld [vmem:[%s6416_s4 + $0x28] sm:$0xff]  }
  0x95   :  { %4192 = vmatpush3.bf16.msra.mxu1 %v4913_v39  ;;  %1431 = vmatprep.mubr.bf16.mxu0 %v4412_v22  ;;  %v4428_v39 = vld [vmem:[%s6418_s1 + $0xa8] ss:$28 sps:$4 sm:$0xff]  }
  0x96   :  { %1519 = vmatprep.mubr.bf16.mxu1 %v4414_v23  ;;  %3728 = vmatprep.subr.bf16.mxu0 %v4926_v42  ;;  %v4429_v42 = vld [vmem:[%s6418_s1 + $0xb0] ss:$28 sps:$4 sm:$0xff]  }
  0x97   :  { %4193 = vmatprep.subr.bf16.mxu1 %v6423_v36  ;;  %v5476_v22 = vld [vmem:[%s6416_s4 + $0xa8] sm:$0xff]   ;;  %v5482_v23 = vld [vmem:[%s6416_s4 + $0x70] sm:$0xff]  }
  0x98   :  { %3729 = vmatpush3.bf16.msra.mxu0 %v4939_v45  ;;  %v4430_v45 = vld [vmem:[%s6418_s1 + $0xe4] ss:$28 sps:$4 sm:$0xff]  }
  0x99   :  { %3730 = vmatprep.subr.bf16.mxu0 %v4944_v46  ;;  %4194 = vmatpush3.bf16.msra.mxu1 %v5011_v62  ;;  %v4432_v46 = vld [vmem:[%s6418_s1 + $0xec] ss:$28 sps:$4 sm:$0xff]   ;;  %v1132_v62 = vld [vmem:[%s6418_s1 + $0x150] sm:$0x33] }
  0x9a   :  { %3851 = vmatprep.subr.bf16.mxu1 %v5229_v28 }
  0x9b   :  { %1432 = vmatmul.mubr.bf16.gmra.mrb[60].mxu0 %v4416_v24  ;;  %v5488_v24 = vld [vmem:[%s6416_s4 + $0xf0] sm:$0xff]  }
  0x9c   :  { %1520 = vmatmul.mubr.bf16.gmra.mrb[60].mxu1 %v4417_v25  ;;  %1439 = vmatprep.mubr.bf16.mxu0 %v4418_v26  ;;  %v5497_v25 = vld [vmem:[%s6416_s4 + $0x30] sm:$0xff]  }
  0x9d   :  { %1527 = vmatprep.mubr.bf16.mxu1 %v4420_v27  ;;  %3731 = vmatpush3.bf16.msra.mxu0 %v4957_v49  ;;  %v4434_v49 = vld [vmem:[%s6418_s1 + $0xe0] ss:$28 sps:$4 sm:$0xff]   ;;  %v5503_v26 = vld [vmem:[%s6416_s4 + $0xb0] sm:$0xff]  }
  0x9e   :  { %3732 = vmatprep.subr.bf16.mxu0 %v4968_v52  ;;  %v4435_v52 = vld [vmem:[%s6418_s1 + $0xe8] ss:$28 sps:$4 sm:$0xff]   ;;  %v5509_v27 = vld [vmem:[%s6416_s4 + $0x78] sm:$0xff]  }
  0xa1   :  { %3733 = vmatpush3.bf16.msra.mxu0 %v4973_v53  ;;  %v4436_v53 = vld [vmem:[%s6418_s1 + $0x11c] ss:$28 sps:$4 sm:$0xff]  }
  0xa2   :  { %3734 = vmatprep.subr.bf16.mxu0 %v4986_v56  ;;  %v4438_v56 = vld [vmem:[%s6418_s1 + $0x124] ss:$28 sps:$4 sm:$0xff]  }
  0xa3   :  { %1440 = vmatmul.mubr.bf16.gmra.mrb[64].mxu0 %v4422_v29  ;;  %v4464_v29 = vld [vmem:[%s6418_s1 + $0xf0] ss:$28 sps:$4 sm:$0xff]  }
  0xa4   :  { %1528 = vmatmul.mubr.bf16.gmra.mrb[64].mxu1 %v4423_v30  ;;  %1447 = vmatprep.mubr.bf16.mxu0 %v4424_v31  ;;  %v5518_v30 = vld [vmem:[%s6416_s4 + $0xf8] sm:$0xff]  }
  0xa5   :  { %1535 = vmatprep.mubr.bf16.mxu1 %v4426_v38  ;;  %3735 = vmatpush3.bf16.msra.mxu0 %v4992_v57  ;;  %v5282_v57 = vld [vmem:[%s6416_s4 + $0x40] sm:$0xff]   ;;  %v4465_v31 = vld [vmem:[%s6418_s1 + $0xf8] ss:$28 sps:$4 sm:$0xff]   ;;  %v4466_v38 = vld [vmem:[%s6418_s1 + $0x12c] ss:$28 sps:$4 sm:$0xff]  }
  0xa6   :  { %3736 = vmatprep.subr.bf16.mxu0 %v5016_v63  ;;  %v1133_v63 = vld [vmem:[%s6418_s1 + $0x158] sm:$0x33] }
  0xa7   :  { %v3303_v43 = vcombine.high %v1133_v63, %v1133_v63 }
  0xa9   :  { %3737 = vmatpush3.bf16.msra.mxu0 %v5022_v32  ;;  %v4440_v32 = vld [vmem:[%s6418_s1 + $0x118] ss:$28 sps:$4 sm:$0xff]  }
  0xaa   :  { %3738 = vmatprep.subr.bf16.mxu0 %v5032_v34  ;;  %v4441_v34 = vld [vmem:[%s6418_s1 + $0x120] ss:$28 sps:$4 sm:$0xff]  }
  0xab   :  { %1448 = vmatmul.mubr.bf16.gmra.mrb[68].mxu0 %v4428_v39  ;;  %v5530_v39 = vld [vmem:[%s6416_s4 + $0x38] sm:$0xff]  }
  0xac   :  { %1536 = vmatmul.mubr.bf16.gmra.mrb[68].mxu1 %v4429_v42  ;;  %1455 = vmatprep.mubr.bf16.mxu0 %v4430_v45  ;;  %v5536_v42 = vld [vmem:[%s6416_s4 + $0xb8] sm:$0xff]   ;;  %v1134_v45 = vld [vmem:[%s6418_s1 + $0x160] sm:$0x33] }
  0xad   :  { %1543 = vmatprep.mubr.bf16.mxu1 %v4432_v46  ;;  %3739 = vmatpush3.bf16.msra.mxu0 %v5040_v40  ;;  %v3301_v40 = vcombine.high %v1132_v62, %v1132_v62  ;;  %v4468_v46 = vld [vmem:[%s6418_s1 + $0x128] ss:$28 sps:$4 sm:$0xff]  }
  0xae   :  { %3740 = vmatprep.subr.bf16.mxu0 %v5053_v44  ;;  %v3300_v44 = vcombine.low %v1132_v62, %v1132_v62 }
  0xb1   :  { %3741 = vmatpush3.bf16.msra.mxu0 %v5059_v1  ;;  %v3302_v1 = vcombine.low %v1133_v63, %v1133_v63 }
  0xb2   :  { %3793 = vmatprep.subr.bf16.mxu0 %v5282_v57 }
  0xb3   :  { %1456 = vmatmul.mubr.bf16.gmra.mrb[72].mxu0 %v4434_v49  ;;  %v3305_v49 = vcombine.high %v1134_v45, %v1134_v45 }
  0xb4   :  { %1544 = vmatmul.mubr.bf16.gmra.mrb[72].mxu1 %v4435_v52  ;;  %1463 = vmatprep.mubr.bf16.mxu0 %v4436_v53  ;;  %v4472_v53 = vld [vmem:[%s6418_s1 + $0x168] ss:$0 sps:$4 sm:$0x33]  }
  0xb5   :  { %1551 = vmatprep.mubr.bf16.mxu1 %v4438_v56  ;;  %v4475_v56 = vld [vmem:[%s6419_s2 + $0x4] ss:$28 sps:$4 sm:$0xff]  }
  0xbb   :  { %1464 = vmatmul.mubr.bf16.gmra.mrb[76].mxu0 %v4440_v32  ;;  %v3304_v32 = vcombine.low %v1134_v45, %v1134_v45 }
  0xbc   :  { %1552 = vmatmul.mubr.bf16.gmra.mrb[76].mxu1 %v4441_v34  ;;  %1471 = vmatprep.mubr.bf16.mxu0 %v3301_v40 }
  0xbd   :  { %1559 = vmatprep.mubr.bf16.mxu1 %v3303_v43 }
  0xc3   :  { %1472 = vmatmul.mubr.bf16.gmra.mrb[80].mxu0 %v3300_v44 }
  0xc4   :  { %1560 = vmatmul.mubr.bf16.gmra.mrb[80].mxu1 %v3302_v1  ;;  %1599 = vmatprep.mubr.bf16.mxu0 %v4448_v47 }
  0xc5   :  { %4195 = vmatprep.mubr.msk.bf16.mxu1 %vm4658_vm0, %v6423_v36 }
  0xcb   :  { %1600 = vmatmul.mubr.bf16.vlgmr.msra.gmra.mrb[84].mxu0 %v4446_v48  ;;  %v4478_v48 = vld [vmem:[%s6419_s2 + $0xc] ss:$28 sps:$4 sm:$0xff]  }
  0xcc   :  { %4196 = vmatmul.mubr.msk.bf16.vlgmr.msra.gmra.mrb[84].mxu1 %vm710_vm1, %v4449_v50  ;;  %3794 = vmatpush3.bf16.msra.mxu0 %v5315_v54 }
  0xcd   :  { %3852 = vmatpush3.bf16.msra.mxu1 %v5321_v55  ;;  %1607 = vmatprep.mubr.bf16.mxu0 %v4450_v51 }
  0xce   :  { %4199 = vmatprep.mubr.msk.bf16.mxu1 %vm4658_vm0, %v6423_v36  ;;  %3795 = vmatprep.subr.bf16.mxu0 %v5329_v58 }
  0xcf   :  { %3853 = vmatprep.subr.bf16.mxu1 %v5338_v0 }
  0xd0   :  { %3796 = vmatpush3.bf16.msra.mxu0 %v5347_v61 }
  0xd1   :  { %3854 = vmatpush3.bf16.msra.mxu1 %v5356_v35  ;;  %3797 = vmatprep.subr.bf16.mxu0 %v5362_v41 }
  0xd2   :  { %3855 = vmatprep.subr.bf16.mxu1 %v5368_v2 }
  0xd3   :  { %1608 = vmatmul.mubr.bf16.gmra.mrb[88].mxu0 %v4452_v59 }
  0xd4   :  { %4200 = vmatmul.mubr.msk.bf16.gmra.mrb[88].mxu1 %vm710_vm1, %v4453_v60  ;;  %1615 = vmatprep.mubr.bf16.mxu0 %v4454_v33 }
  0xd5   :  { %4203 = vmatprep.mubr.msk.bf16.mxu1 %vm4658_vm0, %v6423_v36  ;;  %3798 = vmatpush3.bf16.msra.mxu0 %v5377_v3 }
  0xd6   :  { %3856 = vmatpush3.bf16.msra.mxu1 %v5383_v4  ;;  %3799 = vmatprep.subr.bf16.mxu0 %v5389_v5 }
  0xd7   :  { %3857 = vmatprep.subr.bf16.mxu1 %v5398_v7 }
  0xd9   :  { %3800 = vmatpush3.bf16.msra.mxu0 %v5410_v10 }
  0xda   :  { %3858 = vmatpush3.bf16.msra.mxu1 %v5416_v11  ;;  %3801 = vmatprep.subr.bf16.mxu0 %v5422_v12 }
  0xdb   :  { %1616 = vmatmul.mubr.bf16.gmra.mrb[92].mxu0 %v4456_v6  ;;  %3859 = vmatprep.subr.bf16.mxu1 %v5428_v13  ;;  %v4473_v6 = vld [vmem:[%s6419_s2] ss:$28 sps:$4 sm:$0xff]  }
  0xdc   :  { %4204 = vmatmul.mubr.msk.bf16.gmra.mrb[92].mxu1 %vm710_vm1, %v4457_v8  ;;  %1623 = vmatprep.mubr.bf16.mxu0 %v4458_v9  ;;  %v4476_v9 = vld [vmem:[%s6419_s2 + $0x8] ss:$28 sps:$4 sm:$0xff]  }
  0xdd   :  { %4207 = vmatprep.mubr.msk.bf16.mxu1 %vm4658_vm0, %v6423_v36  ;;  %3802 = vmatpush3.bf16.msra.mxu0 %v5437_v14 }
  0xde   :  { %3860 = vmatpush3.bf16.msra.mxu1 %v5443_v15  ;;  %3803 = vmatprep.subr.bf16.mxu0 %v5449_v16 }
  0xdf   :  { %3861 = vmatprep.subr.bf16.mxu1 %v5458_v18 }
  0xe1   :  { %3804 = vmatpush3.bf16.msra.mxu0 %v5470_v21 }
  0xe2   :  { %3862 = vmatpush3.bf16.msra.mxu1 %v5476_v22  ;;  %3805 = vmatprep.subr.bf16.mxu0 %v5482_v23 }
  0xe3   :  { %1624 = vmatmul.mubr.bf16.gmra.mrb[96].mxu0 %v4460_v17  ;;  %3863 = vmatprep.subr.bf16.mxu1 %v5488_v24 }
  0xe4   :  { %4208 = vmatmul.mubr.msk.bf16.gmra.mrb[96].mxu1 %vm710_vm1, %v4461_v19  ;;  %1631 = vmatprep.mubr.bf16.mxu0 %v4462_v20 }
  0xe5   :  { %4211 = vmatprep.mubr.msk.bf16.mxu1 %vm4658_vm0, %v6423_v36  ;;  %3806 = vmatpush3.bf16.msra.mxu0 %v5497_v25 }
  0xe6   :  { %3864 = vmatpush3.bf16.msra.mxu1 %v5503_v26  ;;  %3807 = vmatprep.subr.bf16.mxu0 %v5509_v27 }
  0xe7   :  { %3865 = vmatprep.subr.bf16.mxu1 %v5518_v30 }
  0xe9   :  { %3808 = vmatpush3.bf16.msra.mxu0 %v5530_v39 }
  0xea   :  { %3866 = vmatpush3.bf16.msra.mxu1 %v5536_v42  ;;  %3909 = vmatprep.subr.bf16.mxu0 %v4902_v37  ;;  %v4469_v37 = vld [vmem:[%s6418_s1 + $0x130] ss:$28 sps:$4 sm:$0xff]  }
  0xeb   :  { %1632 = vmatmul.mubr.bf16.gmra.mrb[100].mxu0 %v4464_v29  ;;  %4223 = vmatprep.subr.bf16.mxu1 %v6423_v36 }
  0xec   :  { %4212 = vmatmul.mubr.msk.bf16.gmra.mrb[100].mxu1 %vm710_vm1, %v4465_v31  ;;  %1639 = vmatprep.mubr.bf16.mxu0 %v4466_v38 }
  0xed   :  { %4215 = vmatprep.mubr.msk.bf16.mxu1 %vm4658_vm0, %v6423_v36 }
  0xf3   :  { %1640 = vmatmul.mubr.bf16.gmra.mrb[104].mxu0 %v4468_v46 }
  0xf4   :  { %4216 = vmatmul.mubr.msk.bf16.gmra.mrb[104].mxu1 %vm710_vm1, %v4469_v37  ;;  %1647 = vmatprep.mubr.bf16.mxu0 %v3305_v49  ;;  %v4479_v37 = vld [vmem:[%s6419_s2 + $0x3c] ss:$28 sps:$4 sm:$0xff]  }
  0xf5   :  { %4219 = vmatprep.mubr.msk.bf16.mxu1 %vm4658_vm0, %v6423_v36 }
  0xf6   :  { %v3443_v52 = vpop.f32.mrb[0].mxu0 }
  0xf7   :  { %v3501_v62 = vpop.f32.mrb[0].mxu1  ;;  %v3444_v63 = vpop.f32.mrb[1].mxu0 }
  0xf8   :  { %v3445_v34 = vadd.f32 %v3444_v63, %v3443_v52  ;;  %v3502_v40 = vpop.f32.mrb[1].mxu1  ;;  %v3446_v43 = vpop.f32.mrb[2].mxu0  ;;  %v5587_v63 = vld [vmem:[%s6416_s4 + $0x100] sm:$0xff]  }
  0xf9   :  { %v3503_v44 = vadd.f32 %v3502_v40, %v3501_v62  ;;  %v3504_v1 = vpop.f32.mrb[2].mxu1  ;;  %v3447_v47 = vpop.f32.mrb[3].mxu0  ;;  %6442 = vst [vmem:[#allocation2_spill] sm:$0xff] %v5587_v63 }
  0xfa   :  { %v3448_v50 = vadd.f32 %v3447_v47, %v3446_v43  ;;  %v3505_v51 = vpop.f32.mrb[3].mxu1  ;;  %v5601_v43 = vld [vmem:[%s6416_s4 + $0x148] sm:$0xff]   ;;  %v4483_v47 = vld [vmem:[%s6419_s2 + $0x38] ss:$28 sps:$4 sm:$0xff]  }
  0xfb   :  { %v5565_v59 = vadd.f32 %v3503_v44, %v3445_v34  ;;  %v3506_v60 = vadd.f32 %v3505_v51, %v3504_v1  ;;  %1648 = vmatmul.mubr.bf16.gmra.mrb[108].mxu0 %v3304_v32  ;;  %v5595_v34 = vld [vmem:[%s6416_s4 + $0x180] sm:$0xff]   ;;  %6444 = vst [vmem:[#allocation4_spill] sm:$0xff] %v5601_v43 }
  0xfc   :  { %4220 = vmatmul.mubr.msk.bf16.gmra.mrb[108].mxu1 %vm710_vm1, %v4472_v53  ;;  %2095 = vmatprep.mubr.bf16.mxu0 %v4475_v56  ;;  %v4481_v53 = vld [vmem:[%s6419_s2 + $0x44] ss:$28 sps:$4 sm:$0xff]   ;;  %6443 = vst [vmem:[#allocation3_spill] sm:$0xff] %v5595_v34 }
  0xfd   :  { %v5568_v33 = vadd.f32 %v3506_v60, %v3448_v50  ;;  %2183 = vmatprep.mubr.bf16.mxu1 %v4478_v48  ;;  %v4484_v60 = vld [vmem:[%s6419_s2 + $0x40] ss:$28 sps:$4 sm:$0xff]  }
  0xfe   :  { %v3449_v8 = vpop.f32.mrb[4].mxu0 }
  0xff   :  { %v3507_v17 = vpop.f32.mrb[4].mxu1  ;;  %v3450_v19 = vpop.f32.mrb[5].mxu0 }
 0x100   :  { %v3451_v20 = vadd.f32 %v3450_v19, %v3449_v8  ;;  %v3508_v29 = vpop.f32.mrb[5].mxu1  ;;  %v3452_v31 = vpop.f32.mrb[6].mxu0  ;;  %v4485_v8 = vld [vmem:[%s6419_s2 + $0x74] ss:$28 sps:$4 sm:$0xff]  }
 0x101   :  { %v3509_v38 = vadd.f32 %v3508_v29, %v3507_v17  ;;  %v3510_v45 = vpop.f32.mrb[6].mxu1  ;;  %v3453_v46 = vpop.f32.mrb[7].mxu0  ;;  %v4487_v29 = vld [vmem:[%s6419_s2 + $0x7c] ss:$28 sps:$4 sm:$0xff]  }
 0x102   :  { %v3454_v49 = vadd.f32 %v3453_v46, %v3452_v31  ;;  %v3511_v52 = vpop.f32.mrb[7].mxu1  ;;  %v5632_v31 = vld [vmem:[%s6416_s4 + $0x188] sm:$0xff]  }
 0x103   :  { %v5582_v56 = vadd.f32 %v3509_v38, %v3451_v20  ;;  %v3512_v62 = vadd.f32 %v3511_v52, %v3510_v45  ;;  %2096 = vmatmul.mubr.bf16.vlgmr.msra.gmra.mrb[112].mxu0 %v4473_v6  ;;  %v5614_v6 = vld [vmem:[%s6416_s4 + $0x108] sm:$0xff]   ;;  %v5623_v20 = vld [vmem:[%s6416_s4 + $0x150] sm:$0xff]   ;;  %6447 = vst [vmem:[#allocation7_spill] sm:$0xff] %v5632_v31 }
 0x104   :  { %2184 = vmatmul.mubr.bf16.vlgmr.msra.gmra.mrb[112].mxu1 %v4476_v9  ;;  %3910 = vmatpush3.bf16.msra.mxu0 %v5587_v63  ;;  %6445 = vst [vmem:[#allocation5_spill] sm:$0xff] %v5614_v6  ;;  %6446 = vst [vmem:[#allocation6_spill] sm:$0xff] %v5623_v20  ;;  %v5643_v52 = vld [vmem:[%s6416_s4 + $0x110] sm:$0xff]  }
 0x105   :  { %v5590_v32 = vadd.f32 %v3512_v62, %v3454_v49  ;;  %4224 = vmatpush3.bf16.msra.mxu1 %v5595_v34  ;;  %2103 = vmatprep.mubr.bf16.mxu0 %v4479_v37  ;;  %6448 = vst [vmem:[#allocation8_spill] sm:$0xff] %v5643_v52 }
 0x106   :  { %v3455_v40 = vpop.f32.mrb[8].mxu0  ;;  %2191 = vmatprep.mubr.bf16.mxu1 %v4481_v53  ;;  %3911 = vmatprep.subr.bf16.mxu0 %v5601_v43 }
 0x107   :  { %v3513_v44 = vpop.f32.mrb[8].mxu1  ;;  %v3456_v1 = vpop.f32.mrb[9].mxu0  ;;  %4225 = vmatprep.subr.bf16.mxu1 %v6423_v36  ;;  %v4499_v36 = vld [vmem:[%s6419_s2 + $0xec] ss:$28 sps:$4 sm:$0xff]  }
 0x108   :  { %v3457_v48 = vadd.f32 %v3456_v1, %v3455_v40  ;;  %v3514_v50 = vpop.f32.mrb[9].mxu1  ;;  %v3458_v51 = vpop.f32.mrb[10].mxu0  ;;  %3912 = vmatpush3.bf16.msra.mxu0 %v5614_v6 }
 0x109   :  { %v3515_v9 = vadd.f32 %v3514_v50, %v3513_v44  ;;  %v3516_v17 = vpop.f32.mrb[10].mxu1  ;;  %v3459_v19 = vpop.f32.mrb[11].mxu0  ;;  %3913 = vmatprep.subr.bf16.mxu0 %v5623_v20  ;;  %4226 = vmatpush3.bf16.msra.mxu1 %v5632_v31  ;;  %v4489_v44 = vld [vmem:[%s6419_s2 + $0x70] ss:$28 sps:$4 sm:$0xff]   ;;  %v4490_v50 = vld [vmem:[%s6419_s2 + $0x78] ss:$28 sps:$4 sm:$0xff]  }
 0x10a   :  { %v3460_v38 = vadd.f32 %v3459_v19, %v3458_v51  ;;  %v3517_v45 = vpop.f32.mrb[11].mxu1  ;;  %4034 = vmatprep.subr.bf16.mxu1 %v5229_v28  ;;  %v5649_v28 = vld [vmem:[%s6416_s4 + $0x158] sm:$0xff]   ;;  %v4491_v51 = vld [vmem:[%s6419_s2 + $0xac] ss:$28 sps:$4 sm:$0xff]   ;;  %v4493_v19 = vld [vmem:[%s6419_s2 + $0xb4] ss:$28 sps:$4 sm:$0xff]  }
 0x10b   :  { %v5636_v46 = vadd.f32 %v3515_v9, %v3457_v48  ;;  %v3518_v37 = vadd.f32 %v3517_v45, %v3516_v17  ;;  %2104 = vmatmul.mubr.bf16.gmra.mrb[116].mxu0 %v4483_v47  ;;  %6449 = vst [vmem:[#allocation9_spill] sm:$0xff] %v5649_v28  ;;  %v5664_v17 = vld [vmem:[%s6416_s4 + $0x118] sm:$0xff]   ;;  %v5673_v45 = vld [vmem:[%s6416_s4 + $0x160] sm:$0xff]  }
 0x10c   :  { %2192 = vmatmul.mubr.bf16.gmra.mrb[116].mxu1 %v4484_v60  ;;  %2111 = vmatprep.mubr.bf16.mxu0 %v4485_v8  ;;  %6450 = vst [vmem:[#allocation10_spill] sm:$0xff] %v5664_v17  ;;  %6451 = vst [vmem:[#allocation11_spill] sm:$0xff] %v5673_v45 }
 0x10d   :  { %v5638_v49 = vadd.f32 %v3518_v37, %v3460_v38  ;;  %2199 = vmatprep.mubr.bf16.mxu1 %v4487_v29  ;;  %3914 = vmatpush3.bf16.msra.mxu0 %v5643_v52 }
 0x10e   :  { %v3461_v53 = vpop.f32.mrb[12].mxu0  ;;  %3915 = vmatprep.subr.bf16.mxu0 %v5649_v28  ;;  %v1804_v28 = vld [vmem:[%s6419_s2 + $0x150] sm:$0x33] }
 0x10f   :  { %v3519_v62 = vpop.f32.mrb[12].mxu1  ;;  %v3462_v40 = vpop.f32.mrb[13].mxu0 }
 0x110   :  { %v3463_v1 = vadd.f32 %v3462_v40, %v3461_v53  ;;  %v3520_v47 = vpop.f32.mrb[13].mxu1  ;;  %v3464_v48 = vpop.f32.mrb[14].mxu0  ;;  %v5683_v40 = vld [vmem:[%s6416_s4 + $0x120] sm:$0xff]  }
 0x111   :  { %v3521_v60 = vadd.f32 %v3520_v47, %v3519_v62  ;;  %v3522_v8 = vpop.f32.mrb[14].mxu1  ;;  %v3465_v9 = vpop.f32.mrb[15].mxu0  ;;  %3916 = vmatpush3.bf16.msra.mxu0 %v5664_v17  ;;  %6452 = vst [vmem:[#allocation12_spill] sm:$0xff] %v5683_v40 }
 0x112   :  { %v3466_v29 = vadd.f32 %v3465_v9, %v3464_v48  ;;  %v3523_v38 = vpop.f32.mrb[15].mxu1  ;;  %3917 = vmatprep.subr.bf16.mxu0 %v5673_v45  ;;  %v4496_v9 = vld [vmem:[%s6419_s2 + $0xb0] ss:$28 sps:$4 sm:$0xff]  }
 0x113   :  { %v5676_v37 = vadd.f32 %v3521_v60, %v3463_v1  ;;  %v3524_v53 = vadd.f32 %v3523_v38, %v3522_v8  ;;  %2112 = vmatmul.mubr.bf16.gmra.mrb[120].mxu0 %v4489_v44  ;;  %v5689_v1 = vld [vmem:[%s6416_s4 + $0x168] sm:$0xff]  }
 0x114   :  { %2200 = vmatmul.mubr.bf16.gmra.mrb[120].mxu1 %v4490_v50  ;;  %2119 = vmatprep.mubr.bf16.mxu0 %v4491_v51  ;;  %6453 = vst [vmem:[#allocation13_spill] sm:$0xff] %v5689_v1  ;;  %v4495_v50 = vld [vmem:[%s6419_s2 + $0xa8] ss:$28 sps:$4 sm:$0xff]  }
 0x115   :  { %v5678_v62 = vadd.f32 %v3524_v53, %v3466_v29  ;;  %2207 = vmatprep.mubr.bf16.mxu1 %v4493_v19  ;;  %3918 = vmatpush3.bf16.msra.mxu0 %v5683_v40  ;;  %v4497_v19 = vld [vmem:[%s6419_s2 + $0xe4] ss:$28 sps:$4 sm:$0xff]   ;;  %v5713_v40 = vld [vmem:[%s6416_s4 + $0x170] sm:$0xff]  }
 0x116   :  { %v3467_v47 = vpop.f32.mrb[16].mxu0  ;;  %3919 = vmatprep.subr.bf16.mxu0 %v5689_v1  ;;  %6455 = vst [vmem:[#allocation15_spill] sm:$0xff] %v5713_v40 }
 0x117   :  { %v3525_v44 = vpop.f32.mrb[16].mxu1  ;;  %v3468_v48 = vpop.f32.mrb[17].mxu0 }
 0x118   :  { %v3469_v51 = vadd.f32 %v3468_v48, %v3467_v47  ;;  %v3526_v60 = vpop.f32.mrb[17].mxu1  ;;  %v3470_v8 = vpop.f32.mrb[18].mxu0  ;;  %v5707_v47 = vld [vmem:[%s6416_s4 + $0x128] sm:$0xff]  }
 0x119   :  { %v3527_v29 = vadd.f32 %v3526_v60, %v3525_v44  ;;  %v3528_v38 = vpop.f32.mrb[18].mxu1  ;;  %v3471_v53 = vpop.f32.mrb[19].mxu0  ;;  %6454 = vst [vmem:[#allocation14_spill] sm:$0xff] %v5707_v47  ;;  %3920 = vmatpush3.bf16.msra.mxu0 %v5707_v47 }
 0x11a   :  { %v3472_v48 = vadd.f32 %v3471_v53, %v3470_v8  ;;  %v3529_v1 = vpop.f32.mrb[19].mxu1  ;;  %3921 = vmatprep.subr.bf16.mxu0 %v5713_v40  ;;  %v5723_v8 = vld [vmem:[%s6416_s4 + $0x130] sm:$0xff]   ;;  %v4505_v40 = vld [vmem:[%s6419_s2 + $0x124] ss:$28 sps:$4 sm:$0xff]  }
 0x11b   :  { %v5716_v44 = vadd.f32 %v3527_v29, %v3469_v51  ;;  %v3530_v60 = vadd.f32 %v3529_v1, %v3528_v38  ;;  %2120 = vmatmul.mubr.bf16.gmra.mrb[124].mxu0 %v4495_v50  ;;  %6456 = vst [vmem:[#allocation16_spill] sm:$0xff] %v5723_v8  ;;  %v5729_v51 = vld [vmem:[%s6416_s4 + $0x178] sm:$0xff]   ;;  %v4502_v38 = vld [vmem:[%s6419_s2 + $0xe8] ss:$28 sps:$4 sm:$0xff]  }
 0x11c   :  { %2208 = vmatmul.mubr.bf16.gmra.mrb[124].mxu1 %v4496_v9  ;;  %2127 = vmatprep.mubr.bf16.mxu0 %v4497_v19  ;;  %6457 = vst [vmem:[#allocation17_spill] sm:$0xff] %v5729_v51 }
 0x11d   :  { %v5718_v45 = vadd.f32 %v3530_v60, %v3472_v48  ;;  %2215 = vmatprep.mubr.bf16.mxu1 %v4499_v36  ;;  %3922 = vmatpush3.bf16.msra.mxu0 %v5723_v8  ;;  %v4501_v36 = vld [vmem:[%s6419_s2 + $0xe0] ss:$28 sps:$4 sm:$0xff]  }
 0x11e   :  { %v3473_v53 = vpop.f32.mrb[20].mxu0  ;;  %3923 = vmatprep.subr.bf16.mxu0 %v5729_v51  ;;  %v4503_v48 = vld [vmem:[%s6419_s2 + $0x11c] ss:$28 sps:$4 sm:$0xff]  }
 0x11f   :  { %v3531_v1 = vpop.f32.mrb[20].mxu1  ;;  %v3474_v50 = vpop.f32.mrb[21].mxu0 }
 0x120   :  { %v3475_v9 = vadd.f32 %v3474_v50, %v3473_v53  ;;  %v3532_v19 = vpop.f32.mrb[21].mxu1  ;;  %v3476_v29 = vpop.f32.mrb[22].mxu0  ;;  %v5747_v53 = vld [vmem:[%s6416_s4 + $0x138] sm:$0xff]  }
 0x121   :  { %v3533_v60 = vadd.f32 %v3532_v19, %v3531_v1  ;;  %v3534_v8 = vpop.f32.mrb[22].mxu1  ;;  %v3477_v51 = vpop.f32.mrb[23].mxu0  ;;  %6458 = vst [vmem:[#allocation18_spill] sm:$0xff] %v5747_v53  ;;  %3924 = vmatpush3.bf16.msra.mxu0 %v5747_v53 }
 0x122   :  { %v3478_v50 = vadd.f32 %v3477_v51, %v3476_v29  ;;  %v3535_v47 = vpop.f32.mrb[23].mxu1  ;;  %3976 = vmatprep.subr.bf16.mxu0 %v5282_v57  ;;  %v1805_v51 = vld [vmem:[%s6419_s2 + $0x158] sm:$0x33] }
 0x123   :  { %v5751_v17 = vadd.f32 %v3533_v60, %v3475_v9  ;;  %v3536_v1 = vadd.f32 %v3535_v47, %v3534_v8  ;;  %2128 = vmatmul.mubr.bf16.gmra.mrb[128].mxu0 %v4501_v36  ;;  %v4507_v47 = vld [vmem:[%s6419_s2 + $0x118] ss:$28 sps:$4 sm:$0xff]   ;;  %v3358_v63 = vcombine.low %v1805_v51, %v1805_v51 }
 0x124   :  { %2216 = vmatmul.mubr.bf16.gmra.mrb[128].mxu1 %v4502_v38  ;;  %2135 = vmatprep.mubr.bf16.mxu0 %v4503_v48  ;;  %v3357_v38 = vcombine.high %v1804_v28, %v1804_v28 }
 0x125   :  { %v5753_v19 = vadd.f32 %v3536_v1, %v3478_v50  ;;  %2223 = vmatprep.mubr.bf16.mxu1 %v4505_v40  ;;  %v4508_v40 = vld [vmem:[%s6419_s2 + $0x120] ss:$28 sps:$4 sm:$0xff]   ;;  %v3359_v1 = vcombine.high %v1805_v51, %v1805_v51 }
 0x126   :  { %v3479_v52 = vpop.f32.mrb[24].mxu0 }
 0x127   :  { %v3537_v29 = vpop.f32.mrb[24].mxu1  ;;  %v3480_v57 = vpop.f32.mrb[25].mxu0 }
 0x128   :  { %v3481_v8 = vadd.f32 %v3480_v57, %v3479_v52  ;;  %v3538_v36 = vpop.f32.mrb[25].mxu1  ;;  %v3482_v9 = vpop.f32.mrb[26].mxu0 }
 0x129   :  { %v3539_v48 = vadd.f32 %v3538_v36, %v3537_v29  ;;  %v3483_v60 = vpop.f32.mrb[27].mxu0  ;;  %v3540_v50 = vpop.f32.mrb[26].mxu1  ;;  %v3356_v9 = vcombine.low %v1804_v28, %v1804_v28  ;;  %v4515_v29 = vld [vmem:[%s6419_s2 + $0x14] ss:$28 sps:$4 sm:$0xff]  }
 0x12a   :  { %v3541_v53 = vpop.f32.mrb[27].mxu1 }
 0x12b   :  { %v5767_v31 = vadd.f32 %v3539_v48, %v3481_v8  ;;  %2136 = vmatmul.mubr.bf16.gmra.mrb[132].mxu0 %v4507_v47 }
 0x12c   :  { %2224 = vmatmul.mubr.bf16.gmra.mrb[132].mxu1 %v4508_v40  ;;  %2143 = vmatprep.mubr.bf16.mxu0 %v3357_v38 }
 0x12d   :  { %2231 = vmatprep.mubr.bf16.mxu1 %v3359_v1 }
 0x12e   :  { %v3559_v20 = vpop.f32.mrb[28].mxu0 }
 0x12f   :  { %v3560_v52 = vpop.f32.mrb[29].mxu0  ;;  %v1030_v57 = vpop.f32.mrb[28].mxu1 }
 0x130   :  { %v3561_v6 = vadd.f32 %v3560_v52, %v3559_v20  ;;  %v3562_v43 = vpop.f32.mrb[30].mxu0  ;;  %v4165_v34 = vpop.f32.mrb[29].mxu1  ;;  %v6459_v20 = vmov 0.0   ;;  %v4517_v52 = vld [vmem:[%s6419_s2 + $0x4c] ss:$28 sps:$4 sm:$0xff]  }
 0x131   :  { %v3563_v36 = vpop.f32.mrb[31].mxu0  ;;  %v1033_v53 = vpop.f32.mrb[30].mxu1 }
 0x132   :  { %v3564_v8 = vadd.f32 %v3563_v36, %v3562_v43  ;;  %v943_v47 = vadd.f32 %v3561_v6, %v5565_v59  ;;  %v4166_v40 = vpop.f32.mrb[31].mxu1  ;;  %v4513_v59 = vld [vmem:[%s6419_s2 + $0x10] ss:$28 sps:$4 sm:$0xff]  }
 0x133   :  { %2144 = vmatmul.mubr.bf16.gmra.mrb[136].mxu0 %v3356_v9 }
 0x134   :  { %v5773_v38 = vadd.f32 %v1030_v57, %v943_v47  ;;  %v946_v48 = vadd.f32 %v3564_v8, %v5568_v33  ;;  %2232 = vmatmul.mubr.bf16.gmra.mrb[136].mxu1 %v3358_v63  ;;  %2271 = vmatprep.mubr.bf16.mxu0 %v4515_v29  ;;  %v4516_v33 = vld [vmem:[%s6419_s2 + $0x18] ss:$28 sps:$4 sm:$0xff]  }
 0x135   :  { %4227 = vmatprep.mubr.msk.bf16.mxu1 %vm4658_vm0, %v6459_v20 }
 0x136   :  { %v5778_v34 = vadd.f32 %v1033_v53, %v946_v48  ;;  %v3565_v28 = vpop.f32.mrb[32].mxu0 }
 0x137   :  { %v3566_v51 = vpop.f32.mrb[33].mxu0  ;;  %v1038_v60 = vpop.f32.mrb[32].mxu1 }
 0x138   :  { %v3567_v43 = vadd.f32 %v3566_v51, %v3565_v28  ;;  %v3568_v6 = vpop.f32.mrb[34].mxu0  ;;  %v4169_v50 = vpop.f32.mrb[33].mxu1  ;;  %v4520_v28 = vld [vmem:[%s6419_s2 + $0x50] ss:$28 sps:$4 sm:$0xff]  }
 0x139   :  { %v3569_v63 = vpop.f32.mrb[35].mxu0  ;;  %v1041_v1 = vpop.f32.mrb[34].mxu1 }
 0x13a   :  { %v3570_v57 = vadd.f32 %v3569_v63, %v3568_v6  ;;  %v951_v9 = vadd.f32 %v3567_v43, %v5582_v56  ;;  %v4170_v29 = vpop.f32.mrb[35].mxu1 }
 0x13b   :  { %2272 = vmatmul.mubr.bf16.vlgmr.msra.gmra.mrb[140].mxu0 %v4513_v59 }
 0x13c   :  { %v5790_v36 = vadd.f32 %v1038_v60, %v951_v9  ;;  %v954_v53 = vadd.f32 %v3570_v57, %v5590_v32  ;;  %4228 = vmatmul.mubr.msk.bf16.vlgmr.msra.gmra.mrb[140].mxu1 %vm710_vm1, %v4516_v33  ;;  %3977 = vmatpush3.bf16.msra.mxu0 %v5315_v54  ;;  %v4519_v32 = vld [vmem:[%s6419_s2 + $0x48] ss:$28 sps:$4 sm:$0xff]  }
 0x13d   :  { %4035 = vmatpush3.bf16.msra.mxu1 %v5321_v55  ;;  %2279 = vmatprep.mubr.bf16.mxu0 %v4517_v52 }
 0x13e   :  { %v5796_v8 = vadd.f32 %v1041_v1, %v954_v53  ;;  %v3571_v47 = vpop.f32.mrb[36].mxu0  ;;  %4231 = vmatprep.mubr.msk.bf16.mxu1 %vm4658_vm0, %v6459_v20  ;;  %3978 = vmatprep.subr.bf16.mxu0 %v5329_v58  ;;  %v4521_v58 = vld [vmem:[%s6419_s2 + $0x84] ss:$28 sps:$4 sm:$0xff]  }
 0x13f   :  { %v3572_v56 = vpop.f32.mrb[37].mxu0  ;;  %v1046_v40 = vpop.f32.mrb[36].mxu1  ;;  %4036 = vmatprep.subr.bf16.mxu1 %v5338_v0 }
 0x140   :  { %v3573_v54 = vadd.f32 %v3572_v56, %v3571_v47  ;;  %v3574_v48 = vpop.f32.mrb[38].mxu0  ;;  %v4173_v55 = vpop.f32.mrb[37].mxu1  ;;  %3979 = vmatpush3.bf16.msra.mxu0 %v5347_v61 }
 0x141   :  { %v3575_v51 = vpop.f32.mrb[39].mxu0  ;;  %v1049_v60 = vpop.f32.mrb[38].mxu1  ;;  %4037 = vmatpush3.bf16.msra.mxu1 %v5356_v35  ;;  %3980 = vmatprep.subr.bf16.mxu0 %v5362_v41 }
 0x142   :  { %v3576_v0 = vadd.f32 %v3575_v51, %v3574_v48  ;;  %v959_v59 = vadd.f32 %v3573_v54, %v5636_v46  ;;  %v4174_v43 = vpop.f32.mrb[39].mxu1  ;;  %4038 = vmatprep.subr.bf16.mxu1 %v5368_v2 }
 0x143   :  { %2280 = vmatmul.mubr.bf16.gmra.mrb[144].mxu0 %v4519_v32 }
 0x144   :  { %v5816_v6 = vadd.f32 %v1046_v40, %v959_v59  ;;  %v962_v61 = vadd.f32 %v3576_v0, %v5638_v49  ;;  %4232 = vmatmul.mubr.msk.bf16.gmra.mrb[144].mxu1 %vm710_vm1, %v4520_v28  ;;  %2287 = vmatprep.mubr.bf16.mxu0 %v4521_v58  ;;  %v4523_v49 = vld [vmem:[%s6419_s2 + $0x80] ss:$28 sps:$4 sm:$0xff]  }
 0x145   :  { %4235 = vmatprep.mubr.msk.bf16.mxu1 %vm4658_vm0, %v6459_v20  ;;  %3981 = vmatpush3.bf16.msra.mxu0 %v5377_v3  ;;  %v4524_v3 = vld [vmem:[%s6419_s2 + $0x88] ss:$28 sps:$4 sm:$0xff]  }
 0x146   :  { %v5823_v35 = vadd.f32 %v1049_v60, %v962_v61  ;;  %v3577_v41 = vpop.f32.mrb[40].mxu0  ;;  %4039 = vmatpush3.bf16.msra.mxu1 %v5383_v4  ;;  %3982 = vmatprep.subr.bf16.mxu0 %v5389_v5  ;;  %v4525_v4 = vld [vmem:[%s6419_s2 + $0xbc] ss:$28 sps:$4 sm:$0xff]  }
 0x147   :  { %v3578_v2 = vpop.f32.mrb[41].mxu0  ;;  %v1054_v46 = vpop.f32.mrb[40].mxu1  ;;  %4040 = vmatprep.subr.bf16.mxu1 %v5398_v7 }
 0x148   :  { %v3579_v50 = vadd.f32 %v3578_v2, %v3577_v41  ;;  %v3580_v33 = vpop.f32.mrb[42].mxu0  ;;  %v4177_v63 = vpop.f32.mrb[41].mxu1  ;;  %v4535_v2 = vld [vmem:[%s6419_s2 + $0x128] ss:$28 sps:$4 sm:$0xff]  }
 0x149   :  { %v3581_v5 = vpop.f32.mrb[43].mxu0  ;;  %v1057_v1 = vpop.f32.mrb[42].mxu1  ;;  %3983 = vmatpush3.bf16.msra.mxu0 %v5410_v10 }
 0x14a   :  { %v3582_v52 = vadd.f32 %v3581_v5, %v3580_v33  ;;  %v967_v57 = vadd.f32 %v3579_v50, %v5676_v37  ;;  %v4178_v9 = vpop.f32.mrb[43].mxu1  ;;  %4041 = vmatpush3.bf16.msra.mxu1 %v5416_v11  ;;  %3984 = vmatprep.subr.bf16.mxu0 %v5422_v12  ;;  %v4527_v37 = vld [vmem:[%s6419_s2 + $0xb8] ss:$28 sps:$4 sm:$0xff]   ;;  %v4536_v50 = vld [vmem:[%s6419_s2 + $0x130] ss:$28 sps:$4 sm:$0xff]  }
 0x14b   :  { %2288 = vmatmul.mubr.bf16.gmra.mrb[148].mxu0 %v4523_v49  ;;  %4042 = vmatprep.subr.bf16.mxu1 %v5428_v13 }
 0x14c   :  { %v5842_v7 = vadd.f32 %v1054_v46, %v967_v57  ;;  %v970_v29 = vadd.f32 %v3582_v52, %v5678_v62  ;;  %4236 = vmatmul.mubr.msk.bf16.gmra.mrb[148].mxu1 %vm710_vm1, %v4524_v3  ;;  %2295 = vmatprep.mubr.bf16.mxu0 %v4525_v4 }
 0x14d   :  { %4239 = vmatprep.mubr.msk.bf16.mxu1 %vm4658_vm0, %v6459_v20  ;;  %3985 = vmatpush3.bf16.msra.mxu0 %v5437_v14  ;;  %v4528_v14 = vld [vmem:[%s6419_s2 + $0xc0] ss:$28 sps:$4 sm:$0xff]  }
 0x14e   :  { %v5849_v10 = vadd.f32 %v1057_v1, %v970_v29  ;;  %v3583_v11 = vpop.f32.mrb[44].mxu0  ;;  %4043 = vmatpush3.bf16.msra.mxu1 %v5443_v15  ;;  %3986 = vmatprep.subr.bf16.mxu0 %v5449_v16  ;;  %v4529_v15 = vld [vmem:[%s6419_s2 + $0xf4] ss:$28 sps:$4 sm:$0xff]  }
 0x14f   :  { %v3584_v12 = vpop.f32.mrb[45].mxu0  ;;  %v1062_v13 = vpop.f32.mrb[44].mxu1  ;;  %4044 = vmatprep.subr.bf16.mxu1 %v5458_v18 }
 0x150   :  { %v3585_v62 = vadd.f32 %v3584_v12, %v3583_v11  ;;  %v3586_v53 = vpop.f32.mrb[46].mxu0  ;;  %v4181_v47 = vpop.f32.mrb[45].mxu1  ;;  %v4539_v11 = vld [vmem:[%s6419_s2 + $0x168] ss:$0 sps:$4 sm:$0x33]  }
 0x151   :  { %v3587_v16 = vpop.f32.mrb[47].mxu0  ;;  %v1065_v56 = vpop.f32.mrb[46].mxu1  ;;  %3987 = vmatpush3.bf16.msra.mxu0 %v5470_v21 }
 0x152   :  { %v3588_v40 = vadd.f32 %v3587_v16, %v3586_v53  ;;  %v975_v32 = vadd.f32 %v3585_v62, %v5716_v44  ;;  %v4182_v54 = vpop.f32.mrb[47].mxu1  ;;  %4045 = vmatpush3.bf16.msra.mxu1 %v5476_v22  ;;  %3988 = vmatprep.subr.bf16.mxu0 %v5482_v23 }
 0x153   :  { %2296 = vmatmul.mubr.bf16.gmra.mrb[152].mxu0 %v4527_v37  ;;  %4046 = vmatprep.subr.bf16.mxu1 %v5488_v24  ;;  %v4542_v37 = vld [vmem:[%s6420_s3 + $0x4] ss:$28 sps:$4 sm:$0xff]  }
 0x154   :  { %v5868_v18 = vadd.f32 %v1062_v13, %v975_v32  ;;  %v978_v48 = vadd.f32 %v3588_v40, %v5718_v45  ;;  %4240 = vmatmul.mubr.msk.bf16.gmra.mrb[152].mxu1 %vm710_vm1, %v4528_v14  ;;  %2303 = vmatprep.mubr.bf16.mxu0 %v4529_v15  ;;  %v4531_v45 = vld [vmem:[%s6419_s2 + $0xf0] ss:$28 sps:$4 sm:$0xff]  }
 0x155   :  { %4243 = vmatprep.mubr.msk.bf16.mxu1 %vm4658_vm0, %v6459_v20  ;;  %3989 = vmatpush3.bf16.msra.mxu0 %v5497_v25  ;;  %v4532_v25 = vld [vmem:[%s6419_s2 + $0xf8] ss:$28 sps:$4 sm:$0xff]   ;;  %v4545_v14 = vld [vmem:[%s6420_s3 + $0xc] ss:$28 sps:$4 sm:$0xff]  }
 0x156   :  { %v5875_v21 = vadd.f32 %v1065_v56, %v978_v48  ;;  %v3589_v22 = vpop.f32.mrb[48].mxu0  ;;  %4047 = vmatpush3.bf16.msra.mxu1 %v5503_v26  ;;  %3990 = vmatprep.subr.bf16.mxu0 %v5509_v27  ;;  %v4533_v26 = vld [vmem:[%s6419_s2 + $0x12c] ss:$28 sps:$4 sm:$0xff]  }
 0x157   :  { %v3590_v23 = vpop.f32.mrb[49].mxu0  ;;  %v1070_v24 = vpop.f32.mrb[48].mxu1  ;;  %4048 = vmatprep.subr.bf16.mxu1 %v5518_v30  ;;  %v4656_v30 = vld [vmem:[%s6416_s4 + $0x140] sm:$0xff]  }
 0x158   :  { %v3591_v44 = vadd.f32 %v3590_v23, %v3589_v22  ;;  %v3592_v55 = vpop.f32.mrb[50].mxu0  ;;  %v4185_v28 = vpop.f32.mrb[49].mxu1  ;;  %v4540_v23 = vld [vmem:[%s6420_s3] ss:$28 sps:$4 sm:$0xff]  }
 0x159   :  { %v3593_v27 = vpop.f32.mrb[51].mxu0  ;;  %v1073_v58 = vpop.f32.mrb[50].mxu1  ;;  %3991 = vmatpush3.bf16.msra.mxu0 %v5530_v39  ;;  %v1806_v39 = vld [vmem:[%s6419_s2 + $0x160] sm:$0x33] }
 0x15a   :  { %v3594_v51 = vadd.f32 %v3593_v27, %v3592_v55  ;;  %v983_v60 = vadd.f32 %v3591_v44, %v5751_v17  ;;  %v4186_v0 = vpop.f32.mrb[51].mxu1  ;;  %4049 = vmatpush3.bf16.msra.mxu1 %v5536_v42  ;;  %4092 = vmatprep.subr.bf16.mxu0 %v4656_v30  ;;  %v3361_v33 = vcombine.high %v1806_v39, %v1806_v39  ;;  %v4543_v55 = vld [vmem:[%s6420_s3 + $0x8] ss:$28 sps:$4 sm:$0xff]   ;;  %v4546_v27 = vld [vmem:[%s6420_s3 + $0x3c] ss:$28 sps:$4 sm:$0xff]  }
 0x15b   :  { %2304 = vmatmul.mubr.bf16.gmra.mrb[156].mxu0 %v4531_v45  ;;  %4255 = vmatprep.subr.bf16.mxu1 %v6459_v20  ;;  %v3360_v29 = vcombine.low %v1806_v39, %v1806_v39 }
 0x15c   :  { %v5896_v59 = vadd.f32 %v1070_v24, %v983_v60  ;;  %v986_v43 = vadd.f32 %v3594_v51, %v5753_v19  ;;  %4244 = vmatmul.mubr.msk.bf16.gmra.mrb[156].mxu1 %vm710_vm1, %v4532_v25  ;;  %2311 = vmatprep.mubr.bf16.mxu0 %v4533_v26  ;;  %v4548_v60 = vld [vmem:[%s6420_s3 + $0x44] ss:$28 sps:$4 sm:$0xff]  }
 0x15d   :  { %4247 = vmatprep.mubr.msk.bf16.mxu1 %vm4658_vm0, %v6459_v20 }
 0x15e   :  { %v5905_v42 = vadd.f32 %v1073_v58, %v986_v43  ;;  %v3595_v17 = vpop.f32.mrb[52].mxu0  ;;  %v6460_v43 = vld [vmem:[#allocation2_spill] sm:$0xff] }
 0x15f   :  { %v3596_v61 = vpop.f32.mrb[53].mxu0  ;;  %v1078_v41 = vpop.f32.mrb[52].mxu1 }
 0x160   :  { %v3597_v19 = vadd.f32 %v3596_v61, %v3595_v17  ;;  %v3598_v46 = vpop.f32.mrb[54].mxu0  ;;  %v4189_v49 = vpop.f32.mrb[53].mxu1  ;;  %v6461_v17 = vld [vmem:[#allocation3_spill] sm:$0xff] }
 0x161   :  { %v3599_v63 = vpop.f32.mrb[55].mxu0  ;;  %v1081_v3 = vpop.f32.mrb[54].mxu1  ;;  %v4550_v46 = vld [vmem:[%s6420_s3 + $0x38] ss:$28 sps:$4 sm:$0xff]  }
 0x162   :  { %v991_v4 = vadd.f32 %v3597_v19, %v5767_v31  ;;  %v4190_v5 = vpop.f32.mrb[55].mxu1  ;;  %v4551_v63 = vld [vmem:[%s6420_s3 + $0x40] ss:$28 sps:$4 sm:$0xff]  }
 0x163   :  { %2312 = vmatmul.mubr.bf16.gmra.mrb[160].mxu0 %v4535_v2  ;;  %v6463_v3 = vld [vmem:[#allocation5_spill] sm:$0xff] }
 0x164   :  { %v5914_v1 = vadd.f32 %v1078_v41, %v991_v4  ;;  %4248 = vmatmul.mubr.msk.bf16.gmra.mrb[160].mxu1 %vm710_vm1, %v4536_v50  ;;  %2319 = vmatprep.mubr.bf16.mxu0 %v3361_v33  ;;  %v6462_v41 = vld [vmem:[#allocation4_spill] sm:$0xff] }
 0x165   :  { %4251 = vmatprep.mubr.msk.bf16.mxu1 %vm4658_vm0, %v6459_v20  ;;  %v4552_v4 = vld [vmem:[%s6420_s3 + $0x74] ss:$28 sps:$4 sm:$0xff]  }
 0x166   :  { %v3626_v52 = vpop.f32.mrb[56].mxu0 }
 0x167   :  { %v3684_v57 = vpop.f32.mrb[56].mxu1  ;;  %v3627_v9 = vpop.f32.mrb[57].mxu0 }
 0x168   :  { %v3628_v12 = vadd.f32 %v3627_v9, %v3626_v52  ;;  %v3685_v31 = vpop.f32.mrb[57].mxu1  ;;  %v3629_v13 = vpop.f32.mrb[58].mxu0  ;;  %v6464_v9 = vld [vmem:[#allocation6_spill] sm:$0xff] }
 0x169   :  { %v3686_v62 = vadd.f32 %v3685_v31, %v3684_v57  ;;  %v3687_v53 = vpop.f32.mrb[58].mxu1  ;;  %v3630_v47 = vpop.f32.mrb[59].mxu0 }
 0x16a   :  { %v3631_v15 = vadd.f32 %v3630_v47, %v3629_v13  ;;  %v3688_v16 = vpop.f32.mrb[59].mxu1 }
 0x16b   :  { %v5928_v56 = vadd.f32 %v3686_v62, %v3628_v12  ;;  %v3689_v40 = vadd.f32 %v3688_v16, %v3687_v53  ;;  %2320 = vmatmul.mubr.bf16.gmra.mrb[164].mxu0 %v3360_v29  ;;  %v4554_v29 = vld [vmem:[%s6420_s3 + $0x7c] ss:$28 sps:$4 sm:$0xff]   ;;  %v6466_v53 = vld [vmem:[#allocation8_spill] sm:$0xff] }
 0x16c   :  { %4252 = vmatmul.mubr.msk.bf16.gmra.mrb[164].mxu1 %vm710_vm1, %v4539_v11  ;;  %2767 = vmatprep.mubr.bf16.mxu0 %v4542_v37  ;;  %v6465_v11 = vld [vmem:[#allocation7_spill] sm:$0xff] }
 0x16d   :  { %v5931_v32 = vadd.f32 %v3689_v40, %v3631_v15  ;;  %2855 = vmatprep.mubr.bf16.mxu1 %v4545_v14  ;;  %v6467_v14 = vld [vmem:[#allocation9_spill] sm:$0xff]  ;;  %v4556_v40 = vld [vmem:[%s6420_s3 + $0x70] ss:$28 sps:$4 sm:$0xff]  }
 0x16e   :  { %v3632_v54 = vpop.f32.mrb[60].mxu0 }
 0x16f   :  { %v3690_v48 = vpop.f32.mrb[60].mxu1  ;;  %v3633_v22 = vpop.f32.mrb[61].mxu0 }
 0x170   :  { %v3634_v24 = vadd.f32 %v3633_v22, %v3632_v54  ;;  %v3691_v45 = vpop.f32.mrb[61].mxu1  ;;  %v3635_v44 = vpop.f32.mrb[62].mxu0 }
 0x171   :  { %v3692_v28 = vadd.f32 %v3691_v45, %v3690_v48  ;;  %v3693_v25 = vpop.f32.mrb[62].mxu1  ;;  %v3636_v26 = vpop.f32.mrb[63].mxu0 }
 0x172   :  { %v3637_v58 = vadd.f32 %v3636_v26, %v3635_v44  ;;  %v3694_v51 = vpop.f32.mrb[63].mxu1 }
 0x173   :  { %v5945_v0 = vadd.f32 %v3692_v28, %v3634_v24  ;;  %v3695_v30 = vadd.f32 %v3694_v51, %v3693_v25  ;;  %2768 = vmatmul.mubr.bf16.vlgmr.msra.gmra.mrb[168].mxu0 %v4540_v23  ;;  %v4557_v23 = vld [vmem:[%s6420_s3 + $0x78] ss:$28 sps:$4 sm:$0xff]   ;;  %v4558_v24 = vld [vmem:[%s6420_s3 + $0xac] ss:$28 sps:$4 sm:$0xff]   ;;  %v6468_v28 = vld [vmem:[#allocation10_spill] sm:$0xff] }
 0x174   :  { %2856 = vmatmul.mubr.bf16.vlgmr.msra.gmra.mrb[168].mxu1 %v4543_v55  ;;  %4093 = vmatpush3.bf16.msra.mxu0 %v6460_v43  ;;  %v4560_v25 = vld [vmem:[%s6420_s3 + $0xb4] ss:$28 sps:$4 sm:$0xff]  }
 0x175   :  { %v5948_v39 = vadd.f32 %v3695_v30, %v3637_v58  ;;  %4256 = vmatpush3.bf16.msra.mxu1 %v6461_v17  ;;  %2775 = vmatprep.mubr.bf16.mxu0 %v4546_v27  ;;  %v6469_v58 = vld [vmem:[#allocation11_spill] sm:$0xff]  ;;  %v6470_v43 = vld [vmem:[#allocation12_spill] sm:$0xff] }
 0x176   :  { %v3638_v61 = vpop.f32.mrb[64].mxu0  ;;  %2863 = vmatprep.mubr.bf16.mxu1 %v4548_v60  ;;  %4094 = vmatprep.subr.bf16.mxu0 %v6462_v41 }
 0x177   :  { %v3696_v2 = vpop.f32.mrb[64].mxu1  ;;  %v3639_v19 = vpop.f32.mrb[65].mxu0  ;;  %4257 = vmatprep.subr.bf16.mxu1 %v6459_v20 }
 0x178   :  { %v3640_v49 = vadd.f32 %v3639_v19, %v3638_v61  ;;  %v3697_v50 = vpop.f32.mrb[65].mxu1  ;;  %v3641_v33 = vpop.f32.mrb[66].mxu0  ;;  %4095 = vmatpush3.bf16.msra.mxu0 %v6463_v3  ;;  %v6471_v61 = vld [vmem:[#allocation13_spill] sm:$0xff]  ;;  %v4562_v19 = vld [vmem:[%s6420_s3 + $0xa8] ss:$28 sps:$4 sm:$0xff]  }
 0x179   :  { %v3698_v5 = vadd.f32 %v3697_v50, %v3696_v2  ;;  %v3699_v52 = vpop.f32.mrb[66].mxu1  ;;  %v3642_v57 = vpop.f32.mrb[67].mxu0  ;;  %4096 = vmatprep.subr.bf16.mxu0 %v6464_v9  ;;  %4258 = vmatpush3.bf16.msra.mxu1 %v6465_v11  ;;  %v6473_v11 = vld [vmem:[#allocation15_spill] sm:$0xff] }
 0x17a   :  { %v3643_v12 = vadd.f32 %v3642_v57, %v3641_v33  ;;  %v3700_v31 = vpop.f32.mrb[67].mxu1  ;;  %v4563_v33 = vld [vmem:[%s6420_s3 + $0xb0] ss:$28 sps:$4 sm:$0xff]   ;;  %v6472_v57 = vld [vmem:[#allocation14_spill] sm:$0xff] }
 0x17b   :  { %v5968_v13 = vadd.f32 %v3698_v5, %v3640_v49  ;;  %v3701_v37 = vadd.f32 %v3700_v31, %v3699_v52  ;;  %2776 = vmatmul.mubr.bf16.gmra.mrb[172].mxu0 %v4550_v46  ;;  %v4566_v52 = vld [vmem:[%s6420_s3 + $0xec] ss:$28 sps:$4 sm:$0xff]  }
 0x17c   :  { %2864 = vmatmul.mubr.bf16.gmra.mrb[172].mxu1 %v4551_v63  ;;  %2783 = vmatprep.mubr.bf16.mxu0 %v4552_v4  ;;  %v4564_v63 = vld [vmem:[%s6420_s3 + $0xe4] ss:$28 sps:$4 sm:$0xff]  }
 0x17d   :  { %v5970_v62 = vadd.f32 %v3701_v37, %v3643_v12  ;;  %2871 = vmatprep.mubr.bf16.mxu1 %v4554_v29  ;;  %4097 = vmatpush3.bf16.msra.mxu0 %v6466_v53  ;;  %v6474_v53 = vld [vmem:[#allocation16_spill] sm:$0xff] }
 0x17e   :  { %v3644_v47 = vpop.f32.mrb[68].mxu0  ;;  %4098 = vmatprep.subr.bf16.mxu0 %v6467_v14  ;;  %v6475_v14 = vld [vmem:[#allocation17_spill] sm:$0xff] }
 0x17f   :  { %v3702_v15 = vpop.f32.mrb[68].mxu1  ;;  %v3645_v16 = vpop.f32.mrb[69].mxu0 }
 0x180   :  { %v3646_v54 = vadd.f32 %v3645_v16, %v3644_v47  ;;  %v3703_v48 = vpop.f32.mrb[69].mxu1  ;;  %v3647_v22 = vpop.f32.mrb[70].mxu0 }
 0x181   :  { %v3704_v45 = vadd.f32 %v3703_v48, %v3702_v15  ;;  %v3705_v44 = vpop.f32.mrb[70].mxu1  ;;  %v3648_v55 = vpop.f32.mrb[71].mxu0  ;;  %4099 = vmatpush3.bf16.msra.mxu0 %v6468_v28  ;;  %v4572_v28 = vld [vmem:[%s6420_s3 + $0x124] ss:$28 sps:$4 sm:$0xff]  }
 0x182   :  { %v3649_v26 = vadd.f32 %v3648_v55, %v3647_v22  ;;  %v3706_v27 = vpop.f32.mrb[71].mxu1  ;;  %4100 = vmatprep.subr.bf16.mxu0 %v6469_v58 }
 0x183   :  { %v5988_v51 = vadd.f32 %v3704_v45, %v3646_v54  ;;  %v3707_v60 = vadd.f32 %v3706_v27, %v3705_v44  ;;  %2784 = vmatmul.mubr.bf16.gmra.mrb[176].mxu0 %v4556_v40  ;;  %v4568_v40 = vld [vmem:[%s6420_s3 + $0xe0] ss:$28 sps:$4 sm:$0xff]  }
 0x184   :  { %2872 = vmatmul.mubr.bf16.gmra.mrb[176].mxu1 %v4557_v23  ;;  %2791 = vmatprep.mubr.bf16.mxu0 %v4558_v24  ;;  %v4569_v23 = vld [vmem:[%s6420_s3 + $0xe8] ss:$28 sps:$4 sm:$0xff]   ;;  %v4570_v24 = vld [vmem:[%s6420_s3 + $0x11c] ss:$28 sps:$4 sm:$0xff]  }
 0x185   :  { %v5990_v30 = vadd.f32 %v3707_v60, %v3649_v26  ;;  %2879 = vmatprep.mubr.bf16.mxu1 %v4560_v25  ;;  %4101 = vmatpush3.bf16.msra.mxu0 %v6470_v43  ;;  %v6476_v25 = vld [vmem:[#allocation18_spill] sm:$0xff] }
 0x186   :  { %v3650_v17 = vpop.f32.mrb[72].mxu0  ;;  %4102 = vmatprep.subr.bf16.mxu0 %v6471_v61 }
 0x187   :  { %v3708_v41 = vpop.f32.mrb[72].mxu1  ;;  %v3651_v2 = vpop.f32.mrb[73].mxu0 }
 0x188   :  { %v3652_v46 = vadd.f32 %v3651_v2, %v3650_v17  ;;  %v3709_v49 = vpop.f32.mrb[73].mxu1  ;;  %v3653_v50 = vpop.f32.mrb[74].mxu0  ;;  %v2476_v17 = vld [vmem:[%s6420_s3 + $0x150] sm:$0x33] }
 0x189   :  { %v3710_v3 = vadd.f32 %v3709_v49, %v3708_v41  ;;  %v3711_v4 = vpop.f32.mrb[74].mxu1  ;;  %v3654_v5 = vpop.f32.mrb[75].mxu0  ;;  %4103 = vmatpush3.bf16.msra.mxu0 %v6472_v57  ;;  %v2477_v41 = vld [vmem:[%s6420_s3 + $0x158] sm:$0x33] }
 0x18a   :  { %v3655_v9 = vadd.f32 %v3654_v5, %v3653_v50  ;;  %v3712_v29 = vpop.f32.mrb[75].mxu1  ;;  %4104 = vmatprep.subr.bf16.mxu0 %v6473_v11  ;;  %v3415_v57 = vcombine.high %v2477_v41, %v2477_v41 }
 0x18b   :  { %v6008_v12 = vadd.f32 %v3710_v3, %v3652_v46  ;;  %v3713_v31 = vadd.f32 %v3712_v29, %v3711_v4  ;;  %2792 = vmatmul.mubr.bf16.gmra.mrb[180].mxu0 %v4562_v19  ;;  %v4574_v46 = vld [vmem:[%s6420_s3 + $0x118] ss:$28 sps:$4 sm:$0xff]   ;;  %v3413_v3 = vcombine.high %v2476_v17, %v2476_v17 }
 0x18c   :  { %2880 = vmatmul.mubr.bf16.gmra.mrb[180].mxu1 %v4563_v33  ;;  %2799 = vmatprep.mubr.bf16.mxu0 %v4564_v63  ;;  %v4575_v63 = vld [vmem:[%s6420_s3 + $0x120] ss:$28 sps:$4 sm:$0xff]  }
 0x18d   :  { %v6010_v37 = vadd.f32 %v3713_v31, %v3655_v9  ;;  %2887 = vmatprep.mubr.bf16.mxu1 %v4566_v52  ;;  %4105 = vmatpush3.bf16.msra.mxu0 %v6474_v53 }
 0x18e   :  { %v3656_v47 = vpop.f32.mrb[76].mxu0  ;;  %4106 = vmatprep.subr.bf16.mxu0 %v6475_v14 }
 0x18f   :  { %v3714_v15 = vpop.f32.mrb[76].mxu1  ;;  %v3657_v16 = vpop.f32.mrb[77].mxu0 }
 0x190   :  { %v3658_v54 = vadd.f32 %v3657_v16, %v3656_v47  ;;  %v3715_v48 = vpop.f32.mrb[77].mxu1  ;;  %v3659_v22 = vpop.f32.mrb[78].mxu0  ;;  %v3412_v47 = vcombine.low %v2476_v17, %v2476_v17 }
 0x191   :  { %v3716_v45 = vadd.f32 %v3715_v48, %v3714_v15  ;;  %v3717_v44 = vpop.f32.mrb[78].mxu1  ;;  %v3660_v55 = vpop.f32.mrb[79].mxu0  ;;  %4107 = vmatpush3.bf16.msra.mxu0 %v6476_v25 }
 0x192   :  { %v3661_v26 = vadd.f32 %v3660_v55, %v3659_v22  ;;  %v3718_v27 = vpop.f32.mrb[79].mxu1 }
 0x193   :  { %v6027_v58 = vadd.f32 %v3716_v45, %v3658_v54  ;;  %v3719_v60 = vadd.f32 %v3718_v27, %v3717_v44  ;;  %2800 = vmatmul.mubr.bf16.gmra.mrb[184].mxu0 %v4568_v40  ;;  %v3414_v40 = vcombine.low %v2477_v41, %v2477_v41  ;;  %v4582_v54 = vld [vmem:[%s6420_s3 + $0x14] ss:$28 sps:$4 sm:$0xff]  }
 0x194   :  { %2888 = vmatmul.mubr.bf16.gmra.mrb[184].mxu1 %v4569_v23  ;;  %2807 = vmatprep.mubr.bf16.mxu0 %v4570_v24 }
 0x195   :  { %v6029_v43 = vadd.f32 %v3719_v60, %v3661_v26  ;;  %2895 = vmatprep.mubr.bf16.mxu1 %v4572_v28 }
 0x196   :  { %v3662_v61 = vpop.f32.mrb[80].mxu0 }
 0x197   :  { %v3720_v2 = vpop.f32.mrb[80].mxu1  ;;  %v3663_v19 = vpop.f32.mrb[81].mxu0 }
 0x198   :  { %v3664_v49 = vadd.f32 %v3663_v19, %v3662_v61  ;;  %v3721_v50 = vpop.f32.mrb[81].mxu1  ;;  %v3665_v33 = vpop.f32.mrb[82].mxu0  ;;  %v4584_v19 = vld [vmem:[%s6420_s3 + $0x4c] ss:$28 sps:$4 sm:$0xff]  }
 0x199   :  { %v3722_v4 = vadd.f32 %v3721_v50, %v3720_v2  ;;  %v3666_v5 = vpop.f32.mrb[83].mxu0  ;;  %v3723_v52 = vpop.f32.mrb[82].mxu1  ;;  %v4583_v2 = vld [vmem:[%s6420_s3 + $0x18] ss:$28 sps:$4 sm:$0xff]  }
 0x19a   :  { %v3724_v9 = vpop.f32.mrb[83].mxu1 }
 0x19b   :  { %v6043_v29 = vadd.f32 %v3722_v4, %v3664_v49  ;;  %2808 = vmatmul.mubr.bf16.gmra.mrb[188].mxu0 %v4574_v46 }
 0x19c   :  { %2896 = vmatmul.mubr.bf16.gmra.mrb[188].mxu1 %v4575_v63  ;;  %2815 = vmatprep.mubr.bf16.mxu0 %v3413_v3 }
 0x19d   :  { %2903 = vmatprep.mubr.bf16.mxu1 %v3415_v57 }
 0x19e   :  { %v3742_v11 = vpop.f32.mrb[84].mxu0 }
 0x19f   :  { %v3743_v31 = vpop.f32.mrb[85].mxu0  ;;  %v1689_v53 = vpop.f32.mrb[84].mxu1 }
 0x1a0   :  { %v3744_v14 = vadd.f32 %v3743_v31, %v3742_v11  ;;  %v3745_v15 = vpop.f32.mrb[86].mxu0  ;;  %v4197_v16 = vpop.f32.mrb[85].mxu1  ;;  %v4586_v11 = vld [vmem:[%s6420_s3 + $0x48] ss:$28 sps:$4 sm:$0xff]  }
 0x1a1   :  { %v3746_v48 = vpop.f32.mrb[87].mxu0  ;;  %v1692_v22 = vpop.f32.mrb[86].mxu1 }
 0x1a2   :  { %v3747_v23 = vadd.f32 %v3746_v48, %v3745_v15  ;;  %v1602_v24 = vadd.f32 %v3744_v14, %v5928_v56  ;;  %v4198_v45 = vpop.f32.mrb[87].mxu1  ;;  %v4580_v56 = vld [vmem:[%s6420_s3 + $0x10] ss:$28 sps:$4 sm:$0xff]   ;;  %v4588_v15 = vld [vmem:[%s6420_s3 + $0x84] ss:$28 sps:$4 sm:$0xff]  }
 0x1a3   :  { %2816 = vmatmul.mubr.bf16.gmra.mrb[192].mxu0 %v3412_v47  ;;  %v4587_v14 = vld [vmem:[%s6420_s3 + $0x50] ss:$28 sps:$4 sm:$0xff]  }
 0x1a4   :  { %v6049_v44 = vadd.f32 %v1689_v53, %v1602_v24  ;;  %v1605_v55 = vadd.f32 %v3747_v23, %v5931_v32  ;;  %2904 = vmatmul.mubr.bf16.gmra.mrb[192].mxu1 %v3414_v40  ;;  %2943 = vmatprep.mubr.bf16.mxu0 %v4582_v54 }
 0x1a5   :  { %4259 = vmatprep.mubr.msk.bf16.mxu1 %vm4658_vm0, %v6459_v20 }
 0x1a6   :  { %v1743_v28 = vmax.f32 %v5773_v38, %v6049_v44  ;;  %v6056_v25 = vadd.f32 %v1692_v22, %v1605_v55  ;;  %v3748_v26 = vpop.f32.mrb[88].mxu0 }
 0x1a7   :  { %v3749_v27 = vpop.f32.mrb[89].mxu0  ;;  %v1697_v60 = vpop.f32.mrb[88].mxu1 }
 0x1a8   :  { %v1744_v32 = vmax.f32 %v5778_v34, %v6056_v25  ;;  %v3750_v17 = vadd.f32 %v3749_v27, %v3748_v26  ;;  %v3751_v61 = vpop.f32.mrb[90].mxu0  ;;  %v4201_v41 = vpop.f32.mrb[89].mxu1 }
 0x1a9   :  { %v3752_v46 = vpop.f32.mrb[91].mxu0  ;;  %v1700_v49 = vpop.f32.mrb[90].mxu1  ;;  %v4591_v41 = vld [vmem:[%s6420_s3 + $0x88] ss:$28 sps:$4 sm:$0xff]  }
 0x1aa   :  { %v3753_v50 = vadd.f32 %v3752_v46, %v3751_v61  ;;  %v1610_v33 = vadd.f32 %v3750_v17, %v5945_v0  ;;  %v4202_v63 = vpop.f32.mrb[91].mxu1 }
 0x1ab   :  { %2944 = vmatmul.mubr.bf16.vlgmr.msra.gmra.mrb[196].mxu0 %v4580_v56 }
 0x1ac   :  { %v6070_v3 = vadd.f32 %v1697_v60, %v1610_v33  ;;  %v1613_v4 = vadd.f32 %v3753_v50, %v5948_v39  ;;  %4260 = vmatmul.mubr.msk.bf16.vlgmr.msra.gmra.mrb[196].mxu1 %vm710_vm1, %v4583_v2  ;;  %2951 = vmatprep.mubr.bf16.mxu0 %v4584_v19  ;;  %v4590_v60 = vld [vmem:[%s6420_s3 + $0x80] ss:$28 sps:$4 sm:$0xff]  }
 0x1ad   :  { %4263 = vmatprep.mubr.msk.bf16.mxu1 %vm4658_vm0, %v6459_v20  ;;  %v4592_v2 = vld [vmem:[%s6420_s3 + $0xbc] ss:$28 sps:$4 sm:$0xff]  }
 0x1ae   :  { %v1745_v5 = vmax.f32 %v5790_v36, %v6070_v3  ;;  %v6078_v52 = vadd.f32 %v1700_v49, %v1613_v4  ;;  %v3754_v57 = vpop.f32.mrb[92].mxu0 }
 0x1af   :  { %v3755_v9 = vpop.f32.mrb[93].mxu0  ;;  %v1705_v0 = vpop.f32.mrb[92].mxu1 }
 0x1b0   :  { %v1746_v39 = vmax.f32 %v5796_v8, %v6078_v52  ;;  %v3756_v31 = vadd.f32 %v3755_v9, %v3754_v57  ;;  %v3757_v53 = vpop.f32.mrb[94].mxu0  ;;  %v4205_v47 = vpop.f32.mrb[93].mxu1 }
 0x1b1   :  { %v3758_v16 = vpop.f32.mrb[95].mxu0  ;;  %v1708_v40 = vpop.f32.mrb[94].mxu1 }
 0x1b2   :  { %v3759_v54 = vadd.f32 %v3758_v16, %v3757_v53  ;;  %v1618_v48 = vadd.f32 %v3756_v31, %v5968_v13  ;;  %v4206_v22 = vpop.f32.mrb[95].mxu1  ;;  %v4594_v31 = vld [vmem:[%s6420_s3 + $0xb8] ss:$28 sps:$4 sm:$0xff]  }
 0x1b3   :  { %2952 = vmatmul.mubr.bf16.gmra.mrb[200].mxu0 %v4586_v11  ;;  %v4596_v16 = vld [vmem:[%s6420_s3 + $0xf4] ss:$28 sps:$4 sm:$0xff]  }
 0x1b4   :  { %v6092_v23 = vadd.f32 %v1705_v0, %v1618_v48  ;;  %v1621_v24 = vadd.f32 %v3759_v54, %v5970_v62  ;;  %4264 = vmatmul.mubr.msk.bf16.gmra.mrb[200].mxu1 %vm710_vm1, %v4587_v14  ;;  %2959 = vmatprep.mubr.bf16.mxu0 %v4588_v15  ;;  %v4595_v15 = vld [vmem:[%s6420_s3 + $0xc0] ss:$28 sps:$4 sm:$0xff]  }
 0x1b5   :  { %4267 = vmatprep.mubr.msk.bf16.mxu1 %vm4658_vm0, %v6459_v20 }
 0x1b6   :  { %v1747_v45 = vmax.f32 %v5816_v6, %v6092_v23  ;;  %v6100_v55 = vadd.f32 %v1708_v40, %v1621_v24  ;;  %v3760_v26 = vpop.f32.mrb[96].mxu0 }
 0x1b7   :  { %v3761_v27 = vpop.f32.mrb[97].mxu0  ;;  %v1713_v13 = vpop.f32.mrb[96].mxu1 }
 0x1b8   :  { %v3762_v56 = vadd.f32 %v3761_v27, %v3760_v26  ;;  %v3763_v17 = vpop.f32.mrb[98].mxu0  ;;  %v4209_v61 = vpop.f32.mrb[97].mxu1 }
 0x1b9   :  { %v3764_v19 = vpop.f32.mrb[99].mxu0  ;;  %v1716_v46 = vpop.f32.mrb[98].mxu1  ;;  %v4598_v61 = vld [vmem:[%s6420_s3 + $0xf0] ss:$28 sps:$4 sm:$0xff]  }
 0x1ba   :  { %v3765_v49 = vadd.f32 %v3764_v19, %v3763_v17  ;;  %v1626_v50 = vadd.f32 %v3762_v56, %v5988_v51  ;;  %v4210_v33 = vpop.f32.mrb[99].mxu1 }
 0x1bb   :  { %2960 = vmatmul.mubr.bf16.gmra.mrb[204].mxu0 %v4590_v60 }
 0x1bc   :  { %v6114_v63 = vadd.f32 %v1713_v13, %v1626_v50  ;;  %v1629_v4 = vadd.f32 %v3765_v49, %v5990_v30  ;;  %4268 = vmatmul.mubr.msk.bf16.gmra.mrb[204].mxu1 %vm710_vm1, %v4591_v41  ;;  %2967 = vmatprep.mubr.bf16.mxu0 %v4592_v2  ;;  %v4600_v49 = vld [vmem:[%s6420_s3 + $0x12c] ss:$28 sps:$4 sm:$0xff]  }
 0x1bd   :  { %4271 = vmatprep.mubr.msk.bf16.mxu1 %vm4658_vm0, %v6459_v20 }
 0x1be   :  { %v6122_v9 = vadd.f32 %v1716_v46, %v1629_v4  ;;  %v3766_v0 = vpop.f32.mrb[100].mxu0  ;;  %v4599_v46 = vld [vmem:[%s6420_s3 + $0xf8] ss:$28 sps:$4 sm:$0xff]  }
 0x1bf   :  { %v3767_v11 = vpop.f32.mrb[101].mxu0  ;;  %v1721_v51 = vpop.f32.mrb[100].mxu1 }
 0x1c0   :  { %v3768_v53 = vadd.f32 %v3767_v11, %v3766_v0  ;;  %v3769_v47 = vpop.f32.mrb[102].mxu0  ;;  %v4213_v14 = vpop.f32.mrb[101].mxu1 }
 0x1c1   :  { %v3770_v40 = vpop.f32.mrb[103].mxu0  ;;  %v1724_v54 = vpop.f32.mrb[102].mxu1 }
 0x1c2   :  { %v3771_v48 = vadd.f32 %v3770_v40, %v3769_v47  ;;  %v1634_v22 = vadd.f32 %v3768_v53, %v6008_v12  ;;  %v4214_v24 = vpop.f32.mrb[103].mxu1  ;;  %v2478_v53 = vld [vmem:[%s6420_s3 + $0x160] sm:$0x33] }
 0x1c3   :  { %2968 = vmatmul.mubr.bf16.gmra.mrb[208].mxu0 %v4594_v31  ;;  %v4603_v24 = vld [vmem:[%s6420_s3 + $0x130] ss:$28 sps:$4 sm:$0xff]  }
 0x1c4   :  { %v6136_v26 = vadd.f32 %v1721_v51, %v1634_v22  ;;  %v1637_v27 = vadd.f32 %v3771_v48, %v6010_v37  ;;  %4272 = vmatmul.mubr.msk.bf16.gmra.mrb[208].mxu1 %vm710_vm1, %v4595_v15  ;;  %2975 = vmatprep.mubr.bf16.mxu0 %v4596_v16 }
 0x1c5   :  { %4275 = vmatprep.mubr.msk.bf16.mxu1 %vm4658_vm0, %v6459_v20 }
 0x1c6   :  { %v6144_v60 = vadd.f32 %v1724_v54, %v1637_v27  ;;  %v3772_v56 = vpop.f32.mrb[104].mxu0  ;;  %v3417_v27 = vcombine.high %v2478_v53, %v2478_v53 }
 0x1c7   :  { %v3773_v17 = vpop.f32.mrb[105].mxu0  ;;  %v1729_v12 = vpop.f32.mrb[104].mxu1 }
 0x1c8   :  { %v3774_v41 = vadd.f32 %v3773_v17, %v3772_v56  ;;  %v3775_v2 = vpop.f32.mrb[106].mxu0  ;;  %v4217_v19 = vpop.f32.mrb[105].mxu1 }
 0x1c9   :  { %v3776_v50 = vpop.f32.mrb[107].mxu0  ;;  %v1732_v33 = vpop.f32.mrb[106].mxu1 }
 0x1ca   :  { %v3777_v4 = vadd.f32 %v3776_v50, %v3775_v2  ;;  %v1642_v0 = vadd.f32 %v3774_v41, %v6027_v58  ;;  %v4218_v11 = vpop.f32.mrb[107].mxu1  ;;  %v3416_v50 = vcombine.low %v2478_v53, %v2478_v53 }
 0x1cb   :  { %2976 = vmatmul.mubr.bf16.gmra.mrb[212].mxu0 %v4598_v61 }
 0x1cc   :  { %v6158_v51 = vadd.f32 %v1729_v12, %v1642_v0  ;;  %v1645_v31 = vadd.f32 %v3777_v4, %v6029_v43  ;;  %4276 = vmatmul.mubr.msk.bf16.gmra.mrb[212].mxu1 %vm710_vm1, %v4599_v46  ;;  %2983 = vmatprep.mubr.bf16.mxu0 %v4600_v49  ;;  %v4602_v43 = vld [vmem:[%s6420_s3 + $0x128] ss:$28 sps:$4 sm:$0xff]  }
 0x1cd   :  { %4279 = vmatprep.mubr.msk.bf16.mxu1 %vm4658_vm0, %v6459_v20  ;;  %v4606_v0 = vld [vmem:[%s6420_s3 + $0x168] ss:$0 sps:$4 sm:$0x33]  }
 0x1ce   :  { %v6169_v58 = vadd.f32 %v1732_v33, %v1645_v31  ;;  %v3778_v14 = vpop.f32.mrb[108].mxu0 }
 0x1cf   :  { %v3779_v15 = vpop.f32.mrb[109].mxu0  ;;  %v1737_v16 = vpop.f32.mrb[108].mxu1 }
 0x1d0   :  { %v3780_v54 = vadd.f32 %v3779_v15, %v3778_v14  ;;  %v3781_v48 = vpop.f32.mrb[110].mxu0  ;;  %v4221_v22 = vpop.f32.mrb[109].mxu1 }
 0x1d1   :  { %v3782_v56 = vpop.f32.mrb[111].mxu0  ;;  %v1740_v17 = vpop.f32.mrb[110].mxu1 }
 0x1d2   :  { %v1650_v12 = vadd.f32 %v3780_v54, %v6043_v29  ;;  %v4222_v61 = vpop.f32.mrb[111].mxu1 }
 0x1d3   :  { %2984 = vmatmul.mubr.bf16.gmra.mrb[216].mxu0 %v4602_v43 }
 0x1d4   :  { %v6180_v41 = vadd.f32 %v1737_v16, %v1650_v12  ;;  %4280 = vmatmul.mubr.msk.bf16.gmra.mrb[216].mxu1 %vm710_vm1, %v4603_v24  ;;  %2991 = vmatprep.mubr.bf16.mxu0 %v3417_v27 }
 0x1d5   :  { %4283 = vmatprep.mubr.msk.bf16.mxu1 %vm4658_vm0, %v6459_v20 }
 0x1d6   :  { %v3809_v19 = vpop.f32.mrb[112].mxu0 }
 0x1d7   :  { %v3867_v46 = vpop.f32.mrb[112].mxu1  ;;  %v3810_v49 = vpop.f32.mrb[113].mxu0 }
 0x1d8   :  { %v3811_v33 = vadd.f32 %v3810_v49, %v3809_v19  ;;  %v3868_v4 = vpop.f32.mrb[113].mxu1  ;;  %v3812_v29 = vpop.f32.mrb[114].mxu0 }
 0x1d9   :  { %v3869_v11 = vadd.f32 %v3868_v4, %v3867_v46  ;;  %v3870_v31 = vpop.f32.mrb[114].mxu1  ;;  %v3813_v14 = vpop.f32.mrb[115].mxu0 }
 0x1da   :  { %v3814_v15 = vadd.f32 %v3813_v14, %v3812_v29  ;;  %v3871_v16 = vpop.f32.mrb[115].mxu1 }
 0x1db   :  { %v6190_v20 = vadd.f32 %v3869_v11, %v3811_v33  ;;  %v3872_v43 = vadd.f32 %v3871_v16, %v3870_v31  ;;  %2992 = vmatmul.mubr.bf16.gmra.mrb[220].mxu0 %v3416_v50 }
 0x1dc   :  { %4284 = vmatmul.mubr.msk.bf16.gmra.mrb[220].mxu1 %vm710_vm1, %v4606_v0 }
 0x1dd   :  { %v6193_v54 = vadd.f32 %v3872_v43, %v3814_v15 }
 0x1de   :  { %v3815_v53 = vpop.f32.mrb[116].mxu0 }
 0x1df   :  { %v3873_v48 = vpop.f32.mrb[116].mxu1  ;;  %v3816_v22 = vpop.f32.mrb[117].mxu0 }
 0x1e0   :  { %v3817_v24 = vadd.f32 %v3816_v22, %v3815_v53  ;;  %v3874_v27 = vpop.f32.mrb[117].mxu1  ;;  %v3818_v56 = vpop.f32.mrb[118].mxu0 }
 0x1e1   :  { %v3875_v17 = vadd.f32 %v3874_v27, %v3873_v48  ;;  %v3876_v12 = vpop.f32.mrb[118].mxu1  ;;  %v3819_v61 = vpop.f32.mrb[119].mxu0 }
 0x1e2   :  { %v3820_v19 = vadd.f32 %v3819_v61, %v3818_v56  ;;  %v3877_v46 = vpop.f32.mrb[119].mxu1 }
 0x1e3   :  { %v6195_v49 = vadd.f32 %v3875_v17, %v3817_v24  ;;  %v3878_v33 = vadd.f32 %v3877_v46, %v3876_v12 }
 0x1e5   :  { %v6197_v4 = vadd.f32 %v3878_v33, %v3820_v19 }
 0x1e6   :  { %v3821_v50 = vpop.f32.mrb[120].mxu0 }
 0x1e7   :  { %v3879_v29 = vpop.f32.mrb[120].mxu1  ;;  %v3822_v0 = vpop.f32.mrb[121].mxu0 }
 0x1e8   :  { %v3823_v11 = vadd.f32 %v3822_v0, %v3821_v50  ;;  %v3880_v31 = vpop.f32.mrb[121].mxu1  ;;  %v3824_v14 = vpop.f32.mrb[122].mxu0 }
 0x1e9   :  { %v3881_v15 = vadd.f32 %v3880_v31, %v3879_v29  ;;  %v3882_v16 = vpop.f32.mrb[122].mxu1  ;;  %v3825_v43 = vpop.f32.mrb[123].mxu0 }
 0x1ea   :  { %v3826_v53 = vadd.f32 %v3825_v43, %v3824_v14  ;;  %v3883_v48 = vpop.f32.mrb[123].mxu1 }
 0x1eb   :  { %v6199_v22 = vadd.f32 %v3881_v15, %v3823_v11  ;;  %v3884_v27 = vadd.f32 %v3883_v48, %v3882_v16 }
 0x1ed   :  { %v6201_v56 = vadd.f32 %v3884_v27, %v3826_v53 }
 0x1ee   :  { %v3827_v24 = vpop.f32.mrb[124].mxu0 }
 0x1ef   :  { %v3885_v17 = vpop.f32.mrb[124].mxu1  ;;  %v3828_v12 = vpop.f32.mrb[125].mxu0 }
 0x1f0   :  { %v3829_v61 = vadd.f32 %v3828_v12, %v3827_v24  ;;  %v3886_v19 = vpop.f32.mrb[125].mxu1  ;;  %v3830_v46 = vpop.f32.mrb[126].mxu0 }
 0x1f1   :  { %v3887_v33 = vadd.f32 %v3886_v19, %v3885_v17  ;;  %v3888_v50 = vpop.f32.mrb[126].mxu1  ;;  %v3831_v0 = vpop.f32.mrb[127].mxu0 }
 0x1f2   :  { %v3832_v2 = vadd.f32 %v3831_v0, %v3830_v46  ;;  %v3889_v29 = vpop.f32.mrb[127].mxu1 }
 0x1f3   :  { %v6203_v31 = vadd.f32 %v3887_v33, %v3829_v61  ;;  %v3890_v14 = vadd.f32 %v3889_v29, %v3888_v50 }
 0x1f5   :  { %v6205_v43 = vadd.f32 %v3890_v14, %v3832_v2 }
 0x1f6   :  { %v3833_v11 = vpop.f32.mrb[128].mxu0 }
 0x1f7   :  { %v3891_v15 = vpop.f32.mrb[128].mxu1  ;;  %v3834_v16 = vpop.f32.mrb[129].mxu0 }
 0x1f8   :  { %v3835_v53 = vadd.f32 %v3834_v16, %v3833_v11  ;;  %v3892_v48 = vpop.f32.mrb[129].mxu1  ;;  %v3836_v27 = vpop.f32.mrb[130].mxu0 }
 0x1f9   :  { %v3893_v40 = vadd.f32 %v3892_v48, %v3891_v15  ;;  %v3894_v24 = vpop.f32.mrb[130].mxu1  ;;  %v3837_v12 = vpop.f32.mrb[131].mxu0 }
 0x1fa   :  { %v3838_v47 = vadd.f32 %v3837_v12, %v3836_v27  ;;  %v3895_v17 = vpop.f32.mrb[131].mxu1 }
 0x1fb   :  { %v6207_v19 = vadd.f32 %v3893_v40, %v3835_v53  ;;  %v3896_v46 = vadd.f32 %v3895_v17, %v3894_v24 }
 0x1fd   :  { %v6209_v0 = vadd.f32 %v3896_v46, %v3838_v47 }
 0x1fe   :  { %v3839_v61 = vpop.f32.mrb[132].mxu0 }
 0x1ff   :  { %v3897_v33 = vpop.f32.mrb[132].mxu1  ;;  %v3840_v2 = vpop.f32.mrb[133].mxu0 }
 0x200   :  { %v3841_v50 = vadd.f32 %v3840_v2, %v3839_v61  ;;  %v3898_v29 = vpop.f32.mrb[133].mxu1  ;;  %v3842_v14 = vpop.f32.mrb[134].mxu0 }
 0x201   :  { %v3899_v37 = vadd.f32 %v3898_v29, %v3897_v33  ;;  %v3900_v11 = vpop.f32.mrb[134].mxu1  ;;  %v3843_v16 = vpop.f32.mrb[135].mxu0 }
 0x202   :  { %v3844_v13 = vadd.f32 %v3843_v16, %v3842_v14  ;;  %v3901_v15 = vpop.f32.mrb[135].mxu1 }
 0x203   :  { %v6211_v48 = vadd.f32 %v3899_v37, %v3841_v50  ;;  %v3902_v27 = vadd.f32 %v3901_v15, %v3900_v11 }
 0x205   :  { %v6213_v12 = vadd.f32 %v3902_v27, %v3844_v13 }
 0x206   :  { %v3845_v40 = vpop.f32.mrb[136].mxu0 }
 0x207   :  { %v3903_v53 = vpop.f32.mrb[136].mxu1  ;;  %v3846_v47 = vpop.f32.mrb[137].mxu0 }
 0x208   :  { %v3847_v24 = vadd.f32 %v3846_v47, %v3845_v40  ;;  %v3904_v17 = vpop.f32.mrb[137].mxu1  ;;  %v3848_v46 = vpop.f32.mrb[138].mxu0 }
 0x209   :  { %v3905_v30 = vadd.f32 %v3904_v17, %v3903_v53  ;;  %v3849_v61 = vpop.f32.mrb[139].mxu0  ;;  %v3906_v2 = vpop.f32.mrb[138].mxu1 }
 0x20a   :  { %v3907_v57 = vpop.f32.mrb[139].mxu1 }
 0x20b   :  { %v6215_v33 = vadd.f32 %v3905_v30, %v3847_v24 }
 0x20e   :  { %v3925_v29 = vpop.f32.mrb[140].mxu0 }
 0x20f   :  { %v3926_v14 = vpop.f32.mrb[141].mxu0  ;;  %v2361_v16 = vpop.f32.mrb[140].mxu1 }
 0x210   :  { %v3927_v37 = vadd.f32 %v3926_v14, %v3925_v29  ;;  %v3928_v50 = vpop.f32.mrb[142].mxu0  ;;  %v4229_v11 = vpop.f32.mrb[141].mxu1 }
 0x211   :  { %v3929_v13 = vpop.f32.mrb[143].mxu0  ;;  %v2364_v15 = vpop.f32.mrb[142].mxu1 }
 0x212   :  { %v3930_v27 = vadd.f32 %v3929_v13, %v3928_v50  ;;  %v2274_v62 = vadd.f32 %v3927_v37, %v6190_v20  ;;  %v4230_v40 = vpop.f32.mrb[143].mxu1 }
 0x214   :  { %v2362_v47 = vadd.f32 %v2361_v16, %v2274_v62  ;;  %v2277_v53 = vadd.f32 %v3930_v27, %v6193_v54 }
 0x216   :  { %v6222_v57 = vmax.f32 %v1743_v28, %v2362_v47  ;;  %v2365_v30 = vadd.f32 %v2364_v15, %v2277_v53  ;;  %v3931_v24 = vpop.f32.mrb[144].mxu0 }
 0x217   :  { %v3932_v17 = vpop.f32.mrb[145].mxu0  ;;  %v2369_v46 = vpop.f32.mrb[144].mxu1 }
 0x218   :  { %v6227_v61 = vmax.f32 %v1744_v32, %v2365_v30  ;;  %v3933_v2 = vadd.f32 %v3932_v17, %v3931_v24  ;;  %v3934_v20 = vpop.f32.mrb[146].mxu0  ;;  %v4233_v29 = vpop.f32.mrb[145].mxu1  ;;  %v6477_v24 = vmax.f32 %v5823_v35, %v6100_v55 }
 0x219   :  { %v3935_v62 = vpop.f32.mrb[147].mxu0  ;;  %v2372_v14 = vpop.f32.mrb[146].mxu1 }
 0x21a   :  { %v3936_v54 = vadd.f32 %v3935_v62, %v3934_v20  ;;  %v2282_v16 = vadd.f32 %v3933_v2, %v6195_v49  ;;  %v4234_v38 = vpop.f32.mrb[147].mxu1 }
 0x21c   :  { %v2370_v44 = vadd.f32 %v2369_v46, %v2282_v16  ;;  %v2285_v28 = vadd.f32 %v3936_v54, %v6197_v4 }
 0x21e   :  { %v6234_v37 = vmax.f32 %v1745_v5, %v2370_v44  ;;  %v2373_v34 = vadd.f32 %v2372_v14, %v2285_v28  ;;  %v3937_v25 = vpop.f32.mrb[148].mxu0  ;;  %v6478_v14 = vmax.f32 %v5842_v7, %v6114_v63  ;;  %v6479_v44 = vmax.f32 %v5849_v10, %v6122_v9 }
 0x21f   :  { %v3938_v32 = vpop.f32.mrb[149].mxu0  ;;  %v2377_v50 = vpop.f32.mrb[148].mxu1 }
 0x220   :  { %v6239_v11 = vmax.f32 %v1746_v39, %v2373_v34  ;;  %v3939_v13 = vadd.f32 %v3938_v32, %v3937_v25  ;;  %v3940_v49 = vpop.f32.mrb[150].mxu0  ;;  %v4237_v15 = vpop.f32.mrb[149].mxu1 }
 0x221   :  { %v3941_v27 = vpop.f32.mrb[151].mxu0  ;;  %v2380_v40 = vpop.f32.mrb[150].mxu1  ;;  %v6480_v15 = vmax.f32 %v5868_v18, %v6136_v26 }
 0x222   :  { %v3942_v4 = vadd.f32 %v3941_v27, %v3940_v49  ;;  %v2290_v47 = vadd.f32 %v3939_v13, %v6199_v22  ;;  %v4238_v36 = vpop.f32.mrb[151].mxu1 }
 0x224   :  { %v2378_v3 = vadd.f32 %v2377_v50, %v2290_v47  ;;  %v2293_v5 = vadd.f32 %v3942_v4, %v6201_v56  ;;  %v6481_v47 = vmax.f32 %v5875_v21, %v6144_v60 }
 0x226   :  { %v6246_v53 = vmax.f32 %v1747_v45, %v2378_v3  ;;  %v2381_v8 = vadd.f32 %v2380_v40, %v2293_v5  ;;  %v3943_v52 = vpop.f32.mrb[152].mxu0 }
 0x227   :  { %v3944_v39 = vpop.f32.mrb[153].mxu0  ;;  %v2385_v30 = vpop.f32.mrb[152].mxu1 }
 0x228   :  { %v6251_v17 = vmax.f32 %v6477_v24, %v2381_v8  ;;  %v3945_v46 = vadd.f32 %v3944_v39, %v3943_v52  ;;  %v3946_v22 = vpop.f32.mrb[154].mxu0  ;;  %v4241_v2 = vpop.f32.mrb[153].mxu1  ;;  %v6482_v24 = vmax.f32 %v5896_v59, %v6158_v51  ;;  %v6484_v51 = vmax.f32 %v5914_v1, %v6180_v41 }
 0x229   :  { %v3947_v20 = vpop.f32.mrb[155].mxu0  ;;  %v2388_v29 = vpop.f32.mrb[154].mxu1 }
 0x22a   :  { %v3948_v56 = vadd.f32 %v3947_v20, %v3946_v22  ;;  %v2298_v62 = vadd.f32 %v3945_v46, %v6203_v31  ;;  %v4242_v6 = vpop.f32.mrb[155].mxu1  ;;  %v6483_v20 = vmax.f32 %v5905_v42, %v6169_v58 }
 0x22c   :  { %v2386_v23 = vadd.f32 %v2385_v30, %v2298_v62  ;;  %v2301_v45 = vadd.f32 %v3948_v56, %v6205_v43 }
 0x22e   :  { %v6258_v54 = vmax.f32 %v6478_v14, %v2386_v23  ;;  %v2389_v35 = vadd.f32 %v2388_v29, %v2301_v45  ;;  %v3949_v55 = vpop.f32.mrb[156].mxu0 }
 0x22f   :  { %v3950_v16 = vpop.f32.mrb[157].mxu0  ;;  %v2393_v38 = vpop.f32.mrb[156].mxu1 }
 0x230   :  { %v6263_v28 = vmax.f32 %v6479_v44, %v2389_v35  ;;  %v3951_v34 = vadd.f32 %v3950_v16, %v3949_v55  ;;  %v3952_v31 = vpop.f32.mrb[158].mxu0  ;;  %v4245_v25 = vpop.f32.mrb[157].mxu1 }
 0x231   :  { %v3953_v32 = vpop.f32.mrb[159].mxu0  ;;  %v2396_v50 = vpop.f32.mrb[158].mxu1 }
 0x232   :  { %v3954_v43 = vadd.f32 %v3953_v32, %v3952_v31  ;;  %v2306_v13 = vadd.f32 %v3951_v34, %v6207_v19  ;;  %v4246_v7 = vpop.f32.mrb[159].mxu1 }
 0x234   :  { %v2394_v63 = vadd.f32 %v2393_v38, %v2306_v13  ;;  %v2309_v49 = vadd.f32 %v3954_v43, %v6209_v0 }
 0x236   :  { %v6270_v27 = vmax.f32 %v6480_v15, %v2394_v63  ;;  %v2397_v10 = vadd.f32 %v2396_v50, %v2309_v49  ;;  %v3955_v9 = vpop.f32.mrb[160].mxu0 }
 0x237   :  { %v3956_v40 = vpop.f32.mrb[161].mxu0  ;;  %v2401_v4 = vpop.f32.mrb[160].mxu1 }
 0x238   :  { %v6275_v36 = vmax.f32 %v6481_v47, %v2397_v10  ;;  %v3957_v3 = vadd.f32 %v3956_v40, %v3955_v9  ;;  %v3958_v19 = vpop.f32.mrb[162].mxu0  ;;  %v4249_v5 = vpop.f32.mrb[161].mxu1 }
 0x239   :  { %v3959_v8 = vpop.f32.mrb[163].mxu0  ;;  %v2404_v52 = vpop.f32.mrb[162].mxu1 }
 0x23a   :  { %v3960_v0 = vadd.f32 %v3959_v8, %v3958_v19  ;;  %v2314_v39 = vadd.f32 %v3957_v3, %v6211_v48  ;;  %v4250_v18 = vpop.f32.mrb[163].mxu1 }
 0x23c   :  { %v2402_v26 = vadd.f32 %v2401_v4, %v2314_v39  ;;  %v2317_v30 = vadd.f32 %v3960_v0, %v6213_v12 }
 0x23e   :  { %v6282_v46 = vmax.f32 %v6482_v24, %v2402_v26  ;;  %v2405_v21 = vadd.f32 %v2404_v52, %v2317_v30  ;;  %v3961_v60 = vpop.f32.mrb[164].mxu0 }
 0x23f   :  { %v3962_v22 = vpop.f32.mrb[165].mxu0  ;;  %v2409_v2 = vpop.f32.mrb[164].mxu1 }
 0x240   :  { %v6287_v29 = vmax.f32 %v6483_v20, %v2405_v21  ;;  %v3963_v56 = vadd.f32 %v3962_v22, %v3961_v60  ;;  %v3964_v48 = vpop.f32.mrb[166].mxu0  ;;  %v4253_v62 = vpop.f32.mrb[165].mxu1 }
 0x241   :  { %v3965_v6 = vpop.f32.mrb[167].mxu0  ;;  %v2412_v23 = vpop.f32.mrb[166].mxu1 }
 0x242   :  { %v2322_v12 = vadd.f32 %v3963_v56, %v6215_v33  ;;  %v4254_v45 = vpop.f32.mrb[167].mxu1 }
 0x244   :  { %v2410_v59 = vadd.f32 %v2409_v2, %v2322_v12 }
 0x246   :  { %v6293_v14 = vmax.f32 %v6484_v51, %v2410_v59  ;;  %v3992_v35 = vpop.f32.mrb[168].mxu0 }
 0x247   :  { %v4050_v55 = vpop.f32.mrb[168].mxu1  ;;  %v3993_v16 = vpop.f32.mrb[169].mxu0 }
 0x248   :  { %v3994_v42 = vadd.f32 %v3993_v16, %v3992_v35  ;;  %v4051_v58 = vpop.f32.mrb[169].mxu1  ;;  %v3995_v38 = vpop.f32.mrb[170].mxu0 }
 0x249   :  { %v4052_v44 = vadd.f32 %v4051_v58, %v4050_v55  ;;  %v4053_v34 = vpop.f32.mrb[170].mxu1  ;;  %v3996_v31 = vpop.f32.mrb[171].mxu0 }
 0x24a   :  { %v3997_v25 = vadd.f32 %v3996_v31, %v3995_v38  ;;  %v4054_v32 = vpop.f32.mrb[171].mxu1 }
 0x24b   :  { %v6295_v50 = vadd.f32 %v4052_v44, %v3994_v42  ;;  %v4055_v33 = vadd.f32 %v4054_v32, %v4053_v34 }
 0x24d   :  { %v6297_v43 = vadd.f32 %v4055_v33, %v3997_v25 }
 0x24e   :  { %v3998_v13 = vpop.f32.mrb[172].mxu0 }
 0x24f   :  { %v4056_v1 = vpop.f32.mrb[172].mxu1  ;;  %v3999_v41 = vpop.f32.mrb[173].mxu0 }
 0x250   :  { %v4000_v7 = vadd.f32 %v3999_v41, %v3998_v13  ;;  %v4057_v63 = vpop.f32.mrb[173].mxu1  ;;  %v4001_v49 = vpop.f32.mrb[174].mxu0 }
 0x251   :  { %v4058_v15 = vadd.f32 %v4057_v63, %v4056_v1  ;;  %v4059_v10 = vpop.f32.mrb[174].mxu1  ;;  %v4002_v9 = vpop.f32.mrb[175].mxu0 }
 0x252   :  { %v4003_v40 = vadd.f32 %v4002_v9, %v4001_v49  ;;  %v4060_v4 = vpop.f32.mrb[175].mxu1 }
 0x253   :  { %v6299_v47 = vadd.f32 %v4058_v15, %v4000_v7  ;;  %v4061_v3 = vadd.f32 %v4060_v4, %v4059_v10 }
 0x255   :  { %v6301_v19 = vadd.f32 %v4061_v3, %v4003_v40 }
 0x256   :  { %v4004_v5 = vpop.f32.mrb[176].mxu0 }
 0x257   :  { %v4062_v8 = vpop.f32.mrb[176].mxu1  ;;  %v4005_v52 = vpop.f32.mrb[177].mxu0 }
 0x258   :  { %v4006_v0 = vadd.f32 %v4005_v52, %v4004_v5  ;;  %v4063_v39 = vpop.f32.mrb[177].mxu1  ;;  %v4007_v18 = vpop.f32.mrb[178].mxu0 }
 0x259   :  { %v4064_v26 = vadd.f32 %v4063_v39, %v4062_v8  ;;  %v4065_v30 = vpop.f32.mrb[178].mxu1  ;;  %v4008_v24 = vpop.f32.mrb[179].mxu0 }
 0x25a   :  { %v4009_v21 = vadd.f32 %v4008_v24, %v4007_v18  ;;  %v4066_v60 = vpop.f32.mrb[179].mxu1 }
 0x25b   :  { %v6303_v22 = vadd.f32 %v4064_v26, %v4006_v0  ;;  %v4067_v2 = vadd.f32 %v4066_v60, %v4065_v30 }
 0x25d   :  { %v6305_v20 = vadd.f32 %v4067_v2, %v4009_v21 }
 0x25e   :  { %v4010_v56 = vpop.f32.mrb[180].mxu0 }
 0x25f   :  { %v4068_v48 = vpop.f32.mrb[180].mxu1  ;;  %v4011_v62 = vpop.f32.mrb[181].mxu0 }
 0x260   :  { %v4012_v6 = vadd.f32 %v4011_v62, %v4010_v56  ;;  %v4069_v23 = vpop.f32.mrb[181].mxu1  ;;  %v4013_v12 = vpop.f32.mrb[182].mxu0 }
 0x261   :  { %v4070_v45 = vadd.f32 %v4069_v23, %v4068_v48  ;;  %v4071_v59 = vpop.f32.mrb[182].mxu1  ;;  %v4014_v51 = vpop.f32.mrb[183].mxu0 }
 0x262   :  { %v4015_v35 = vadd.f32 %v4014_v51, %v4013_v12  ;;  %v4072_v55 = vpop.f32.mrb[183].mxu1 }
 0x263   :  { %v6307_v16 = vadd.f32 %v4070_v45, %v4012_v6  ;;  %v4073_v42 = vadd.f32 %v4072_v55, %v4071_v59 }
 0x265   :  { %v6309_v58 = vadd.f32 %v4073_v42, %v4015_v35 }
 0x266   :  { %v4016_v38 = vpop.f32.mrb[184].mxu0 }
 0x267   :  { %v4074_v44 = vpop.f32.mrb[184].mxu1  ;;  %v4017_v34 = vpop.f32.mrb[185].mxu0 }
 0x268   :  { %v4018_v31 = vadd.f32 %v4017_v34, %v4016_v38  ;;  %v4075_v25 = vpop.f32.mrb[185].mxu1  ;;  %v4019_v32 = vpop.f32.mrb[186].mxu0 }
 0x269   :  { %v4076_v33 = vadd.f32 %v4075_v25, %v4074_v44  ;;  %v4077_v13 = vpop.f32.mrb[186].mxu1  ;;  %v4020_v1 = vpop.f32.mrb[187].mxu0 }
 0x26a   :  { %v4021_v41 = vadd.f32 %v4020_v1, %v4019_v32  ;;  %v4078_v7 = vpop.f32.mrb[187].mxu1 }
 0x26b   :  { %v6311_v63 = vadd.f32 %v4076_v33, %v4018_v31  ;;  %v4079_v49 = vadd.f32 %v4078_v7, %v4077_v13 }
 0x26d   :  { %v6313_v15 = vadd.f32 %v4079_v49, %v4021_v41  ;;  %v6326_v41 = vld [vmem:[%s6421_s5] ss:$0 sm:$0xff] }
 0x26e   :  { %v4022_v10 = vpop.f32.mrb[188].mxu0 }
 0x26f   :  { %v4080_v9 = vpop.f32.mrb[188].mxu1  ;;  %v4023_v40 = vpop.f32.mrb[189].mxu0 }
 0x270   :  { %v4024_v4 = vadd.f32 %v4023_v40, %v4022_v10  ;;  %v4081_v3 = vpop.f32.mrb[189].mxu1  ;;  %v4025_v5 = vpop.f32.mrb[190].mxu0 }
 0x271   :  { %v4082_v8 = vadd.f32 %v4081_v3, %v4080_v9  ;;  %v4083_v52 = vpop.f32.mrb[190].mxu1  ;;  %v4026_v0 = vpop.f32.mrb[191].mxu0 }
 0x272   :  { %v4027_v39 = vadd.f32 %v4026_v0, %v4025_v5  ;;  %v4084_v18 = vpop.f32.mrb[191].mxu1 }
 0x273   :  { %v6315_v26 = vadd.f32 %v4082_v8, %v4024_v4  ;;  %v4085_v30 = vadd.f32 %v4084_v18, %v4083_v52 }
 0x275   :  { %v6317_v24 = vadd.f32 %v4085_v30, %v4027_v39 }
 0x276   :  { %v4028_v21 = vpop.f32.mrb[192].mxu0 }
 0x277   :  { %v4086_v60 = vpop.f32.mrb[192].mxu1  ;;  %v4029_v2 = vpop.f32.mrb[193].mxu0 }
 0x278   :  { %v4030_v56 = vadd.f32 %v4029_v2, %v4028_v21  ;;  %v4087_v48 = vpop.f32.mrb[193].mxu1  ;;  %v4031_v62 = vpop.f32.mrb[194].mxu0 }
 0x279   :  { %v4088_v6 = vadd.f32 %v4087_v48, %v4086_v60  ;;  %v4032_v23 = vpop.f32.mrb[195].mxu0  ;;  %v4089_v12 = vpop.f32.mrb[194].mxu1 }
 0x27a   :  { %v4090_v45 = vpop.f32.mrb[195].mxu1 }
 0x27b   :  { %v6319_v59 = vadd.f32 %v4088_v6, %v4030_v56 }
 0x27e   :  { %v4108_v51 = vpop.f32.mrb[196].mxu0 }
 0x27f   :  { %v4109_v35 = vpop.f32.mrb[197].mxu0  ;;  %v3033_v55 = vpop.f32.mrb[196].mxu1 }
 0x280   :  { %v4110_v42 = vadd.f32 %v4109_v35, %v4108_v51  ;;  %v4111_v38 = vpop.f32.mrb[198].mxu0  ;;  %v4261_v44 = vpop.f32.mrb[197].mxu1 }
 0x281   :  { %v4112_v34 = vpop.f32.mrb[199].mxu0  ;;  %v3036_v31 = vpop.f32.mrb[198].mxu1 }
 0x282   :  { %v4113_v25 = vadd.f32 %v4112_v34, %v4111_v38  ;;  %v2946_v32 = vadd.f32 %v4110_v42, %v6295_v50  ;;  %v4262_v33 = vpop.f32.mrb[199].mxu1 }
 0x284   :  { %v3034_v13 = vadd.f32 %v3033_v55, %v2946_v32  ;;  %v2949_v1 = vadd.f32 %v4113_v25, %v6297_v43 }
 0x286   :  { %v3087_v7 = vmax.f32 %v6222_v57, %v3034_v13  ;;  %v3037_v49 = vadd.f32 %v3036_v31, %v2949_v1  ;;  %v4114_v10 = vpop.f32.mrb[200].mxu0 }
 0x287   :  { %v4115_v9 = vpop.f32.mrb[201].mxu0  ;;  %v3041_v40 = vpop.f32.mrb[200].mxu1 }
 0x288   :  { %v3107_v4 = vadd.f32 %v6326_v41, %v3087_v7  ;;  %v3088_v3 = vmax.f32 %v6227_v61, %v3037_v49  ;;  %v4116_v50 = vadd.f32 %v4115_v9, %v4114_v10  ;;  %v4117_v5 = vpop.f32.mrb[202].mxu0  ;;  %v4265_v8 = vpop.f32.mrb[201].mxu1 }
 0x289   :  { %v4118_v43 = vpop.f32.mrb[203].mxu0  ;;  %v3044_v52 = vpop.f32.mrb[202].mxu1 }
 0x28a   :  { %v3120_v0 = vmax.f32 %v3107_v4, 0.0  ;;  %v3108_v39 = vadd.f32 %v6326_v41, %v3088_v3  ;;  %v4119_v18 = vadd.f32 %v4118_v43, %v4117_v5  ;;  %v2954_v57 = vadd.f32 %v4116_v50, %v6299_v47  ;;  %v4266_v30 = vpop.f32.mrb[203].mxu1 }
 0x28c   :  { %3134 = vst.msk [vmem:[%s6422_s6] sm:$0xff] %vm3133_vm2, %v3120_v0  ;;  %v3121_v21 = vmax.f32 %v3108_v39, 0.0  ;;  %v3042_v61 = vadd.f32 %v3041_v40, %v2954_v57  ;;  %v2957_v60 = vadd.f32 %v4119_v18, %v6301_v19 }
 0x28e   :  { %3135 = vst.msk [vmem:[%s6422_s6 + $0x8] sm:$0xff] %vm3133_vm2, %v3121_v21  ;;  %v3089_v2 = vmax.f32 %v6234_v37, %v3042_v61  ;;  %v3045_v56 = vadd.f32 %v3044_v52, %v2957_v60  ;;  %v4120_v48 = vpop.f32.mrb[204].mxu0 }
 0x28f   :  { %v4121_v47 = vpop.f32.mrb[205].mxu0  ;;  %v3049_v62 = vpop.f32.mrb[204].mxu1 }
 0x290   :  { %v3109_v6 = vadd.f32 %v6326_v41, %v3089_v2  ;;  %v3090_v23 = vmax.f32 %v6239_v11, %v3045_v56  ;;  %v4122_v12 = vadd.f32 %v4121_v47, %v4120_v48  ;;  %v4123_v45 = vpop.f32.mrb[206].mxu0  ;;  %v4269_v51 = vpop.f32.mrb[205].mxu1 }
 0x291   :  { %v4124_v35 = vpop.f32.mrb[207].mxu0  ;;  %v3052_v19 = vpop.f32.mrb[206].mxu1 }
 0x292   :  { %v3122_v55 = vmax.f32 %v3109_v6, 0.0  ;;  %v3110_v42 = vadd.f32 %v6326_v41, %v3090_v23  ;;  %v4125_v38 = vadd.f32 %v4124_v35, %v4123_v45  ;;  %v2962_v44 = vadd.f32 %v4122_v12, %v6303_v22  ;;  %v4270_v37 = vpop.f32.mrb[207].mxu1 }
 0x294   :  { %3136 = vst.msk [vmem:[%s6422_s6 + $0x10] sm:$0xff] %vm3133_vm2, %v3122_v55  ;;  %v3123_v34 = vmax.f32 %v3110_v42, 0.0  ;;  %v3050_v31 = vadd.f32 %v3049_v62, %v2962_v44  ;;  %v2965_v11 = vadd.f32 %v4125_v38, %v6305_v20 }
 0x296   :  { %3137 = vst.msk [vmem:[%s6422_s6 + $0x18] sm:$0xff] %vm3133_vm2, %v3123_v34  ;;  %v3091_v25 = vmax.f32 %v6246_v53, %v3050_v31  ;;  %v3053_v32 = vadd.f32 %v3052_v19, %v2965_v11  ;;  %v4126_v33 = vpop.f32.mrb[208].mxu0 }
 0x297   :  { %v4127_v22 = vpop.f32.mrb[209].mxu0  ;;  %v3057_v13 = vpop.f32.mrb[208].mxu1 }
 0x298   :  { %v3111_v1 = vadd.f32 %v6326_v41, %v3091_v25  ;;  %v3092_v7 = vmax.f32 %v6251_v17, %v3053_v32  ;;  %v4128_v49 = vadd.f32 %v4127_v22, %v4126_v33  ;;  %v4129_v10 = vpop.f32.mrb[210].mxu0  ;;  %v4273_v9 = vpop.f32.mrb[209].mxu1 }
 0x299   :  { %v4130_v40 = vpop.f32.mrb[211].mxu0  ;;  %v3060_v20 = vpop.f32.mrb[210].mxu1 }
 0x29a   :  { %v3124_v4 = vmax.f32 %v3111_v1, 0.0  ;;  %v3112_v3 = vadd.f32 %v6326_v41, %v3092_v7  ;;  %v4131_v50 = vadd.f32 %v4130_v40, %v4129_v10  ;;  %v2970_v5 = vadd.f32 %v4128_v49, %v6307_v16  ;;  %v4274_v53 = vpop.f32.mrb[211].mxu1 }
 0x29c   :  { %3138 = vst.msk [vmem:[%s6422_s6 + $0x20] sm:$0xff] %vm3133_vm2, %v3124_v4  ;;  %v3125_v8 = vmax.f32 %v3112_v3, 0.0  ;;  %v3058_v43 = vadd.f32 %v3057_v13, %v2970_v5  ;;  %v2973_v17 = vadd.f32 %v4131_v50, %v6309_v58 }
 0x29e   :  { %3139 = vst.msk [vmem:[%s6422_s6 + $0x28] sm:$0xff] %vm3133_vm2, %v3125_v8  ;;  %v3093_v52 = vmax.f32 %v6258_v54, %v3058_v43  ;;  %v3061_v0 = vadd.f32 %v3060_v20, %v2973_v17  ;;  %v4132_v39 = vpop.f32.mrb[212].mxu0 }
 0x29f   :  { %v4133_v16 = vpop.f32.mrb[213].mxu0  ;;  %v3065_v18 = vpop.f32.mrb[212].mxu1 }
 0x2a0   :  { %v3113_v57 = vadd.f32 %v6326_v41, %v3093_v52  ;;  %v3094_v30 = vmax.f32 %v6263_v28, %v3061_v0  ;;  %v4134_v21 = vadd.f32 %v4133_v16, %v4132_v39  ;;  %v4135_v61 = vpop.f32.mrb[214].mxu0  ;;  %v4277_v60 = vpop.f32.mrb[213].mxu1 }
 0x2a1   :  { %v4136_v2 = vpop.f32.mrb[215].mxu0  ;;  %v3068_v58 = vpop.f32.mrb[214].mxu1 }
 0x2a2   :  { %v3126_v56 = vmax.f32 %v3113_v57, 0.0  ;;  %v3114_v48 = vadd.f32 %v6326_v41, %v3094_v30  ;;  %v4137_v47 = vadd.f32 %v4136_v2, %v4135_v61  ;;  %v2978_v62 = vadd.f32 %v4134_v21, %v6311_v63  ;;  %v4278_v54 = vpop.f32.mrb[215].mxu1 }
 0x2a4   :  { %3140 = vst.msk [vmem:[%s6422_s6 + $0x30] sm:$0xff] %vm3133_vm2, %v3126_v56  ;;  %v3127_v6 = vmax.f32 %v3114_v48, 0.0  ;;  %v3066_v23 = vadd.f32 %v3065_v18, %v2978_v62  ;;  %v2981_v28 = vadd.f32 %v4137_v47, %v6313_v15 }
 0x2a6   :  { %3141 = vst.msk [vmem:[%s6422_s6 + $0x38] sm:$0xff] %vm3133_vm2, %v3127_v6  ;;  %v3095_v12 = vmax.f32 %v6270_v27, %v3066_v23  ;;  %v3069_v45 = vadd.f32 %v3068_v58, %v2981_v28  ;;  %v4138_v51 = vpop.f32.mrb[216].mxu0 }
 0x2a7   :  { %v4139_v63 = vpop.f32.mrb[217].mxu0  ;;  %v3073_v35 = vpop.f32.mrb[216].mxu1 }
 0x2a8   :  { %v3115_v19 = vadd.f32 %v6326_v41, %v3095_v12  ;;  %v3096_v55 = vmax.f32 %v6275_v36, %v3069_v45  ;;  %v4140_v42 = vadd.f32 %v4139_v63, %v4138_v51  ;;  %v4141_v38 = vpop.f32.mrb[218].mxu0  ;;  %v4281_v44 = vpop.f32.mrb[217].mxu1 }
 0x2a9   :  { %v4142_v37 = vpop.f32.mrb[219].mxu0  ;;  %v3076_v15 = vpop.f32.mrb[218].mxu1 }
 0x2aa   :  { %v3128_v34 = vmax.f32 %v3115_v19, 0.0  ;;  %v3116_v31 = vadd.f32 %v6326_v41, %v3096_v55  ;;  %v4143_v11 = vadd.f32 %v4142_v37, %v4141_v38  ;;  %v2986_v25 = vadd.f32 %v4140_v42, %v6315_v26  ;;  %v4282_v27 = vpop.f32.mrb[219].mxu1 }
 0x2ac   :  { %3142 = vst.msk [vmem:[%s6422_s6 + $0x40] sm:$0xff] %vm3133_vm2, %v3128_v34  ;;  %v3129_v32 = vmax.f32 %v3116_v31, 0.0  ;;  %v3074_v33 = vadd.f32 %v3073_v35, %v2986_v25  ;;  %v2989_v36 = vadd.f32 %v4143_v11, %v6317_v24 }
 0x2ae   :  { %3143 = vst.msk [vmem:[%s6422_s6 + $0x48] sm:$0xff] %vm3133_vm2, %v3129_v32  ;;  %v3097_v22 = vmax.f32 %v6282_v46, %v3074_v33  ;;  %v3077_v13 = vadd.f32 %v3076_v15, %v2989_v36  ;;  %v4144_v1 = vpop.f32.mrb[220].mxu0 }
 0x2af   :  { %v4145_v26 = vpop.f32.mrb[221].mxu0  ;;  %v3081_v7 = vpop.f32.mrb[220].mxu1 }
 0x2b0   :  { %v3117_v49 = vadd.f32 %v6326_v41, %v3097_v22  ;;  %v3098_v10 = vmax.f32 %v6287_v29, %v3077_v13  ;;  %v4146_v9 = vadd.f32 %v4145_v26, %v4144_v1  ;;  %v4147_v40 = vpop.f32.mrb[222].mxu0  ;;  %v4285_v20 = vpop.f32.mrb[221].mxu1 }
 0x2b1   :  { %v4148_v4 = vpop.f32.mrb[223].mxu0  ;;  %v3084_v24 = vpop.f32.mrb[222].mxu1 }
 0x2b2   :  { %v3130_v3 = vmax.f32 %v3117_v49, 0.0  ;;  %v3118_v50 = vadd.f32 %v6326_v41, %v3098_v10  ;;  %v2994_v5 = vadd.f32 %v4146_v9, %v6319_v59  ;;  %v4286_v53 = vpop.f32.mrb[223].mxu1 }
 0x2b4   :  { %3144 = vst.msk [vmem:[%s6422_s6 + $0x50] sm:$0xff] %vm3133_vm2, %v3130_v3  ;;  %v3131_v46 = vmax.f32 %v3118_v50, 0.0  ;;  %v3082_v8 = vadd.f32 %v3081_v7, %v2994_v5 }
 0x2b6   :  { %3145 = vst.msk [vmem:[%s6422_s6 + $0x58] sm:$0xff] %vm3133_vm2, %v3131_v46  ;;  %v3099_v29 = vmax.f32 %v6293_v14, %v3082_v8 }
 0x2b8   :  { %v3119_v43 = vadd.f32 %v6326_v41, %v3099_v29 }
 0x2ba   :  { %v3132_v17 = vmax.f32 %v3119_v43, 0.0 }
 0x2bc   :  { %3147 = vst.msk [vmem:[%s6422_s6 + $0x60] sm:$0xf] %vm3146_vm3, %v3132_v17 }

// kernel: siamese_forward.17
= control target key start
LH: loop header
LB: loop body
LE: loop exit
PB: predicated region body
PF: predicated region fallthrough
CT: control target
= control target key end

     0   :  { %v1168_v34 = vmov 0.0   ;;  %vm1169_vm0 = vmmov 0   ;;  %vm516_vm1 = vcmask 523264   ;;  %vm827_vm2 = vcmask 519168   ;;  %s1519_s1 = inlined_call_operand.vmem [shape: bf16[576,64], index: 1, kind: input, shape index: {}]   ;;  %s1520_s0 = inlined_call_operand.vmem [shape: bf16[100,576], index: 0, kind: input, shape index: {}]   ;;  %s1521_s2 = inlined_call_operand.vmem [shape: f32[1,64], index: 2, kind: input, shape index: {}]   ;;  %s1522_s3 = inlined_call_operand.vmem [shape: f32[100,64], index: 3, kind: output, shape index: {}]  }
   0x1   :  { %v1085_v0 = vld [vmem:[%s1519_s1 + $0x40] sm:$0xff]   ;;  %v1089_v4 = vld [vmem:[%s1519_s1 + $0x48] sm:$0xff]   ;;  %v1093_v8 = vld [vmem:[%s1519_s1 + $0x50] sm:$0xff]  }
   0x2   :  { %v1086_v1 = vld [vmem:[%s1519_s1 + $0xc0] sm:$0xff]   ;;  %912 = vmatprep.subr.bf16.mxu0 %v1085_v0  ;;  %v1090_v5 = vld [vmem:[%s1519_s1 + $0xc8] sm:$0xff]   ;;  %v1094_v9 = vld [vmem:[%s1519_s1 + $0xd0] sm:$0xff]  }
   0x3   :  { %v1087_v2 = vld [vmem:[%s1519_s1] sm:$0xff]   ;;  %970 = vmatprep.subr.bf16.mxu1 %v1086_v1  ;;  %v1091_v6 = vld [vmem:[%s1519_s1 + $0x8] sm:$0xff]   ;;  %v1095_v10 = vld [vmem:[%s1519_s1 + $0x10] sm:$0xff]  }
   0x4   :  { %v1088_v3 = vld [vmem:[%s1519_s1 + $0x80] sm:$0xff]   ;;  %913 = vmatpush3.bf16.msra.mxu0 %v1087_v2  ;;  %v1092_v7 = vld [vmem:[%s1519_s1 + $0x88] sm:$0xff]   ;;  %v1096_v11 = vld [vmem:[%s1519_s1 + $0x90] sm:$0xff]  }
   0x5   :  { %971 = vmatpush3.bf16.msra.mxu1 %v1088_v3  ;;  %914 = vmatprep.subr.bf16.mxu0 %v1089_v4  ;;  %v1097_v12 = vld [vmem:[%s1519_s1 + $0x58] sm:$0xff]   ;;  %v1101_v16 = vld [vmem:[%s1519_s1 + $0x60] sm:$0xff]   ;;  %v1105_v20 = vld [vmem:[%s1519_s1 + $0x68] sm:$0xff]  }
   0x6   :  { %972 = vmatprep.subr.bf16.mxu1 %v1090_v5  ;;  %v1098_v13 = vld [vmem:[%s1519_s1 + $0xd8] sm:$0xff]   ;;  %v1102_v17 = vld [vmem:[%s1519_s1 + $0xe0] sm:$0xff]   ;;  %v1106_v21 = vld [vmem:[%s1519_s1 + $0xe8] sm:$0xff]  }
   0x7   :  { %v1099_v14 = vld [vmem:[%s1519_s1 + $0x18] sm:$0xff]   ;;  %v1103_v18 = vld [vmem:[%s1519_s1 + $0x20] sm:$0xff]   ;;  %v1107_v22 = vld [vmem:[%s1519_s1 + $0x28] sm:$0xff]  }
   0x8   :  { %915 = vmatpush3.bf16.msra.mxu0 %v1091_v6  ;;  %v1100_v15 = vld [vmem:[%s1519_s1 + $0x98] sm:$0xff]   ;;  %v1104_v19 = vld [vmem:[%s1519_s1 + $0xa0] sm:$0xff]   ;;  %v1108_v23 = vld [vmem:[%s1519_s1 + $0xa8] sm:$0xff]  }
   0x9   :  { %973 = vmatpush3.bf16.msra.mxu1 %v1092_v7  ;;  %916 = vmatprep.subr.bf16.mxu0 %v1093_v8  ;;  %v1109_v24 = vld [vmem:[%s1519_s1 + $0x70] sm:$0xff]   ;;  %v1113_v28 = vld [vmem:[%s1519_s1 + $0x78] sm:$0xff]   ;;  %v1122_v36 = vld [vmem:[%s1520_s0 + $0xc] ss:$20 sps:$4 sm:$0xff]  }
   0xa   :  { %974 = vmatprep.subr.bf16.mxu1 %v1094_v9  ;;  %v1110_v25 = vld [vmem:[%s1519_s1 + $0xf0] sm:$0xff]   ;;  %v1114_v29 = vld [vmem:[%s1519_s1 + $0xf8] sm:$0xff]   ;;  %v1123_v37 = vld [vmem:[%s1519_s1 + $0x100] sm:$0xff]   ;;  %658 = vmatprep.mubr.bf16.mxu1 %v1122_v36 }
   0xb   :  { %v1111_v26 = vld [vmem:[%s1519_s1 + $0x30] sm:$0xff]   ;;  %v1115_v30 = vld [vmem:[%s1519_s1 + $0x38] sm:$0xff]   ;;  %v1124_v38 = vld [vmem:[%s1520_s0 + $0x2c] ss:$20 sps:$4 sm:$0xff]  }
   0xc   :  { %917 = vmatpush3.bf16.msra.mxu0 %v1095_v10  ;;  %v1112_v27 = vld [vmem:[%s1519_s1 + $0xb0] sm:$0xff]   ;;  %v1116_v31 = vld [vmem:[%s1519_s1 + $0xb8] sm:$0xff]   ;;  %v1134_v43 = vld [vmem:[%s1519_s1 + $0x108] sm:$0xff]  }
   0xd   :  { %975 = vmatpush3.bf16.msra.mxu1 %v1096_v11  ;;  %918 = vmatprep.subr.bf16.mxu0 %v1097_v12  ;;  %v1117_v32 = vld [vmem:[%s1520_s0] ss:$20 sps:$4 sm:$0xff]   ;;  %v1119_v33 = vld [vmem:[%s1520_s0 + $0x4] ss:$20 sps:$4 sm:$0xff]   ;;  %v1120_v35 = vld [vmem:[%s1520_s0 + $0x8] ss:$20 sps:$4 sm:$0xff]  }
   0xe   :  { %976 = vmatprep.subr.bf16.mxu1 %v1098_v13  ;;  %570 = vmatprep.mubr.bf16.mxu0 %v1119_v33  ;;  %v1126_v39 = vld [vmem:[%s1520_s0 + $0x34] ss:$20 sps:$4 sm:$0xff]   ;;  %v1129_v41 = vld [vmem:[%s1520_s0 + $0x30] ss:$20 sps:$4 sm:$0xff]   ;;  %v1136_v47 = vld [vmem:[%s1520_s0 + $0x58] ss:$20 sps:$4 sm:$0xff]  }
   0xf   :  { %v1128_v40 = vld [vmem:[%s1520_s0 + $0x28] ss:$20 sps:$4 sm:$0xff]   ;;  %v1143_v45 = vld [vmem:[%s1519_s1 + $0x110] sm:$0xff]   ;;  %v1139_v49 = vld [vmem:[%s1520_s0 + $0x84] ss:$20 sps:$4 sm:$0xff]  }
  0x10   :  { %919 = vmatpush3.bf16.msra.mxu0 %v1099_v14  ;;  %v1130_v42 = vld [vmem:[%s1520_s0 + $0x54] ss:$20 sps:$4 sm:$0xff]   ;;  %v1132_v44 = vld [vmem:[%s1520_s0 + $0x5c] ss:$20 sps:$4 sm:$0xff]   ;;  %v1141_v51 = vld [vmem:[%s1520_s0 + $0x78] ss:$20 sps:$4 sm:$0xff]  }
  0x11   :  { %977 = vmatpush3.bf16.msra.mxu1 %v1100_v15  ;;  %920 = vmatprep.subr.bf16.mxu0 %v1101_v16  ;;  %v1135_v46 = vld [vmem:[%s1520_s0 + $0x50] ss:$20 sps:$4 sm:$0xff]   ;;  %v1156_v50 = vld [vmem:[%s1519_s1 + $0x118] sm:$0xff]   ;;  %v1142_v52 = vld [vmem:[%s1520_s0 + $0x80] ss:$20 sps:$4 sm:$0xff]  }
  0x12   :  { %978 = vmatprep.subr.bf16.mxu1 %v1102_v17  ;;  %v1137_v48 = vld [vmem:[%s1520_s0 + $0x7c] ss:$20 sps:$4 sm:$0xff]   ;;  %v1144_v53 = vld [vmem:[%s1520_s0 + $0xa4] ss:$20 sps:$4 sm:$0xff]   ;;  %v1146_v54 = vld [vmem:[%s1520_s0 + $0xac] ss:$20 sps:$4 sm:$0xff]  }
  0x13   :  { %v1148_v55 = vld [vmem:[%s1520_s0 + $0xa0] ss:$20 sps:$4 sm:$0xff]   ;;  %v1149_v56 = vld [vmem:[%s1520_s0 + $0xa8] ss:$20 sps:$4 sm:$0xff]   ;;  %v1155_v62 = vld [vmem:[%s1520_s0 + $0xd0] ss:$20 sps:$4 sm:$0xff]  }
  0x14   :  { %921 = vmatpush3.bf16.msra.mxu0 %v1103_v18  ;;  %v1150_v57 = vld [vmem:[%s1520_s0 + $0xcc] ss:$20 sps:$4 sm:$0xff]   ;;  %v1152_v58 = vld [vmem:[%s1520_s0 + $0xd4] ss:$20 sps:$4 sm:$0xff]   ;;  %v52_v60 = vld [vmem:[%s1520_s0 + $0xf8] sm:$0x33] }
  0x15   :  { %979 = vmatpush3.bf16.msra.mxu1 %v1104_v19  ;;  %922 = vmatprep.subr.bf16.mxu0 %v1105_v20  ;;  %v51_v59 = vld [vmem:[%s1520_s0 + $0xf0] sm:$0x33]  ;;  %v1154_v61 = vld [vmem:[%s1520_s0 + $0xc8] ss:$20 sps:$4 sm:$0xff]   ;;  %v867_v0 = vcombine.high %v52_v60, %v52_v60  ;;  %v866_v2 = vcombine.low %v52_v60, %v52_v60  ;;  %v1163_v5 = vld [vmem:[%s1520_s0 + $0x38] ss:$20 sps:$4 sm:$0xff]  }
  0x16   :  { %980 = vmatprep.subr.bf16.mxu1 %v1106_v21  ;;  %v865_v63 = vcombine.high %v51_v59, %v51_v59  ;;  %v864_v1 = vcombine.low %v51_v59, %v51_v59  ;;  %v1161_v3 = vld [vmem:[%s1520_s0 + $0x10] ss:$20 sps:$4 sm:$0xff]   ;;  %v1164_v6 = vld [vmem:[%s1520_s0 + $0xd8] ss:$20 sps:$4 sm:$0xff]   ;;  %v1165_v7 = vld [vmem:[%s1520_s0 + $0x60] ss:$20 sps:$4 sm:$0xff]  }
  0x17   :  { %v1162_v4 = vld [vmem:[%s1520_s0 + $0xb0] ss:$20 sps:$4 sm:$0xff]   ;;  %v1166_v8 = vld [vmem:[%s1520_s0 + $0x100] ss:$0 sps:$4 sm:$0x33]  }
  0x18   :  { %923 = vmatpush3.bf16.msra.mxu0 %v1107_v22  ;;  %v1167_v9 = vld [vmem:[%s1520_s0 + $0x88] ss:$20 sps:$4 sm:$0xff]   ;;  %v1429_v11 = vld [vmem:[%s1521_s2] ss:$0 sm:$0xff] }
  0x19   :  { %981 = vmatpush3.bf16.msra.mxu1 %v1108_v23  ;;  %924 = vmatprep.subr.bf16.mxu0 %v1109_v24 }
  0x1a   :  { %982 = vmatprep.subr.bf16.mxu1 %v1110_v25 }
  0x1c   :  { %925 = vmatpush3.bf16.msra.mxu0 %v1111_v26 }
  0x1d   :  { %983 = vmatpush3.bf16.msra.mxu1 %v1112_v27  ;;  %926 = vmatprep.subr.bf16.mxu0 %v1113_v28 }
  0x1e   :  { %984 = vmatprep.subr.bf16.mxu1 %v1114_v29 }
  0x20   :  { %927 = vmatpush3.bf16.msra.mxu0 %v1115_v30 }
  0x21   :  { %985 = vmatpush3.bf16.msra.mxu1 %v1116_v31  ;;  %1039 = vmatprep.subr.bf16.mxu0 %v1168_v34 }
  0x22   :  { %1075 = vmatprep.subr.bf16.mxu1 %v1168_v34 }
  0x23   :  { %571 = vmatmul.mubr.bf16.vlgmr.msra.gmra.mrb[0].mxu0 %v1117_v32 }
  0x24   :  { %659 = vmatmul.mubr.bf16.vlgmr.msra.gmra.mrb[0].mxu1 %v1120_v35  ;;  %1040 = vmatpush3.bf16.msra.mxu0 %v1123_v37 }
  0x25   :  { %578 = vmatprep.mubr.bf16.mxu0 %v1124_v38  ;;  %1079 = vmatpush3.bf16.msra.mxu1 %v1123_v37 }
  0x26   :  { %666 = vmatprep.mubr.bf16.mxu1 %v1126_v39  ;;  %1041 = vmatprep.subr.bf16.mxu0 %v1168_v34 }
  0x27   :  { %1076 = vmatprep.subr.bf16.mxu1 %v1168_v34 }
  0x28   :  { %1042 = vmatpush3.bf16.msra.mxu0 %v1134_v43 }
  0x29   :  { %1080 = vmatpush3.bf16.msra.mxu1 %v1134_v43  ;;  %1043 = vmatprep.subr.bf16.mxu0 %v1168_v34 }
  0x2a   :  { %1077 = vmatprep.subr.bf16.mxu1 %v1168_v34 }
  0x2b   :  { %579 = vmatmul.mubr.bf16.gmra.mrb[4].mxu0 %v1128_v40 }
  0x2c   :  { %667 = vmatmul.mubr.bf16.gmra.mrb[4].mxu1 %v1129_v41  ;;  %586 = vmatprep.mubr.bf16.mxu0 %v1130_v42 }
  0x2d   :  { %674 = vmatprep.mubr.bf16.mxu1 %v1132_v44  ;;  %1044 = vmatpush3.bf16.msra.mxu0 %v1143_v45 }
  0x2e   :  { %1081 = vmatpush3.bf16.msra.mxu1 %v1143_v45  ;;  %1045 = vmatprep.subr.bf16.mxu0 %v1168_v34 }
  0x2f   :  { %1078 = vmatprep.subr.bf16.mxu1 %v1168_v34 }
  0x31   :  { %1046 = vmatpush3.bf16.msra.mxu0 %v1156_v50 }
  0x32   :  { %1082 = vmatpush3.bf16.msra.mxu1 %v1156_v50 }
  0x33   :  { %587 = vmatmul.mubr.bf16.gmra.mrb[8].mxu0 %v1135_v46 }
  0x34   :  { %675 = vmatmul.mubr.bf16.gmra.mrb[8].mxu1 %v1136_v47  ;;  %594 = vmatprep.mubr.bf16.mxu0 %v1137_v48 }
  0x35   :  { %682 = vmatprep.mubr.bf16.mxu1 %v1139_v49 }
  0x3b   :  { %595 = vmatmul.mubr.bf16.gmra.mrb[12].mxu0 %v1141_v51 }
  0x3c   :  { %683 = vmatmul.mubr.bf16.gmra.mrb[12].mxu1 %v1142_v52  ;;  %602 = vmatprep.mubr.bf16.mxu0 %v1144_v53 }
  0x3d   :  { %690 = vmatprep.mubr.bf16.mxu1 %v1146_v54 }
  0x43   :  { %603 = vmatmul.mubr.bf16.gmra.mrb[16].mxu0 %v1148_v55 }
  0x44   :  { %691 = vmatmul.mubr.bf16.gmra.mrb[16].mxu1 %v1149_v56  ;;  %610 = vmatprep.mubr.bf16.mxu0 %v1150_v57 }
  0x45   :  { %698 = vmatprep.mubr.bf16.mxu1 %v1152_v58 }
  0x4b   :  { %611 = vmatmul.mubr.bf16.gmra.mrb[20].mxu0 %v1154_v61 }
  0x4c   :  { %699 = vmatmul.mubr.bf16.gmra.mrb[20].mxu1 %v1155_v62  ;;  %618 = vmatprep.mubr.bf16.mxu0 %v865_v63 }
  0x4d   :  { %706 = vmatprep.mubr.bf16.mxu1 %v867_v0 }
  0x53   :  { %619 = vmatmul.mubr.bf16.gmra.mrb[24].mxu0 %v864_v1 }
  0x54   :  { %707 = vmatmul.mubr.bf16.gmra.mrb[24].mxu1 %v866_v2  ;;  %1047 = vmatprep.mubr.msk.bf16.mxu0 %vm1169_vm0, %v1168_v34 }
  0x55   :  { %1063 = vmatprep.mubr.msk.bf16.mxu1 %vm1169_vm0, %v1168_v34 }
  0x5b   :  { %1048 = vmatmul.mubr.msk.bf16.vlgmr.msra.gmra.mrb[28].mxu0 %vm516_vm1, %v1161_v3 }
  0x5c   :  { %1064 = vmatmul.mubr.msk.bf16.vlgmr.msra.gmra.mrb[28].mxu1 %vm516_vm1, %v1162_v4  ;;  %1051 = vmatprep.mubr.msk.bf16.mxu0 %vm1169_vm0, %v1168_v34 }
  0x5d   :  { %1067 = vmatprep.mubr.msk.bf16.mxu1 %vm1169_vm0, %v1168_v34 }
  0x63   :  { %1052 = vmatmul.mubr.msk.bf16.gmra.mrb[32].mxu0 %vm516_vm1, %v1163_v5 }
  0x64   :  { %1068 = vmatmul.mubr.msk.bf16.gmra.mrb[32].mxu1 %vm516_vm1, %v1164_v6  ;;  %1055 = vmatprep.mubr.msk.bf16.mxu0 %vm1169_vm0, %v1168_v34 }
  0x65   :  { %1071 = vmatprep.mubr.msk.bf16.mxu1 %vm1169_vm0, %v1168_v34 }
  0x6b   :  { %1056 = vmatmul.mubr.msk.bf16.gmra.mrb[36].mxu0 %vm516_vm1, %v1165_v7 }
  0x6c   :  { %1072 = vmatmul.mubr.msk.bf16.gmra.mrb[36].mxu1 %vm516_vm1, %v1166_v8  ;;  %1059 = vmatprep.mubr.msk.bf16.mxu0 %vm1169_vm0, %v1168_v34 }
  0x73   :  { %1060 = vmatmul.mubr.msk.bf16.gmra.mrb[40].mxu0 %vm516_vm1, %v1167_v9 }
  0xf6   :  { %v928_v10 = vpop.f32.mrb[0].mxu0 }
  0xf7   :  { %v929_v12 = vpop.f32.mrb[1].mxu0  ;;  %v986_v13 = vpop.f32.mrb[0].mxu1 }
  0xf8   :  { %v930_v14 = vadd.f32 %v929_v12, %v928_v10  ;;  %v931_v15 = vpop.f32.mrb[2].mxu0  ;;  %v987_v16 = vpop.f32.mrb[1].mxu1 }
  0xf9   :  { %v932_v17 = vpop.f32.mrb[3].mxu0  ;;  %v988_v18 = vadd.f32 %v987_v16, %v986_v13  ;;  %v989_v19 = vpop.f32.mrb[2].mxu1 }
  0xfa   :  { %v573_v20 = vadd.f32 %v930_v14, %v1429_v11  ;;  %v933_v21 = vadd.f32 %v932_v17, %v931_v15  ;;  %v990_v22 = vpop.f32.mrb[3].mxu1 }
  0xfb   :  { %v991_v23 = vadd.f32 %v990_v22, %v989_v19 }
  0xfc   :  { %v576_v24 = vadd.f32 %v933_v21, %v1429_v11  ;;  %v1433_v25 = vadd.f32 %v988_v18, %v573_v20 }
  0xfe   :  { %v934_v26 = vpop.f32.mrb[4].mxu0  ;;  %v1435_v27 = vadd.f32 %v991_v23, %v576_v24 }
  0xff   :  { %v935_v28 = vpop.f32.mrb[5].mxu0  ;;  %v992_v29 = vpop.f32.mrb[4].mxu1 }
 0x100   :  { %v936_v30 = vadd.f32 %v935_v28, %v934_v26  ;;  %v937_v31 = vpop.f32.mrb[6].mxu0  ;;  %v993_v32 = vpop.f32.mrb[5].mxu1 }
 0x101   :  { %v938_v33 = vpop.f32.mrb[7].mxu0  ;;  %v994_v34 = vadd.f32 %v993_v32, %v992_v29  ;;  %v995_v35 = vpop.f32.mrb[6].mxu1 }
 0x102   :  { %v581_v36 = vadd.f32 %v936_v30, %v1429_v11  ;;  %v939_v37 = vadd.f32 %v938_v33, %v937_v31  ;;  %v996_v38 = vpop.f32.mrb[7].mxu1 }
 0x103   :  { %v997_v39 = vadd.f32 %v996_v38, %v995_v35 }
 0x104   :  { %v584_v40 = vadd.f32 %v939_v37, %v1429_v11  ;;  %v1439_v41 = vadd.f32 %v994_v34, %v581_v36 }
 0x106   :  { %v940_v42 = vpop.f32.mrb[8].mxu0  ;;  %v1441_v43 = vadd.f32 %v997_v39, %v584_v40 }
 0x107   :  { %v941_v44 = vpop.f32.mrb[9].mxu0  ;;  %v998_v45 = vpop.f32.mrb[8].mxu1 }
 0x108   :  { %v942_v46 = vadd.f32 %v941_v44, %v940_v42  ;;  %v943_v47 = vpop.f32.mrb[10].mxu0  ;;  %v999_v48 = vpop.f32.mrb[9].mxu1 }
 0x109   :  { %v944_v49 = vpop.f32.mrb[11].mxu0  ;;  %v1000_v50 = vadd.f32 %v999_v48, %v998_v45  ;;  %v1001_v51 = vpop.f32.mrb[10].mxu1 }
 0x10a   :  { %v589_v52 = vadd.f32 %v942_v46, %v1429_v11  ;;  %v945_v53 = vadd.f32 %v944_v49, %v943_v47  ;;  %v1002_v54 = vpop.f32.mrb[11].mxu1 }
 0x10b   :  { %v1003_v55 = vadd.f32 %v1002_v54, %v1001_v51 }
 0x10c   :  { %v592_v56 = vadd.f32 %v945_v53, %v1429_v11  ;;  %v1445_v57 = vadd.f32 %v1000_v50, %v589_v52 }
 0x10e   :  { %v946_v58 = vpop.f32.mrb[12].mxu0  ;;  %v1447_v59 = vadd.f32 %v1003_v55, %v592_v56 }
 0x10f   :  { %v947_v60 = vpop.f32.mrb[13].mxu0  ;;  %v1004_v61 = vpop.f32.mrb[12].mxu1 }
 0x110   :  { %v948_v62 = vadd.f32 %v947_v60, %v946_v58  ;;  %v949_v63 = vpop.f32.mrb[14].mxu0  ;;  %v1005_v0 = vpop.f32.mrb[13].mxu1 }
 0x111   :  { %v950_v1 = vpop.f32.mrb[15].mxu0  ;;  %v1006_v2 = vadd.f32 %v1005_v0, %v1004_v61  ;;  %v1007_v3 = vpop.f32.mrb[14].mxu1 }
 0x112   :  { %v597_v4 = vadd.f32 %v948_v62, %v1429_v11  ;;  %v951_v5 = vadd.f32 %v950_v1, %v949_v63  ;;  %v1008_v6 = vpop.f32.mrb[15].mxu1 }
 0x113   :  { %v1009_v7 = vadd.f32 %v1008_v6, %v1007_v3 }
 0x114   :  { %v600_v8 = vadd.f32 %v951_v5, %v1429_v11  ;;  %v1451_v9 = vadd.f32 %v1006_v2, %v597_v4 }
 0x116   :  { %v952_v10 = vpop.f32.mrb[16].mxu0  ;;  %v1453_v12 = vadd.f32 %v1009_v7, %v600_v8 }
 0x117   :  { %v953_v13 = vpop.f32.mrb[17].mxu0  ;;  %v1010_v14 = vpop.f32.mrb[16].mxu1 }
 0x118   :  { %v954_v15 = vadd.f32 %v953_v13, %v952_v10  ;;  %v955_v16 = vpop.f32.mrb[18].mxu0  ;;  %v1011_v17 = vpop.f32.mrb[17].mxu1 }
 0x119   :  { %v956_v18 = vpop.f32.mrb[19].mxu0  ;;  %v1012_v19 = vadd.f32 %v1011_v17, %v1010_v14  ;;  %v1013_v20 = vpop.f32.mrb[18].mxu1 }
 0x11a   :  { %v605_v21 = vadd.f32 %v954_v15, %v1429_v11  ;;  %v957_v22 = vadd.f32 %v956_v18, %v955_v16  ;;  %v1014_v23 = vpop.f32.mrb[19].mxu1 }
 0x11b   :  { %v1015_v24 = vadd.f32 %v1014_v23, %v1013_v20 }
 0x11c   :  { %v608_v26 = vadd.f32 %v957_v22, %v1429_v11  ;;  %v693_v28 = vadd.f32 %v1012_v19, %v605_v21 }
 0x11e   :  { %v958_v29 = vpop.f32.mrb[20].mxu0  ;;  %v696_v30 = vadd.f32 %v1015_v24, %v608_v26 }
 0x11f   :  { %v959_v31 = vpop.f32.mrb[21].mxu0  ;;  %v1016_v32 = vpop.f32.mrb[20].mxu1 }
 0x120   :  { %v960_v33 = vadd.f32 %v959_v31, %v958_v29  ;;  %v961_v34 = vpop.f32.mrb[22].mxu0  ;;  %v1017_v35 = vpop.f32.mrb[21].mxu1 }
 0x121   :  { %v962_v36 = vpop.f32.mrb[23].mxu0  ;;  %v1018_v37 = vadd.f32 %v1017_v35, %v1016_v32  ;;  %v1019_v38 = vpop.f32.mrb[22].mxu1 }
 0x122   :  { %v613_v39 = vadd.f32 %v960_v33, %v1429_v11  ;;  %v963_v40 = vadd.f32 %v962_v36, %v961_v34  ;;  %v1020_v42 = vpop.f32.mrb[23].mxu1 }
 0x123   :  { %v1021_v44 = vadd.f32 %v1020_v42, %v1019_v38 }
 0x124   :  { %v616_v45 = vadd.f32 %v963_v40, %v1429_v11  ;;  %v701_v46 = vadd.f32 %v1018_v37, %v613_v39 }
 0x126   :  { %v964_v47 = vpop.f32.mrb[24].mxu0  ;;  %v704_v48 = vadd.f32 %v1021_v44, %v616_v45 }
 0x127   :  { %v965_v49 = vpop.f32.mrb[25].mxu0  ;;  %v1022_v50 = vpop.f32.mrb[24].mxu1 }
 0x128   :  { %v966_v51 = vadd.f32 %v965_v49, %v964_v47  ;;  %v967_v52 = vpop.f32.mrb[26].mxu0  ;;  %v1023_v53 = vpop.f32.mrb[25].mxu1 }
 0x129   :  { %v968_v54 = vpop.f32.mrb[27].mxu0  ;;  %v1024_v55 = vadd.f32 %v1023_v53, %v1022_v50  ;;  %v1025_v56 = vpop.f32.mrb[26].mxu1 }
 0x12a   :  { %v621_v58 = vadd.f32 %v966_v51, %v1429_v11  ;;  %v1026_v60 = vpop.f32.mrb[27].mxu1 }
 0x12c   :  { %v709_v61 = vadd.f32 %v1024_v55, %v621_v58 }
 0x12e   :  { %v748_v62 = vpop.f32.mrb[28].mxu0 }
 0x12f   :  { %v749_v63 = vadd.f32 %v748_v62, %v1433_v25  ;;  %v780_v0 = vpop.f32.mrb[28].mxu1  ;;  %v1049_v1 = vpop.f32.mrb[29].mxu0 }
 0x130   :  { %v781_v2 = vadd.f32 %v780_v0, %v693_v28  ;;  %v1065_v3 = vpop.f32.mrb[29].mxu1  ;;  %v751_v4 = vpop.f32.mrb[30].mxu0 }
 0x131   :  { %v802_v5 = vmax.f32 %v749_v63, 0.0  ;;  %v752_v6 = vadd.f32 %v751_v4, %v1435_v27  ;;  %v783_v7 = vpop.f32.mrb[30].mxu1  ;;  %v1050_v8 = vpop.f32.mrb[31].mxu0 }
 0x132   :  { %v810_v10 = vmax.f32 %v781_v2, 0.0  ;;  %v784_v13 = vadd.f32 %v783_v7, %v696_v30  ;;  %v1066_v14 = vpop.f32.mrb[31].mxu1 }
 0x133   :  { %815 = vst.msk [vmem:[%s1522_s3] sm:$0xff] %vm516_vm1, %v802_v5  ;;  %v803_v11 = vmax.f32 %v752_v6, 0.0 }
 0x134   :  { %823 = vst.msk [vmem:[%s1522_s3 + $0x40] sm:$0xff] %vm516_vm1, %v810_v10  ;;  %v811_v25 = vmax.f32 %v784_v13, 0.0 }
 0x135   :  { %816 = vst.msk [vmem:[%s1522_s3 + $0x8] sm:$0xff] %vm516_vm1, %v803_v11 }
 0x136   :  { %824 = vst.msk [vmem:[%s1522_s3 + $0x48] sm:$0xff] %vm516_vm1, %v811_v25  ;;  %v756_v27 = vpop.f32.mrb[32].mxu0 }
 0x137   :  { %v757_v15 = vadd.f32 %v756_v27, %v1439_v41  ;;  %v788_v16 = vpop.f32.mrb[32].mxu1  ;;  %v1053_v17 = vpop.f32.mrb[33].mxu0 }
 0x138   :  { %v789_v18 = vadd.f32 %v788_v16, %v701_v46  ;;  %v1069_v19 = vpop.f32.mrb[33].mxu1  ;;  %v759_v20 = vpop.f32.mrb[34].mxu0 }
 0x139   :  { %v804_v21 = vmax.f32 %v757_v15, 0.0  ;;  %v760_v22 = vadd.f32 %v759_v20, %v1441_v43  ;;  %v791_v23 = vpop.f32.mrb[34].mxu1  ;;  %v1054_v24 = vpop.f32.mrb[35].mxu0 }
 0x13a   :  { %v812_v26 = vmax.f32 %v789_v18, 0.0  ;;  %v792_v28 = vadd.f32 %v791_v23, %v704_v48  ;;  %v1070_v29 = vpop.f32.mrb[35].mxu1 }
 0x13b   :  { %817 = vst.msk [vmem:[%s1522_s3 + $0x10] sm:$0xff] %vm516_vm1, %v804_v21  ;;  %v805_v30 = vmax.f32 %v760_v22, 0.0 }
 0x13c   :  { %825 = vst.msk [vmem:[%s1522_s3 + $0x50] sm:$0xff] %vm516_vm1, %v812_v26  ;;  %v813_v41 = vmax.f32 %v792_v28, 0.0 }
 0x13d   :  { %818 = vst.msk [vmem:[%s1522_s3 + $0x18] sm:$0xff] %vm516_vm1, %v805_v30 }
 0x13e   :  { %826 = vst.msk [vmem:[%s1522_s3 + $0x58] sm:$0xff] %vm516_vm1, %v813_v41  ;;  %v764_v43 = vpop.f32.mrb[36].mxu0 }
 0x13f   :  { %v765_v31 = vadd.f32 %v764_v43, %v1445_v57  ;;  %v796_v32 = vpop.f32.mrb[36].mxu1  ;;  %v1057_v33 = vpop.f32.mrb[37].mxu0 }
 0x140   :  { %v797_v34 = vadd.f32 %v796_v32, %v709_v61  ;;  %v767_v35 = vpop.f32.mrb[38].mxu0  ;;  %v1073_v36 = vpop.f32.mrb[37].mxu1 }
 0x141   :  { %v806_v37 = vmax.f32 %v765_v31, 0.0  ;;  %v768_v38 = vadd.f32 %v767_v35, %v1447_v59  ;;  %v1058_v39 = vpop.f32.mrb[39].mxu0  ;;  %v799_v40 = vpop.f32.mrb[38].mxu1 }
 0x142   :  { %v814_v42 = vmax.f32 %v797_v34, 0.0  ;;  %v1074_v44 = vpop.f32.mrb[39].mxu1 }
 0x143   :  { %819 = vst.msk [vmem:[%s1522_s3 + $0x20] sm:$0xff] %vm516_vm1, %v806_v37  ;;  %v807_v45 = vmax.f32 %v768_v38, 0.0 }
 0x144   :  { %828 = vst.msk [vmem:[%s1522_s3 + $0x60] sm:$0xf] %vm827_vm2, %v814_v42 }
 0x145   :  { %820 = vst.msk [vmem:[%s1522_s3 + $0x28] sm:$0xff] %vm516_vm1, %v807_v45 }
 0x146   :  { %v772_v57 = vpop.f32.mrb[40].mxu0 }
 0x147   :  { %v773_v59 = vadd.f32 %v772_v57, %v1451_v9  ;;  %v1061_v46 = vpop.f32.mrb[41].mxu0 }
 0x148   :  { %v775_v47 = vpop.f32.mrb[42].mxu0 }
 0x149   :  { %v808_v48 = vmax.f32 %v773_v59, 0.0  ;;  %v776_v49 = vadd.f32 %v775_v47, %v1453_v12  ;;  %v1062_v50 = vpop.f32.mrb[43].mxu0 }
 0x14b   :  { %821 = vst.msk [vmem:[%s1522_s3 + $0x30] sm:$0xff] %vm516_vm1, %v808_v48  ;;  %v809_v51 = vmax.f32 %v776_v49, 0.0 }
 0x14d   :  { %822 = vst.msk [vmem:[%s1522_s3 + $0x38] sm:$0xff] %vm516_vm1, %v809_v51 }

// kernel: siamese_forward.18
= control target key start
LH: loop header
LB: loop body
LE: loop exit
PB: predicated region body
PF: predicated region fallthrough
CT: control target
= control target key end

     0   :  { %v1197_v34 = vmov 0.0   ;;  %vm1198_vm0 = vmmov 0   ;;  %vm519_vm1 = vcmask 523264   ;;  %vm856_vm2 = vcmask 519168   ;;  %s1595_s1 = inlined_call_operand.vmem [shape: bf16[576,64], index: 1, kind: input, shape index: {}]   ;;  %s1596_s0 = inlined_call_operand.vmem [shape: bf16[100,576], index: 0, kind: input, shape index: {}]   ;;  %s1597_s2 = inlined_call_operand.vmem [shape: f32[1,64], index: 2, kind: input, shape index: {}]   ;;  %s1598_s3 = inlined_call_operand.vmem [shape: f32[100,64], index: 3, kind: input, shape index: {}]   ;;  %s1599_s4 = inlined_call_operand.vmem [shape: f32[100,64], index: 4, kind: output, shape index: {}]  }
   0x1   :  { %v1114_v0 = vld [vmem:[%s1595_s1 + $0x40] sm:$0xff]   ;;  %v1118_v4 = vld [vmem:[%s1595_s1 + $0x48] sm:$0xff]   ;;  %v1122_v8 = vld [vmem:[%s1595_s1 + $0x50] sm:$0xff]  }
   0x2   :  { %v1115_v1 = vld [vmem:[%s1595_s1 + $0xc0] sm:$0xff]   ;;  %941 = vmatprep.subr.bf16.mxu0 %v1114_v0  ;;  %v1119_v5 = vld [vmem:[%s1595_s1 + $0xc8] sm:$0xff]   ;;  %v1123_v9 = vld [vmem:[%s1595_s1 + $0xd0] sm:$0xff]  }
   0x3   :  { %v1116_v2 = vld [vmem:[%s1595_s1] sm:$0xff]   ;;  %999 = vmatprep.subr.bf16.mxu1 %v1115_v1  ;;  %v1120_v6 = vld [vmem:[%s1595_s1 + $0x8] sm:$0xff]   ;;  %v1124_v10 = vld [vmem:[%s1595_s1 + $0x10] sm:$0xff]  }
   0x4   :  { %v1117_v3 = vld [vmem:[%s1595_s1 + $0x80] sm:$0xff]   ;;  %942 = vmatpush3.bf16.msra.mxu0 %v1116_v2  ;;  %v1121_v7 = vld [vmem:[%s1595_s1 + $0x88] sm:$0xff]   ;;  %v1125_v11 = vld [vmem:[%s1595_s1 + $0x90] sm:$0xff]  }
   0x5   :  { %1000 = vmatpush3.bf16.msra.mxu1 %v1117_v3  ;;  %943 = vmatprep.subr.bf16.mxu0 %v1118_v4  ;;  %v1126_v12 = vld [vmem:[%s1595_s1 + $0x58] sm:$0xff]   ;;  %v1130_v16 = vld [vmem:[%s1595_s1 + $0x60] sm:$0xff]   ;;  %v1134_v20 = vld [vmem:[%s1595_s1 + $0x68] sm:$0xff]  }
   0x6   :  { %1001 = vmatprep.subr.bf16.mxu1 %v1119_v5  ;;  %v1127_v13 = vld [vmem:[%s1595_s1 + $0xd8] sm:$0xff]   ;;  %v1131_v17 = vld [vmem:[%s1595_s1 + $0xe0] sm:$0xff]   ;;  %v1135_v21 = vld [vmem:[%s1595_s1 + $0xe8] sm:$0xff]  }
   0x7   :  { %v1128_v14 = vld [vmem:[%s1595_s1 + $0x18] sm:$0xff]   ;;  %v1132_v18 = vld [vmem:[%s1595_s1 + $0x20] sm:$0xff]   ;;  %v1136_v22 = vld [vmem:[%s1595_s1 + $0x28] sm:$0xff]  }
   0x8   :  { %944 = vmatpush3.bf16.msra.mxu0 %v1120_v6  ;;  %v1129_v15 = vld [vmem:[%s1595_s1 + $0x98] sm:$0xff]   ;;  %v1133_v19 = vld [vmem:[%s1595_s1 + $0xa0] sm:$0xff]   ;;  %v1137_v23 = vld [vmem:[%s1595_s1 + $0xa8] sm:$0xff]  }
   0x9   :  { %1002 = vmatpush3.bf16.msra.mxu1 %v1121_v7  ;;  %945 = vmatprep.subr.bf16.mxu0 %v1122_v8  ;;  %v1138_v24 = vld [vmem:[%s1595_s1 + $0x70] sm:$0xff]   ;;  %v1142_v28 = vld [vmem:[%s1595_s1 + $0x78] sm:$0xff]   ;;  %v1151_v36 = vld [vmem:[%s1596_s0 + $0xc] ss:$20 sps:$4 sm:$0xff]  }
   0xa   :  { %1003 = vmatprep.subr.bf16.mxu1 %v1123_v9  ;;  %v1139_v25 = vld [vmem:[%s1595_s1 + $0xf0] sm:$0xff]   ;;  %v1143_v29 = vld [vmem:[%s1595_s1 + $0xf8] sm:$0xff]   ;;  %v1152_v37 = vld [vmem:[%s1595_s1 + $0x100] sm:$0xff]   ;;  %661 = vmatprep.mubr.bf16.mxu1 %v1151_v36 }
   0xb   :  { %v1140_v26 = vld [vmem:[%s1595_s1 + $0x30] sm:$0xff]   ;;  %v1144_v30 = vld [vmem:[%s1595_s1 + $0x38] sm:$0xff]   ;;  %v1153_v38 = vld [vmem:[%s1596_s0 + $0x2c] ss:$20 sps:$4 sm:$0xff]  }
   0xc   :  { %946 = vmatpush3.bf16.msra.mxu0 %v1124_v10  ;;  %v1141_v27 = vld [vmem:[%s1595_s1 + $0xb0] sm:$0xff]   ;;  %v1145_v31 = vld [vmem:[%s1595_s1 + $0xb8] sm:$0xff]   ;;  %v1163_v43 = vld [vmem:[%s1595_s1 + $0x108] sm:$0xff]  }
   0xd   :  { %1004 = vmatpush3.bf16.msra.mxu1 %v1125_v11  ;;  %947 = vmatprep.subr.bf16.mxu0 %v1126_v12  ;;  %v1146_v32 = vld [vmem:[%s1596_s0] ss:$20 sps:$4 sm:$0xff]   ;;  %v1148_v33 = vld [vmem:[%s1596_s0 + $0x4] ss:$20 sps:$4 sm:$0xff]   ;;  %v1149_v35 = vld [vmem:[%s1596_s0 + $0x8] ss:$20 sps:$4 sm:$0xff]  }
   0xe   :  { %1005 = vmatprep.subr.bf16.mxu1 %v1127_v13  ;;  %573 = vmatprep.mubr.bf16.mxu0 %v1148_v33  ;;  %v1155_v39 = vld [vmem:[%s1596_s0 + $0x34] ss:$20 sps:$4 sm:$0xff]   ;;  %v1158_v41 = vld [vmem:[%s1596_s0 + $0x30] ss:$20 sps:$4 sm:$0xff]   ;;  %v1165_v47 = vld [vmem:[%s1596_s0 + $0x58] ss:$20 sps:$4 sm:$0xff]  }
   0xf   :  { %v1157_v40 = vld [vmem:[%s1596_s0 + $0x28] ss:$20 sps:$4 sm:$0xff]   ;;  %v1172_v45 = vld [vmem:[%s1595_s1 + $0x110] sm:$0xff]   ;;  %v1168_v49 = vld [vmem:[%s1596_s0 + $0x84] ss:$20 sps:$4 sm:$0xff]  }
  0x10   :  { %948 = vmatpush3.bf16.msra.mxu0 %v1128_v14  ;;  %v1159_v42 = vld [vmem:[%s1596_s0 + $0x54] ss:$20 sps:$4 sm:$0xff]   ;;  %v1161_v44 = vld [vmem:[%s1596_s0 + $0x5c] ss:$20 sps:$4 sm:$0xff]   ;;  %v1170_v51 = vld [vmem:[%s1596_s0 + $0x78] ss:$20 sps:$4 sm:$0xff]  }
  0x11   :  { %1006 = vmatpush3.bf16.msra.mxu1 %v1129_v15  ;;  %949 = vmatprep.subr.bf16.mxu0 %v1130_v16  ;;  %v1164_v46 = vld [vmem:[%s1596_s0 + $0x50] ss:$20 sps:$4 sm:$0xff]   ;;  %v1185_v50 = vld [vmem:[%s1595_s1 + $0x118] sm:$0xff]   ;;  %v1171_v52 = vld [vmem:[%s1596_s0 + $0x80] ss:$20 sps:$4 sm:$0xff]  }
  0x12   :  { %1007 = vmatprep.subr.bf16.mxu1 %v1131_v17  ;;  %v1166_v48 = vld [vmem:[%s1596_s0 + $0x7c] ss:$20 sps:$4 sm:$0xff]   ;;  %v1173_v53 = vld [vmem:[%s1596_s0 + $0xa4] ss:$20 sps:$4 sm:$0xff]   ;;  %v1175_v54 = vld [vmem:[%s1596_s0 + $0xac] ss:$20 sps:$4 sm:$0xff]  }
  0x13   :  { %v1177_v55 = vld [vmem:[%s1596_s0 + $0xa0] ss:$20 sps:$4 sm:$0xff]   ;;  %v1178_v56 = vld [vmem:[%s1596_s0 + $0xa8] ss:$20 sps:$4 sm:$0xff]   ;;  %v1184_v62 = vld [vmem:[%s1596_s0 + $0xd0] ss:$20 sps:$4 sm:$0xff]  }
  0x14   :  { %950 = vmatpush3.bf16.msra.mxu0 %v1132_v18  ;;  %v1179_v57 = vld [vmem:[%s1596_s0 + $0xcc] ss:$20 sps:$4 sm:$0xff]   ;;  %v1181_v58 = vld [vmem:[%s1596_s0 + $0xd4] ss:$20 sps:$4 sm:$0xff]   ;;  %v55_v60 = vld [vmem:[%s1596_s0 + $0xf8] sm:$0x33] }
  0x15   :  { %1008 = vmatpush3.bf16.msra.mxu1 %v1133_v19  ;;  %951 = vmatprep.subr.bf16.mxu0 %v1134_v20  ;;  %v54_v59 = vld [vmem:[%s1596_s0 + $0xf0] sm:$0x33]  ;;  %v1183_v61 = vld [vmem:[%s1596_s0 + $0xc8] ss:$20 sps:$4 sm:$0xff]   ;;  %v896_v0 = vcombine.high %v55_v60, %v55_v60  ;;  %v895_v2 = vcombine.low %v55_v60, %v55_v60  ;;  %v1192_v5 = vld [vmem:[%s1596_s0 + $0x38] ss:$20 sps:$4 sm:$0xff]  }
  0x16   :  { %1009 = vmatprep.subr.bf16.mxu1 %v1135_v21  ;;  %v894_v63 = vcombine.high %v54_v59, %v54_v59  ;;  %v893_v1 = vcombine.low %v54_v59, %v54_v59  ;;  %v1190_v3 = vld [vmem:[%s1596_s0 + $0x10] ss:$20 sps:$4 sm:$0xff]   ;;  %v1193_v6 = vld [vmem:[%s1596_s0 + $0xd8] ss:$20 sps:$4 sm:$0xff]   ;;  %v1194_v7 = vld [vmem:[%s1596_s0 + $0x60] ss:$20 sps:$4 sm:$0xff]  }
  0x17   :  { %v1191_v4 = vld [vmem:[%s1596_s0 + $0xb0] ss:$20 sps:$4 sm:$0xff]   ;;  %v1195_v8 = vld [vmem:[%s1596_s0 + $0x100] ss:$0 sps:$4 sm:$0x33]  }
  0x18   :  { %952 = vmatpush3.bf16.msra.mxu0 %v1136_v22  ;;  %v1196_v9 = vld [vmem:[%s1596_s0 + $0x88] ss:$20 sps:$4 sm:$0xff]   ;;  %v1463_v11 = vld [vmem:[%s1597_s2] ss:$0 sm:$0xff] }
  0x19   :  { %1010 = vmatpush3.bf16.msra.mxu1 %v1137_v23  ;;  %953 = vmatprep.subr.bf16.mxu0 %v1138_v24 }
  0x1a   :  { %1011 = vmatprep.subr.bf16.mxu1 %v1139_v25 }
  0x1c   :  { %954 = vmatpush3.bf16.msra.mxu0 %v1140_v26 }
  0x1d   :  { %1012 = vmatpush3.bf16.msra.mxu1 %v1141_v27  ;;  %955 = vmatprep.subr.bf16.mxu0 %v1142_v28 }
  0x1e   :  { %1013 = vmatprep.subr.bf16.mxu1 %v1143_v29 }
  0x20   :  { %956 = vmatpush3.bf16.msra.mxu0 %v1144_v30 }
  0x21   :  { %1014 = vmatpush3.bf16.msra.mxu1 %v1145_v31  ;;  %1068 = vmatprep.subr.bf16.mxu0 %v1197_v34 }
  0x22   :  { %1104 = vmatprep.subr.bf16.mxu1 %v1197_v34 }
  0x23   :  { %574 = vmatmul.mubr.bf16.vlgmr.msra.gmra.mrb[0].mxu0 %v1146_v32 }
  0x24   :  { %662 = vmatmul.mubr.bf16.vlgmr.msra.gmra.mrb[0].mxu1 %v1149_v35  ;;  %1069 = vmatpush3.bf16.msra.mxu0 %v1152_v37 }
  0x25   :  { %581 = vmatprep.mubr.bf16.mxu0 %v1153_v38  ;;  %1108 = vmatpush3.bf16.msra.mxu1 %v1152_v37 }
  0x26   :  { %669 = vmatprep.mubr.bf16.mxu1 %v1155_v39  ;;  %1070 = vmatprep.subr.bf16.mxu0 %v1197_v34 }
  0x27   :  { %1105 = vmatprep.subr.bf16.mxu1 %v1197_v34 }
  0x28   :  { %1071 = vmatpush3.bf16.msra.mxu0 %v1163_v43 }
  0x29   :  { %1109 = vmatpush3.bf16.msra.mxu1 %v1163_v43  ;;  %1072 = vmatprep.subr.bf16.mxu0 %v1197_v34 }
  0x2a   :  { %1106 = vmatprep.subr.bf16.mxu1 %v1197_v34 }
  0x2b   :  { %582 = vmatmul.mubr.bf16.gmra.mrb[4].mxu0 %v1157_v40 }
  0x2c   :  { %670 = vmatmul.mubr.bf16.gmra.mrb[4].mxu1 %v1158_v41  ;;  %589 = vmatprep.mubr.bf16.mxu0 %v1159_v42 }
  0x2d   :  { %677 = vmatprep.mubr.bf16.mxu1 %v1161_v44  ;;  %1073 = vmatpush3.bf16.msra.mxu0 %v1172_v45 }
  0x2e   :  { %1110 = vmatpush3.bf16.msra.mxu1 %v1172_v45  ;;  %1074 = vmatprep.subr.bf16.mxu0 %v1197_v34 }
  0x2f   :  { %1107 = vmatprep.subr.bf16.mxu1 %v1197_v34 }
  0x31   :  { %1075 = vmatpush3.bf16.msra.mxu0 %v1185_v50 }
  0x32   :  { %1111 = vmatpush3.bf16.msra.mxu1 %v1185_v50 }
  0x33   :  { %590 = vmatmul.mubr.bf16.gmra.mrb[8].mxu0 %v1164_v46 }
  0x34   :  { %678 = vmatmul.mubr.bf16.gmra.mrb[8].mxu1 %v1165_v47  ;;  %597 = vmatprep.mubr.bf16.mxu0 %v1166_v48 }
  0x35   :  { %685 = vmatprep.mubr.bf16.mxu1 %v1168_v49 }
  0x3b   :  { %598 = vmatmul.mubr.bf16.gmra.mrb[12].mxu0 %v1170_v51 }
  0x3c   :  { %686 = vmatmul.mubr.bf16.gmra.mrb[12].mxu1 %v1171_v52  ;;  %605 = vmatprep.mubr.bf16.mxu0 %v1173_v53 }
  0x3d   :  { %693 = vmatprep.mubr.bf16.mxu1 %v1175_v54 }
  0x43   :  { %606 = vmatmul.mubr.bf16.gmra.mrb[16].mxu0 %v1177_v55 }
  0x44   :  { %694 = vmatmul.mubr.bf16.gmra.mrb[16].mxu1 %v1178_v56  ;;  %613 = vmatprep.mubr.bf16.mxu0 %v1179_v57 }
  0x45   :  { %701 = vmatprep.mubr.bf16.mxu1 %v1181_v58 }
  0x4b   :  { %614 = vmatmul.mubr.bf16.gmra.mrb[20].mxu0 %v1183_v61 }
  0x4c   :  { %702 = vmatmul.mubr.bf16.gmra.mrb[20].mxu1 %v1184_v62  ;;  %621 = vmatprep.mubr.bf16.mxu0 %v894_v63 }
  0x4d   :  { %709 = vmatprep.mubr.bf16.mxu1 %v896_v0 }
  0x53   :  { %622 = vmatmul.mubr.bf16.gmra.mrb[24].mxu0 %v893_v1 }
  0x54   :  { %710 = vmatmul.mubr.bf16.gmra.mrb[24].mxu1 %v895_v2  ;;  %1076 = vmatprep.mubr.msk.bf16.mxu0 %vm1198_vm0, %v1197_v34 }
  0x55   :  { %1092 = vmatprep.mubr.msk.bf16.mxu1 %vm1198_vm0, %v1197_v34 }
  0x5b   :  { %1077 = vmatmul.mubr.msk.bf16.vlgmr.msra.gmra.mrb[28].mxu0 %vm519_vm1, %v1190_v3 }
  0x5c   :  { %1093 = vmatmul.mubr.msk.bf16.vlgmr.msra.gmra.mrb[28].mxu1 %vm519_vm1, %v1191_v4  ;;  %1080 = vmatprep.mubr.msk.bf16.mxu0 %vm1198_vm0, %v1197_v34 }
  0x5d   :  { %1096 = vmatprep.mubr.msk.bf16.mxu1 %vm1198_vm0, %v1197_v34 }
  0x63   :  { %1081 = vmatmul.mubr.msk.bf16.gmra.mrb[32].mxu0 %vm519_vm1, %v1192_v5 }
  0x64   :  { %1097 = vmatmul.mubr.msk.bf16.gmra.mrb[32].mxu1 %vm519_vm1, %v1193_v6  ;;  %1084 = vmatprep.mubr.msk.bf16.mxu0 %vm1198_vm0, %v1197_v34 }
  0x65   :  { %1100 = vmatprep.mubr.msk.bf16.mxu1 %vm1198_vm0, %v1197_v34 }
  0x6b   :  { %1085 = vmatmul.mubr.msk.bf16.gmra.mrb[36].mxu0 %vm519_vm1, %v1194_v7 }
  0x6c   :  { %1101 = vmatmul.mubr.msk.bf16.gmra.mrb[36].mxu1 %vm519_vm1, %v1195_v8  ;;  %1088 = vmatprep.mubr.msk.bf16.mxu0 %vm1198_vm0, %v1197_v34 }
  0x73   :  { %1089 = vmatmul.mubr.msk.bf16.gmra.mrb[40].mxu0 %vm519_vm1, %v1196_v9 }
  0xf6   :  { %v957_v10 = vpop.f32.mrb[0].mxu0 }
  0xf7   :  { %v958_v12 = vpop.f32.mrb[1].mxu0  ;;  %v1015_v13 = vpop.f32.mrb[0].mxu1 }
  0xf8   :  { %v959_v14 = vadd.f32 %v958_v12, %v957_v10  ;;  %v960_v15 = vpop.f32.mrb[2].mxu0  ;;  %v1016_v16 = vpop.f32.mrb[1].mxu1 }
  0xf9   :  { %v961_v17 = vpop.f32.mrb[3].mxu0  ;;  %v1017_v18 = vadd.f32 %v1016_v16, %v1015_v13  ;;  %v1018_v19 = vpop.f32.mrb[2].mxu1 }
  0xfa   :  { %v576_v20 = vadd.f32 %v959_v14, %v1463_v11  ;;  %v962_v21 = vadd.f32 %v961_v17, %v960_v15  ;;  %v1019_v22 = vpop.f32.mrb[3].mxu1 }
  0xfb   :  { %v1020_v23 = vadd.f32 %v1019_v22, %v1018_v19 }
  0xfc   :  { %v579_v24 = vadd.f32 %v962_v21, %v1463_v11  ;;  %v1467_v25 = vadd.f32 %v1017_v18, %v576_v20 }
  0xfe   :  { %v963_v26 = vpop.f32.mrb[4].mxu0  ;;  %v1469_v27 = vadd.f32 %v1020_v23, %v579_v24 }
  0xff   :  { %v964_v28 = vpop.f32.mrb[5].mxu0  ;;  %v1021_v29 = vpop.f32.mrb[4].mxu1 }
 0x100   :  { %v965_v30 = vadd.f32 %v964_v28, %v963_v26  ;;  %v966_v31 = vpop.f32.mrb[6].mxu0  ;;  %v1022_v32 = vpop.f32.mrb[5].mxu1 }
 0x101   :  { %v967_v33 = vpop.f32.mrb[7].mxu0  ;;  %v1023_v34 = vadd.f32 %v1022_v32, %v1021_v29  ;;  %v1024_v35 = vpop.f32.mrb[6].mxu1 }
 0x102   :  { %v584_v36 = vadd.f32 %v965_v30, %v1463_v11  ;;  %v968_v37 = vadd.f32 %v967_v33, %v966_v31  ;;  %v1025_v38 = vpop.f32.mrb[7].mxu1 }
 0x103   :  { %v1026_v39 = vadd.f32 %v1025_v38, %v1024_v35 }
 0x104   :  { %v587_v40 = vadd.f32 %v968_v37, %v1463_v11  ;;  %v1473_v41 = vadd.f32 %v1023_v34, %v584_v36 }
 0x106   :  { %v969_v42 = vpop.f32.mrb[8].mxu0  ;;  %v1475_v43 = vadd.f32 %v1026_v39, %v587_v40 }
 0x107   :  { %v970_v44 = vpop.f32.mrb[9].mxu0  ;;  %v1027_v45 = vpop.f32.mrb[8].mxu1 }
 0x108   :  { %v971_v46 = vadd.f32 %v970_v44, %v969_v42  ;;  %v972_v47 = vpop.f32.mrb[10].mxu0  ;;  %v1028_v48 = vpop.f32.mrb[9].mxu1 }
 0x109   :  { %v973_v49 = vpop.f32.mrb[11].mxu0  ;;  %v1029_v50 = vadd.f32 %v1028_v48, %v1027_v45  ;;  %v1030_v51 = vpop.f32.mrb[10].mxu1 }
 0x10a   :  { %v592_v52 = vadd.f32 %v971_v46, %v1463_v11  ;;  %v974_v53 = vadd.f32 %v973_v49, %v972_v47  ;;  %v1031_v54 = vpop.f32.mrb[11].mxu1 }
 0x10b   :  { %v1032_v55 = vadd.f32 %v1031_v54, %v1030_v51 }
 0x10c   :  { %v595_v56 = vadd.f32 %v974_v53, %v1463_v11  ;;  %v1479_v57 = vadd.f32 %v1029_v50, %v592_v52 }
 0x10e   :  { %v975_v58 = vpop.f32.mrb[12].mxu0  ;;  %v1481_v59 = vadd.f32 %v1032_v55, %v595_v56 }
 0x10f   :  { %v976_v60 = vpop.f32.mrb[13].mxu0  ;;  %v1033_v61 = vpop.f32.mrb[12].mxu1 }
 0x110   :  { %v977_v62 = vadd.f32 %v976_v60, %v975_v58  ;;  %v978_v63 = vpop.f32.mrb[14].mxu0  ;;  %v1034_v0 = vpop.f32.mrb[13].mxu1 }
 0x111   :  { %v979_v1 = vpop.f32.mrb[15].mxu0  ;;  %v1035_v2 = vadd.f32 %v1034_v0, %v1033_v61  ;;  %v1036_v3 = vpop.f32.mrb[14].mxu1 }
 0x112   :  { %v600_v4 = vadd.f32 %v977_v62, %v1463_v11  ;;  %v980_v5 = vadd.f32 %v979_v1, %v978_v63  ;;  %v1037_v6 = vpop.f32.mrb[15].mxu1  ;;  %v805_v63 = vld [vmem:[%s1598_s3] sm:$0xff] }
 0x113   :  { %v1038_v7 = vadd.f32 %v1037_v6, %v1036_v3 }
 0x114   :  { %v603_v8 = vadd.f32 %v980_v5, %v1463_v11  ;;  %v1485_v9 = vadd.f32 %v1035_v2, %v600_v4  ;;  %v813_v2 = vld [vmem:[%s1598_s3 + $0x40] sm:$0xff] }
 0x116   :  { %v981_v10 = vpop.f32.mrb[16].mxu0  ;;  %v1487_v12 = vadd.f32 %v1038_v7, %v603_v8 }
 0x117   :  { %v982_v13 = vpop.f32.mrb[17].mxu0  ;;  %v1039_v14 = vpop.f32.mrb[16].mxu1 }
 0x118   :  { %v983_v15 = vadd.f32 %v982_v13, %v981_v10  ;;  %v984_v16 = vpop.f32.mrb[18].mxu0  ;;  %v1040_v17 = vpop.f32.mrb[17].mxu1 }
 0x119   :  { %v985_v18 = vpop.f32.mrb[19].mxu0  ;;  %v1041_v19 = vadd.f32 %v1040_v17, %v1039_v14  ;;  %v1042_v20 = vpop.f32.mrb[18].mxu1 }
 0x11a   :  { %v608_v21 = vadd.f32 %v983_v15, %v1463_v11  ;;  %v986_v22 = vadd.f32 %v985_v18, %v984_v16  ;;  %v1043_v23 = vpop.f32.mrb[19].mxu1 }
 0x11b   :  { %v1044_v24 = vadd.f32 %v1043_v23, %v1042_v20  ;;  %v807_v23 = vld [vmem:[%s1598_s3 + $0x10] sm:$0xff] }
 0x11c   :  { %v611_v26 = vadd.f32 %v986_v22, %v1463_v11  ;;  %v696_v28 = vadd.f32 %v1041_v19, %v608_v21 }
 0x11e   :  { %v987_v29 = vpop.f32.mrb[20].mxu0  ;;  %v699_v30 = vadd.f32 %v1044_v24, %v611_v26 }
 0x11f   :  { %v988_v31 = vpop.f32.mrb[21].mxu0  ;;  %v1045_v32 = vpop.f32.mrb[20].mxu1 }
 0x120   :  { %v989_v33 = vadd.f32 %v988_v31, %v987_v29  ;;  %v990_v34 = vpop.f32.mrb[22].mxu0  ;;  %v1046_v35 = vpop.f32.mrb[21].mxu1 }
 0x121   :  { %v991_v36 = vpop.f32.mrb[23].mxu0  ;;  %v1047_v37 = vadd.f32 %v1046_v35, %v1045_v32  ;;  %v1048_v38 = vpop.f32.mrb[22].mxu1 }
 0x122   :  { %v616_v39 = vadd.f32 %v989_v33, %v1463_v11  ;;  %v992_v40 = vadd.f32 %v991_v36, %v990_v34  ;;  %v1049_v42 = vpop.f32.mrb[23].mxu1  ;;  %v808_v33 = vld [vmem:[%s1598_s3 + $0x18] sm:$0xff] }
 0x123   :  { %v1050_v44 = vadd.f32 %v1049_v42, %v1048_v38  ;;  %v816_v36 = vld [vmem:[%s1598_s3 + $0x58] sm:$0xff] }
 0x124   :  { %v619_v45 = vadd.f32 %v992_v40, %v1463_v11  ;;  %v704_v46 = vadd.f32 %v1047_v37, %v616_v39 }
 0x126   :  { %v993_v47 = vpop.f32.mrb[24].mxu0  ;;  %v707_v48 = vadd.f32 %v1050_v44, %v619_v45 }
 0x127   :  { %v994_v49 = vpop.f32.mrb[25].mxu0  ;;  %v1051_v50 = vpop.f32.mrb[24].mxu1 }
 0x128   :  { %v995_v51 = vadd.f32 %v994_v49, %v993_v47  ;;  %v996_v52 = vpop.f32.mrb[26].mxu0  ;;  %v1052_v53 = vpop.f32.mrb[25].mxu1 }
 0x129   :  { %v997_v54 = vpop.f32.mrb[27].mxu0  ;;  %v1053_v55 = vadd.f32 %v1052_v53, %v1051_v50  ;;  %v1054_v56 = vpop.f32.mrb[26].mxu1  ;;  %v817_v52 = vld [vmem:[%s1598_s3 + $0x60] sm:$0xf] }
 0x12a   :  { %v624_v58 = vadd.f32 %v995_v51, %v1463_v11  ;;  %v1055_v60 = vpop.f32.mrb[27].mxu1  ;;  %v806_v11 = vld [vmem:[%s1598_s3 + $0x8] sm:$0xff] }
 0x12b   :  { %v810_v56 = vld [vmem:[%s1598_s3 + $0x28] sm:$0xff] }
 0x12c   :  { %v1494_v61 = vadd.f32 %v1053_v55, %v624_v58 }
 0x12e   :  { %v751_v62 = vpop.f32.mrb[28].mxu0 }
 0x12f   :  { %v752_v0 = vadd.f32 %v751_v62, %v1467_v25  ;;  %v783_v1 = vpop.f32.mrb[28].mxu1  ;;  %v1078_v3 = vpop.f32.mrb[29].mxu0  ;;  %v814_v25 = vld [vmem:[%s1598_s3 + $0x48] sm:$0xff] }
 0x130   :  { %v784_v4 = vadd.f32 %v783_v1, %v696_v28  ;;  %v1094_v5 = vpop.f32.mrb[29].mxu1  ;;  %v754_v6 = vpop.f32.mrb[30].mxu0  ;;  %v815_v28 = vld [vmem:[%s1598_s3 + $0x50] sm:$0xff] }
 0x131   :  { %v818_v7 = vadd.f32 %v805_v63, %v752_v0  ;;  %v755_v8 = vadd.f32 %v754_v6, %v1469_v27  ;;  %v786_v10 = vpop.f32.mrb[30].mxu1  ;;  %v1079_v13 = vpop.f32.mrb[31].mxu0 }
 0x132   :  { %v826_v14 = vadd.f32 %v813_v2, %v784_v4  ;;  %v787_v15 = vadd.f32 %v786_v10, %v699_v30  ;;  %v1095_v16 = vpop.f32.mrb[31].mxu1 }
 0x133   :  { %v831_v17 = vmax.f32 %v818_v7, 0.0  ;;  %v819_v18 = vadd.f32 %v806_v11, %v755_v8  ;;  %v812_v8 = vld [vmem:[%s1598_s3 + $0x38] sm:$0xff] }
 0x134   :  { %v839_v19 = vmax.f32 %v826_v14, 0.0  ;;  %v827_v20 = vadd.f32 %v814_v25, %v787_v15 }
 0x135   :  { %844 = vst.msk [vmem:[%s1599_s4] sm:$0xff] %vm519_vm1, %v831_v17  ;;  %v832_v21 = vmax.f32 %v819_v18, 0.0 }
 0x136   :  { %852 = vst.msk [vmem:[%s1599_s4 + $0x40] sm:$0xff] %vm519_vm1, %v839_v19  ;;  %v840_v27 = vmax.f32 %v827_v20, 0.0  ;;  %v759_v22 = vpop.f32.mrb[32].mxu0 }
 0x137   :  { %845 = vst.msk [vmem:[%s1599_s4 + $0x8] sm:$0xff] %vm519_vm1, %v832_v21  ;;  %v760_v24 = vadd.f32 %v759_v22, %v1473_v41  ;;  %v791_v26 = vpop.f32.mrb[32].mxu1  ;;  %v1082_v29 = vpop.f32.mrb[33].mxu0 }
 0x138   :  { %853 = vst.msk [vmem:[%s1599_s4 + $0x48] sm:$0xff] %vm519_vm1, %v840_v27  ;;  %v792_v30 = vadd.f32 %v791_v26, %v704_v46  ;;  %v1098_v31 = vpop.f32.mrb[33].mxu1  ;;  %v762_v32 = vpop.f32.mrb[34].mxu0 }
 0x139   :  { %v820_v34 = vadd.f32 %v807_v23, %v760_v24  ;;  %v763_v41 = vadd.f32 %v762_v32, %v1475_v43  ;;  %v794_v35 = vpop.f32.mrb[34].mxu1  ;;  %v1083_v37 = vpop.f32.mrb[35].mxu0 }
 0x13a   :  { %v828_v38 = vadd.f32 %v815_v28, %v792_v30  ;;  %v795_v39 = vadd.f32 %v794_v35, %v707_v48  ;;  %v1099_v40 = vpop.f32.mrb[35].mxu1  ;;  %v809_v48 = vld [vmem:[%s1598_s3 + $0x20] sm:$0xff] }
 0x13b   :  { %v833_v42 = vmax.f32 %v820_v34, 0.0  ;;  %v821_v44 = vadd.f32 %v808_v33, %v763_v41 }
 0x13c   :  { %v841_v45 = vmax.f32 %v828_v38, 0.0  ;;  %v829_v46 = vadd.f32 %v816_v36, %v795_v39 }
 0x13d   :  { %846 = vst.msk [vmem:[%s1599_s4 + $0x10] sm:$0xff] %vm519_vm1, %v833_v42  ;;  %v834_v47 = vmax.f32 %v821_v44, 0.0 }
 0x13e   :  { %854 = vst.msk [vmem:[%s1599_s4 + $0x50] sm:$0xff] %vm519_vm1, %v841_v45  ;;  %v842_v43 = vmax.f32 %v829_v46, 0.0  ;;  %v767_v49 = vpop.f32.mrb[36].mxu0 }
 0x13f   :  { %847 = vst.msk [vmem:[%s1599_s4 + $0x18] sm:$0xff] %vm519_vm1, %v834_v47  ;;  %v768_v50 = vadd.f32 %v767_v49, %v1479_v57  ;;  %v799_v51 = vpop.f32.mrb[36].mxu1  ;;  %v1086_v53 = vpop.f32.mrb[37].mxu0 }
 0x140   :  { %855 = vst.msk [vmem:[%s1599_s4 + $0x58] sm:$0xff] %vm519_vm1, %v842_v43  ;;  %v800_v54 = vadd.f32 %v799_v51, %v1494_v61  ;;  %v770_v55 = vpop.f32.mrb[38].mxu0  ;;  %v1102_v58 = vpop.f32.mrb[37].mxu1 }
 0x141   :  { %v822_v57 = vadd.f32 %v809_v48, %v768_v50  ;;  %v771_v60 = vadd.f32 %v770_v55, %v1481_v59  ;;  %v1087_v62 = vpop.f32.mrb[39].mxu0  ;;  %v802_v63 = vpop.f32.mrb[38].mxu1  ;;  %v811_v59 = vld [vmem:[%s1598_s3 + $0x30] sm:$0xff] }
 0x142   :  { %v830_v0 = vadd.f32 %v817_v52, %v800_v54  ;;  %v1103_v1 = vpop.f32.mrb[39].mxu1 }
 0x143   :  { %v835_v2 = vmax.f32 %v822_v57, 0.0  ;;  %v823_v3 = vadd.f32 %v810_v56, %v771_v60 }
 0x144   :  { %v843_v4 = vmax.f32 %v830_v0, 0.0 }
 0x145   :  { %848 = vst.msk [vmem:[%s1599_s4 + $0x20] sm:$0xff] %vm519_vm1, %v835_v2  ;;  %v836_v61 = vmax.f32 %v823_v3, 0.0 }
 0x146   :  { %857 = vst.msk [vmem:[%s1599_s4 + $0x60] sm:$0xf] %vm856_vm2, %v843_v4  ;;  %v775_v5 = vpop.f32.mrb[40].mxu0 }
 0x147   :  { %849 = vst.msk [vmem:[%s1599_s4 + $0x28] sm:$0xff] %vm519_vm1, %v836_v61  ;;  %v776_v6 = vadd.f32 %v775_v5, %v1485_v9  ;;  %v1090_v11 = vpop.f32.mrb[41].mxu0 }
 0x148   :  { %v778_v7 = vpop.f32.mrb[42].mxu0 }
 0x149   :  { %v824_v10 = vadd.f32 %v811_v59, %v776_v6  ;;  %v779_v25 = vadd.f32 %v778_v7, %v1487_v12  ;;  %v1091_v13 = vpop.f32.mrb[43].mxu0 }
 0x14b   :  { %v837_v14 = vmax.f32 %v824_v10, 0.0  ;;  %v825_v15 = vadd.f32 %v812_v8, %v779_v25 }
 0x14d   :  { %850 = vst.msk [vmem:[%s1599_s4 + $0x30] sm:$0xff] %vm519_vm1, %v837_v14  ;;  %v838_v16 = vmax.f32 %v825_v15, 0.0 }
 0x14f   :  { %851 = vst.msk [vmem:[%s1599_s4 + $0x38] sm:$0xff] %vm519_vm1, %v838_v16 }

// kernel: siamese_forward.21
= control target key start
LH: loop header
LB: loop body
LE: loop exit
PB: predicated region body
PF: predicated region fallthrough
CT: control target
= control target key end

     0   :  { %v799_v34 = vmov 0.0   ;;  %vm800_vm0 = vmmov 0   ;;  %vm392_vm1 = vcmask 523264   ;;  %s986_s1 = inlined_call_operand.vmem [shape: bf16[576,128], index: 1, kind: input, shape index: {}]   ;;  %s987_s0 = inlined_call_operand.vmem [shape: bf16[36,576], index: 0, kind: input, shape index: {}]   ;;  %s988_s2 = inlined_call_operand.vmem [shape: f32[1,128], index: 2, kind: input, shape index: {}]   ;;  %s989_s3 = inlined_call_operand.vmem [shape: f32[36,128], index: 3, kind: output, shape index: {}]  }
   0x1   :  { %v744_v0 = vld [vmem:[%s986_s1 + $0x40] sm:$0xff]   ;;  %v748_v4 = vld [vmem:[%s986_s1 + $0x48] sm:$0xff]   ;;  %v752_v8 = vld [vmem:[%s986_s1 + $0x50] sm:$0xff]  }
   0x2   :  { %v745_v1 = vld [vmem:[%s986_s1 + $0xc0] sm:$0xff]   ;;  %639 = vmatprep.subr.bf16.mxu0 %v744_v0  ;;  %v749_v5 = vld [vmem:[%s986_s1 + $0xc8] sm:$0xff]   ;;  %v753_v9 = vld [vmem:[%s986_s1 + $0xd0] sm:$0xff]  }
   0x3   :  { %v746_v2 = vld [vmem:[%s986_s1] sm:$0xff]   ;;  %673 = vmatprep.subr.bf16.mxu1 %v745_v1  ;;  %v750_v6 = vld [vmem:[%s986_s1 + $0x8] sm:$0xff]   ;;  %v754_v10 = vld [vmem:[%s986_s1 + $0x10] sm:$0xff]  }
   0x4   :  { %v747_v3 = vld [vmem:[%s986_s1 + $0x80] sm:$0xff]   ;;  %640 = vmatpush3.bf16.msra.mxu0 %v746_v2  ;;  %v751_v7 = vld [vmem:[%s986_s1 + $0x88] sm:$0xff]   ;;  %v755_v11 = vld [vmem:[%s986_s1 + $0x90] sm:$0xff]  }
   0x5   :  { %674 = vmatpush3.bf16.msra.mxu1 %v747_v3  ;;  %641 = vmatprep.subr.bf16.mxu0 %v748_v4  ;;  %v756_v12 = vld [vmem:[%s986_s1 + $0x58] sm:$0xff]   ;;  %v760_v16 = vld [vmem:[%s986_s1 + $0x60] sm:$0xff]   ;;  %v764_v20 = vld [vmem:[%s986_s1 + $0x68] sm:$0xff]  }
   0x6   :  { %675 = vmatprep.subr.bf16.mxu1 %v749_v5  ;;  %v757_v13 = vld [vmem:[%s986_s1 + $0xd8] sm:$0xff]   ;;  %v761_v17 = vld [vmem:[%s986_s1 + $0xe0] sm:$0xff]   ;;  %v765_v21 = vld [vmem:[%s986_s1 + $0xe8] sm:$0xff]  }
   0x7   :  { %v758_v14 = vld [vmem:[%s986_s1 + $0x18] sm:$0xff]   ;;  %v762_v18 = vld [vmem:[%s986_s1 + $0x20] sm:$0xff]   ;;  %v766_v22 = vld [vmem:[%s986_s1 + $0x28] sm:$0xff]  }
   0x8   :  { %642 = vmatpush3.bf16.msra.mxu0 %v750_v6  ;;  %v759_v15 = vld [vmem:[%s986_s1 + $0x98] sm:$0xff]   ;;  %v763_v19 = vld [vmem:[%s986_s1 + $0xa0] sm:$0xff]   ;;  %v767_v23 = vld [vmem:[%s986_s1 + $0xa8] sm:$0xff]  }
   0x9   :  { %676 = vmatpush3.bf16.msra.mxu1 %v751_v7  ;;  %643 = vmatprep.subr.bf16.mxu0 %v752_v8  ;;  %v768_v24 = vld [vmem:[%s986_s1 + $0x70] sm:$0xff]   ;;  %v772_v28 = vld [vmem:[%s986_s1 + $0x78] sm:$0xff]   ;;  %v781_v36 = vld [vmem:[%s987_s0 + $0xc] ss:$20 sps:$4 sm:$0xff]  }
   0xa   :  { %677 = vmatprep.subr.bf16.mxu1 %v753_v9  ;;  %v769_v25 = vld [vmem:[%s986_s1 + $0xf0] sm:$0xff]   ;;  %v773_v29 = vld [vmem:[%s986_s1 + $0xf8] sm:$0xff]   ;;  %v782_v37 = vld [vmem:[%s986_s1 + $0x100] sm:$0xff]   ;;  %490 = vmatprep.mubr.bf16.mxu1 %v781_v36 }
   0xb   :  { %v770_v26 = vld [vmem:[%s986_s1 + $0x30] sm:$0xff]   ;;  %v774_v30 = vld [vmem:[%s986_s1 + $0x38] sm:$0xff]   ;;  %v783_v38 = vld [vmem:[%s987_s0 + $0x2c] ss:$20 sps:$4 sm:$0xff]  }
   0xc   :  { %644 = vmatpush3.bf16.msra.mxu0 %v754_v10  ;;  %v771_v27 = vld [vmem:[%s986_s1 + $0xb0] sm:$0xff]   ;;  %v775_v31 = vld [vmem:[%s986_s1 + $0xb8] sm:$0xff]   ;;  %v787_v40 = vld [vmem:[%s986_s1 + $0x108] sm:$0xff]  }
   0xd   :  { %678 = vmatpush3.bf16.msra.mxu1 %v755_v11  ;;  %645 = vmatprep.subr.bf16.mxu0 %v756_v12  ;;  %v776_v32 = vld [vmem:[%s987_s0] ss:$20 sps:$4 sm:$0xff]   ;;  %v778_v33 = vld [vmem:[%s987_s0 + $0x4] ss:$20 sps:$4 sm:$0xff]   ;;  %v779_v35 = vld [vmem:[%s987_s0 + $0x8] ss:$20 sps:$4 sm:$0xff]  }
   0xe   :  { %679 = vmatprep.subr.bf16.mxu1 %v757_v13  ;;  %434 = vmatprep.mubr.bf16.mxu0 %v778_v33  ;;  %v785_v39 = vld [vmem:[%s987_s0 + $0x34] ss:$20 sps:$4 sm:$0xff]   ;;  %v28_v43 = vld [vmem:[%s987_s0 + $0x58] sm:$0x33]  ;;  %v789_v44 = vld [vmem:[%s987_s0 + $0x30] ss:$20 sps:$4 sm:$0xff]  }
   0xf   :  { %v788_v41 = vld [vmem:[%s987_s0 + $0x28] ss:$20 sps:$4 sm:$0xff]   ;;  %v27_v42 = vld [vmem:[%s987_s0 + $0x50] sm:$0x33]  ;;  %v598_v47 = vcombine.high %v28_v43, %v28_v43  ;;  %v597_v50 = vcombine.low %v28_v43, %v28_v43  ;;  %v797_v52 = vld [vmem:[%s987_s0 + $0x38] ss:$20 sps:$4 sm:$0xff]  }
  0x10   :  { %646 = vmatpush3.bf16.msra.mxu0 %v758_v14  ;;  %v596_v45 = vcombine.high %v27_v42, %v27_v42  ;;  %v790_v46 = vld [vmem:[%s986_s1 + $0x110] sm:$0xff]   ;;  %v795_v48 = vld [vmem:[%s986_s1 + $0x118] sm:$0xff]   ;;  %v595_v49 = vcombine.low %v27_v42, %v27_v42  ;;  %v798_v53 = vld [vmem:[%s987_s0 + $0x60] ss:$0 sps:$4 sm:$0x33]  }
  0x11   :  { %680 = vmatpush3.bf16.msra.mxu1 %v759_v15  ;;  %647 = vmatprep.subr.bf16.mxu0 %v760_v16  ;;  %v796_v51 = vld [vmem:[%s987_s0 + $0x10] ss:$20 sps:$4 sm:$0xff]   ;;  %v584_v56 = vld [vmem:[%s988_s2] ss:$0 sm:$0xff] }
  0x12   :  { %681 = vmatprep.subr.bf16.mxu1 %v761_v17 }
  0x14   :  { %648 = vmatpush3.bf16.msra.mxu0 %v762_v18 }
  0x15   :  { %682 = vmatpush3.bf16.msra.mxu1 %v763_v19  ;;  %649 = vmatprep.subr.bf16.mxu0 %v764_v20 }
  0x16   :  { %683 = vmatprep.subr.bf16.mxu1 %v765_v21 }
  0x18   :  { %650 = vmatpush3.bf16.msra.mxu0 %v766_v22 }
  0x19   :  { %684 = vmatpush3.bf16.msra.mxu1 %v767_v23  ;;  %651 = vmatprep.subr.bf16.mxu0 %v768_v24 }
  0x1a   :  { %685 = vmatprep.subr.bf16.mxu1 %v769_v25 }
  0x1c   :  { %652 = vmatpush3.bf16.msra.mxu0 %v770_v26 }
  0x1d   :  { %686 = vmatpush3.bf16.msra.mxu1 %v771_v27  ;;  %653 = vmatprep.subr.bf16.mxu0 %v772_v28 }
  0x1e   :  { %687 = vmatprep.subr.bf16.mxu1 %v773_v29 }
  0x20   :  { %654 = vmatpush3.bf16.msra.mxu0 %v774_v30 }
  0x21   :  { %688 = vmatpush3.bf16.msra.mxu1 %v775_v31  ;;  %714 = vmatprep.subr.bf16.mxu0 %v799_v34 }
  0x22   :  { %734 = vmatprep.subr.bf16.mxu1 %v799_v34 }
  0x23   :  { %435 = vmatmul.mubr.bf16.vlgmr.msra.gmra.mrb[0].mxu0 %v776_v32 }
  0x24   :  { %491 = vmatmul.mubr.bf16.vlgmr.msra.gmra.mrb[0].mxu1 %v779_v35  ;;  %715 = vmatpush3.bf16.msra.mxu0 %v782_v37 }
  0x25   :  { %738 = vmatpush3.bf16.msra.mxu1 %v782_v37  ;;  %442 = vmatprep.mubr.bf16.mxu0 %v783_v38 }
  0x26   :  { %735 = vmatprep.subr.bf16.mxu1 %v799_v34  ;;  %498 = vmatprep.mubr.bf16.mxu1 %v785_v39 }
  0x27   :  { %716 = vmatprep.subr.bf16.mxu0 %v799_v34 }
  0x28   :  { %717 = vmatpush3.bf16.msra.mxu0 %v787_v40 }
  0x29   :  { %739 = vmatpush3.bf16.msra.mxu1 %v787_v40  ;;  %718 = vmatprep.subr.bf16.mxu0 %v799_v34 }
  0x2a   :  { %736 = vmatprep.subr.bf16.mxu1 %v799_v34 }
  0x2b   :  { %443 = vmatmul.mubr.bf16.gmra.mrb[4].mxu0 %v788_v41 }
  0x2c   :  { %499 = vmatmul.mubr.bf16.gmra.mrb[4].mxu1 %v789_v44  ;;  %450 = vmatprep.mubr.bf16.mxu0 %v596_v45 }
  0x2d   :  { %740 = vmatpush3.bf16.msra.mxu1 %v790_v46  ;;  %506 = vmatprep.mubr.bf16.mxu1 %v598_v47 }
  0x2e   :  { %719 = vmatpush3.bf16.msra.mxu0 %v790_v46  ;;  %737 = vmatprep.subr.bf16.mxu1 %v799_v34 }
  0x2f   :  { %720 = vmatprep.subr.bf16.mxu0 %v799_v34 }
  0x31   :  { %741 = vmatpush3.bf16.msra.mxu1 %v795_v48 }
  0x32   :  { %721 = vmatpush3.bf16.msra.mxu0 %v795_v48 }
  0x33   :  { %451 = vmatmul.mubr.bf16.gmra.mrb[8].mxu0 %v595_v49 }
  0x34   :  { %507 = vmatmul.mubr.bf16.gmra.mrb[8].mxu1 %v597_v50  ;;  %722 = vmatprep.mubr.msk.bf16.mxu0 %vm800_vm0, %v799_v34 }
  0x35   :  { %726 = vmatprep.mubr.msk.bf16.mxu1 %vm800_vm0, %v799_v34 }
  0x3b   :  { %723 = vmatmul.mubr.msk.bf16.vlgmr.msra.gmra.mrb[12].mxu0 %vm392_vm1, %v796_v51 }
  0x3c   :  { %727 = vmatmul.mubr.msk.bf16.vlgmr.msra.gmra.mrb[12].mxu1 %vm392_vm1, %v797_v52 }
  0x3d   :  { %730 = vmatprep.mubr.msk.bf16.mxu1 %vm800_vm0, %v799_v34 }
  0x44   :  { %731 = vmatmul.mubr.msk.bf16.gmra.mrb[16].mxu1 %vm392_vm1, %v798_v53 }
  0xf6   :  { %v655_v54 = vpop.f32.mrb[0].mxu0 }
  0xf7   :  { %v689_v55 = vpop.f32.mrb[0].mxu1  ;;  %v656_v57 = vpop.f32.mrb[1].mxu0 }
  0xf8   :  { %v657_v58 = vadd.f32 %v656_v57, %v655_v54  ;;  %v690_v59 = vpop.f32.mrb[1].mxu1  ;;  %v658_v60 = vpop.f32.mrb[2].mxu0 }
  0xf9   :  { %v691_v61 = vadd.f32 %v690_v59, %v689_v55  ;;  %v692_v62 = vpop.f32.mrb[2].mxu1  ;;  %v659_v63 = vpop.f32.mrb[3].mxu0 }
  0xfa   :  { %v437_v0 = vadd.f32 %v657_v58, %v584_v56  ;;  %v660_v1 = vadd.f32 %v659_v63, %v658_v60  ;;  %v693_v2 = vpop.f32.mrb[3].mxu1 }
  0xfb   :  { %v694_v3 = vadd.f32 %v693_v2, %v692_v62 }
  0xfc   :  { %v440_v4 = vadd.f32 %v660_v1, %v584_v56  ;;  %v493_v5 = vadd.f32 %v691_v61, %v437_v0 }
  0xfe   :  { %v661_v6 = vpop.f32.mrb[4].mxu0  ;;  %v496_v7 = vadd.f32 %v694_v3, %v440_v4 }
  0xff   :  { %v695_v8 = vpop.f32.mrb[4].mxu1  ;;  %v662_v9 = vpop.f32.mrb[5].mxu0 }
 0x100   :  { %v663_v10 = vadd.f32 %v662_v9, %v661_v6  ;;  %v696_v11 = vpop.f32.mrb[5].mxu1  ;;  %v664_v12 = vpop.f32.mrb[6].mxu0 }
 0x101   :  { %v697_v13 = vadd.f32 %v696_v11, %v695_v8  ;;  %v698_v14 = vpop.f32.mrb[6].mxu1  ;;  %v665_v15 = vpop.f32.mrb[7].mxu0 }
 0x102   :  { %v445_v16 = vadd.f32 %v663_v10, %v584_v56  ;;  %v666_v17 = vadd.f32 %v665_v15, %v664_v12  ;;  %v699_v18 = vpop.f32.mrb[7].mxu1 }
 0x103   :  { %v700_v19 = vadd.f32 %v699_v18, %v698_v14 }
 0x104   :  { %v448_v20 = vadd.f32 %v666_v17, %v584_v56  ;;  %v501_v21 = vadd.f32 %v697_v13, %v445_v16 }
 0x106   :  { %v667_v22 = vpop.f32.mrb[8].mxu0  ;;  %v504_v23 = vadd.f32 %v700_v19, %v448_v20 }
 0x107   :  { %v701_v24 = vpop.f32.mrb[8].mxu1  ;;  %v668_v25 = vpop.f32.mrb[9].mxu0 }
 0x108   :  { %v669_v26 = vadd.f32 %v668_v25, %v667_v22  ;;  %v702_v27 = vpop.f32.mrb[9].mxu1  ;;  %v670_v28 = vpop.f32.mrb[10].mxu0 }
 0x109   :  { %v703_v29 = vadd.f32 %v702_v27, %v701_v24  ;;  %v704_v30 = vpop.f32.mrb[10].mxu1  ;;  %v671_v31 = vpop.f32.mrb[11].mxu0 }
 0x10a   :  { %v453_v32 = vadd.f32 %v669_v26, %v584_v56  ;;  %v705_v33 = vpop.f32.mrb[11].mxu1 }
 0x10c   :  { %v509_v34 = vadd.f32 %v703_v29, %v453_v32 }
 0x10e   :  { %v548_v35 = vpop.f32.mrb[12].mxu0 }
 0x10f   :  { %v549_v36 = vadd.f32 %v548_v35, %v493_v5  ;;  %v556_v37 = vpop.f32.mrb[12].mxu1  ;;  %v724_v38 = vpop.f32.mrb[13].mxu0 }
 0x110   :  { %v557_v39 = vadd.f32 %v556_v37, %v501_v21  ;;  %v728_v40 = vpop.f32.mrb[13].mxu1  ;;  %v551_v41 = vpop.f32.mrb[14].mxu0 }
 0x111   :  { %v570_v42 = vmax.f32 %v549_v36, 0.0  ;;  %v552_v43 = vadd.f32 %v551_v41, %v496_v7  ;;  %v559_v44 = vpop.f32.mrb[14].mxu1  ;;  %v725_v45 = vpop.f32.mrb[15].mxu0 }
 0x112   :  { %v572_v46 = vmax.f32 %v557_v39, 0.0  ;;  %v560_v47 = vadd.f32 %v559_v44, %v504_v23  ;;  %v729_v48 = vpop.f32.mrb[15].mxu1 }
 0x113   :  { %575 = vst [vmem:[%s989_s3] sm:$0xff] %v570_v42  ;;  %v571_v49 = vmax.f32 %v552_v43, 0.0 }
 0x114   :  { %577 = vst [vmem:[%s989_s3 + $0x10] sm:$0xff] %v572_v46  ;;  %v573_v50 = vmax.f32 %v560_v47, 0.0 }
 0x115   :  { %576 = vst [vmem:[%s989_s3 + $0x8] sm:$0xff] %v571_v49 }
 0x116   :  { %578 = vst [vmem:[%s989_s3 + $0x18] sm:$0xff] %v573_v50 }
 0x117   :  { %v564_v51 = vpop.f32.mrb[16].mxu1 }
 0x118   :  { %v565_v52 = vadd.f32 %v564_v51, %v509_v34  ;;  %v732_v53 = vpop.f32.mrb[17].mxu1 }
 0x119   :  { %v567_v54 = vpop.f32.mrb[18].mxu1 }
 0x11a   :  { %v574_v55 = vmax.f32 %v565_v52, 0.0  ;;  %v733_v56 = vpop.f32.mrb[19].mxu1 }
 0x11c   :  { %579 = vst [vmem:[%s989_s3 + $0x20] sm:$0xf] %v574_v55 }

// kernel: siamese_forward.24
= control target key start
LH: loop header
LB: loop body
LE: loop exit
PB: predicated region body
PF: predicated region fallthrough
CT: control target
= control target key end

     0   :  { %vm1455_vm0 = vmmov 0   ;;  %s1821_s1 = inlined_call_operand.vmem [shape: bf16[1152,128], index: 1, kind: input, shape index: {}]   ;;  %s1822_s0 = inlined_call_operand.vmem [shape: bf16[36,1152], index: 0, kind: input, shape index: {}]   ;;  %s1823_s2 = inlined_call_operand.vmem [shape: f32[1,128], index: 2, kind: input, shape index: {}]   ;;  %s1824_s3 = inlined_call_operand.vmem [shape: f32[36,128], index: 3, kind: input, shape index: {}]   ;;  %s1825_s4 = inlined_call_operand.vmem [shape: f32[36,128], index: 4, kind: output, shape index: {}]  }
   0x1   :  { %v1347_v0 = vld [vmem:[%s1821_s1 + $0x40] sm:$0xff]   ;;  %v1351_v4 = vld [vmem:[%s1821_s1 + $0x48] sm:$0xff]   ;;  %v1355_v8 = vld [vmem:[%s1821_s1 + $0x50] sm:$0xff]  }
   0x2   :  { %v1348_v1 = vld [vmem:[%s1821_s1 + $0xc0] sm:$0xff]   ;;  %1154 = vmatprep.subr.bf16.mxu0 %v1347_v0  ;;  %v1352_v5 = vld [vmem:[%s1821_s1 + $0xc8] sm:$0xff]   ;;  %v1356_v9 = vld [vmem:[%s1821_s1 + $0xd0] sm:$0xff]  }
   0x3   :  { %v1349_v2 = vld [vmem:[%s1821_s1] sm:$0xff]   ;;  %1188 = vmatprep.subr.bf16.mxu1 %v1348_v1  ;;  %v1353_v6 = vld [vmem:[%s1821_s1 + $0x8] sm:$0xff]   ;;  %v1357_v10 = vld [vmem:[%s1821_s1 + $0x10] sm:$0xff]  }
   0x4   :  { %v1350_v3 = vld [vmem:[%s1821_s1 + $0x80] sm:$0xff]   ;;  %1155 = vmatpush3.bf16.msra.mxu0 %v1349_v2  ;;  %v1354_v7 = vld [vmem:[%s1821_s1 + $0x88] sm:$0xff]   ;;  %v1358_v11 = vld [vmem:[%s1821_s1 + $0x90] sm:$0xff]  }
   0x5   :  { %1189 = vmatpush3.bf16.msra.mxu1 %v1350_v3  ;;  %1156 = vmatprep.subr.bf16.mxu0 %v1351_v4  ;;  %v1359_v12 = vld [vmem:[%s1821_s1 + $0x58] sm:$0xff]   ;;  %v1363_v16 = vld [vmem:[%s1821_s1 + $0x60] sm:$0xff]   ;;  %v1367_v20 = vld [vmem:[%s1821_s1 + $0x68] sm:$0xff]  }
   0x6   :  { %1190 = vmatprep.subr.bf16.mxu1 %v1352_v5  ;;  %v1360_v13 = vld [vmem:[%s1821_s1 + $0xd8] sm:$0xff]   ;;  %v1364_v17 = vld [vmem:[%s1821_s1 + $0xe0] sm:$0xff]   ;;  %v1368_v21 = vld [vmem:[%s1821_s1 + $0xe8] sm:$0xff]  }
   0x7   :  { %v1361_v14 = vld [vmem:[%s1821_s1 + $0x18] sm:$0xff]   ;;  %v1365_v18 = vld [vmem:[%s1821_s1 + $0x20] sm:$0xff]   ;;  %v1369_v22 = vld [vmem:[%s1821_s1 + $0x28] sm:$0xff]  }
   0x8   :  { %1157 = vmatpush3.bf16.msra.mxu0 %v1353_v6  ;;  %v1362_v15 = vld [vmem:[%s1821_s1 + $0x98] sm:$0xff]   ;;  %v1366_v19 = vld [vmem:[%s1821_s1 + $0xa0] sm:$0xff]   ;;  %v1370_v23 = vld [vmem:[%s1821_s1 + $0xa8] sm:$0xff]  }
   0x9   :  { %1191 = vmatpush3.bf16.msra.mxu1 %v1354_v7  ;;  %1158 = vmatprep.subr.bf16.mxu0 %v1355_v8  ;;  %v1371_v24 = vld [vmem:[%s1821_s1 + $0x70] sm:$0xff]   ;;  %v1375_v28 = vld [vmem:[%s1821_s1 + $0x78] sm:$0xff]   ;;  %v1379_v32 = vld [vmem:[%s1822_s0] ss:$36 sps:$4 sm:$0xff]  }
   0xa   :  { %1192 = vmatprep.subr.bf16.mxu1 %v1356_v9  ;;  %v1372_v25 = vld [vmem:[%s1821_s1 + $0xf0] sm:$0xff]   ;;  %v1376_v29 = vld [vmem:[%s1821_s1 + $0xf8] sm:$0xff]   ;;  %v1381_v33 = vld [vmem:[%s1822_s0 + $0x4] ss:$36 sps:$4 sm:$0xff]  }
   0xb   :  { %v1373_v26 = vld [vmem:[%s1821_s1 + $0x30] sm:$0xff]   ;;  %v1377_v30 = vld [vmem:[%s1821_s1 + $0x38] sm:$0xff]   ;;  %v1382_v34 = vld [vmem:[%s1822_s0 + $0x8] ss:$36 sps:$4 sm:$0xff]   ;;  %782 = vmatprep.mubr.bf16.mxu0 %v1381_v33 }
   0xc   :  { %1159 = vmatpush3.bf16.msra.mxu0 %v1357_v10  ;;  %v1374_v27 = vld [vmem:[%s1821_s1 + $0xb0] sm:$0xff]   ;;  %v1378_v31 = vld [vmem:[%s1821_s1 + $0xb8] sm:$0xff]   ;;  %v1385_v36 = vld [vmem:[%s1821_s1 + $0x140] sm:$0xff]  }
   0xd   :  { %1193 = vmatpush3.bf16.msra.mxu1 %v1358_v11  ;;  %1160 = vmatprep.subr.bf16.mxu0 %v1359_v12  ;;  %v1384_v35 = vld [vmem:[%s1822_s0 + $0xc] ss:$36 sps:$4 sm:$0xff]   ;;  %v1386_v37 = vld [vmem:[%s1821_s1 + $0x1c0] sm:$0xff]   ;;  %v1400_v50 = vld [vmem:[%s1821_s1 + $0x158] sm:$0xff]  }
   0xe   :  { %1194 = vmatprep.subr.bf16.mxu1 %v1360_v13  ;;  %838 = vmatprep.mubr.bf16.mxu1 %v1384_v35  ;;  %v1387_v38 = vld [vmem:[%s1821_s1 + $0x100] sm:$0xff]   ;;  %v1389_v40 = vld [vmem:[%s1821_s1 + $0x148] sm:$0xff]   ;;  %v1393_v44 = vld [vmem:[%s1821_s1 + $0x150] sm:$0xff]  }
   0xf   :  { %v1388_v39 = vld [vmem:[%s1821_s1 + $0x180] sm:$0xff]   ;;  %v1390_v41 = vld [vmem:[%s1821_s1 + $0x1c8] sm:$0xff]   ;;  %v1394_v45 = vld [vmem:[%s1821_s1 + $0x1d0] sm:$0xff]  }
  0x10   :  { %1161 = vmatpush3.bf16.msra.mxu0 %v1361_v14  ;;  %v1391_v42 = vld [vmem:[%s1821_s1 + $0x108] sm:$0xff]   ;;  %v1395_v46 = vld [vmem:[%s1821_s1 + $0x110] sm:$0xff]   ;;  %v1401_v51 = vld [vmem:[%s1821_s1 + $0x1d8] sm:$0xff]  }
  0x11   :  { %1195 = vmatpush3.bf16.msra.mxu1 %v1362_v15  ;;  %1162 = vmatprep.subr.bf16.mxu0 %v1363_v16  ;;  %v1392_v43 = vld [vmem:[%s1821_s1 + $0x188] sm:$0xff]   ;;  %v1396_v47 = vld [vmem:[%s1821_s1 + $0x190] sm:$0xff]   ;;  %v1404_v53 = vld [vmem:[%s1821_s1 + $0x118] sm:$0xff]  }
  0x12   :  { %1196 = vmatprep.subr.bf16.mxu1 %v1364_v17  ;;  %v1397_v48 = vld [vmem:[%s1822_s0 + $0x4c] ss:$36 sps:$4 sm:$0xff]   ;;  %v1402_v52 = vld [vmem:[%s1822_s0 + $0x54] ss:$36 sps:$4 sm:$0xff]   ;;  %v1407_v56 = vld [vmem:[%s1821_s1 + $0x160] sm:$0xff]  }
  0x13   :  { %v1399_v49 = vld [vmem:[%s1822_s0 + $0x48] ss:$36 sps:$4 sm:$0xff]   ;;  %v1405_v54 = vld [vmem:[%s1821_s1 + $0x198] sm:$0xff]   ;;  %v1406_v55 = vld [vmem:[%s1822_s0 + $0x50] ss:$36 sps:$4 sm:$0xff]  }
  0x14   :  { %1163 = vmatpush3.bf16.msra.mxu0 %v1365_v18  ;;  %v1408_v57 = vld [vmem:[%s1821_s1 + $0x1e0] sm:$0xff]   ;;  %v1411_v60 = vld [vmem:[%s1821_s1 + $0x168] sm:$0xff]   ;;  %v38_v62 = vld [vmem:[%s1822_s0 + $0x90] sm:$0x33]  ;;  %v1454_v18 = vmov 0.0  }
  0x15   :  { %1197 = vmatpush3.bf16.msra.mxu1 %v1366_v19  ;;  %1164 = vmatprep.subr.bf16.mxu0 %v1367_v20  ;;  %v1409_v58 = vld [vmem:[%s1821_s1 + $0x120] sm:$0xff]   ;;  %v1412_v61 = vld [vmem:[%s1821_s1 + $0x1e8] sm:$0xff]   ;;  %v39_v63 = vld [vmem:[%s1822_s0 + $0x98] sm:$0x33]  ;;  %v1074_v0 = vcombine.high %v38_v62, %v38_v62  ;;  %v1073_v3 = vcombine.low %v38_v62, %v38_v62 }
  0x16   :  { %1198 = vmatprep.subr.bf16.mxu1 %v1368_v21  ;;  %v1410_v59 = vld [vmem:[%s1821_s1 + $0x1a0] sm:$0xff]   ;;  %v1076_v1 = vcombine.high %v39_v63, %v39_v63  ;;  %v1415_v2 = vld [vmem:[%s1821_s1 + $0x128] sm:$0xff]   ;;  %v1075_v4 = vcombine.low %v39_v63, %v39_v63  ;;  %v1419_v6 = vld [vmem:[%s1821_s1 + $0x170] sm:$0xff]  }
  0x17   :  { %v1416_v5 = vld [vmem:[%s1821_s1 + $0x1a8] sm:$0xff]   ;;  %v1420_v7 = vld [vmem:[%s1821_s1 + $0x1f0] sm:$0xff]   ;;  %v1423_v10 = vld [vmem:[%s1821_s1 + $0x178] sm:$0xff]  }
  0x18   :  { %1165 = vmatpush3.bf16.msra.mxu0 %v1369_v22  ;;  %v1421_v8 = vld [vmem:[%s1821_s1 + $0x130] sm:$0xff]   ;;  %v1424_v11 = vld [vmem:[%s1821_s1 + $0x1f8] sm:$0xff]   ;;  %v1433_v19 = vld [vmem:[%s1821_s1 + $0x200] sm:$0xff]  }
  0x19   :  { %1199 = vmatpush3.bf16.msra.mxu1 %v1370_v23  ;;  %1166 = vmatprep.subr.bf16.mxu0 %v1371_v24  ;;  %v1422_v9 = vld [vmem:[%s1821_s1 + $0x1b0] sm:$0xff]   ;;  %v1425_v12 = vld [vmem:[%s1821_s1 + $0x138] sm:$0xff]   ;;  %v1434_v20 = vld [vmem:[%s1821_s1 + $0x208] sm:$0xff]  }
  0x1a   :  { %1200 = vmatprep.subr.bf16.mxu1 %v1372_v25  ;;  %v1426_v13 = vld [vmem:[%s1821_s1 + $0x1b8] sm:$0xff]   ;;  %v1427_v14 = vld [vmem:[%s1822_s0 + $0x10] ss:$36 sps:$4 sm:$0xff]   ;;  %v1438_v22 = vld [vmem:[%s1822_s0 + $0x64] ss:$36 sps:$4 sm:$0xff]  }
  0x1b   :  { %v1429_v15 = vld [vmem:[%s1822_s0 + $0x14] ss:$36 sps:$4 sm:$0xff]   ;;  %v1432_v17 = vld [vmem:[%s1822_s0 + $0x1c] ss:$36 sps:$4 sm:$0xff]  }
  0x1c   :  { %1167 = vmatpush3.bf16.msra.mxu0 %v1373_v26  ;;  %v1430_v16 = vld [vmem:[%s1822_s0 + $0x18] ss:$36 sps:$4 sm:$0xff]   ;;  %v1440_v24 = vld [vmem:[%s1821_s1 + $0x210] sm:$0xff]   ;;  %v1441_v25 = vld [vmem:[%s1822_s0 + $0x60] ss:$36 sps:$4 sm:$0xff]  }
  0x1d   :  { %1201 = vmatpush3.bf16.msra.mxu1 %v1374_v27  ;;  %1168 = vmatprep.subr.bf16.mxu0 %v1375_v28  ;;  %v1435_v21 = vld [vmem:[%s1822_s0 + $0x5c] ss:$36 sps:$4 sm:$0xff]   ;;  %v41_v27 = vld [vmem:[%s1822_s0 + $0xa8] sm:$0x33]  ;;  %v1449_v35 = vld [vmem:[%s1821_s1 + $0x230] sm:$0xff]  }
  0x1e   :  { %1202 = vmatprep.subr.bf16.mxu1 %v1376_v29  ;;  %v1437_v23 = vld [vmem:[%s1822_s0 + $0x58] ss:$36 sps:$4 sm:$0xff]   ;;  %v40_v26 = vld [vmem:[%s1822_s0 + $0xa0] sm:$0x33]  ;;  %v1080_v29 = vcombine.high %v41_v27, %v41_v27  ;;  %v1079_v33 = vcombine.low %v41_v27, %v41_v27 }
  0x1f   :  { %v1078_v28 = vcombine.high %v40_v26, %v40_v26 }
  0x20   :  { %1169 = vmatpush3.bf16.msra.mxu0 %v1377_v30  ;;  %v1442_v30 = vld [vmem:[%s1821_s1 + $0x218] sm:$0xff]  }
  0x21   :  { %1203 = vmatpush3.bf16.msra.mxu1 %v1378_v31  ;;  %1222 = vmatprep.subr.bf16.mxu0 %v1385_v36  ;;  %v1077_v31 = vcombine.low %v40_v26, %v40_v26  ;;  %v1450_v36 = vld [vmem:[%s1821_s1 + $0x238] sm:$0xff]  }
  0x22   :  { %1256 = vmatprep.subr.bf16.mxu1 %v1386_v37  ;;  %v1451_v37 = vld [vmem:[%s1822_s0 + $0x20] ss:$36 sps:$4 sm:$0xff]  }
  0x23   :  { %783 = vmatmul.mubr.bf16.vlgmr.msra.gmra.mrb[0].mxu0 %v1379_v32  ;;  %v1446_v32 = vld [vmem:[%s1821_s1 + $0x220] sm:$0xff]  }
  0x24   :  { %839 = vmatmul.mubr.bf16.vlgmr.msra.gmra.mrb[0].mxu1 %v1382_v34  ;;  %1223 = vmatpush3.bf16.msra.mxu0 %v1387_v38  ;;  %v1448_v34 = vld [vmem:[%s1821_s1 + $0x228] sm:$0xff]  }
  0x25   :  { %1257 = vmatpush3.bf16.msra.mxu1 %v1388_v39  ;;  %1224 = vmatprep.subr.bf16.mxu0 %v1389_v40  ;;  %v1452_v38 = vld [vmem:[%s1822_s0 + $0x68] ss:$36 sps:$4 sm:$0xff]   ;;  %v1453_v39 = vld [vmem:[%s1822_s0 + $0xb0] ss:$0 sps:$4 sm:$0x33]  }
  0x26   :  { %1258 = vmatprep.subr.bf16.mxu1 %v1390_v41  ;;  %790 = vmatprep.mubr.bf16.mxu0 %v1397_v48 }
  0x27   :  { %846 = vmatprep.mubr.bf16.mxu1 %v1402_v52 }
  0x28   :  { %1225 = vmatpush3.bf16.msra.mxu0 %v1391_v42  ;;  %v1054_v42 = vld [vmem:[%s1823_s2] ss:$0 sm:$0xff] }
  0x29   :  { %1259 = vmatpush3.bf16.msra.mxu1 %v1392_v43  ;;  %1226 = vmatprep.subr.bf16.mxu0 %v1393_v44 }
  0x2a   :  { %1260 = vmatprep.subr.bf16.mxu1 %v1394_v45 }
  0x2b   :  { %791 = vmatmul.mubr.bf16.gmra.mrb[4].mxu0 %v1399_v49 }
  0x2c   :  { %1227 = vmatpush3.bf16.msra.mxu0 %v1395_v46  ;;  %847 = vmatmul.mubr.bf16.gmra.mrb[4].mxu1 %v1406_v55 }
  0x2d   :  { %1261 = vmatpush3.bf16.msra.mxu1 %v1396_v47  ;;  %1228 = vmatprep.subr.bf16.mxu0 %v1400_v50 }
  0x2e   :  { %1262 = vmatprep.subr.bf16.mxu1 %v1401_v51  ;;  %798 = vmatprep.mubr.bf16.mxu0 %v1074_v0 }
  0x2f   :  { %854 = vmatprep.mubr.bf16.mxu1 %v1076_v1 }
  0x30   :  { %1229 = vmatpush3.bf16.msra.mxu0 %v1404_v53 }
  0x31   :  { %1263 = vmatpush3.bf16.msra.mxu1 %v1405_v54  ;;  %1230 = vmatprep.subr.bf16.mxu0 %v1407_v56 }
  0x32   :  { %1264 = vmatprep.subr.bf16.mxu1 %v1408_v57 }
  0x33   :  { %799 = vmatmul.mubr.bf16.gmra.mrb[8].mxu0 %v1073_v3 }
  0x34   :  { %1231 = vmatpush3.bf16.msra.mxu0 %v1409_v58  ;;  %855 = vmatmul.mubr.bf16.gmra.mrb[8].mxu1 %v1075_v4 }
  0x35   :  { %1265 = vmatpush3.bf16.msra.mxu1 %v1410_v59  ;;  %1232 = vmatprep.subr.bf16.mxu0 %v1411_v60 }
  0x36   :  { %1266 = vmatprep.subr.bf16.mxu1 %v1412_v61  ;;  %894 = vmatprep.mubr.bf16.mxu0 %v1429_v15 }
  0x37   :  { %950 = vmatprep.mubr.bf16.mxu1 %v1432_v17 }
  0x38   :  { %1233 = vmatpush3.bf16.msra.mxu0 %v1415_v2 }
  0x39   :  { %1267 = vmatpush3.bf16.msra.mxu1 %v1416_v5  ;;  %1234 = vmatprep.subr.bf16.mxu0 %v1419_v6 }
  0x3a   :  { %1268 = vmatprep.subr.bf16.mxu1 %v1420_v7 }
  0x3c   :  { %1235 = vmatpush3.bf16.msra.mxu0 %v1421_v8 }
  0x3d   :  { %1269 = vmatpush3.bf16.msra.mxu1 %v1422_v9  ;;  %1236 = vmatprep.subr.bf16.mxu0 %v1423_v10 }
  0x3e   :  { %1270 = vmatprep.subr.bf16.mxu1 %v1424_v11 }
  0x40   :  { %1237 = vmatpush3.bf16.msra.mxu0 %v1425_v12 }
  0x41   :  { %1271 = vmatpush3.bf16.msra.mxu1 %v1426_v13  ;;  %1301 = vmatprep.subr.bf16.mxu0 %v1454_v18 }
  0x42   :  { %1329 = vmatprep.subr.bf16.mxu1 %v1454_v18 }
  0x43   :  { %895 = vmatmul.mubr.bf16.vlgmr.msra.gmra.mrb[12].mxu0 %v1427_v14 }
  0x44   :  { %951 = vmatmul.mubr.bf16.vlgmr.msra.gmra.mrb[12].mxu1 %v1430_v16  ;;  %1302 = vmatpush3.bf16.msra.mxu0 %v1433_v19 }
  0x45   :  { %1337 = vmatpush3.bf16.msra.mxu1 %v1433_v19  ;;  %1303 = vmatprep.subr.bf16.mxu0 %v1454_v18 }
  0x46   :  { %1330 = vmatprep.subr.bf16.mxu1 %v1454_v18  ;;  %902 = vmatprep.mubr.bf16.mxu0 %v1435_v21 }
  0x47   :  { %958 = vmatprep.mubr.bf16.mxu1 %v1438_v22 }
  0x48   :  { %1304 = vmatpush3.bf16.msra.mxu0 %v1434_v20 }
  0x49   :  { %1338 = vmatpush3.bf16.msra.mxu1 %v1434_v20  ;;  %1305 = vmatprep.subr.bf16.mxu0 %v1454_v18 }
  0x4a   :  { %1331 = vmatprep.subr.bf16.mxu1 %v1454_v18 }
  0x4b   :  { %903 = vmatmul.mubr.bf16.gmra.mrb[16].mxu0 %v1437_v23 }
  0x4c   :  { %1306 = vmatpush3.bf16.msra.mxu0 %v1440_v24  ;;  %959 = vmatmul.mubr.bf16.gmra.mrb[16].mxu1 %v1441_v25 }
  0x4d   :  { %1339 = vmatpush3.bf16.msra.mxu1 %v1440_v24  ;;  %1307 = vmatprep.subr.bf16.mxu0 %v1454_v18 }
  0x4e   :  { %1332 = vmatprep.subr.bf16.mxu1 %v1454_v18  ;;  %910 = vmatprep.mubr.bf16.mxu0 %v1078_v28 }
  0x4f   :  { %966 = vmatprep.mubr.bf16.mxu1 %v1080_v29 }
  0x50   :  { %1308 = vmatpush3.bf16.msra.mxu0 %v1442_v30 }
  0x51   :  { %1340 = vmatpush3.bf16.msra.mxu1 %v1442_v30  ;;  %1309 = vmatprep.subr.bf16.mxu0 %v1454_v18 }
  0x52   :  { %1333 = vmatprep.subr.bf16.mxu1 %v1454_v18 }
  0x53   :  { %911 = vmatmul.mubr.bf16.gmra.mrb[20].mxu0 %v1077_v31 }
  0x54   :  { %1310 = vmatpush3.bf16.msra.mxu0 %v1446_v32  ;;  %967 = vmatmul.mubr.bf16.gmra.mrb[20].mxu1 %v1079_v33 }
  0x55   :  { %1341 = vmatpush3.bf16.msra.mxu1 %v1446_v32  ;;  %1311 = vmatprep.subr.bf16.mxu0 %v1454_v18 }
  0x56   :  { %1334 = vmatprep.subr.bf16.mxu1 %v1454_v18  ;;  %1317 = vmatprep.mubr.msk.bf16.mxu0 %vm1455_vm0, %v1454_v18 }
  0x57   :  { %1321 = vmatprep.mubr.msk.bf16.mxu1 %vm1455_vm0, %v1454_v18 }
  0x58   :  { %1312 = vmatpush3.bf16.msra.mxu0 %v1448_v34 }
  0x59   :  { %1342 = vmatpush3.bf16.msra.mxu1 %v1448_v34  ;;  %1313 = vmatprep.subr.bf16.mxu0 %v1454_v18 }
  0x5a   :  { %1335 = vmatprep.subr.bf16.mxu1 %v1454_v18 }
  0x5c   :  { %1314 = vmatpush3.bf16.msra.mxu0 %v1449_v35 }
  0x5d   :  { %1343 = vmatpush3.bf16.msra.mxu1 %v1449_v35  ;;  %1315 = vmatprep.subr.bf16.mxu0 %v1454_v18 }
  0x5e   :  { %1336 = vmatprep.subr.bf16.mxu1 %v1454_v18 }
  0x60   :  { %1316 = vmatpush3.bf16.msra.mxu0 %v1450_v36 }
  0x61   :  { %1344 = vmatpush3.bf16.msra.mxu1 %v1450_v36 }
  0x63   :  { %1318 = vmatmul.mubr.bf16.vlgmr.msra.gmra.mrb[24].mxu0 %v1451_v37 }
  0x64   :  { %1322 = vmatmul.mubr.bf16.vlgmr.msra.gmra.mrb[24].mxu1 %v1452_v38 }
  0x65   :  { %1325 = vmatprep.mubr.msk.bf16.mxu1 %vm1455_vm0, %v1454_v18 }
  0x6c   :  { %1326 = vmatmul.mubr.bf16.gmra.mrb[28].mxu1 %v1453_v39 }
  0xf6   :  { %v1170_v40 = vpop.f32.mrb[0].mxu0 }
  0xf7   :  { %v1204_v41 = vpop.f32.mrb[0].mxu1  ;;  %v1171_v43 = vpop.f32.mrb[1].mxu0 }
  0xf8   :  { %v1172_v44 = vadd.f32 %v1171_v43, %v1170_v40  ;;  %v1205_v45 = vpop.f32.mrb[1].mxu1  ;;  %v1173_v46 = vpop.f32.mrb[2].mxu0 }
  0xf9   :  { %v1206_v47 = vadd.f32 %v1205_v45, %v1204_v41  ;;  %v1207_v48 = vpop.f32.mrb[2].mxu1  ;;  %v1174_v49 = vpop.f32.mrb[3].mxu0 }
  0xfa   :  { %v785_v50 = vadd.f32 %v1172_v44, %v1054_v42  ;;  %v1175_v51 = vadd.f32 %v1174_v49, %v1173_v46  ;;  %v1208_v52 = vpop.f32.mrb[3].mxu1 }
  0xfb   :  { %v1209_v53 = vadd.f32 %v1208_v52, %v1207_v48 }
  0xfc   :  { %v841_v54 = vadd.f32 %v1206_v47, %v785_v50  ;;  %v788_v55 = vadd.f32 %v1175_v51, %v1054_v42 }
  0xfe   :  { %v844_v56 = vadd.f32 %v1209_v53, %v788_v55  ;;  %v1176_v57 = vpop.f32.mrb[4].mxu0 }
  0xff   :  { %v1177_v58 = vpop.f32.mrb[5].mxu0  ;;  %v1210_v0 = vpop.f32.mrb[4].mxu1 }
 0x100   :  { %v1178_v59 = vadd.f32 %v1177_v58, %v1176_v57  ;;  %v1179_v60 = vpop.f32.mrb[6].mxu0  ;;  %v1211_v1 = vpop.f32.mrb[5].mxu1 }
 0x101   :  { %v1180_v61 = vpop.f32.mrb[7].mxu0  ;;  %v1212_v3 = vadd.f32 %v1211_v1, %v1210_v0  ;;  %v1213_v4 = vpop.f32.mrb[6].mxu1 }
 0x102   :  { %v1181_v62 = vadd.f32 %v1180_v61, %v1179_v60  ;;  %v793_v63 = vadd.f32 %v1178_v59, %v1054_v42  ;;  %v1214_v5 = vpop.f32.mrb[7].mxu1 }
 0x103   :  { %v1215_v7 = vadd.f32 %v1214_v5, %v1213_v4  ;;  %v1032_v5 = vld [vmem:[%s1824_s3 + $0x10] sm:$0xff] }
 0x104   :  { %v796_v2 = vadd.f32 %v1181_v62, %v1054_v42  ;;  %v849_v6 = vadd.f32 %v1212_v3, %v793_v63 }
 0x106   :  { %v852_v8 = vadd.f32 %v1215_v7, %v796_v2  ;;  %v1182_v9 = vpop.f32.mrb[8].mxu0  ;;  %v1030_v2 = vld [vmem:[%s1824_s3] sm:$0xff] }
 0x107   :  { %v1216_v10 = vpop.f32.mrb[8].mxu1  ;;  %v1183_v11 = vpop.f32.mrb[9].mxu0 }
 0x108   :  { %v1217_v12 = vpop.f32.mrb[9].mxu1  ;;  %v1184_v13 = vadd.f32 %v1183_v11, %v1182_v9  ;;  %v1185_v16 = vpop.f32.mrb[10].mxu0 }
 0x109   :  { %v1218_v14 = vadd.f32 %v1217_v12, %v1216_v10  ;;  %v1219_v15 = vpop.f32.mrb[10].mxu1  ;;  %v1186_v18 = vpop.f32.mrb[11].mxu0  ;;  %v1031_v10 = vld [vmem:[%s1824_s3 + $0x8] sm:$0xff] }
 0x10a   :  { %v1220_v17 = vpop.f32.mrb[11].mxu1  ;;  %v801_v19 = vadd.f32 %v1184_v13, %v1054_v42 }
 0x10c   :  { %v857_v20 = vadd.f32 %v1218_v14, %v801_v19  ;;  %v1033_v14 = vld [vmem:[%s1824_s3 + $0x18] sm:$0xff] }
 0x116   :  { %v1238_v21 = vpop.f32.mrb[12].mxu0 }
 0x117   :  { %v1272_v22 = vpop.f32.mrb[12].mxu1  ;;  %v1239_v23 = vpop.f32.mrb[13].mxu0 }
 0x118   :  { %v1240_v24 = vadd.f32 %v1239_v23, %v1238_v21  ;;  %v1273_v25 = vpop.f32.mrb[13].mxu1  ;;  %v1241_v26 = vpop.f32.mrb[14].mxu0 }
 0x119   :  { %v1274_v27 = vadd.f32 %v1273_v25, %v1272_v22  ;;  %v1275_v28 = vpop.f32.mrb[14].mxu1  ;;  %v1242_v29 = vpop.f32.mrb[15].mxu0 }
 0x11a   :  { %v897_v30 = vadd.f32 %v1240_v24, %v841_v54  ;;  %v1243_v31 = vadd.f32 %v1242_v29, %v1241_v26  ;;  %v1276_v32 = vpop.f32.mrb[15].mxu1  ;;  %v1034_v26 = vld [vmem:[%s1824_s3 + $0x20] sm:$0xf] }
 0x11b   :  { %v1277_v33 = vadd.f32 %v1276_v32, %v1275_v28 }
 0x11c   :  { %v900_v34 = vadd.f32 %v1243_v31, %v844_v56  ;;  %v953_v35 = vadd.f32 %v1274_v27, %v897_v30 }
 0x11e   :  { %v1244_v36 = vpop.f32.mrb[16].mxu0  ;;  %v956_v37 = vadd.f32 %v1277_v33, %v900_v34 }
 0x11f   :  { %v1245_v38 = vpop.f32.mrb[17].mxu0  ;;  %v1278_v39 = vpop.f32.mrb[16].mxu1 }
 0x120   :  { %v1246_v40 = vadd.f32 %v1245_v38, %v1244_v36  ;;  %v1247_v41 = vpop.f32.mrb[18].mxu0  ;;  %v1279_v42 = vpop.f32.mrb[17].mxu1 }
 0x121   :  { %v1248_v43 = vpop.f32.mrb[19].mxu0  ;;  %v1280_v44 = vadd.f32 %v1279_v42, %v1278_v39  ;;  %v1281_v45 = vpop.f32.mrb[18].mxu1 }
 0x122   :  { %v905_v46 = vadd.f32 %v1246_v40, %v849_v6  ;;  %v1249_v47 = vadd.f32 %v1248_v43, %v1247_v41  ;;  %v1282_v48 = vpop.f32.mrb[19].mxu1 }
 0x123   :  { %v1283_v49 = vadd.f32 %v1282_v48, %v1281_v45 }
 0x124   :  { %v908_v50 = vadd.f32 %v1249_v47, %v852_v8  ;;  %v961_v51 = vadd.f32 %v1280_v44, %v905_v46 }
 0x126   :  { %v1250_v52 = vpop.f32.mrb[20].mxu0  ;;  %v964_v53 = vadd.f32 %v1283_v49, %v908_v50 }
 0x127   :  { %v1251_v54 = vpop.f32.mrb[21].mxu0  ;;  %v1284_v55 = vpop.f32.mrb[20].mxu1 }
 0x128   :  { %v1252_v56 = vadd.f32 %v1251_v54, %v1250_v52  ;;  %v1285_v57 = vpop.f32.mrb[21].mxu1  ;;  %v1253_v58 = vpop.f32.mrb[22].mxu0 }
 0x129   :  { %v1286_v59 = vadd.f32 %v1285_v57, %v1284_v55  ;;  %v1287_v60 = vpop.f32.mrb[22].mxu1  ;;  %v1254_v61 = vpop.f32.mrb[23].mxu0 }
 0x12a   :  { %v913_v62 = vadd.f32 %v1252_v56, %v857_v20  ;;  %v1288_v63 = vpop.f32.mrb[23].mxu1 }
 0x12c   :  { %v969_v0 = vadd.f32 %v1286_v59, %v913_v62 }
 0x136   :  { %v1008_v1 = vpop.f32.mrb[24].mxu0 }
 0x137   :  { %v1009_v3 = vadd.f32 %v1008_v1, %v953_v35  ;;  %v1016_v4 = vpop.f32.mrb[24].mxu1  ;;  %v1319_v6 = vpop.f32.mrb[25].mxu0 }
 0x138   :  { %v1017_v7 = vadd.f32 %v1016_v4, %v961_v51  ;;  %v1323_v8 = vpop.f32.mrb[25].mxu1  ;;  %v1011_v9 = vpop.f32.mrb[26].mxu0 }
 0x139   :  { %v1035_v11 = vadd.f32 %v1030_v2, %v1009_v3  ;;  %v1012_v12 = vadd.f32 %v1011_v9, %v956_v37  ;;  %v1019_v13 = vpop.f32.mrb[26].mxu1  ;;  %v1320_v15 = vpop.f32.mrb[27].mxu0 }
 0x13a   :  { %v1037_v16 = vadd.f32 %v1032_v5, %v1017_v7  ;;  %v1020_v17 = vadd.f32 %v1019_v13, %v964_v53  ;;  %v1324_v18 = vpop.f32.mrb[27].mxu1 }
 0x13b   :  { %v1040_v19 = vmax.f32 %v1035_v11, 0.0  ;;  %v1036_v20 = vadd.f32 %v1031_v10, %v1012_v12 }
 0x13c   :  { %v1042_v21 = vmax.f32 %v1037_v16, 0.0  ;;  %v1038_v22 = vadd.f32 %v1033_v14, %v1020_v17 }
 0x13d   :  { %1045 = vst [vmem:[%s1825_s4] sm:$0xff] %v1040_v19  ;;  %v1041_v23 = vmax.f32 %v1036_v20, 0.0 }
 0x13e   :  { %1047 = vst [vmem:[%s1825_s4 + $0x10] sm:$0xff] %v1042_v21  ;;  %v1043_v24 = vmax.f32 %v1038_v22, 0.0 }
 0x13f   :  { %1046 = vst [vmem:[%s1825_s4 + $0x8] sm:$0xff] %v1041_v23  ;;  %v1024_v25 = vpop.f32.mrb[28].mxu1 }
 0x140   :  { %1048 = vst [vmem:[%s1825_s4 + $0x18] sm:$0xff] %v1043_v24  ;;  %v1025_v27 = vadd.f32 %v1024_v25, %v969_v0  ;;  %v1327_v28 = vpop.f32.mrb[29].mxu1 }
 0x141   :  { %v1027_v29 = vpop.f32.mrb[30].mxu1 }
 0x142   :  { %v1039_v30 = vadd.f32 %v1034_v26, %v1025_v27  ;;  %v1328_v31 = vpop.f32.mrb[31].mxu1 }
 0x144   :  { %v1044_v32 = vmax.f32 %v1039_v30, 0.0 }
 0x146   :  { %1049 = vst [vmem:[%s1825_s4 + $0x20] sm:$0xf] %v1044_v32 }

// kernel: siamese_forward.23
= control target key start
LH: loop header
LB: loop body
LE: loop exit
PB: predicated region body
PF: predicated region fallthrough
CT: control target
= control target key end

     0   :  { %vm1442_vm0 = vmmov 0   ;;  %s1788_s1 = inlined_call_operand.vmem [shape: bf16[1152,128], index: 1, kind: input, shape index: {}]   ;;  %s1789_s0 = inlined_call_operand.vmem [shape: bf16[36,1152], index: 0, kind: input, shape index: {}]   ;;  %s1790_s2 = inlined_call_operand.vmem [shape: f32[1,128], index: 2, kind: input, shape index: {}]   ;;  %s1791_s3 = inlined_call_operand.vmem [shape: f32[36,128], index: 3, kind: output, shape index: {}]  }
   0x1   :  { %v1334_v0 = vld [vmem:[%s1788_s1 + $0x40] sm:$0xff]   ;;  %v1338_v4 = vld [vmem:[%s1788_s1 + $0x48] sm:$0xff]   ;;  %v1342_v8 = vld [vmem:[%s1788_s1 + $0x50] sm:$0xff]  }
   0x2   :  { %v1335_v1 = vld [vmem:[%s1788_s1 + $0xc0] sm:$0xff]   ;;  %1141 = vmatprep.subr.bf16.mxu0 %v1334_v0  ;;  %v1339_v5 = vld [vmem:[%s1788_s1 + $0xc8] sm:$0xff]   ;;  %v1343_v9 = vld [vmem:[%s1788_s1 + $0xd0] sm:$0xff]  }
   0x3   :  { %v1336_v2 = vld [vmem:[%s1788_s1] sm:$0xff]   ;;  %1175 = vmatprep.subr.bf16.mxu1 %v1335_v1  ;;  %v1340_v6 = vld [vmem:[%s1788_s1 + $0x8] sm:$0xff]   ;;  %v1344_v10 = vld [vmem:[%s1788_s1 + $0x10] sm:$0xff]  }
   0x4   :  { %v1337_v3 = vld [vmem:[%s1788_s1 + $0x80] sm:$0xff]   ;;  %1142 = vmatpush3.bf16.msra.mxu0 %v1336_v2  ;;  %v1341_v7 = vld [vmem:[%s1788_s1 + $0x88] sm:$0xff]   ;;  %v1345_v11 = vld [vmem:[%s1788_s1 + $0x90] sm:$0xff]  }
   0x5   :  { %1176 = vmatpush3.bf16.msra.mxu1 %v1337_v3  ;;  %1143 = vmatprep.subr.bf16.mxu0 %v1338_v4  ;;  %v1346_v12 = vld [vmem:[%s1788_s1 + $0x58] sm:$0xff]   ;;  %v1350_v16 = vld [vmem:[%s1788_s1 + $0x60] sm:$0xff]   ;;  %v1354_v20 = vld [vmem:[%s1788_s1 + $0x68] sm:$0xff]  }
   0x6   :  { %1177 = vmatprep.subr.bf16.mxu1 %v1339_v5  ;;  %v1347_v13 = vld [vmem:[%s1788_s1 + $0xd8] sm:$0xff]   ;;  %v1351_v17 = vld [vmem:[%s1788_s1 + $0xe0] sm:$0xff]   ;;  %v1355_v21 = vld [vmem:[%s1788_s1 + $0xe8] sm:$0xff]  }
   0x7   :  { %v1348_v14 = vld [vmem:[%s1788_s1 + $0x18] sm:$0xff]   ;;  %v1352_v18 = vld [vmem:[%s1788_s1 + $0x20] sm:$0xff]   ;;  %v1356_v22 = vld [vmem:[%s1788_s1 + $0x28] sm:$0xff]  }
   0x8   :  { %1144 = vmatpush3.bf16.msra.mxu0 %v1340_v6  ;;  %v1349_v15 = vld [vmem:[%s1788_s1 + $0x98] sm:$0xff]   ;;  %v1353_v19 = vld [vmem:[%s1788_s1 + $0xa0] sm:$0xff]   ;;  %v1357_v23 = vld [vmem:[%s1788_s1 + $0xa8] sm:$0xff]  }
   0x9   :  { %1178 = vmatpush3.bf16.msra.mxu1 %v1341_v7  ;;  %1145 = vmatprep.subr.bf16.mxu0 %v1342_v8  ;;  %v1358_v24 = vld [vmem:[%s1788_s1 + $0x70] sm:$0xff]   ;;  %v1362_v28 = vld [vmem:[%s1788_s1 + $0x78] sm:$0xff]   ;;  %v1366_v32 = vld [vmem:[%s1789_s0] ss:$36 sps:$4 sm:$0xff]  }
   0xa   :  { %1179 = vmatprep.subr.bf16.mxu1 %v1343_v9  ;;  %v1359_v25 = vld [vmem:[%s1788_s1 + $0xf0] sm:$0xff]   ;;  %v1363_v29 = vld [vmem:[%s1788_s1 + $0xf8] sm:$0xff]   ;;  %v1368_v33 = vld [vmem:[%s1789_s0 + $0x4] ss:$36 sps:$4 sm:$0xff]  }
   0xb   :  { %v1360_v26 = vld [vmem:[%s1788_s1 + $0x30] sm:$0xff]   ;;  %v1364_v30 = vld [vmem:[%s1788_s1 + $0x38] sm:$0xff]   ;;  %v1369_v34 = vld [vmem:[%s1789_s0 + $0x8] ss:$36 sps:$4 sm:$0xff]   ;;  %779 = vmatprep.mubr.bf16.mxu0 %v1368_v33 }
   0xc   :  { %1146 = vmatpush3.bf16.msra.mxu0 %v1344_v10  ;;  %v1361_v27 = vld [vmem:[%s1788_s1 + $0xb0] sm:$0xff]   ;;  %v1365_v31 = vld [vmem:[%s1788_s1 + $0xb8] sm:$0xff]   ;;  %v1372_v36 = vld [vmem:[%s1788_s1 + $0x140] sm:$0xff]  }
   0xd   :  { %1180 = vmatpush3.bf16.msra.mxu1 %v1345_v11  ;;  %1147 = vmatprep.subr.bf16.mxu0 %v1346_v12  ;;  %v1371_v35 = vld [vmem:[%s1789_s0 + $0xc] ss:$36 sps:$4 sm:$0xff]   ;;  %v1373_v37 = vld [vmem:[%s1788_s1 + $0x1c0] sm:$0xff]   ;;  %v1387_v50 = vld [vmem:[%s1788_s1 + $0x158] sm:$0xff]  }
   0xe   :  { %1181 = vmatprep.subr.bf16.mxu1 %v1347_v13  ;;  %835 = vmatprep.mubr.bf16.mxu1 %v1371_v35  ;;  %v1374_v38 = vld [vmem:[%s1788_s1 + $0x100] sm:$0xff]   ;;  %v1376_v40 = vld [vmem:[%s1788_s1 + $0x148] sm:$0xff]   ;;  %v1380_v44 = vld [vmem:[%s1788_s1 + $0x150] sm:$0xff]  }
   0xf   :  { %v1375_v39 = vld [vmem:[%s1788_s1 + $0x180] sm:$0xff]   ;;  %v1377_v41 = vld [vmem:[%s1788_s1 + $0x1c8] sm:$0xff]   ;;  %v1381_v45 = vld [vmem:[%s1788_s1 + $0x1d0] sm:$0xff]  }
  0x10   :  { %1148 = vmatpush3.bf16.msra.mxu0 %v1348_v14  ;;  %v1378_v42 = vld [vmem:[%s1788_s1 + $0x108] sm:$0xff]   ;;  %v1382_v46 = vld [vmem:[%s1788_s1 + $0x110] sm:$0xff]   ;;  %v1388_v51 = vld [vmem:[%s1788_s1 + $0x1d8] sm:$0xff]  }
  0x11   :  { %1182 = vmatpush3.bf16.msra.mxu1 %v1349_v15  ;;  %1149 = vmatprep.subr.bf16.mxu0 %v1350_v16  ;;  %v1379_v43 = vld [vmem:[%s1788_s1 + $0x188] sm:$0xff]   ;;  %v1383_v47 = vld [vmem:[%s1788_s1 + $0x190] sm:$0xff]   ;;  %v1391_v53 = vld [vmem:[%s1788_s1 + $0x118] sm:$0xff]  }
  0x12   :  { %1183 = vmatprep.subr.bf16.mxu1 %v1351_v17  ;;  %v1384_v48 = vld [vmem:[%s1789_s0 + $0x4c] ss:$36 sps:$4 sm:$0xff]   ;;  %v1389_v52 = vld [vmem:[%s1789_s0 + $0x54] ss:$36 sps:$4 sm:$0xff]   ;;  %v1394_v56 = vld [vmem:[%s1788_s1 + $0x160] sm:$0xff]  }
  0x13   :  { %v1386_v49 = vld [vmem:[%s1789_s0 + $0x48] ss:$36 sps:$4 sm:$0xff]   ;;  %v1392_v54 = vld [vmem:[%s1788_s1 + $0x198] sm:$0xff]   ;;  %v1393_v55 = vld [vmem:[%s1789_s0 + $0x50] ss:$36 sps:$4 sm:$0xff]  }
  0x14   :  { %1150 = vmatpush3.bf16.msra.mxu0 %v1352_v18  ;;  %v1395_v57 = vld [vmem:[%s1788_s1 + $0x1e0] sm:$0xff]   ;;  %v1398_v60 = vld [vmem:[%s1788_s1 + $0x168] sm:$0xff]   ;;  %v35_v62 = vld [vmem:[%s1789_s0 + $0x90] sm:$0x33]  ;;  %v1441_v18 = vmov 0.0  }
  0x15   :  { %1184 = vmatpush3.bf16.msra.mxu1 %v1353_v19  ;;  %1151 = vmatprep.subr.bf16.mxu0 %v1354_v20  ;;  %v1396_v58 = vld [vmem:[%s1788_s1 + $0x120] sm:$0xff]   ;;  %v1399_v61 = vld [vmem:[%s1788_s1 + $0x1e8] sm:$0xff]   ;;  %v36_v63 = vld [vmem:[%s1789_s0 + $0x98] sm:$0x33]  ;;  %v1061_v0 = vcombine.high %v35_v62, %v35_v62  ;;  %v1060_v3 = vcombine.low %v35_v62, %v35_v62 }
  0x16   :  { %1185 = vmatprep.subr.bf16.mxu1 %v1355_v21  ;;  %v1397_v59 = vld [vmem:[%s1788_s1 + $0x1a0] sm:$0xff]   ;;  %v1063_v1 = vcombine.high %v36_v63, %v36_v63  ;;  %v1402_v2 = vld [vmem:[%s1788_s1 + $0x128] sm:$0xff]   ;;  %v1062_v4 = vcombine.low %v36_v63, %v36_v63  ;;  %v1406_v6 = vld [vmem:[%s1788_s1 + $0x170] sm:$0xff]  }
  0x17   :  { %v1403_v5 = vld [vmem:[%s1788_s1 + $0x1a8] sm:$0xff]   ;;  %v1407_v7 = vld [vmem:[%s1788_s1 + $0x1f0] sm:$0xff]   ;;  %v1410_v10 = vld [vmem:[%s1788_s1 + $0x178] sm:$0xff]  }
  0x18   :  { %1152 = vmatpush3.bf16.msra.mxu0 %v1356_v22  ;;  %v1408_v8 = vld [vmem:[%s1788_s1 + $0x130] sm:$0xff]   ;;  %v1411_v11 = vld [vmem:[%s1788_s1 + $0x1f8] sm:$0xff]   ;;  %v1420_v19 = vld [vmem:[%s1788_s1 + $0x200] sm:$0xff]  }
  0x19   :  { %1186 = vmatpush3.bf16.msra.mxu1 %v1357_v23  ;;  %1153 = vmatprep.subr.bf16.mxu0 %v1358_v24  ;;  %v1409_v9 = vld [vmem:[%s1788_s1 + $0x1b0] sm:$0xff]   ;;  %v1412_v12 = vld [vmem:[%s1788_s1 + $0x138] sm:$0xff]   ;;  %v1421_v20 = vld [vmem:[%s1788_s1 + $0x208] sm:$0xff]  }
  0x1a   :  { %1187 = vmatprep.subr.bf16.mxu1 %v1359_v25  ;;  %v1413_v13 = vld [vmem:[%s1788_s1 + $0x1b8] sm:$0xff]   ;;  %v1414_v14 = vld [vmem:[%s1789_s0 + $0x10] ss:$36 sps:$4 sm:$0xff]   ;;  %v1425_v22 = vld [vmem:[%s1789_s0 + $0x64] ss:$36 sps:$4 sm:$0xff]  }
  0x1b   :  { %v1416_v15 = vld [vmem:[%s1789_s0 + $0x14] ss:$36 sps:$4 sm:$0xff]   ;;  %v1419_v17 = vld [vmem:[%s1789_s0 + $0x1c] ss:$36 sps:$4 sm:$0xff]  }
  0x1c   :  { %1154 = vmatpush3.bf16.msra.mxu0 %v1360_v26  ;;  %v1417_v16 = vld [vmem:[%s1789_s0 + $0x18] ss:$36 sps:$4 sm:$0xff]   ;;  %v1427_v24 = vld [vmem:[%s1788_s1 + $0x210] sm:$0xff]   ;;  %v1428_v25 = vld [vmem:[%s1789_s0 + $0x60] ss:$36 sps:$4 sm:$0xff]  }
  0x1d   :  { %1188 = vmatpush3.bf16.msra.mxu1 %v1361_v27  ;;  %1155 = vmatprep.subr.bf16.mxu0 %v1362_v28  ;;  %v1422_v21 = vld [vmem:[%s1789_s0 + $0x5c] ss:$36 sps:$4 sm:$0xff]   ;;  %v38_v27 = vld [vmem:[%s1789_s0 + $0xa8] sm:$0x33]  ;;  %v1436_v35 = vld [vmem:[%s1788_s1 + $0x230] sm:$0xff]  }
  0x1e   :  { %1189 = vmatprep.subr.bf16.mxu1 %v1363_v29  ;;  %v1424_v23 = vld [vmem:[%s1789_s0 + $0x58] ss:$36 sps:$4 sm:$0xff]   ;;  %v37_v26 = vld [vmem:[%s1789_s0 + $0xa0] sm:$0x33]  ;;  %v1067_v29 = vcombine.high %v38_v27, %v38_v27  ;;  %v1066_v33 = vcombine.low %v38_v27, %v38_v27 }
  0x1f   :  { %v1065_v28 = vcombine.high %v37_v26, %v37_v26 }
  0x20   :  { %1156 = vmatpush3.bf16.msra.mxu0 %v1364_v30  ;;  %v1429_v30 = vld [vmem:[%s1788_s1 + $0x218] sm:$0xff]  }
  0x21   :  { %1190 = vmatpush3.bf16.msra.mxu1 %v1365_v31  ;;  %1209 = vmatprep.subr.bf16.mxu0 %v1372_v36  ;;  %v1064_v31 = vcombine.low %v37_v26, %v37_v26  ;;  %v1437_v36 = vld [vmem:[%s1788_s1 + $0x238] sm:$0xff]  }
  0x22   :  { %1243 = vmatprep.subr.bf16.mxu1 %v1373_v37  ;;  %v1438_v37 = vld [vmem:[%s1789_s0 + $0x20] ss:$36 sps:$4 sm:$0xff]  }
  0x23   :  { %780 = vmatmul.mubr.bf16.vlgmr.msra.gmra.mrb[0].mxu0 %v1366_v32  ;;  %v1433_v32 = vld [vmem:[%s1788_s1 + $0x220] sm:$0xff]  }
  0x24   :  { %836 = vmatmul.mubr.bf16.vlgmr.msra.gmra.mrb[0].mxu1 %v1369_v34  ;;  %1210 = vmatpush3.bf16.msra.mxu0 %v1374_v38  ;;  %v1435_v34 = vld [vmem:[%s1788_s1 + $0x228] sm:$0xff]  }
  0x25   :  { %1244 = vmatpush3.bf16.msra.mxu1 %v1375_v39  ;;  %1211 = vmatprep.subr.bf16.mxu0 %v1376_v40  ;;  %v1439_v38 = vld [vmem:[%s1789_s0 + $0x68] ss:$36 sps:$4 sm:$0xff]   ;;  %v1440_v39 = vld [vmem:[%s1789_s0 + $0xb0] ss:$0 sps:$4 sm:$0x33]  }
  0x26   :  { %1245 = vmatprep.subr.bf16.mxu1 %v1377_v41  ;;  %787 = vmatprep.mubr.bf16.mxu0 %v1384_v48 }
  0x27   :  { %843 = vmatprep.mubr.bf16.mxu1 %v1389_v52 }
  0x28   :  { %1212 = vmatpush3.bf16.msra.mxu0 %v1378_v42  ;;  %v1041_v42 = vld [vmem:[%s1790_s2] ss:$0 sm:$0xff] }
  0x29   :  { %1246 = vmatpush3.bf16.msra.mxu1 %v1379_v43  ;;  %1213 = vmatprep.subr.bf16.mxu0 %v1380_v44 }
  0x2a   :  { %1247 = vmatprep.subr.bf16.mxu1 %v1381_v45 }
  0x2b   :  { %788 = vmatmul.mubr.bf16.gmra.mrb[4].mxu0 %v1386_v49 }
  0x2c   :  { %1214 = vmatpush3.bf16.msra.mxu0 %v1382_v46  ;;  %844 = vmatmul.mubr.bf16.gmra.mrb[4].mxu1 %v1393_v55 }
  0x2d   :  { %1248 = vmatpush3.bf16.msra.mxu1 %v1383_v47  ;;  %1215 = vmatprep.subr.bf16.mxu0 %v1387_v50 }
  0x2e   :  { %1249 = vmatprep.subr.bf16.mxu1 %v1388_v51  ;;  %795 = vmatprep.mubr.bf16.mxu0 %v1061_v0 }
  0x2f   :  { %851 = vmatprep.mubr.bf16.mxu1 %v1063_v1 }
  0x30   :  { %1216 = vmatpush3.bf16.msra.mxu0 %v1391_v53 }
  0x31   :  { %1250 = vmatpush3.bf16.msra.mxu1 %v1392_v54  ;;  %1217 = vmatprep.subr.bf16.mxu0 %v1394_v56 }
  0x32   :  { %1251 = vmatprep.subr.bf16.mxu1 %v1395_v57 }
  0x33   :  { %796 = vmatmul.mubr.bf16.gmra.mrb[8].mxu0 %v1060_v3 }
  0x34   :  { %1218 = vmatpush3.bf16.msra.mxu0 %v1396_v58  ;;  %852 = vmatmul.mubr.bf16.gmra.mrb[8].mxu1 %v1062_v4 }
  0x35   :  { %1252 = vmatpush3.bf16.msra.mxu1 %v1397_v59  ;;  %1219 = vmatprep.subr.bf16.mxu0 %v1398_v60 }
  0x36   :  { %1253 = vmatprep.subr.bf16.mxu1 %v1399_v61  ;;  %891 = vmatprep.mubr.bf16.mxu0 %v1416_v15 }
  0x37   :  { %947 = vmatprep.mubr.bf16.mxu1 %v1419_v17 }
  0x38   :  { %1220 = vmatpush3.bf16.msra.mxu0 %v1402_v2 }
  0x39   :  { %1254 = vmatpush3.bf16.msra.mxu1 %v1403_v5  ;;  %1221 = vmatprep.subr.bf16.mxu0 %v1406_v6 }
  0x3a   :  { %1255 = vmatprep.subr.bf16.mxu1 %v1407_v7 }
  0x3c   :  { %1222 = vmatpush3.bf16.msra.mxu0 %v1408_v8 }
  0x3d   :  { %1256 = vmatpush3.bf16.msra.mxu1 %v1409_v9  ;;  %1223 = vmatprep.subr.bf16.mxu0 %v1410_v10 }
  0x3e   :  { %1257 = vmatprep.subr.bf16.mxu1 %v1411_v11 }
  0x40   :  { %1224 = vmatpush3.bf16.msra.mxu0 %v1412_v12 }
  0x41   :  { %1258 = vmatpush3.bf16.msra.mxu1 %v1413_v13  ;;  %1288 = vmatprep.subr.bf16.mxu0 %v1441_v18 }
  0x42   :  { %1316 = vmatprep.subr.bf16.mxu1 %v1441_v18 }
  0x43   :  { %892 = vmatmul.mubr.bf16.vlgmr.msra.gmra.mrb[12].mxu0 %v1414_v14 }
  0x44   :  { %948 = vmatmul.mubr.bf16.vlgmr.msra.gmra.mrb[12].mxu1 %v1417_v16  ;;  %1289 = vmatpush3.bf16.msra.mxu0 %v1420_v19 }
  0x45   :  { %1324 = vmatpush3.bf16.msra.mxu1 %v1420_v19  ;;  %1290 = vmatprep.subr.bf16.mxu0 %v1441_v18 }
  0x46   :  { %1317 = vmatprep.subr.bf16.mxu1 %v1441_v18  ;;  %899 = vmatprep.mubr.bf16.mxu0 %v1422_v21 }
  0x47   :  { %955 = vmatprep.mubr.bf16.mxu1 %v1425_v22 }
  0x48   :  { %1291 = vmatpush3.bf16.msra.mxu0 %v1421_v20 }
  0x49   :  { %1325 = vmatpush3.bf16.msra.mxu1 %v1421_v20  ;;  %1292 = vmatprep.subr.bf16.mxu0 %v1441_v18 }
  0x4a   :  { %1318 = vmatprep.subr.bf16.mxu1 %v1441_v18 }
  0x4b   :  { %900 = vmatmul.mubr.bf16.gmra.mrb[16].mxu0 %v1424_v23 }
  0x4c   :  { %1293 = vmatpush3.bf16.msra.mxu0 %v1427_v24  ;;  %956 = vmatmul.mubr.bf16.gmra.mrb[16].mxu1 %v1428_v25 }
  0x4d   :  { %1326 = vmatpush3.bf16.msra.mxu1 %v1427_v24  ;;  %1294 = vmatprep.subr.bf16.mxu0 %v1441_v18 }
  0x4e   :  { %1319 = vmatprep.subr.bf16.mxu1 %v1441_v18  ;;  %907 = vmatprep.mubr.bf16.mxu0 %v1065_v28 }
  0x4f   :  { %963 = vmatprep.mubr.bf16.mxu1 %v1067_v29 }
  0x50   :  { %1295 = vmatpush3.bf16.msra.mxu0 %v1429_v30 }
  0x51   :  { %1327 = vmatpush3.bf16.msra.mxu1 %v1429_v30  ;;  %1296 = vmatprep.subr.bf16.mxu0 %v1441_v18 }
  0x52   :  { %1320 = vmatprep.subr.bf16.mxu1 %v1441_v18 }
  0x53   :  { %908 = vmatmul.mubr.bf16.gmra.mrb[20].mxu0 %v1064_v31 }
  0x54   :  { %1297 = vmatpush3.bf16.msra.mxu0 %v1433_v32  ;;  %964 = vmatmul.mubr.bf16.gmra.mrb[20].mxu1 %v1066_v33 }
  0x55   :  { %1328 = vmatpush3.bf16.msra.mxu1 %v1433_v32  ;;  %1298 = vmatprep.subr.bf16.mxu0 %v1441_v18 }
  0x56   :  { %1321 = vmatprep.subr.bf16.mxu1 %v1441_v18  ;;  %1304 = vmatprep.mubr.msk.bf16.mxu0 %vm1442_vm0, %v1441_v18 }
  0x57   :  { %1308 = vmatprep.mubr.msk.bf16.mxu1 %vm1442_vm0, %v1441_v18 }
  0x58   :  { %1299 = vmatpush3.bf16.msra.mxu0 %v1435_v34 }
  0x59   :  { %1329 = vmatpush3.bf16.msra.mxu1 %v1435_v34  ;;  %1300 = vmatprep.subr.bf16.mxu0 %v1441_v18 }
  0x5a   :  { %1322 = vmatprep.subr.bf16.mxu1 %v1441_v18 }
  0x5c   :  { %1301 = vmatpush3.bf16.msra.mxu0 %v1436_v35 }
  0x5d   :  { %1330 = vmatpush3.bf16.msra.mxu1 %v1436_v35  ;;  %1302 = vmatprep.subr.bf16.mxu0 %v1441_v18 }
  0x5e   :  { %1323 = vmatprep.subr.bf16.mxu1 %v1441_v18 }
  0x60   :  { %1303 = vmatpush3.bf16.msra.mxu0 %v1437_v36 }
  0x61   :  { %1331 = vmatpush3.bf16.msra.mxu1 %v1437_v36 }
  0x63   :  { %1305 = vmatmul.mubr.bf16.vlgmr.msra.gmra.mrb[24].mxu0 %v1438_v37 }
  0x64   :  { %1309 = vmatmul.mubr.bf16.vlgmr.msra.gmra.mrb[24].mxu1 %v1439_v38 }
  0x65   :  { %1312 = vmatprep.mubr.msk.bf16.mxu1 %vm1442_vm0, %v1441_v18 }
  0x6c   :  { %1313 = vmatmul.mubr.bf16.gmra.mrb[28].mxu1 %v1440_v39 }
  0xf6   :  { %v1157_v40 = vpop.f32.mrb[0].mxu0 }
  0xf7   :  { %v1191_v41 = vpop.f32.mrb[0].mxu1  ;;  %v1158_v43 = vpop.f32.mrb[1].mxu0 }
  0xf8   :  { %v1159_v44 = vadd.f32 %v1158_v43, %v1157_v40  ;;  %v1192_v45 = vpop.f32.mrb[1].mxu1  ;;  %v1160_v46 = vpop.f32.mrb[2].mxu0 }
  0xf9   :  { %v1193_v47 = vadd.f32 %v1192_v45, %v1191_v41  ;;  %v1194_v48 = vpop.f32.mrb[2].mxu1  ;;  %v1161_v49 = vpop.f32.mrb[3].mxu0 }
  0xfa   :  { %v782_v50 = vadd.f32 %v1159_v44, %v1041_v42  ;;  %v1162_v51 = vadd.f32 %v1161_v49, %v1160_v46  ;;  %v1195_v52 = vpop.f32.mrb[3].mxu1 }
  0xfb   :  { %v1196_v53 = vadd.f32 %v1195_v52, %v1194_v48 }
  0xfc   :  { %v838_v54 = vadd.f32 %v1193_v47, %v782_v50  ;;  %v785_v55 = vadd.f32 %v1162_v51, %v1041_v42 }
  0xfe   :  { %v841_v56 = vadd.f32 %v1196_v53, %v785_v55  ;;  %v1163_v57 = vpop.f32.mrb[4].mxu0 }
  0xff   :  { %v1164_v58 = vpop.f32.mrb[5].mxu0  ;;  %v1197_v0 = vpop.f32.mrb[4].mxu1 }
 0x100   :  { %v1165_v59 = vadd.f32 %v1164_v58, %v1163_v57  ;;  %v1166_v60 = vpop.f32.mrb[6].mxu0  ;;  %v1198_v1 = vpop.f32.mrb[5].mxu1 }
 0x101   :  { %v1167_v61 = vpop.f32.mrb[7].mxu0  ;;  %v1199_v3 = vadd.f32 %v1198_v1, %v1197_v0  ;;  %v1200_v4 = vpop.f32.mrb[6].mxu1 }
 0x102   :  { %v1168_v62 = vadd.f32 %v1167_v61, %v1166_v60  ;;  %v790_v63 = vadd.f32 %v1165_v59, %v1041_v42  ;;  %v1201_v5 = vpop.f32.mrb[7].mxu1 }
 0x103   :  { %v1202_v7 = vadd.f32 %v1201_v5, %v1200_v4 }
 0x104   :  { %v793_v2 = vadd.f32 %v1168_v62, %v1041_v42  ;;  %v846_v6 = vadd.f32 %v1199_v3, %v790_v63 }
 0x106   :  { %v849_v8 = vadd.f32 %v1202_v7, %v793_v2  ;;  %v1169_v9 = vpop.f32.mrb[8].mxu0 }
 0x107   :  { %v1203_v10 = vpop.f32.mrb[8].mxu1  ;;  %v1170_v11 = vpop.f32.mrb[9].mxu0 }
 0x108   :  { %v1204_v12 = vpop.f32.mrb[9].mxu1  ;;  %v1171_v13 = vadd.f32 %v1170_v11, %v1169_v9  ;;  %v1172_v16 = vpop.f32.mrb[10].mxu0 }
 0x109   :  { %v1205_v14 = vadd.f32 %v1204_v12, %v1203_v10  ;;  %v1206_v15 = vpop.f32.mrb[10].mxu1  ;;  %v1173_v18 = vpop.f32.mrb[11].mxu0 }
 0x10a   :  { %v1207_v17 = vpop.f32.mrb[11].mxu1  ;;  %v798_v19 = vadd.f32 %v1171_v13, %v1041_v42 }
 0x10c   :  { %v854_v20 = vadd.f32 %v1205_v14, %v798_v19 }
 0x116   :  { %v1225_v21 = vpop.f32.mrb[12].mxu0 }
 0x117   :  { %v1259_v22 = vpop.f32.mrb[12].mxu1  ;;  %v1226_v23 = vpop.f32.mrb[13].mxu0 }
 0x118   :  { %v1227_v24 = vadd.f32 %v1226_v23, %v1225_v21  ;;  %v1260_v25 = vpop.f32.mrb[13].mxu1  ;;  %v1228_v26 = vpop.f32.mrb[14].mxu0 }
 0x119   :  { %v1261_v27 = vadd.f32 %v1260_v25, %v1259_v22  ;;  %v1262_v28 = vpop.f32.mrb[14].mxu1  ;;  %v1229_v29 = vpop.f32.mrb[15].mxu0 }
 0x11a   :  { %v894_v30 = vadd.f32 %v1227_v24, %v838_v54  ;;  %v1230_v31 = vadd.f32 %v1229_v29, %v1228_v26  ;;  %v1263_v32 = vpop.f32.mrb[15].mxu1 }
 0x11b   :  { %v1264_v33 = vadd.f32 %v1263_v32, %v1262_v28 }
 0x11c   :  { %v897_v34 = vadd.f32 %v1230_v31, %v841_v56  ;;  %v950_v35 = vadd.f32 %v1261_v27, %v894_v30 }
 0x11e   :  { %v1231_v36 = vpop.f32.mrb[16].mxu0  ;;  %v953_v37 = vadd.f32 %v1264_v33, %v897_v34 }
 0x11f   :  { %v1232_v38 = vpop.f32.mrb[17].mxu0  ;;  %v1265_v39 = vpop.f32.mrb[16].mxu1 }
 0x120   :  { %v1233_v40 = vadd.f32 %v1232_v38, %v1231_v36  ;;  %v1234_v41 = vpop.f32.mrb[18].mxu0  ;;  %v1266_v42 = vpop.f32.mrb[17].mxu1 }
 0x121   :  { %v1235_v43 = vpop.f32.mrb[19].mxu0  ;;  %v1267_v44 = vadd.f32 %v1266_v42, %v1265_v39  ;;  %v1268_v45 = vpop.f32.mrb[18].mxu1 }
 0x122   :  { %v902_v46 = vadd.f32 %v1233_v40, %v846_v6  ;;  %v1236_v47 = vadd.f32 %v1235_v43, %v1234_v41  ;;  %v1269_v48 = vpop.f32.mrb[19].mxu1 }
 0x123   :  { %v1270_v49 = vadd.f32 %v1269_v48, %v1268_v45 }
 0x124   :  { %v905_v50 = vadd.f32 %v1236_v47, %v849_v8  ;;  %v958_v51 = vadd.f32 %v1267_v44, %v902_v46 }
 0x126   :  { %v1237_v52 = vpop.f32.mrb[20].mxu0  ;;  %v961_v53 = vadd.f32 %v1270_v49, %v905_v50 }
 0x127   :  { %v1238_v54 = vpop.f32.mrb[21].mxu0  ;;  %v1271_v55 = vpop.f32.mrb[20].mxu1 }
 0x128   :  { %v1239_v56 = vadd.f32 %v1238_v54, %v1237_v52  ;;  %v1272_v57 = vpop.f32.mrb[21].mxu1  ;;  %v1240_v58 = vpop.f32.mrb[22].mxu0 }
 0x129   :  { %v1273_v59 = vadd.f32 %v1272_v57, %v1271_v55  ;;  %v1274_v60 = vpop.f32.mrb[22].mxu1  ;;  %v1241_v61 = vpop.f32.mrb[23].mxu0 }
 0x12a   :  { %v910_v62 = vadd.f32 %v1239_v56, %v854_v20  ;;  %v1275_v63 = vpop.f32.mrb[23].mxu1 }
 0x12c   :  { %v966_v0 = vadd.f32 %v1273_v59, %v910_v62 }
 0x136   :  { %v1005_v1 = vpop.f32.mrb[24].mxu0 }
 0x137   :  { %v1006_v2 = vadd.f32 %v1005_v1, %v950_v35  ;;  %v1013_v3 = vpop.f32.mrb[24].mxu1  ;;  %v1306_v4 = vpop.f32.mrb[25].mxu0 }
 0x138   :  { %v1014_v5 = vadd.f32 %v1013_v3, %v958_v51  ;;  %v1310_v6 = vpop.f32.mrb[25].mxu1  ;;  %v1008_v7 = vpop.f32.mrb[26].mxu0 }
 0x139   :  { %v1027_v8 = vmax.f32 %v1006_v2, 0.0  ;;  %v1009_v9 = vadd.f32 %v1008_v7, %v953_v37  ;;  %v1016_v10 = vpop.f32.mrb[26].mxu1  ;;  %v1307_v11 = vpop.f32.mrb[27].mxu0 }
 0x13a   :  { %v1029_v12 = vmax.f32 %v1014_v5, 0.0  ;;  %v1017_v13 = vadd.f32 %v1016_v10, %v961_v53  ;;  %v1311_v14 = vpop.f32.mrb[27].mxu1 }
 0x13b   :  { %1032 = vst [vmem:[%s1791_s3] sm:$0xff] %v1027_v8  ;;  %v1028_v15 = vmax.f32 %v1009_v9, 0.0 }
 0x13c   :  { %1034 = vst [vmem:[%s1791_s3 + $0x10] sm:$0xff] %v1029_v12  ;;  %v1030_v16 = vmax.f32 %v1017_v13, 0.0 }
 0x13d   :  { %1033 = vst [vmem:[%s1791_s3 + $0x8] sm:$0xff] %v1028_v15 }
 0x13e   :  { %1035 = vst [vmem:[%s1791_s3 + $0x18] sm:$0xff] %v1030_v16 }
 0x13f   :  { %v1021_v17 = vpop.f32.mrb[28].mxu1 }
 0x140   :  { %v1022_v18 = vadd.f32 %v1021_v17, %v966_v0  ;;  %v1314_v19 = vpop.f32.mrb[29].mxu1 }
 0x141   :  { %v1024_v20 = vpop.f32.mrb[30].mxu1 }
 0x142   :  { %v1031_v21 = vmax.f32 %v1022_v18, 0.0  ;;  %v1315_v22 = vpop.f32.mrb[31].mxu1 }
 0x144   :  { %1036 = vst [vmem:[%s1791_s3 + $0x20] sm:$0xf] %v1031_v21 }

// kernel: siamese_forward.22
= control target key start
LH: loop header
LB: loop body
LE: loop exit
PB: predicated region body
PF: predicated region fallthrough
CT: control target
= control target key end

     0   :  { %vm1613_vm0 = vmmov 0   ;;  %vm1086_vm1 = vcmask 523264   ;;  %s2003_s1 = inlined_call_operand.vmem [shape: bf16[1152,128], index: 1, kind: input, shape index: {}]   ;;  %s2004_s0 = inlined_call_operand.vmem [shape: bf16[36,1152], index: 0, kind: input, shape index: {}]   ;;  %s2005_s4 = inlined_call_operand.vmem [shape: bf16[64,128], index: 4, kind: input, shape index: {}]   ;;  %s2006_s3 = inlined_call_operand.vmem [shape: bf16[36,64], index: 3, kind: input, shape index: {}]   ;;  %s2007_s2 = inlined_call_operand.vmem [shape: f32[1,128], index: 2, kind: input, shape index: {}]   ;;  %s2008_s5 = inlined_call_operand.vmem [shape: f32[1,128], index: 5, kind: input, shape index: {}]   ;;  %s2009_s6 = inlined_call_operand.vmem [shape: f32[36,128], index: 6, kind: output, shape index: {}]  }
   0x1   :  { %v1498_v0 = vld [vmem:[%s2003_s1 + $0x40] sm:$0xff]   ;;  %v1502_v4 = vld [vmem:[%s2003_s1 + $0x48] sm:$0xff]   ;;  %v1506_v8 = vld [vmem:[%s2003_s1 + $0x50] sm:$0xff]  }
   0x2   :  { %v1499_v1 = vld [vmem:[%s2003_s1] sm:$0xff]   ;;  %1294 = vmatprep.subr.bf16.mxu0 %v1498_v0  ;;  %v1503_v5 = vld [vmem:[%s2003_s1 + $0x8] sm:$0xff]   ;;  %v1507_v9 = vld [vmem:[%s2003_s1 + $0x10] sm:$0xff]  }
   0x3   :  { %v1500_v2 = vld [vmem:[%s2003_s1 + $0xc0] sm:$0xff]   ;;  %1295 = vmatpush3.bf16.msra.mxu0 %v1499_v1  ;;  %v1504_v6 = vld [vmem:[%s2003_s1 + $0xc8] sm:$0xff]   ;;  %v1508_v10 = vld [vmem:[%s2003_s1 + $0xd0] sm:$0xff]  }
   0x4   :  { %v1501_v3 = vld [vmem:[%s2003_s1 + $0x80] sm:$0xff]   ;;  %1328 = vmatprep.subr.bf16.mxu1 %v1500_v2  ;;  %1296 = vmatprep.subr.bf16.mxu0 %v1502_v4  ;;  %v1505_v7 = vld [vmem:[%s2003_s1 + $0x88] sm:$0xff]   ;;  %v1509_v11 = vld [vmem:[%s2003_s1 + $0x90] sm:$0xff]  }
   0x5   :  { %1329 = vmatpush3.bf16.msra.mxu1 %v1501_v3  ;;  %v1510_v12 = vld [vmem:[%s2003_s1 + $0x58] sm:$0xff]   ;;  %v1514_v16 = vld [vmem:[%s2003_s1 + $0x60] sm:$0xff]   ;;  %v1518_v20 = vld [vmem:[%s2003_s1 + $0x68] sm:$0xff]  }
   0x6   :  { %1330 = vmatprep.subr.bf16.mxu1 %v1504_v6  ;;  %v1511_v13 = vld [vmem:[%s2003_s1 + $0x18] sm:$0xff]   ;;  %v1515_v17 = vld [vmem:[%s2003_s1 + $0x20] sm:$0xff]   ;;  %v1519_v21 = vld [vmem:[%s2003_s1 + $0x28] sm:$0xff]  }
   0x7   :  { %1297 = vmatpush3.bf16.msra.mxu0 %v1503_v5  ;;  %v1512_v14 = vld [vmem:[%s2003_s1 + $0xd8] sm:$0xff]   ;;  %v1516_v18 = vld [vmem:[%s2003_s1 + $0xe0] sm:$0xff]   ;;  %v1520_v22 = vld [vmem:[%s2003_s1 + $0xe8] sm:$0xff]  }
   0x8   :  { %1298 = vmatprep.subr.bf16.mxu0 %v1506_v8  ;;  %v1513_v15 = vld [vmem:[%s2003_s1 + $0x98] sm:$0xff]   ;;  %v1517_v19 = vld [vmem:[%s2003_s1 + $0xa0] sm:$0xff]   ;;  %v1521_v23 = vld [vmem:[%s2003_s1 + $0xa8] sm:$0xff]  }
   0x9   :  { %1331 = vmatpush3.bf16.msra.mxu1 %v1505_v7  ;;  %v1522_v24 = vld [vmem:[%s2003_s1 + $0x70] sm:$0xff]   ;;  %v1526_v28 = vld [vmem:[%s2003_s1 + $0x78] sm:$0xff]   ;;  %v1529_v31 = vld [vmem:[%s2004_s0] ss:$36 sps:$4 sm:$0xff]  }
   0xa   :  { %1332 = vmatprep.subr.bf16.mxu1 %v1508_v10  ;;  %v1523_v25 = vld [vmem:[%s2003_s1 + $0x30] sm:$0xff]   ;;  %v1527_v29 = vld [vmem:[%s2003_s1 + $0x38] sm:$0xff]   ;;  %v1531_v32 = vld [vmem:[%s2004_s0 + $0x4] ss:$36 sps:$4 sm:$0xff]  }
   0xb   :  { %1299 = vmatpush3.bf16.msra.mxu0 %v1507_v9  ;;  %v1524_v26 = vld [vmem:[%s2003_s1 + $0xf0] sm:$0xff]   ;;  %v1528_v30 = vld [vmem:[%s2003_s1 + $0xf8] sm:$0xff]   ;;  %788 = vmatprep.mubr.bf16.mxu0 %v1531_v32  ;;  %v1533_v34 = vld [vmem:[%s2003_s1 + $0x140] sm:$0xff]  }
   0xc   :  { %1300 = vmatprep.subr.bf16.mxu0 %v1510_v12  ;;  %v1525_v27 = vld [vmem:[%s2003_s1 + $0xb0] sm:$0xff]   ;;  %v1532_v33 = vld [vmem:[%s2003_s1 + $0xb8] sm:$0xff]   ;;  %v1534_v35 = vld [vmem:[%s2004_s0 + $0x8] ss:$36 sps:$4 sm:$0xff]  }
   0xd   :  { %1333 = vmatpush3.bf16.msra.mxu1 %v1509_v11  ;;  %v1536_v36 = vld [vmem:[%s2004_s0 + $0xc] ss:$36 sps:$4 sm:$0xff]   ;;  %v1537_v37 = vld [vmem:[%s2003_s1 + $0x100] sm:$0xff]   ;;  %v1548_v48 = vld [vmem:[%s2003_s1 + $0x158] sm:$0xff]  }
   0xe   :  { %1334 = vmatprep.subr.bf16.mxu1 %v1512_v14  ;;  %844 = vmatprep.mubr.bf16.mxu1 %v1536_v36  ;;  %v1538_v38 = vld [vmem:[%s2003_s1 + $0x1c0] sm:$0xff]   ;;  %v1540_v40 = vld [vmem:[%s2003_s1 + $0x148] sm:$0xff]   ;;  %v1544_v44 = vld [vmem:[%s2003_s1 + $0x150] sm:$0xff]  }
   0xf   :  { %1301 = vmatpush3.bf16.msra.mxu0 %v1511_v13  ;;  %v1539_v39 = vld [vmem:[%s2003_s1 + $0x180] sm:$0xff]   ;;  %v1541_v41 = vld [vmem:[%s2003_s1 + $0x108] sm:$0xff]   ;;  %v1545_v45 = vld [vmem:[%s2003_s1 + $0x110] sm:$0xff]  }
  0x10   :  { %1302 = vmatprep.subr.bf16.mxu0 %v1514_v16  ;;  %v1542_v42 = vld [vmem:[%s2003_s1 + $0x1c8] sm:$0xff]   ;;  %v1546_v46 = vld [vmem:[%s2003_s1 + $0x1d0] sm:$0xff]   ;;  %v1551_v50 = vld [vmem:[%s2003_s1 + $0x118] sm:$0xff]  }
  0x11   :  { %1335 = vmatpush3.bf16.msra.mxu1 %v1513_v15  ;;  %v1543_v43 = vld [vmem:[%s2003_s1 + $0x188] sm:$0xff]   ;;  %v1547_v47 = vld [vmem:[%s2003_s1 + $0x190] sm:$0xff]   ;;  %v1553_v52 = vld [vmem:[%s2003_s1 + $0x1d8] sm:$0xff]   ;;  %v1612_v15 = vmov 0.0  }
  0x12   :  { %1336 = vmatprep.subr.bf16.mxu1 %v1516_v18  ;;  %v1549_v49 = vld [vmem:[%s2004_s0 + $0x4c] ss:$36 sps:$4 sm:$0xff]   ;;  %v1554_v53 = vld [vmem:[%s2004_s0 + $0x54] ss:$36 sps:$4 sm:$0xff]   ;;  %v1558_v56 = vld [vmem:[%s2003_s1 + $0x160] sm:$0xff]  }
  0x13   :  { %1303 = vmatpush3.bf16.msra.mxu0 %v1515_v17  ;;  %v1552_v51 = vld [vmem:[%s2004_s0 + $0x48] ss:$36 sps:$4 sm:$0xff]   ;;  %v1556_v54 = vld [vmem:[%s2003_s1 + $0x198] sm:$0xff]   ;;  %v1557_v55 = vld [vmem:[%s2004_s0 + $0x50] ss:$36 sps:$4 sm:$0xff]  }
  0x14   :  { %1304 = vmatprep.subr.bf16.mxu0 %v1518_v20  ;;  %v1559_v57 = vld [vmem:[%s2003_s1 + $0x120] sm:$0xff]   ;;  %v1562_v60 = vld [vmem:[%s2003_s1 + $0x168] sm:$0xff]   ;;  %v44_v61 = vld [vmem:[%s2004_s0 + $0x90] sm:$0x33] }
  0x15   :  { %1337 = vmatpush3.bf16.msra.mxu1 %v1517_v19  ;;  %v1560_v58 = vld [vmem:[%s2003_s1 + $0x1e0] sm:$0xff]   ;;  %v1203_v62 = vcombine.high %v44_v61, %v44_v61  ;;  %v1564_v63 = vld [vmem:[%s2003_s1 + $0x128] sm:$0xff]   ;;  %v1202_v0 = vcombine.low %v44_v61, %v44_v61  ;;  %v1568_v3 = vld [vmem:[%s2003_s1 + $0x170] sm:$0xff]  }
  0x16   :  { %1338 = vmatprep.subr.bf16.mxu1 %v1520_v22  ;;  %v1561_v59 = vld [vmem:[%s2003_s1 + $0x1a0] sm:$0xff]   ;;  %v1566_v1 = vld [vmem:[%s2003_s1 + $0x1e8] sm:$0xff]   ;;  %v45_v4 = vld [vmem:[%s2004_s0 + $0x98] sm:$0x33] }
  0x17   :  { %1305 = vmatpush3.bf16.msra.mxu0 %v1519_v21  ;;  %v1567_v2 = vld [vmem:[%s2003_s1 + $0x1a8] sm:$0xff]   ;;  %v1205_v5 = vcombine.high %v45_v4, %v45_v4  ;;  %v1570_v6 = vld [vmem:[%s2003_s1 + $0x130] sm:$0xff]   ;;  %v1204_v7 = vcombine.low %v45_v4, %v45_v4  ;;  %v1574_v10 = vld [vmem:[%s2003_s1 + $0x178] sm:$0xff]  }
  0x18   :  { %1306 = vmatprep.subr.bf16.mxu0 %v1522_v24  ;;  %v1572_v8 = vld [vmem:[%s2003_s1 + $0x1f0] sm:$0xff]   ;;  %v1575_v11 = vld [vmem:[%s2003_s1 + $0x138] sm:$0xff]   ;;  %v1584_v19 = vld [vmem:[%s2003_s1 + $0x200] sm:$0xff]  }
  0x19   :  { %1339 = vmatpush3.bf16.msra.mxu1 %v1521_v23  ;;  %v1573_v9 = vld [vmem:[%s2003_s1 + $0x1b0] sm:$0xff]   ;;  %v1576_v12 = vld [vmem:[%s2003_s1 + $0x1f8] sm:$0xff]   ;;  %v1585_v20 = vld [vmem:[%s2003_s1 + $0x208] sm:$0xff]  }
  0x1a   :  { %1340 = vmatprep.subr.bf16.mxu1 %v1524_v26  ;;  %v1577_v13 = vld [vmem:[%s2004_s0 + $0x10] ss:$36 sps:$4 sm:$0xff]   ;;  %v1580_v16 = vld [vmem:[%s2003_s1 + $0x1b8] sm:$0xff]   ;;  %v1589_v22 = vld [vmem:[%s2004_s0 + $0x64] ss:$36 sps:$4 sm:$0xff]  }
  0x1b   :  { %1307 = vmatpush3.bf16.msra.mxu0 %v1523_v25  ;;  %v1579_v14 = vld [vmem:[%s2004_s0 + $0x14] ss:$36 sps:$4 sm:$0xff]   ;;  %v1583_v18 = vld [vmem:[%s2004_s0 + $0x1c] ss:$36 sps:$4 sm:$0xff]  }
  0x1c   :  { %1308 = vmatprep.subr.bf16.mxu0 %v1526_v28  ;;  %v1581_v17 = vld [vmem:[%s2004_s0 + $0x18] ss:$36 sps:$4 sm:$0xff]   ;;  %v1591_v24 = vld [vmem:[%s2003_s1 + $0x210] sm:$0xff]   ;;  %v1593_v25 = vld [vmem:[%s2005_s4] sm:$0xff]  }
  0x1d   :  { %1341 = vmatpush3.bf16.msra.mxu1 %v1525_v27  ;;  %v1586_v21 = vld [vmem:[%s2004_s0 + $0x5c] ss:$36 sps:$4 sm:$0xff]  }
  0x1e   :  { %1342 = vmatprep.subr.bf16.mxu1 %v1528_v30  ;;  %v1588_v23 = vld [vmem:[%s2004_s0 + $0x58] ss:$36 sps:$4 sm:$0xff]   ;;  %v1592_v26 = vld [vmem:[%s2004_s0 + $0x60] ss:$36 sps:$4 sm:$0xff]   ;;  %v47_v30 = vld [vmem:[%s2004_s0 + $0xa8] sm:$0x33] }
  0x1f   :  { %1309 = vmatpush3.bf16.msra.mxu0 %v1527_v29  ;;  %v46_v27 = vld [vmem:[%s2004_s0 + $0xa0] sm:$0x33]  ;;  %v1597_v29 = vld [vmem:[%s2005_s4 + $0x8] sm:$0xff]   ;;  %v1594_v32 = vld [vmem:[%s2003_s1 + $0x218] sm:$0xff]   ;;  %v1208_v36 = vcombine.low %v47_v30, %v47_v30 }
  0x20   :  { %1362 = vmatprep.subr.bf16.mxu0 %v1533_v34  ;;  %v1207_v28 = vcombine.high %v46_v27, %v46_v27  ;;  %v1602_v34 = vld [vmem:[%s2005_s4 + $0x10] sm:$0xff]  }
  0x21   :  { %1343 = vmatpush3.bf16.msra.mxu1 %v1532_v33  ;;  %v1206_v33 = vcombine.low %v46_v27, %v46_v27 }
  0x22   :  { %789 = vmatmul.mubr.bf16.vlgmr.msra.gmra.mrb[0].mxu0 %v1529_v31  ;;  %1396 = vmatprep.subr.bf16.mxu1 %v1538_v38  ;;  %v1209_v31 = vcombine.high %v47_v30, %v47_v30  ;;  %v1601_v38 = vld [vmem:[%s2003_s1 + $0x228] sm:$0xff]  }
  0x23   :  { %1363 = vmatpush3.bf16.msra.mxu0 %v1537_v37  ;;  %796 = vmatprep.mubr.bf16.mxu0 %v1549_v49  ;;  %v1604_v37 = vld [vmem:[%s2005_s4 + $0x18] sm:$0xff]  }
  0x24   :  { %845 = vmatmul.mubr.bf16.vlgmr.msra.gmra.mrb[0].mxu1 %v1534_v35  ;;  %1364 = vmatprep.subr.bf16.mxu0 %v1540_v40  ;;  %v1599_v35 = vld [vmem:[%s2003_s1 + $0x220] sm:$0xff]  }
  0x25   :  { %1397 = vmatpush3.bf16.msra.mxu1 %v1539_v39  ;;  %852 = vmatprep.mubr.bf16.mxu1 %v1554_v53  ;;  %v1603_v39 = vld [vmem:[%s2003_s1 + $0x230] sm:$0xff]   ;;  %v1606_v40 = vld [vmem:[%s2006_s3] sm:$0xff]  }
  0x26   :  { %1398 = vmatprep.subr.bf16.mxu1 %v1542_v42  ;;  %v1607_v42 = vld [vmem:[%s2004_s0 + $0x20] ss:$36 sps:$4 sm:$0xff]  }
  0x27   :  { %1365 = vmatpush3.bf16.msra.mxu0 %v1541_v41  ;;  %v1605_v41 = vld [vmem:[%s2003_s1 + $0x238] sm:$0xff]  }
  0x28   :  { %1366 = vmatprep.subr.bf16.mxu0 %v1544_v44  ;;  %v1609_v44 = vld [vmem:[%s2004_s0 + $0x68] ss:$36 sps:$4 sm:$0xff]  }
  0x29   :  { %1399 = vmatpush3.bf16.msra.mxu1 %v1543_v43  ;;  %v1608_v43 = vld [vmem:[%s2006_s3 + $0x8] sm:$0xff]  }
  0x2a   :  { %1400 = vmatprep.subr.bf16.mxu1 %v1546_v46  ;;  %797 = vmatmul.mubr.bf16.gmra.mrb[4].mxu0 %v1552_v51  ;;  %v1611_v46 = vld [vmem:[%s2004_s0 + $0xb0] ss:$0 sps:$4 sm:$0x33]  }
  0x2b   :  { %1367 = vmatpush3.bf16.msra.mxu0 %v1545_v45  ;;  %804 = vmatprep.mubr.bf16.mxu0 %v1203_v62  ;;  %v1610_v45 = vld [vmem:[%s2006_s3 + $0x10] ss:$0 sps:$4 sm:$0x33]  }
  0x2c   :  { %1368 = vmatprep.subr.bf16.mxu0 %v1548_v48  ;;  %853 = vmatmul.mubr.bf16.gmra.mrb[4].mxu1 %v1557_v55  ;;  %v1183_v48 = vld [vmem:[%s2007_s2] ss:$0 sm:$0xff] }
  0x2d   :  { %1401 = vmatpush3.bf16.msra.mxu1 %v1547_v47  ;;  %860 = vmatprep.mubr.bf16.mxu1 %v1205_v5 }
  0x2e   :  { %1402 = vmatprep.subr.bf16.mxu1 %v1553_v52 }
  0x2f   :  { %1369 = vmatpush3.bf16.msra.mxu0 %v1551_v50 }
  0x30   :  { %1370 = vmatprep.subr.bf16.mxu0 %v1558_v56 }
  0x31   :  { %1403 = vmatpush3.bf16.msra.mxu1 %v1556_v54 }
  0x32   :  { %1404 = vmatprep.subr.bf16.mxu1 %v1560_v58  ;;  %805 = vmatmul.mubr.bf16.gmra.mrb[8].mxu0 %v1202_v0 }
  0x33   :  { %1371 = vmatpush3.bf16.msra.mxu0 %v1559_v57  ;;  %900 = vmatprep.mubr.bf16.mxu0 %v1579_v14 }
  0x34   :  { %1372 = vmatprep.subr.bf16.mxu0 %v1562_v60  ;;  %861 = vmatmul.mubr.bf16.gmra.mrb[8].mxu1 %v1204_v7 }
  0x35   :  { %1405 = vmatpush3.bf16.msra.mxu1 %v1561_v59  ;;  %956 = vmatprep.mubr.bf16.mxu1 %v1583_v18 }
  0x36   :  { %1406 = vmatprep.subr.bf16.mxu1 %v1566_v1 }
  0x37   :  { %1373 = vmatpush3.bf16.msra.mxu0 %v1564_v63 }
  0x38   :  { %1374 = vmatprep.subr.bf16.mxu0 %v1568_v3 }
  0x39   :  { %1407 = vmatpush3.bf16.msra.mxu1 %v1567_v2 }
  0x3a   :  { %1408 = vmatprep.subr.bf16.mxu1 %v1572_v8 }
  0x3b   :  { %1375 = vmatpush3.bf16.msra.mxu0 %v1570_v6 }
  0x3c   :  { %1376 = vmatprep.subr.bf16.mxu0 %v1574_v10 }
  0x3d   :  { %1409 = vmatpush3.bf16.msra.mxu1 %v1573_v9 }
  0x3e   :  { %1410 = vmatprep.subr.bf16.mxu1 %v1576_v12 }
  0x3f   :  { %1377 = vmatpush3.bf16.msra.mxu0 %v1575_v11 }
  0x40   :  { %1448 = vmatprep.subr.bf16.mxu0 %v1612_v15 }
  0x41   :  { %1411 = vmatpush3.bf16.msra.mxu1 %v1580_v16 }
  0x42   :  { %901 = vmatmul.mubr.bf16.vlgmr.msra.gmra.mrb[12].mxu0 %v1577_v13  ;;  %1476 = vmatprep.subr.bf16.mxu1 %v1612_v15 }
  0x43   :  { %1449 = vmatpush3.bf16.msra.mxu0 %v1584_v19  ;;  %908 = vmatprep.mubr.bf16.mxu0 %v1586_v21 }
  0x44   :  { %957 = vmatmul.mubr.bf16.vlgmr.msra.gmra.mrb[12].mxu1 %v1581_v17  ;;  %1450 = vmatprep.subr.bf16.mxu0 %v1612_v15 }
  0x45   :  { %964 = vmatprep.mubr.bf16.mxu1 %v1589_v22  ;;  %1477 = vmatpush3.bf16.msra.mxu1 %v1593_v25 }
  0x46   :  { %1478 = vmatprep.subr.bf16.mxu1 %v1612_v15 }
  0x47   :  { %1451 = vmatpush3.bf16.msra.mxu0 %v1585_v20 }
  0x48   :  { %1452 = vmatprep.subr.bf16.mxu0 %v1612_v15 }
  0x49   :  { %1479 = vmatpush3.bf16.msra.mxu1 %v1597_v29 }
  0x4a   :  { %909 = vmatmul.mubr.bf16.gmra.mrb[16].mxu0 %v1588_v23  ;;  %1480 = vmatprep.subr.bf16.mxu1 %v1612_v15 }
  0x4b   :  { %1453 = vmatpush3.bf16.msra.mxu0 %v1591_v24  ;;  %916 = vmatprep.mubr.bf16.mxu0 %v1207_v28 }
  0x4c   :  { %965 = vmatmul.mubr.bf16.gmra.mrb[16].mxu1 %v1592_v26  ;;  %1454 = vmatprep.subr.bf16.mxu0 %v1612_v15 }
  0x4d   :  { %972 = vmatprep.mubr.bf16.mxu1 %v1209_v31  ;;  %1481 = vmatpush3.bf16.msra.mxu1 %v1602_v34 }
  0x4e   :  { %1482 = vmatprep.subr.bf16.mxu1 %v1612_v15 }
  0x4f   :  { %1455 = vmatpush3.bf16.msra.mxu0 %v1594_v32 }
  0x50   :  { %1456 = vmatprep.subr.bf16.mxu0 %v1612_v15 }
  0x51   :  { %1483 = vmatpush3.bf16.msra.mxu1 %v1604_v37 }
  0x52   :  { %917 = vmatmul.mubr.bf16.gmra.mrb[20].mxu0 %v1206_v33 }
  0x53   :  { %1464 = vmatprep.mubr.msk.bf16.mxu0 %vm1613_vm0, %v1612_v15  ;;  %1457 = vmatpush3.bf16.msra.mxu0 %v1599_v35 }
  0x54   :  { %973 = vmatmul.mubr.bf16.gmra.mrb[20].mxu1 %v1208_v36  ;;  %1458 = vmatprep.subr.bf16.mxu0 %v1612_v15 }
  0x55   :  { %1484 = vmatprep.mubr.msk.bf16.mxu1 %vm1613_vm0, %v1612_v15 }
  0x57   :  { %1459 = vmatpush3.bf16.msra.mxu0 %v1601_v38 }
  0x58   :  { %1460 = vmatprep.subr.bf16.mxu0 %v1612_v15 }
  0x5b   :  { %1461 = vmatpush3.bf16.msra.mxu0 %v1603_v39 }
  0x5c   :  { %1462 = vmatprep.subr.bf16.mxu0 %v1612_v15  ;;  %1485 = vmatmul.mubr.msk.bf16.vlgmr.msra.gmra.mrb[24].mxu1 %vm1086_vm1, %v1606_v40 }
  0x5d   :  { %1488 = vmatprep.mubr.msk.bf16.mxu1 %vm1613_vm0, %v1612_v15 }
  0x5f   :  { %1463 = vmatpush3.bf16.msra.mxu0 %v1605_v41 }
  0x62   :  { %1465 = vmatmul.mubr.bf16.vlgmr.msra.gmra.mrb[24].mxu0 %v1607_v42 }
  0x63   :  { %1468 = vmatprep.mubr.msk.bf16.mxu0 %vm1613_vm0, %v1612_v15 }
  0x64   :  { %1489 = vmatmul.mubr.msk.bf16.gmra.mrb[28].mxu1 %vm1086_vm1, %v1608_v43 }
  0x65   :  { %1492 = vmatprep.mubr.msk.bf16.mxu1 %vm1613_vm0, %v1612_v15 }
  0x6a   :  { %1469 = vmatmul.mubr.bf16.gmra.mrb[28].mxu0 %v1609_v44 }
  0x6b   :  { %1472 = vmatprep.mubr.msk.bf16.mxu0 %vm1613_vm0, %v1612_v15 }
  0x6c   :  { %1493 = vmatmul.mubr.msk.bf16.gmra.mrb[32].mxu1 %vm1086_vm1, %v1610_v45 }
  0x72   :  { %1473 = vmatmul.mubr.bf16.gmra.mrb[32].mxu0 %v1611_v46 }
  0xf5   :  { %v1310_v47 = vpop.f32.mrb[0].mxu0 }
  0xf6   :  { %v1311_v49 = vpop.f32.mrb[1].mxu0 }
  0xf7   :  { %v1312_v50 = vadd.f32 %v1311_v49, %v1310_v47  ;;  %v1313_v51 = vpop.f32.mrb[2].mxu0  ;;  %v1344_v52 = vpop.f32.mrb[0].mxu1 }
  0xf8   :  { %v1314_v53 = vpop.f32.mrb[3].mxu0  ;;  %v1345_v56 = vpop.f32.mrb[1].mxu1 }
  0xf9   :  { %v791_v54 = vadd.f32 %v1312_v50, %v1183_v48  ;;  %v1315_v55 = vadd.f32 %v1314_v53, %v1313_v51  ;;  %v1346_v57 = vadd.f32 %v1345_v56, %v1344_v52  ;;  %v1347_v58 = vpop.f32.mrb[2].mxu1 }
  0xfa   :  { %v1348_v60 = vpop.f32.mrb[3].mxu1 }
  0xfb   :  { %v794_v59 = vadd.f32 %v1315_v55, %v1183_v48  ;;  %v847_v61 = vadd.f32 %v1346_v57, %v791_v54  ;;  %v1349_v62 = vadd.f32 %v1348_v60, %v1347_v58 }
  0xfd   :  { %v850_v63 = vadd.f32 %v1349_v62, %v794_v59  ;;  %v1316_v0 = vpop.f32.mrb[4].mxu0 }
  0xfe   :  { %v1317_v1 = vpop.f32.mrb[5].mxu0 }
  0xff   :  { %v1318_v2 = vadd.f32 %v1317_v1, %v1316_v0  ;;  %v1319_v3 = vpop.f32.mrb[6].mxu0  ;;  %v1350_v4 = vpop.f32.mrb[4].mxu1 }
 0x100   :  { %v1320_v5 = vpop.f32.mrb[7].mxu0  ;;  %v1351_v8 = vpop.f32.mrb[5].mxu1 }
 0x101   :  { %v799_v6 = vadd.f32 %v1318_v2, %v1183_v48  ;;  %v1321_v7 = vadd.f32 %v1320_v5, %v1319_v3  ;;  %v1352_v9 = vadd.f32 %v1351_v8, %v1350_v4  ;;  %v1353_v10 = vpop.f32.mrb[6].mxu1 }
 0x102   :  { %v1354_v12 = vpop.f32.mrb[7].mxu1 }
 0x103   :  { %v802_v11 = vadd.f32 %v1321_v7, %v1183_v48  ;;  %v855_v13 = vadd.f32 %v1352_v9, %v799_v6  ;;  %v1355_v14 = vadd.f32 %v1354_v12, %v1353_v10 }
 0x105   :  { %v858_v15 = vadd.f32 %v1355_v14, %v802_v11  ;;  %v1322_v16 = vpop.f32.mrb[8].mxu0 }
 0x106   :  { %v1323_v17 = vpop.f32.mrb[9].mxu0 }
 0x107   :  { %v1324_v18 = vadd.f32 %v1323_v17, %v1322_v16  ;;  %v1325_v19 = vpop.f32.mrb[10].mxu0  ;;  %v1356_v22 = vpop.f32.mrb[8].mxu1 }
 0x108   :  { %v1326_v20 = vpop.f32.mrb[11].mxu0  ;;  %v1357_v23 = vpop.f32.mrb[9].mxu1 }
 0x109   :  { %v807_v21 = vadd.f32 %v1324_v18, %v1183_v48  ;;  %v1358_v24 = vadd.f32 %v1357_v23, %v1356_v22  ;;  %v1359_v25 = vpop.f32.mrb[10].mxu1 }
 0x10a   :  { %v1360_v26 = vpop.f32.mrb[11].mxu1 }
 0x10b   :  { %v863_v27 = vadd.f32 %v1358_v24, %v807_v21 }
 0x115   :  { %v1378_v28 = vpop.f32.mrb[12].mxu0 }
 0x116   :  { %v1379_v29 = vpop.f32.mrb[13].mxu0 }
 0x117   :  { %v1380_v30 = vadd.f32 %v1379_v29, %v1378_v28  ;;  %v1381_v31 = vpop.f32.mrb[14].mxu0  ;;  %v1412_v32 = vpop.f32.mrb[12].mxu1 }
 0x118   :  { %v1382_v33 = vpop.f32.mrb[15].mxu0  ;;  %v1413_v36 = vpop.f32.mrb[13].mxu1 }
 0x119   :  { %v903_v34 = vadd.f32 %v1380_v30, %v847_v61  ;;  %v1383_v35 = vadd.f32 %v1382_v33, %v1381_v31  ;;  %v1414_v37 = vadd.f32 %v1413_v36, %v1412_v32  ;;  %v1415_v38 = vpop.f32.mrb[14].mxu1 }
 0x11a   :  { %v1416_v40 = vpop.f32.mrb[15].mxu1 }
 0x11b   :  { %v906_v39 = vadd.f32 %v1383_v35, %v850_v63  ;;  %v1417_v41 = vadd.f32 %v1416_v40, %v1415_v38  ;;  %v959_v42 = vadd.f32 %v1414_v37, %v903_v34 }
 0x11d   :  { %v1384_v43 = vpop.f32.mrb[16].mxu0  ;;  %v962_v45 = vadd.f32 %v1417_v41, %v906_v39 }
 0x11e   :  { %v1385_v44 = vpop.f32.mrb[17].mxu0 }
 0x11f   :  { %v1386_v46 = vadd.f32 %v1385_v44, %v1384_v43  ;;  %v1387_v47 = vpop.f32.mrb[18].mxu0  ;;  %v1418_v48 = vpop.f32.mrb[16].mxu1 }
 0x120   :  { %v1388_v49 = vpop.f32.mrb[19].mxu0  ;;  %v1419_v52 = vpop.f32.mrb[17].mxu1 }
 0x121   :  { %v911_v50 = vadd.f32 %v1386_v46, %v855_v13  ;;  %v1389_v51 = vadd.f32 %v1388_v49, %v1387_v47  ;;  %v1420_v53 = vadd.f32 %v1419_v52, %v1418_v48  ;;  %v1421_v54 = vpop.f32.mrb[18].mxu1 }
 0x122   :  { %v1422_v56 = vpop.f32.mrb[19].mxu1 }
 0x123   :  { %v914_v55 = vadd.f32 %v1389_v51, %v858_v15  ;;  %v1423_v57 = vadd.f32 %v1422_v56, %v1421_v54  ;;  %v967_v58 = vadd.f32 %v1420_v53, %v911_v50  ;;  %v1293_v15 = vld [vmem:[%s2008_s5] ss:$0 sm:$0xff] }
 0x125   :  { %v1390_v59 = vpop.f32.mrb[20].mxu0  ;;  %v970_v61 = vadd.f32 %v1423_v57, %v914_v55 }
 0x126   :  { %v1391_v60 = vpop.f32.mrb[21].mxu0 }
 0x127   :  { %v1392_v62 = vadd.f32 %v1391_v60, %v1390_v59  ;;  %v1393_v63 = vpop.f32.mrb[22].mxu0  ;;  %v1424_v0 = vpop.f32.mrb[20].mxu1 }
 0x128   :  { %v1394_v1 = vpop.f32.mrb[23].mxu0  ;;  %v1425_v3 = vpop.f32.mrb[21].mxu1 }
 0x129   :  { %v919_v2 = vadd.f32 %v1392_v62, %v863_v27  ;;  %v1426_v4 = vadd.f32 %v1425_v3, %v1424_v0  ;;  %v1427_v5 = vpop.f32.mrb[22].mxu1 }
 0x12a   :  { %v1428_v6 = vpop.f32.mrb[23].mxu1 }
 0x12b   :  { %v975_v7 = vadd.f32 %v1426_v4, %v919_v2 }
 0x12f   :  { %v1130_v8 = vpop.f32.mrb[24].mxu1 }
 0x130   :  { %v1486_v9 = vpop.f32.mrb[25].mxu1 }
 0x131   :  { %v1133_v10 = vpop.f32.mrb[26].mxu1 }
 0x132   :  { %v1487_v11 = vpop.f32.mrb[27].mxu1 }
 0x135   :  { %v1014_v12 = vpop.f32.mrb[24].mxu0 }
 0x136   :  { %v1015_v13 = vadd.f32 %v1014_v12, %v959_v42  ;;  %v1466_v14 = vpop.f32.mrb[25].mxu0 }
 0x137   :  { %v1017_v16 = vpop.f32.mrb[26].mxu0  ;;  %v1138_v17 = vpop.f32.mrb[28].mxu1 }
 0x138   :  { %v1152_v18 = vadd.f32 %v1130_v8, %v1015_v13  ;;  %v1018_v19 = vadd.f32 %v1017_v16, %v962_v45  ;;  %v1467_v20 = vpop.f32.mrb[27].mxu0  ;;  %v1490_v21 = vpop.f32.mrb[29].mxu1 }
 0x139   :  { %v1141_v22 = vpop.f32.mrb[30].mxu1 }
 0x13a   :  { %v1164_v23 = vadd.f32 %v1293_v15, %v1152_v18  ;;  %v1153_v24 = vadd.f32 %v1133_v10, %v1018_v19  ;;  %v1491_v25 = vpop.f32.mrb[31].mxu1 }
 0x13c   :  { %v1169_v26 = vmax.f32 %v1164_v23, 0.0  ;;  %v1165_v27 = vadd.f32 %v1293_v15, %v1153_v24 }
 0x13d   :  { %v1022_v28 = vpop.f32.mrb[28].mxu0 }
 0x13e   :  { %1174 = vst [vmem:[%s2009_s6] sm:$0xff] %v1169_v26  ;;  %v1170_v29 = vmax.f32 %v1165_v27, 0.0  ;;  %v1023_v30 = vadd.f32 %v1022_v28, %v967_v58  ;;  %v1470_v31 = vpop.f32.mrb[29].mxu0 }
 0x13f   :  { %v1025_v32 = vpop.f32.mrb[30].mxu0  ;;  %v1146_v33 = vpop.f32.mrb[32].mxu1 }
 0x140   :  { %1175 = vst [vmem:[%s2009_s6 + $0x8] sm:$0xff] %v1170_v29  ;;  %v1154_v34 = vadd.f32 %v1138_v17, %v1023_v30  ;;  %v1026_v35 = vadd.f32 %v1025_v32, %v970_v61  ;;  %v1471_v36 = vpop.f32.mrb[31].mxu0  ;;  %v1494_v37 = vpop.f32.mrb[33].mxu1 }
 0x141   :  { %v1149_v38 = vpop.f32.mrb[34].mxu1 }
 0x142   :  { %v1166_v39 = vadd.f32 %v1293_v15, %v1154_v34  ;;  %v1155_v40 = vadd.f32 %v1141_v22, %v1026_v35  ;;  %v1495_v41 = vpop.f32.mrb[35].mxu1 }
 0x144   :  { %v1171_v42 = vmax.f32 %v1166_v39, 0.0  ;;  %v1167_v43 = vadd.f32 %v1293_v15, %v1155_v40 }
 0x145   :  { %v1030_v44 = vpop.f32.mrb[32].mxu0 }
 0x146   :  { %1176 = vst [vmem:[%s2009_s6 + $0x10] sm:$0xff] %v1171_v42  ;;  %v1172_v45 = vmax.f32 %v1167_v43, 0.0  ;;  %v1031_v46 = vadd.f32 %v1030_v44, %v975_v7  ;;  %v1474_v47 = vpop.f32.mrb[33].mxu0 }
 0x147   :  { %v1033_v48 = vpop.f32.mrb[34].mxu0 }
 0x148   :  { %1177 = vst [vmem:[%s2009_s6 + $0x18] sm:$0xff] %v1172_v45  ;;  %v1156_v49 = vadd.f32 %v1146_v33, %v1031_v46  ;;  %v1475_v50 = vpop.f32.mrb[35].mxu0 }
 0x14a   :  { %v1168_v51 = vadd.f32 %v1293_v15, %v1156_v49 }
 0x14c   :  { %v1173_v52 = vmax.f32 %v1168_v51, 0.0 }
 0x14e   :  { %1178 = vst [vmem:[%s2009_s6 + $0x20] sm:$0xf] %v1173_v52 }

// kernel: siamese_forward.25
= control target key start
LH: loop header
LB: loop body
LE: loop exit
PB: predicated region body
PF: predicated region fallthrough
CT: control target
= control target key end

     0   :  { %s2072_s1 = inlined_call_operand.vmem [shape: bf16[1152,256], index: 1, kind: input, shape index: {}]   ;;  %s2073_s0 = inlined_call_operand.vmem [shape: bf16[16,1152], index: 0, kind: input, shape index: {}]   ;;  %s2074_s2 = inlined_call_operand.vmem [shape: f32[1,256], index: 2, kind: input, shape index: {}]   ;;  %s2075_s3 = inlined_call_operand.vmem [shape: f32[16,256], index: 3, kind: output, shape index: {}]  }
   0x1   :  { %v1348_v0 = vld [vmem:[%s2072_s1 + $0x4] ss:$8 sps:$4 sm:$0xff]   ;;  %v1352_v2 = vld [vmem:[%s2072_s1] ss:$8 sps:$4 sm:$0xff]   ;;  %v1354_v4 = vld [vmem:[%s2072_s1 + $0x14] ss:$8 sps:$4 sm:$0xff]  }
   0x2   :  { %v1350_v1 = vld [vmem:[%s2072_s1 + $0x204] ss:$8 sps:$4 sm:$0xff]   ;;  %947 = vmatprep.subr.bf16.mxu1 %v1348_v0  ;;  %v1353_v3 = vld [vmem:[%s2072_s1 + $0x200] ss:$8 sps:$4 sm:$0xff]   ;;  %v1356_v5 = vld [vmem:[%s2072_s1 + $0x214] ss:$8 sps:$4 sm:$0xff]  }
   0x3   :  { %1033 = vmatprep.subr.bf16.mxu0 %v1350_v1  ;;  %948 = vmatpush1.bf16.msra.mxu1 %v1352_v2  ;;  %v1358_v6 = vld [vmem:[%s2072_s1 + $0x10] ss:$8 sps:$4 sm:$0xff]   ;;  %v1360_v8 = vld [vmem:[%s2072_s1 + $0x24] ss:$8 sps:$4 sm:$0xff]   ;;  %v1364_v10 = vld [vmem:[%s2072_s1 + $0x20] ss:$8 sps:$4 sm:$0xff]  }
   0x4   :  { %1034 = vmatpush1.bf16.msra.mxu0 %v1353_v3  ;;  %949 = vmatprep.subr.bf16.mxu1 %v1354_v4  ;;  %v1359_v7 = vld [vmem:[%s2072_s1 + $0x210] ss:$8 sps:$4 sm:$0xff]   ;;  %v1362_v9 = vld [vmem:[%s2072_s1 + $0x224] ss:$8 sps:$4 sm:$0xff]   ;;  %v1365_v11 = vld [vmem:[%s2072_s1 + $0x220] ss:$8 sps:$4 sm:$0xff]  }
   0x5   :  { %1035 = vmatprep.subr.bf16.mxu0 %v1356_v5  ;;  %v1366_v12 = vld [vmem:[%s2072_s1 + $0x34] ss:$8 sps:$4 sm:$0xff]   ;;  %v1370_v14 = vld [vmem:[%s2072_s1 + $0x30] ss:$8 sps:$4 sm:$0xff]   ;;  %v1372_v16 = vld [vmem:[%s2072_s1 + $0x44] ss:$8 sps:$4 sm:$0xff]  }
   0x6   :  { %v1368_v13 = vld [vmem:[%s2072_s1 + $0x234] ss:$8 sps:$4 sm:$0xff]   ;;  %v1371_v15 = vld [vmem:[%s2072_s1 + $0x230] ss:$8 sps:$4 sm:$0xff]   ;;  %v1374_v17 = vld [vmem:[%s2072_s1 + $0x244] ss:$8 sps:$4 sm:$0xff]  }
   0x7   :  { %950 = vmatpush1.bf16.msra.mxu1 %v1358_v6  ;;  %v1376_v18 = vld [vmem:[%s2072_s1 + $0x40] ss:$8 sps:$4 sm:$0xff]   ;;  %v1378_v20 = vld [vmem:[%s2072_s1 + $0x54] ss:$8 sps:$4 sm:$0xff]   ;;  %v1382_v22 = vld [vmem:[%s2072_s1 + $0x50] ss:$8 sps:$4 sm:$0xff]  }
   0x8   :  { %1036 = vmatpush1.bf16.msra.mxu0 %v1359_v7  ;;  %951 = vmatprep.subr.bf16.mxu1 %v1360_v8  ;;  %v1377_v19 = vld [vmem:[%s2072_s1 + $0x240] ss:$8 sps:$4 sm:$0xff]   ;;  %v1380_v21 = vld [vmem:[%s2072_s1 + $0x254] ss:$8 sps:$4 sm:$0xff]   ;;  %v1383_v23 = vld [vmem:[%s2072_s1 + $0x250] ss:$8 sps:$4 sm:$0xff]  }
   0x9   :  { %1037 = vmatprep.subr.bf16.mxu0 %v1362_v9  ;;  %v1384_v24 = vld [vmem:[%s2072_s1 + $0x64] ss:$8 sps:$4 sm:$0xff]   ;;  %v1388_v26 = vld [vmem:[%s2072_s1 + $0x60] ss:$8 sps:$4 sm:$0xff]   ;;  %v1390_v28 = vld [vmem:[%s2072_s1 + $0x74] ss:$8 sps:$4 sm:$0xff]  }
   0xa   :  { %v1386_v25 = vld [vmem:[%s2072_s1 + $0x264] ss:$8 sps:$4 sm:$0xff]   ;;  %v1389_v27 = vld [vmem:[%s2072_s1 + $0x260] ss:$8 sps:$4 sm:$0xff]   ;;  %v1392_v29 = vld [vmem:[%s2072_s1 + $0x274] ss:$8 sps:$4 sm:$0xff]  }
   0xb   :  { %952 = vmatpush1.bf16.msra.mxu1 %v1364_v10  ;;  %v1394_v30 = vld [vmem:[%s2072_s1 + $0x70] ss:$8 sps:$4 sm:$0xff]   ;;  %v1396_v32 = vld [vmem:[%s2072_s1 + $0x84] ss:$8 sps:$4 sm:$0xff]   ;;  %v1400_v34 = vld [vmem:[%s2072_s1 + $0x80] ss:$8 sps:$4 sm:$0xff]  }
   0xc   :  { %1038 = vmatpush1.bf16.msra.mxu0 %v1365_v11  ;;  %953 = vmatprep.subr.bf16.mxu1 %v1366_v12  ;;  %v1395_v31 = vld [vmem:[%s2072_s1 + $0x270] ss:$8 sps:$4 sm:$0xff]   ;;  %v1398_v33 = vld [vmem:[%s2072_s1 + $0x284] ss:$8 sps:$4 sm:$0xff]   ;;  %v1401_v35 = vld [vmem:[%s2072_s1 + $0x280] ss:$8 sps:$4 sm:$0xff]  }
   0xd   :  { %1039 = vmatprep.subr.bf16.mxu0 %v1368_v13  ;;  %v1402_v36 = vld [vmem:[%s2072_s1 + $0x94] ss:$8 sps:$4 sm:$0xff]   ;;  %v1406_v38 = vld [vmem:[%s2072_s1 + $0x90] ss:$8 sps:$4 sm:$0xff]   ;;  %v1408_v40 = vld [vmem:[%s2072_s1 + $0xa4] ss:$8 sps:$4 sm:$0xff]  }
   0xe   :  { %v1404_v37 = vld [vmem:[%s2072_s1 + $0x294] ss:$8 sps:$4 sm:$0xff]   ;;  %v1407_v39 = vld [vmem:[%s2072_s1 + $0x290] ss:$8 sps:$4 sm:$0xff]   ;;  %v1410_v41 = vld [vmem:[%s2072_s1 + $0x2a4] ss:$8 sps:$4 sm:$0xff]  }
   0xf   :  { %954 = vmatpush1.bf16.msra.mxu1 %v1370_v14  ;;  %v1412_v42 = vld [vmem:[%s2072_s1 + $0xa0] ss:$8 sps:$4 sm:$0xff]   ;;  %v1414_v44 = vld [vmem:[%s2072_s1 + $0xb4] ss:$8 sps:$4 sm:$0xff]   ;;  %v1418_v46 = vld [vmem:[%s2072_s1 + $0xb0] ss:$8 sps:$4 sm:$0xff]  }
  0x10   :  { %1040 = vmatpush1.bf16.msra.mxu0 %v1371_v15  ;;  %955 = vmatprep.subr.bf16.mxu1 %v1372_v16  ;;  %v1413_v43 = vld [vmem:[%s2072_s1 + $0x2a0] ss:$8 sps:$4 sm:$0xff]   ;;  %v1416_v45 = vld [vmem:[%s2072_s1 + $0x2b4] ss:$8 sps:$4 sm:$0xff]   ;;  %v1419_v47 = vld [vmem:[%s2072_s1 + $0x2b0] ss:$8 sps:$4 sm:$0xff]  }
  0x11   :  { %1041 = vmatprep.subr.bf16.mxu0 %v1374_v17  ;;  %v1446_v48 = vld [vmem:[%s2073_s0 + $0x4] ss:$36 sps:$4 sm:$0xff]   ;;  %v1452_v51 = vld [vmem:[%s2073_s0 + $0x14] ss:$36 sps:$4 sm:$0xff]  }
  0x12   :  { %v1420_v49 = vld [vmem:[%s2072_s1 + $0xc4] ss:$8 sps:$4 sm:$0xff]   ;;  %979 = vmatprep.mubr.bf16.mxu1 %v1446_v48  ;;  %v1424_v52 = vld [vmem:[%s2072_s1 + $0xc0] ss:$8 sps:$4 sm:$0xff]   ;;  %v1426_v54 = vld [vmem:[%s2072_s1 + $0xd4] ss:$8 sps:$4 sm:$0xff]   ;;  %1065 = vmatprep.mubr.bf16.mxu0 %v1452_v51 }
  0x13   :  { %956 = vmatpush1.bf16.msra.mxu1 %v1376_v18  ;;  %v1422_v50 = vld [vmem:[%s2072_s1 + $0x2c4] ss:$8 sps:$4 sm:$0xff]   ;;  %v1425_v53 = vld [vmem:[%s2072_s1 + $0x2c0] ss:$8 sps:$4 sm:$0xff]   ;;  %v1428_v55 = vld [vmem:[%s2072_s1 + $0x2d4] ss:$8 sps:$4 sm:$0xff]  }
  0x14   :  { %1042 = vmatpush1.bf16.msra.mxu0 %v1377_v19  ;;  %957 = vmatprep.subr.bf16.mxu1 %v1378_v20  ;;  %v1430_v56 = vld [vmem:[%s2072_s1 + $0xd0] ss:$8 sps:$4 sm:$0xff]   ;;  %v1432_v58 = vld [vmem:[%s2072_s1 + $0xe4] ss:$8 sps:$4 sm:$0xff]   ;;  %v1436_v60 = vld [vmem:[%s2072_s1 + $0xe0] ss:$8 sps:$4 sm:$0xff]  }
  0x15   :  { %1043 = vmatprep.subr.bf16.mxu0 %v1380_v21  ;;  %v1431_v57 = vld [vmem:[%s2072_s1 + $0x2d0] ss:$8 sps:$4 sm:$0xff]   ;;  %v1434_v59 = vld [vmem:[%s2072_s1 + $0x2e4] ss:$8 sps:$4 sm:$0xff]   ;;  %v1437_v61 = vld [vmem:[%s2072_s1 + $0x2e0] ss:$8 sps:$4 sm:$0xff]  }
  0x16   :  { %v1438_v62 = vld [vmem:[%s2072_s1 + $0xf4] ss:$8 sps:$4 sm:$0xff]   ;;  %v1442_v0 = vld [vmem:[%s2072_s1 + $0xf0] ss:$8 sps:$4 sm:$0xff]   ;;  %v1449_v2 = vld [vmem:[%s2072_s1 + $0x104] ss:$8 sps:$4 sm:$0xff]  }
  0x17   :  { %958 = vmatpush1.bf16.msra.mxu1 %v1382_v22  ;;  %v1440_v63 = vld [vmem:[%s2072_s1 + $0x2f4] ss:$8 sps:$4 sm:$0xff]   ;;  %v1443_v1 = vld [vmem:[%s2072_s1 + $0x2f0] ss:$8 sps:$4 sm:$0xff]   ;;  %v1455_v3 = vld [vmem:[%s2072_s1 + $0x304] ss:$8 sps:$4 sm:$0xff]  }
  0x18   :  { %1044 = vmatpush1.bf16.msra.mxu0 %v1383_v23  ;;  %959 = vmatprep.subr.bf16.mxu1 %v1384_v24  ;;  %v1444_v4 = vld [vmem:[%s2073_s0] ss:$36 sps:$4 sm:$0xff]   ;;  %v1450_v6 = vld [vmem:[%s2073_s0 + $0x10] ss:$36 sps:$4 sm:$0xff]  }
  0x19   :  { %1045 = vmatprep.subr.bf16.mxu0 %v1386_v25  ;;  %v1447_v5 = vld [vmem:[%s2072_s1 + $0x100] ss:$8 sps:$4 sm:$0xff]   ;;  %v1458_v8 = vld [vmem:[%s2072_s1 + $0x114] ss:$8 sps:$4 sm:$0xff]   ;;  %v1456_v10 = vld [vmem:[%s2072_s1 + $0x110] ss:$8 sps:$4 sm:$0xff]  }
  0x1a   :  { %v1453_v7 = vld [vmem:[%s2072_s1 + $0x300] ss:$8 sps:$4 sm:$0xff]   ;;  %v1461_v9 = vld [vmem:[%s2072_s1 + $0x314] ss:$8 sps:$4 sm:$0xff]   ;;  %v1459_v11 = vld [vmem:[%s2072_s1 + $0x310] ss:$8 sps:$4 sm:$0xff]  }
  0x1b   :  { %960 = vmatpush1.bf16.msra.mxu1 %v1388_v26  ;;  %v1464_v12 = vld [vmem:[%s2072_s1 + $0x124] ss:$8 sps:$4 sm:$0xff]   ;;  %v1462_v14 = vld [vmem:[%s2072_s1 + $0x120] ss:$8 sps:$4 sm:$0xff]   ;;  %v1470_v16 = vld [vmem:[%s2072_s1 + $0x134] ss:$8 sps:$4 sm:$0xff]  }
  0x1c   :  { %1046 = vmatpush1.bf16.msra.mxu0 %v1389_v27  ;;  %961 = vmatprep.subr.bf16.mxu1 %v1390_v28  ;;  %v1467_v13 = vld [vmem:[%s2072_s1 + $0x324] ss:$8 sps:$4 sm:$0xff]   ;;  %v1465_v15 = vld [vmem:[%s2072_s1 + $0x320] ss:$8 sps:$4 sm:$0xff]   ;;  %v1473_v17 = vld [vmem:[%s2072_s1 + $0x334] ss:$8 sps:$4 sm:$0xff]  }
  0x1d   :  { %1047 = vmatprep.subr.bf16.mxu0 %v1392_v29  ;;  %v1468_v18 = vld [vmem:[%s2072_s1 + $0x130] ss:$8 sps:$4 sm:$0xff]   ;;  %v1476_v20 = vld [vmem:[%s2072_s1 + $0x144] ss:$8 sps:$4 sm:$0xff]   ;;  %v1474_v22 = vld [vmem:[%s2072_s1 + $0x140] ss:$8 sps:$4 sm:$0xff]  }
  0x1e   :  { %v1471_v19 = vld [vmem:[%s2072_s1 + $0x330] ss:$8 sps:$4 sm:$0xff]   ;;  %v1479_v21 = vld [vmem:[%s2072_s1 + $0x344] ss:$8 sps:$4 sm:$0xff]   ;;  %v1477_v23 = vld [vmem:[%s2072_s1 + $0x340] ss:$8 sps:$4 sm:$0xff]  }
  0x1f   :  { %962 = vmatpush1.bf16.msra.mxu1 %v1394_v30  ;;  %v1482_v24 = vld [vmem:[%s2072_s1 + $0x154] ss:$8 sps:$4 sm:$0xff]   ;;  %v1480_v26 = vld [vmem:[%s2072_s1 + $0x150] ss:$8 sps:$4 sm:$0xff]   ;;  %v1488_v28 = vld [vmem:[%s2072_s1 + $0x164] ss:$8 sps:$4 sm:$0xff]  }
  0x20   :  { %1048 = vmatpush1.bf16.msra.mxu0 %v1395_v31  ;;  %963 = vmatprep.subr.bf16.mxu1 %v1396_v32  ;;  %v1485_v25 = vld [vmem:[%s2072_s1 + $0x354] ss:$8 sps:$4 sm:$0xff]   ;;  %v1483_v27 = vld [vmem:[%s2072_s1 + $0x350] ss:$8 sps:$4 sm:$0xff]   ;;  %v1491_v29 = vld [vmem:[%s2072_s1 + $0x364] ss:$8 sps:$4 sm:$0xff]  }
  0x21   :  { %1049 = vmatprep.subr.bf16.mxu0 %v1398_v33  ;;  %v1486_v30 = vld [vmem:[%s2072_s1 + $0x160] ss:$8 sps:$4 sm:$0xff]   ;;  %v1494_v32 = vld [vmem:[%s2072_s1 + $0x174] ss:$8 sps:$4 sm:$0xff]  }
  0x22   :  { %v1489_v31 = vld [vmem:[%s2072_s1 + $0x360] ss:$8 sps:$4 sm:$0xff]   ;;  %v1497_v33 = vld [vmem:[%s2072_s1 + $0x374] ss:$8 sps:$4 sm:$0xff]  }
  0x23   :  { %964 = vmatpush1.bf16.msra.mxu1 %v1400_v34  ;;  %v1548_v34 = vld [vmem:[%s2073_s0 + $0xc] ss:$36 sps:$4 sm:$0xff]   ;;  %v1510_v48 = vld [vmem:[%s2072_s1 + $0x1a0] ss:$8 sps:$4 sm:$0xff]   ;;  %v1521_v51 = vld [vmem:[%s2072_s1 + $0x3b4] ss:$8 sps:$4 sm:$0xff]  }
  0x24   :  { %1050 = vmatpush1.bf16.msra.mxu0 %v1401_v35  ;;  %965 = vmatprep.subr.bf16.mxu1 %v1402_v36  ;;  %v1551_v35 = vld [vmem:[%s2073_s0 + $0x1c] ss:$36 sps:$4 sm:$0xff]   ;;  %v1492_v36 = vld [vmem:[%s2072_s1 + $0x170] ss:$8 sps:$4 sm:$0xff]  }
  0x25   :  { %1051 = vmatprep.subr.bf16.mxu0 %v1404_v37  ;;  %v1495_v37 = vld [vmem:[%s2072_s1 + $0x370] ss:$8 sps:$4 sm:$0xff]  }
  0x27   :  { %966 = vmatpush1.bf16.msra.mxu1 %v1406_v38  ;;  %v1500_v38 = vld [vmem:[%s2072_s1 + $0x184] ss:$8 sps:$4 sm:$0xff]  }
  0x28   :  { %1052 = vmatpush1.bf16.msra.mxu0 %v1407_v39  ;;  %967 = vmatprep.subr.bf16.mxu1 %v1408_v40  ;;  %v1503_v39 = vld [vmem:[%s2072_s1 + $0x384] ss:$8 sps:$4 sm:$0xff]   ;;  %v1498_v40 = vld [vmem:[%s2072_s1 + $0x180] ss:$8 sps:$4 sm:$0xff]  }
  0x29   :  { %1053 = vmatprep.subr.bf16.mxu0 %v1410_v41  ;;  %v1501_v41 = vld [vmem:[%s2072_s1 + $0x380] ss:$8 sps:$4 sm:$0xff]  }
  0x2b   :  { %968 = vmatpush1.bf16.msra.mxu1 %v1412_v42  ;;  %v1506_v42 = vld [vmem:[%s2072_s1 + $0x194] ss:$8 sps:$4 sm:$0xff]  }
  0x2c   :  { %1054 = vmatpush1.bf16.msra.mxu0 %v1413_v43  ;;  %969 = vmatprep.subr.bf16.mxu1 %v1414_v44  ;;  %v1509_v43 = vld [vmem:[%s2072_s1 + $0x394] ss:$8 sps:$4 sm:$0xff]   ;;  %v1504_v44 = vld [vmem:[%s2072_s1 + $0x190] ss:$8 sps:$4 sm:$0xff]  }
  0x2d   :  { %1055 = vmatprep.subr.bf16.mxu0 %v1416_v45  ;;  %v1507_v45 = vld [vmem:[%s2072_s1 + $0x390] ss:$8 sps:$4 sm:$0xff]  }
  0x2f   :  { %970 = vmatpush1.bf16.msra.mxu1 %v1418_v46  ;;  %v1512_v46 = vld [vmem:[%s2072_s1 + $0x1a4] ss:$8 sps:$4 sm:$0xff]  }
  0x30   :  { %1056 = vmatpush1.bf16.msra.mxu0 %v1419_v47  ;;  %971 = vmatprep.subr.bf16.mxu1 %v1420_v49  ;;  %v1515_v47 = vld [vmem:[%s2072_s1 + $0x3a4] ss:$8 sps:$4 sm:$0xff]   ;;  %v1513_v49 = vld [vmem:[%s2072_s1 + $0x3a0] ss:$8 sps:$4 sm:$0xff]  }
  0x31   :  { %1057 = vmatprep.subr.bf16.mxu0 %v1422_v50  ;;  %v1518_v50 = vld [vmem:[%s2072_s1 + $0x1b4] ss:$8 sps:$4 sm:$0xff]  }
  0x33   :  { %972 = vmatpush1.bf16.msra.mxu1 %v1424_v52  ;;  %v1516_v52 = vld [vmem:[%s2072_s1 + $0x1b0] ss:$8 sps:$4 sm:$0xff]  }
  0x34   :  { %1058 = vmatpush1.bf16.msra.mxu0 %v1425_v53  ;;  %973 = vmatprep.subr.bf16.mxu1 %v1426_v54  ;;  %v1519_v53 = vld [vmem:[%s2072_s1 + $0x3b0] ss:$8 sps:$4 sm:$0xff]   ;;  %v1524_v54 = vld [vmem:[%s2072_s1 + $0x1c4] ss:$8 sps:$4 sm:$0xff]  }
  0x35   :  { %1059 = vmatprep.subr.bf16.mxu0 %v1428_v55  ;;  %v1527_v55 = vld [vmem:[%s2072_s1 + $0x3c4] ss:$8 sps:$4 sm:$0xff]  }
  0x37   :  { %974 = vmatpush1.bf16.msra.mxu1 %v1430_v56  ;;  %v1522_v56 = vld [vmem:[%s2072_s1 + $0x1c0] ss:$8 sps:$4 sm:$0xff]  }
  0x38   :  { %1060 = vmatpush1.bf16.msra.mxu0 %v1431_v57  ;;  %975 = vmatprep.subr.bf16.mxu1 %v1432_v58  ;;  %v1525_v57 = vld [vmem:[%s2072_s1 + $0x3c0] ss:$8 sps:$4 sm:$0xff]   ;;  %v1530_v58 = vld [vmem:[%s2072_s1 + $0x1d4] ss:$8 sps:$4 sm:$0xff]  }
  0x39   :  { %1061 = vmatprep.subr.bf16.mxu0 %v1434_v59  ;;  %v1533_v59 = vld [vmem:[%s2072_s1 + $0x3d4] ss:$8 sps:$4 sm:$0xff]  }
  0x3b   :  { %976 = vmatpush1.bf16.msra.mxu1 %v1436_v60  ;;  %v1528_v60 = vld [vmem:[%s2072_s1 + $0x1d0] ss:$8 sps:$4 sm:$0xff]  }
  0x3c   :  { %1062 = vmatpush1.bf16.msra.mxu0 %v1437_v61  ;;  %977 = vmatprep.subr.bf16.mxu1 %v1438_v62  ;;  %v1531_v61 = vld [vmem:[%s2072_s1 + $0x3d0] ss:$8 sps:$4 sm:$0xff]   ;;  %v1536_v62 = vld [vmem:[%s2072_s1 + $0x1e4] ss:$8 sps:$4 sm:$0xff]  }
  0x3d   :  { %1063 = vmatprep.subr.bf16.mxu0 %v1440_v63  ;;  %v1539_v63 = vld [vmem:[%s2072_s1 + $0x3e4] ss:$8 sps:$4 sm:$0xff]  }
  0x3f   :  { %978 = vmatpush1.bf16.msra.mxu1 %v1442_v0  ;;  %v1534_v0 = vld [vmem:[%s2072_s1 + $0x1e0] ss:$8 sps:$4 sm:$0xff]  }
  0x40   :  { %1064 = vmatpush1.bf16.msra.mxu0 %v1443_v1  ;;  %990 = vmatprep.subr.bf16.mxu1 %v1449_v2  ;;  %v1537_v1 = vld [vmem:[%s2072_s1 + $0x3e0] ss:$8 sps:$4 sm:$0xff]   ;;  %v1542_v2 = vld [vmem:[%s2072_s1 + $0x1f4] ss:$8 sps:$4 sm:$0xff]  }
  0x41   :  { %1076 = vmatprep.subr.bf16.mxu0 %v1455_v3  ;;  %v1545_v3 = vld [vmem:[%s2072_s1 + $0x3f4] ss:$8 sps:$4 sm:$0xff]  }
  0x42   :  { %980 = vmatmul.mubr.bf16.vlgmr.msra.gmra.mrb[0].mxu1 %v1444_v4  ;;  %v1540_v4 = vld [vmem:[%s2072_s1 + $0x1f0] ss:$8 sps:$4 sm:$0xff]  }
  0x43   :  { %1066 = vmatmul.mubr.bf16.vlgmr.msra.gmra.mrb[0].mxu0 %v1450_v6  ;;  %991 = vmatpush1.bf16.msra.mxu1 %v1447_v5  ;;  %v1543_v5 = vld [vmem:[%s2072_s1 + $0x3f0] ss:$8 sps:$4 sm:$0xff]   ;;  %v1554_v6 = vld [vmem:[%s2072_s1 + $0x404] ss:$8 sps:$4 sm:$0xff]  }
  0x44   :  { %1077 = vmatpush1.bf16.msra.mxu0 %v1453_v7  ;;  %992 = vmatprep.subr.bf16.mxu1 %v1458_v8  ;;  %v1546_v7 = vld [vmem:[%s2073_s0 + $0x8] ss:$36 sps:$4 sm:$0xff]   ;;  %v1549_v8 = vld [vmem:[%s2073_s0 + $0x18] ss:$36 sps:$4 sm:$0xff]  }
  0x45   :  { %1078 = vmatprep.subr.bf16.mxu0 %v1461_v9  ;;  %1022 = vmatprep.mubr.bf16.mxu1 %v1548_v34  ;;  %v1552_v9 = vld [vmem:[%s2072_s1 + $0x400] ss:$8 sps:$4 sm:$0xff]  }
  0x46   :  { %1108 = vmatprep.mubr.bf16.mxu0 %v1551_v35 }
  0x47   :  { %993 = vmatpush1.bf16.msra.mxu1 %v1456_v10  ;;  %v1557_v10 = vld [vmem:[%s2072_s1 + $0x414] ss:$8 sps:$4 sm:$0xff]  }
  0x48   :  { %1079 = vmatpush1.bf16.msra.mxu0 %v1459_v11  ;;  %994 = vmatprep.subr.bf16.mxu1 %v1464_v12  ;;  %v1555_v11 = vld [vmem:[%s2072_s1 + $0x410] ss:$8 sps:$4 sm:$0xff]   ;;  %v1577_v12 = vmov 0  }
  0x49   :  { %1080 = vmatprep.subr.bf16.mxu0 %v1467_v13  ;;  %v1560_v13 = vld [vmem:[%s2072_s1 + $0x424] ss:$8 sps:$4 sm:$0xff]  }
  0x4b   :  { %995 = vmatpush1.bf16.msra.mxu1 %v1462_v14  ;;  %v1558_v14 = vld [vmem:[%s2072_s1 + $0x420] ss:$8 sps:$4 sm:$0xff]  }
  0x4c   :  { %1081 = vmatpush1.bf16.msra.mxu0 %v1465_v15  ;;  %996 = vmatprep.subr.bf16.mxu1 %v1470_v16  ;;  %v1563_v15 = vld [vmem:[%s2072_s1 + $0x434] ss:$8 sps:$4 sm:$0xff]   ;;  %v1561_v16 = vld [vmem:[%s2072_s1 + $0x430] ss:$8 sps:$4 sm:$0xff]  }
  0x4d   :  { %1082 = vmatprep.subr.bf16.mxu0 %v1473_v17  ;;  %v1566_v17 = vld [vmem:[%s2072_s1 + $0x444] ss:$8 sps:$4 sm:$0xff]  }
  0x4f   :  { %997 = vmatpush1.bf16.msra.mxu1 %v1468_v18  ;;  %v1564_v18 = vld [vmem:[%s2072_s1 + $0x440] ss:$8 sps:$4 sm:$0xff]  }
  0x50   :  { %1083 = vmatpush1.bf16.msra.mxu0 %v1471_v19  ;;  %998 = vmatprep.subr.bf16.mxu1 %v1476_v20  ;;  %v1569_v19 = vld [vmem:[%s2072_s1 + $0x454] ss:$8 sps:$4 sm:$0xff]   ;;  %v1567_v20 = vld [vmem:[%s2072_s1 + $0x450] ss:$8 sps:$4 sm:$0xff]  }
  0x51   :  { %1084 = vmatprep.subr.bf16.mxu0 %v1479_v21  ;;  %v1572_v21 = vld [vmem:[%s2072_s1 + $0x464] ss:$8 sps:$4 sm:$0xff]  }
  0x53   :  { %999 = vmatpush1.bf16.msra.mxu1 %v1474_v22  ;;  %v1570_v22 = vld [vmem:[%s2072_s1 + $0x460] ss:$8 sps:$4 sm:$0xff]  }
  0x54   :  { %1085 = vmatpush1.bf16.msra.mxu0 %v1477_v23  ;;  %1000 = vmatprep.subr.bf16.mxu1 %v1482_v24  ;;  %v1575_v23 = vld [vmem:[%s2072_s1 + $0x474] ss:$8 sps:$4 sm:$0xff]   ;;  %v1573_v24 = vld [vmem:[%s2072_s1 + $0x470] ss:$8 sps:$4 sm:$0xff]  }
  0x55   :  { %1086 = vmatprep.subr.bf16.mxu0 %v1485_v25  ;;  %v1576_v25 = vld [vmem:[%s2073_s0 + $0x20] ss:$36 sps:$4 sm:$0xff]  }
  0x57   :  { %1001 = vmatpush1.bf16.msra.mxu1 %v1480_v26 }
  0x58   :  { %1087 = vmatpush1.bf16.msra.mxu0 %v1483_v27  ;;  %1002 = vmatprep.subr.bf16.mxu1 %v1488_v28 }
  0x59   :  { %1088 = vmatprep.subr.bf16.mxu0 %v1491_v29 }
  0x5b   :  { %1003 = vmatpush1.bf16.msra.mxu1 %v1486_v30  ;;  %v171_v30 = vlaneseq }
  0x5c   :  { %1089 = vmatpush1.bf16.msra.mxu0 %v1489_v31  ;;  %1004 = vmatprep.subr.bf16.mxu1 %v1494_v32 }
  0x5d   :  { %1090 = vmatprep.subr.bf16.mxu0 %v1497_v33  ;;  %v172_v31 = vshrl.u32 %v171_v30, 7  ;;  %v169_v33 = vld [vmem:[%s2074_s2] sm:$0x3] }
  0x5f   :  { %1005 = vmatpush1.bf16.msra.mxu1 %v1492_v36  ;;  %v173_v32 = vsub.s32 0, %v172_v31  ;;  %v177_v34 = vsub.s32 1, %v172_v31 }
  0x60   :  { %1091 = vmatpush1.bf16.msra.mxu0 %v1495_v37  ;;  %1006 = vmatprep.subr.bf16.mxu1 %v1500_v38 }
  0x61   :  { %1092 = vmatprep.subr.bf16.mxu0 %v1503_v39  ;;  %v174_v35 = vrot.slane %v169_v33, %v173_v32  ;;  %v178_v36 = vrot.slane %v169_v33, %v177_v34 }
  0x63   :  { %1007 = vmatpush1.bf16.msra.mxu1 %v1498_v40 }
  0x64   :  { %1093 = vmatpush1.bf16.msra.mxu0 %v1501_v41  ;;  %1008 = vmatprep.subr.bf16.mxu1 %v1506_v42 }
  0x65   :  { %1094 = vmatprep.subr.bf16.mxu0 %v1509_v43 }
  0x67   :  { %1009 = vmatpush1.bf16.msra.mxu1 %v1504_v44 }
  0x68   :  { %1095 = vmatpush1.bf16.msra.mxu0 %v1507_v45  ;;  %1010 = vmatprep.subr.bf16.mxu1 %v1512_v46 }
  0x69   :  { %1096 = vmatprep.subr.bf16.mxu0 %v1515_v47 }
  0x6b   :  { %1011 = vmatpush1.bf16.msra.mxu1 %v1510_v48 }
  0x6c   :  { %1097 = vmatpush1.bf16.msra.mxu0 %v1513_v49  ;;  %1012 = vmatprep.subr.bf16.mxu1 %v1518_v50 }
  0x6d   :  { %1098 = vmatprep.subr.bf16.mxu0 %v1521_v51 }
  0x6f   :  { %1013 = vmatpush1.bf16.msra.mxu1 %v1516_v52 }
  0x70   :  { %1099 = vmatpush1.bf16.msra.mxu0 %v1519_v53  ;;  %1014 = vmatprep.subr.bf16.mxu1 %v1524_v54 }
  0x71   :  { %1100 = vmatprep.subr.bf16.mxu0 %v1527_v55 }
  0x73   :  { %1015 = vmatpush1.bf16.msra.mxu1 %v1522_v56 }
  0x74   :  { %1101 = vmatpush1.bf16.msra.mxu0 %v1525_v57  ;;  %1016 = vmatprep.subr.bf16.mxu1 %v1530_v58 }
  0x75   :  { %1102 = vmatprep.subr.bf16.mxu0 %v1533_v59 }
  0x77   :  { %1017 = vmatpush1.bf16.msra.mxu1 %v1528_v60 }
  0x78   :  { %1103 = vmatpush1.bf16.msra.mxu0 %v1531_v61  ;;  %1018 = vmatprep.subr.bf16.mxu1 %v1536_v62 }
  0x79   :  { %1104 = vmatprep.subr.bf16.mxu0 %v1539_v63 }
  0x7b   :  { %1019 = vmatpush1.bf16.msra.mxu1 %v1534_v0 }
  0x7c   :  { %1105 = vmatpush1.bf16.msra.mxu0 %v1537_v1  ;;  %1020 = vmatprep.subr.bf16.mxu1 %v1542_v2 }
  0x7d   :  { %1106 = vmatprep.subr.bf16.mxu0 %v1545_v3 }
  0x7f   :  { %1021 = vmatpush1.bf16.msra.mxu1 %v1540_v4 }
  0x80   :  { %1107 = vmatpush1.bf16.msra.mxu0 %v1543_v5 }
  0x81   :  { %1119 = vmatprep.subr.bf16.mxu0 %v1554_v6 }
  0x82   :  { %1023 = vmatmul.mubr.bf16.vlgmr.msra.gmra.mrb[0].mxu1 %v1546_v7 }
  0x83   :  { %1109 = vmatmul.mubr.bf16.vlgmr.msra.gmra.mrb[0].mxu0 %v1549_v8 }
  0x84   :  { %1120 = vmatpush1.bf16.msra.mxu0 %v1552_v9  ;;  %1151 = vmatprep.mubr.bf16.mxu0 %v1577_v12 }
  0x85   :  { %1121 = vmatprep.subr.bf16.mxu0 %v1557_v10 }
  0x88   :  { %1122 = vmatpush1.bf16.msra.mxu0 %v1555_v11 }
  0x89   :  { %1123 = vmatprep.subr.bf16.mxu0 %v1560_v13 }
  0x8c   :  { %1124 = vmatpush1.bf16.msra.mxu0 %v1558_v14 }
  0x8d   :  { %1125 = vmatprep.subr.bf16.mxu0 %v1563_v15 }
  0x90   :  { %1126 = vmatpush1.bf16.msra.mxu0 %v1561_v16 }
  0x91   :  { %1127 = vmatprep.subr.bf16.mxu0 %v1566_v17 }
  0x94   :  { %1128 = vmatpush1.bf16.msra.mxu0 %v1564_v18 }
  0x95   :  { %1129 = vmatprep.subr.bf16.mxu0 %v1569_v19 }
  0x98   :  { %1130 = vmatpush1.bf16.msra.mxu0 %v1567_v20 }
  0x99   :  { %1131 = vmatprep.subr.bf16.mxu0 %v1572_v21 }
  0x9c   :  { %1132 = vmatpush1.bf16.msra.mxu0 %v1570_v22 }
  0x9d   :  { %1133 = vmatprep.subr.bf16.mxu0 %v1575_v23 }
  0xa0   :  { %1134 = vmatpush1.bf16.msra.mxu0 %v1573_v24 }
  0xa3   :  { %1152 = vmatmul.mubr.bf16.vlgmr.msra.gmra.mrb[0].mxu0 %v1576_v25 }
 0x155   :  { %v1024_v26 = vpop.f32.mrb[0].mxu1 }
 0x156   :  { %v1026_v27 = vpop.f32.mrb[1].mxu1  ;;  %v1327_v37 = vadd.f32 %v1024_v26, %v174_v35 }
 0x157   :  { %v1028_v28 = vpop.f32.mrb[2].mxu1  ;;  %v1329_v38 = vadd.f32 %v1026_v27, %v178_v36 }
 0x158   :  { %v1030_v29 = vpop.f32.mrb[3].mxu1  ;;  %v1331_v40 = vadd.f32 %v1028_v28, %v174_v35 }
 0x159   :  { %v1333_v43 = vadd.f32 %v1030_v29, %v178_v36 }
 0x176   :  { %v1153_v39 = vpop.f32.mrb[0].mxu0 }
 0x177   :  { %v1328_v41 = vadd.f32 %v1327_v37, %v1153_v39  ;;  %v1155_v42 = vpop.f32.mrb[1].mxu0 }
 0x178   :  { %v1330_v44 = vadd.f32 %v1329_v38, %v1155_v42  ;;  %v1157_v45 = vpop.f32.mrb[2].mxu0 }
 0x179   :  { %v1162_v46 = vmax.f32 %v1328_v41, 0.0  ;;  %v1332_v47 = vadd.f32 %v1331_v40, %v1157_v45  ;;  %v1159_v48 = vpop.f32.mrb[3].mxu0 }
 0x17a   :  { %v1163_v49 = vmax.f32 %v1330_v44, 0.0  ;;  %v1334_v50 = vadd.f32 %v1333_v43, %v1159_v48 }
 0x17b   :  { %1166 = vst [vmem:[%s2075_s3] sm:$0xff] %v1162_v46  ;;  %v1164_v51 = vmax.f32 %v1332_v47, 0.0 }
 0x17c   :  { %1167 = vst [vmem:[%s2075_s3 + $0x8] sm:$0xff] %v1163_v49  ;;  %v1165_v52 = vmax.f32 %v1334_v50, 0.0 }
 0x17d   :  { %1168 = vst [vmem:[%s2075_s3 + $0x10] sm:$0xff] %v1164_v51 }
 0x17e   :  { %1169 = vst [vmem:[%s2075_s3 + $0x18] sm:$0xff] %v1165_v52 }

// kernel: siamese_forward.27
= control target key start
LH: loop header
LB: loop body
LE: loop exit
PB: predicated region body
PF: predicated region fallthrough
CT: control target
= control target key end

     0   :  { %s4015_s1 = inlined_call_operand.vmem [shape: bf16[2304,256], index: 1, kind: input, shape index: {}]   ;;  %s4016_s0 = inlined_call_operand.vmem [shape: bf16[16,2304], index: 0, kind: input, shape index: {}]   ;;  %s4017_s2 = inlined_call_operand.vmem [shape: f32[1,256], index: 2, kind: input, shape index: {}]   ;;  %s4018_s3 = inlined_call_operand.vmem [shape: f32[16,256], index: 3, kind: output, shape index: {}]  }
   0x1   :  { %v2603_v0 = vld [vmem:[%s4015_s1 + $0x4] ss:$8 sps:$4 sm:$0xff]   ;;  %v2607_v2 = vld [vmem:[%s4015_s1] ss:$8 sps:$4 sm:$0xff]   ;;  %v2609_v4 = vld [vmem:[%s4015_s1 + $0x14] ss:$8 sps:$4 sm:$0xff]  }
   0x2   :  { %v2605_v1 = vld [vmem:[%s4015_s1 + $0x404] ss:$8 sps:$4 sm:$0xff]   ;;  %1862 = vmatprep.subr.bf16.mxu1 %v2603_v0  ;;  %v2608_v3 = vld [vmem:[%s4015_s1 + $0x400] ss:$8 sps:$4 sm:$0xff]   ;;  %v2611_v5 = vld [vmem:[%s4015_s1 + $0x414] ss:$8 sps:$4 sm:$0xff]  }
   0x3   :  { %2034 = vmatprep.subr.bf16.mxu0 %v2605_v1  ;;  %1863 = vmatpush1.bf16.msra.mxu1 %v2607_v2  ;;  %v2613_v6 = vld [vmem:[%s4015_s1 + $0x10] ss:$8 sps:$4 sm:$0xff]   ;;  %v2615_v8 = vld [vmem:[%s4015_s1 + $0x24] ss:$8 sps:$4 sm:$0xff]   ;;  %v2619_v10 = vld [vmem:[%s4015_s1 + $0x20] ss:$8 sps:$4 sm:$0xff]  }
   0x4   :  { %2035 = vmatpush1.bf16.msra.mxu0 %v2608_v3  ;;  %1864 = vmatprep.subr.bf16.mxu1 %v2609_v4  ;;  %v2614_v7 = vld [vmem:[%s4015_s1 + $0x410] ss:$8 sps:$4 sm:$0xff]   ;;  %v2617_v9 = vld [vmem:[%s4015_s1 + $0x424] ss:$8 sps:$4 sm:$0xff]   ;;  %v2620_v11 = vld [vmem:[%s4015_s1 + $0x420] ss:$8 sps:$4 sm:$0xff]  }
   0x5   :  { %2036 = vmatprep.subr.bf16.mxu0 %v2611_v5  ;;  %v2621_v12 = vld [vmem:[%s4015_s1 + $0x34] ss:$8 sps:$4 sm:$0xff]   ;;  %v2625_v14 = vld [vmem:[%s4015_s1 + $0x30] ss:$8 sps:$4 sm:$0xff]   ;;  %v2627_v16 = vld [vmem:[%s4015_s1 + $0x44] ss:$8 sps:$4 sm:$0xff]  }
   0x6   :  { %v2623_v13 = vld [vmem:[%s4015_s1 + $0x434] ss:$8 sps:$4 sm:$0xff]   ;;  %v2626_v15 = vld [vmem:[%s4015_s1 + $0x430] ss:$8 sps:$4 sm:$0xff]   ;;  %v2629_v17 = vld [vmem:[%s4015_s1 + $0x444] ss:$8 sps:$4 sm:$0xff]  }
   0x7   :  { %1865 = vmatpush1.bf16.msra.mxu1 %v2613_v6  ;;  %v2631_v18 = vld [vmem:[%s4015_s1 + $0x40] ss:$8 sps:$4 sm:$0xff]   ;;  %v2633_v20 = vld [vmem:[%s4015_s1 + $0x54] ss:$8 sps:$4 sm:$0xff]   ;;  %v2637_v22 = vld [vmem:[%s4015_s1 + $0x50] ss:$8 sps:$4 sm:$0xff]  }
   0x8   :  { %2037 = vmatpush1.bf16.msra.mxu0 %v2614_v7  ;;  %1866 = vmatprep.subr.bf16.mxu1 %v2615_v8  ;;  %v2632_v19 = vld [vmem:[%s4015_s1 + $0x440] ss:$8 sps:$4 sm:$0xff]   ;;  %v2635_v21 = vld [vmem:[%s4015_s1 + $0x454] ss:$8 sps:$4 sm:$0xff]   ;;  %v2638_v23 = vld [vmem:[%s4015_s1 + $0x450] ss:$8 sps:$4 sm:$0xff]  }
   0x9   :  { %2038 = vmatprep.subr.bf16.mxu0 %v2617_v9  ;;  %v2639_v24 = vld [vmem:[%s4015_s1 + $0x64] ss:$8 sps:$4 sm:$0xff]   ;;  %v2643_v26 = vld [vmem:[%s4015_s1 + $0x60] ss:$8 sps:$4 sm:$0xff]   ;;  %v2645_v28 = vld [vmem:[%s4015_s1 + $0x74] ss:$8 sps:$4 sm:$0xff]  }
   0xa   :  { %v2641_v25 = vld [vmem:[%s4015_s1 + $0x464] ss:$8 sps:$4 sm:$0xff]   ;;  %v2644_v27 = vld [vmem:[%s4015_s1 + $0x460] ss:$8 sps:$4 sm:$0xff]   ;;  %v2647_v29 = vld [vmem:[%s4015_s1 + $0x474] ss:$8 sps:$4 sm:$0xff]  }
   0xb   :  { %1867 = vmatpush1.bf16.msra.mxu1 %v2619_v10  ;;  %v2649_v30 = vld [vmem:[%s4015_s1 + $0x70] ss:$8 sps:$4 sm:$0xff]   ;;  %v2651_v32 = vld [vmem:[%s4015_s1 + $0x84] ss:$8 sps:$4 sm:$0xff]   ;;  %v2655_v34 = vld [vmem:[%s4015_s1 + $0x80] ss:$8 sps:$4 sm:$0xff]  }
   0xc   :  { %2039 = vmatpush1.bf16.msra.mxu0 %v2620_v11  ;;  %1868 = vmatprep.subr.bf16.mxu1 %v2621_v12  ;;  %v2650_v31 = vld [vmem:[%s4015_s1 + $0x470] ss:$8 sps:$4 sm:$0xff]   ;;  %v2653_v33 = vld [vmem:[%s4015_s1 + $0x484] ss:$8 sps:$4 sm:$0xff]   ;;  %v2656_v35 = vld [vmem:[%s4015_s1 + $0x480] ss:$8 sps:$4 sm:$0xff]  }
   0xd   :  { %2040 = vmatprep.subr.bf16.mxu0 %v2623_v13  ;;  %v2657_v36 = vld [vmem:[%s4015_s1 + $0x94] ss:$8 sps:$4 sm:$0xff]   ;;  %v2661_v38 = vld [vmem:[%s4015_s1 + $0x90] ss:$8 sps:$4 sm:$0xff]   ;;  %v2663_v40 = vld [vmem:[%s4015_s1 + $0xa4] ss:$8 sps:$4 sm:$0xff]  }
   0xe   :  { %v2659_v37 = vld [vmem:[%s4015_s1 + $0x494] ss:$8 sps:$4 sm:$0xff]   ;;  %v2662_v39 = vld [vmem:[%s4015_s1 + $0x490] ss:$8 sps:$4 sm:$0xff]   ;;  %v2665_v41 = vld [vmem:[%s4015_s1 + $0x4a4] ss:$8 sps:$4 sm:$0xff]  }
   0xf   :  { %1869 = vmatpush1.bf16.msra.mxu1 %v2625_v14  ;;  %v2667_v42 = vld [vmem:[%s4015_s1 + $0xa0] ss:$8 sps:$4 sm:$0xff]   ;;  %v2669_v44 = vld [vmem:[%s4015_s1 + $0xb4] ss:$8 sps:$4 sm:$0xff]   ;;  %v2673_v46 = vld [vmem:[%s4015_s1 + $0xb0] ss:$8 sps:$4 sm:$0xff]  }
  0x10   :  { %2041 = vmatpush1.bf16.msra.mxu0 %v2626_v15  ;;  %1870 = vmatprep.subr.bf16.mxu1 %v2627_v16  ;;  %v2668_v43 = vld [vmem:[%s4015_s1 + $0x4a0] ss:$8 sps:$4 sm:$0xff]   ;;  %v2671_v45 = vld [vmem:[%s4015_s1 + $0x4b4] ss:$8 sps:$4 sm:$0xff]   ;;  %v2674_v47 = vld [vmem:[%s4015_s1 + $0x4b0] ss:$8 sps:$4 sm:$0xff]  }
  0x11   :  { %2042 = vmatprep.subr.bf16.mxu0 %v2629_v17  ;;  %v2701_v48 = vld [vmem:[%s4016_s0 + $0x4] ss:$72 sps:$4 sm:$0xff]   ;;  %v2679_v52 = vld [vmem:[%s4015_s1 + $0xc0] ss:$8 sps:$4 sm:$0xff]   ;;  %v2681_v54 = vld [vmem:[%s4015_s1 + $0xd4] ss:$8 sps:$4 sm:$0xff]  }
  0x12   :  { %v2675_v49 = vld [vmem:[%s4015_s1 + $0xc4] ss:$8 sps:$4 sm:$0xff]   ;;  %1894 = vmatprep.mubr.bf16.mxu1 %v2701_v48  ;;  %v2680_v53 = vld [vmem:[%s4015_s1 + $0x4c0] ss:$8 sps:$4 sm:$0xff]   ;;  %v2683_v55 = vld [vmem:[%s4015_s1 + $0x4d4] ss:$8 sps:$4 sm:$0xff]  }
  0x13   :  { %1871 = vmatpush1.bf16.msra.mxu1 %v2631_v18  ;;  %v2677_v50 = vld [vmem:[%s4015_s1 + $0x4c4] ss:$8 sps:$4 sm:$0xff]   ;;  %v2685_v56 = vld [vmem:[%s4015_s1 + $0xd0] ss:$8 sps:$4 sm:$0xff]   ;;  %v2691_v60 = vld [vmem:[%s4015_s1 + $0xe0] ss:$8 sps:$4 sm:$0xff]  }
  0x14   :  { %2043 = vmatpush1.bf16.msra.mxu0 %v2632_v19  ;;  %1872 = vmatprep.subr.bf16.mxu1 %v2633_v20  ;;  %v2707_v51 = vld [vmem:[%s4016_s0 + $0x24] ss:$72 sps:$4 sm:$0xff]   ;;  %v2686_v57 = vld [vmem:[%s4015_s1 + $0x4d0] ss:$8 sps:$4 sm:$0xff]   ;;  %v2692_v61 = vld [vmem:[%s4015_s1 + $0x4e0] ss:$8 sps:$4 sm:$0xff]  }
  0x15   :  { %2044 = vmatprep.subr.bf16.mxu0 %v2635_v21  ;;  %2066 = vmatprep.mubr.bf16.mxu0 %v2707_v51  ;;  %v2687_v58 = vld [vmem:[%s4015_s1 + $0xe4] ss:$8 sps:$4 sm:$0xff]   ;;  %v2693_v62 = vld [vmem:[%s4015_s1 + $0xf4] ss:$8 sps:$4 sm:$0xff]   ;;  %v2697_v0 = vld [vmem:[%s4015_s1 + $0xf0] ss:$8 sps:$4 sm:$0xff]  }
  0x16   :  { %v2689_v59 = vld [vmem:[%s4015_s1 + $0x4e4] ss:$8 sps:$4 sm:$0xff]   ;;  %v2695_v63 = vld [vmem:[%s4015_s1 + $0x4f4] ss:$8 sps:$4 sm:$0xff]   ;;  %v2698_v1 = vld [vmem:[%s4015_s1 + $0x4f0] ss:$8 sps:$4 sm:$0xff]  }
  0x17   :  { %1873 = vmatpush1.bf16.msra.mxu1 %v2637_v22  ;;  %v2704_v2 = vld [vmem:[%s4015_s1 + $0x104] ss:$8 sps:$4 sm:$0xff]   ;;  %v2699_v4 = vld [vmem:[%s4016_s0] ss:$72 sps:$4 sm:$0xff]   ;;  %v2713_v8 = vld [vmem:[%s4015_s1 + $0x114] ss:$8 sps:$4 sm:$0xff]  }
  0x18   :  { %2045 = vmatpush1.bf16.msra.mxu0 %v2638_v23  ;;  %1874 = vmatprep.subr.bf16.mxu1 %v2639_v24  ;;  %v2710_v3 = vld [vmem:[%s4015_s1 + $0x504] ss:$8 sps:$4 sm:$0xff]   ;;  %v2702_v5 = vld [vmem:[%s4015_s1 + $0x100] ss:$8 sps:$4 sm:$0xff]   ;;  %v2716_v9 = vld [vmem:[%s4015_s1 + $0x514] ss:$8 sps:$4 sm:$0xff]  }
  0x19   :  { %2046 = vmatprep.subr.bf16.mxu0 %v2641_v25  ;;  %v2705_v6 = vld [vmem:[%s4016_s0 + $0x20] ss:$72 sps:$4 sm:$0xff]   ;;  %v2711_v10 = vld [vmem:[%s4015_s1 + $0x110] ss:$8 sps:$4 sm:$0xff]   ;;  %v2719_v12 = vld [vmem:[%s4015_s1 + $0x124] ss:$8 sps:$4 sm:$0xff]  }
  0x1a   :  { %v2708_v7 = vld [vmem:[%s4015_s1 + $0x500] ss:$8 sps:$4 sm:$0xff]   ;;  %v2714_v11 = vld [vmem:[%s4015_s1 + $0x510] ss:$8 sps:$4 sm:$0xff]   ;;  %v2722_v13 = vld [vmem:[%s4015_s1 + $0x524] ss:$8 sps:$4 sm:$0xff]  }
  0x1b   :  { %1875 = vmatpush1.bf16.msra.mxu1 %v2643_v26  ;;  %v2717_v14 = vld [vmem:[%s4015_s1 + $0x120] ss:$8 sps:$4 sm:$0xff]   ;;  %v2725_v16 = vld [vmem:[%s4015_s1 + $0x134] ss:$8 sps:$4 sm:$0xff]   ;;  %v2723_v18 = vld [vmem:[%s4015_s1 + $0x130] ss:$8 sps:$4 sm:$0xff]  }
  0x1c   :  { %2047 = vmatpush1.bf16.msra.mxu0 %v2644_v27  ;;  %1876 = vmatprep.subr.bf16.mxu1 %v2645_v28  ;;  %v2720_v15 = vld [vmem:[%s4015_s1 + $0x520] ss:$8 sps:$4 sm:$0xff]   ;;  %v2728_v17 = vld [vmem:[%s4015_s1 + $0x534] ss:$8 sps:$4 sm:$0xff]   ;;  %v2726_v19 = vld [vmem:[%s4015_s1 + $0x530] ss:$8 sps:$4 sm:$0xff]  }
  0x1d   :  { %2048 = vmatprep.subr.bf16.mxu0 %v2647_v29  ;;  %v2731_v20 = vld [vmem:[%s4015_s1 + $0x144] ss:$8 sps:$4 sm:$0xff]   ;;  %v2729_v22 = vld [vmem:[%s4015_s1 + $0x140] ss:$8 sps:$4 sm:$0xff]   ;;  %v2737_v24 = vld [vmem:[%s4015_s1 + $0x154] ss:$8 sps:$4 sm:$0xff]  }
  0x1e   :  { %v2734_v21 = vld [vmem:[%s4015_s1 + $0x544] ss:$8 sps:$4 sm:$0xff]   ;;  %v2732_v23 = vld [vmem:[%s4015_s1 + $0x540] ss:$8 sps:$4 sm:$0xff]   ;;  %v2740_v25 = vld [vmem:[%s4015_s1 + $0x554] ss:$8 sps:$4 sm:$0xff]  }
  0x1f   :  { %1877 = vmatpush1.bf16.msra.mxu1 %v2649_v30  ;;  %v2735_v26 = vld [vmem:[%s4015_s1 + $0x150] ss:$8 sps:$4 sm:$0xff]   ;;  %v2743_v28 = vld [vmem:[%s4015_s1 + $0x164] ss:$8 sps:$4 sm:$0xff]   ;;  %v2741_v30 = vld [vmem:[%s4015_s1 + $0x160] ss:$8 sps:$4 sm:$0xff]  }
  0x20   :  { %2049 = vmatpush1.bf16.msra.mxu0 %v2650_v31  ;;  %1878 = vmatprep.subr.bf16.mxu1 %v2651_v32  ;;  %v2738_v27 = vld [vmem:[%s4015_s1 + $0x550] ss:$8 sps:$4 sm:$0xff]   ;;  %v2746_v29 = vld [vmem:[%s4015_s1 + $0x564] ss:$8 sps:$4 sm:$0xff]   ;;  %v2744_v31 = vld [vmem:[%s4015_s1 + $0x560] ss:$8 sps:$4 sm:$0xff]  }
  0x21   :  { %2050 = vmatprep.subr.bf16.mxu0 %v2653_v33  ;;  %v2749_v32 = vld [vmem:[%s4015_s1 + $0x174] ss:$8 sps:$4 sm:$0xff]   ;;  %v2765_v48 = vld [vmem:[%s4015_s1 + $0x1a0] ss:$8 sps:$4 sm:$0xff]  }
  0x22   :  { %v2752_v33 = vld [vmem:[%s4015_s1 + $0x574] ss:$8 sps:$4 sm:$0xff]  }
  0x23   :  { %1879 = vmatpush1.bf16.msra.mxu1 %v2655_v34  ;;  %v2803_v34 = vld [vmem:[%s4016_s0 + $0xc] ss:$72 sps:$4 sm:$0xff]  }
  0x24   :  { %2051 = vmatpush1.bf16.msra.mxu0 %v2656_v35  ;;  %1880 = vmatprep.subr.bf16.mxu1 %v2657_v36  ;;  %v2747_v35 = vld [vmem:[%s4015_s1 + $0x170] ss:$8 sps:$4 sm:$0xff]   ;;  %v2776_v51 = vld [vmem:[%s4015_s1 + $0x5b4] ss:$8 sps:$4 sm:$0xff]  }
  0x25   :  { %2052 = vmatprep.subr.bf16.mxu0 %v2659_v37  ;;  %v2750_v36 = vld [vmem:[%s4015_s1 + $0x570] ss:$8 sps:$4 sm:$0xff]   ;;  %v2809_v37 = vld [vmem:[%s4016_s0 + $0x2c] ss:$72 sps:$4 sm:$0xff]  }
  0x27   :  { %1881 = vmatpush1.bf16.msra.mxu1 %v2661_v38  ;;  %v2755_v38 = vld [vmem:[%s4015_s1 + $0x184] ss:$8 sps:$4 sm:$0xff]  }
  0x28   :  { %2053 = vmatpush1.bf16.msra.mxu0 %v2662_v39  ;;  %1882 = vmatprep.subr.bf16.mxu1 %v2663_v40  ;;  %v2758_v39 = vld [vmem:[%s4015_s1 + $0x584] ss:$8 sps:$4 sm:$0xff]   ;;  %v2753_v40 = vld [vmem:[%s4015_s1 + $0x180] ss:$8 sps:$4 sm:$0xff]  }
  0x29   :  { %2054 = vmatprep.subr.bf16.mxu0 %v2665_v41  ;;  %v2756_v41 = vld [vmem:[%s4015_s1 + $0x580] ss:$8 sps:$4 sm:$0xff]  }
  0x2b   :  { %1883 = vmatpush1.bf16.msra.mxu1 %v2667_v42  ;;  %v2761_v42 = vld [vmem:[%s4015_s1 + $0x194] ss:$8 sps:$4 sm:$0xff]  }
  0x2c   :  { %2055 = vmatpush1.bf16.msra.mxu0 %v2668_v43  ;;  %1884 = vmatprep.subr.bf16.mxu1 %v2669_v44  ;;  %v2764_v43 = vld [vmem:[%s4015_s1 + $0x594] ss:$8 sps:$4 sm:$0xff]   ;;  %v2759_v44 = vld [vmem:[%s4015_s1 + $0x190] ss:$8 sps:$4 sm:$0xff]  }
  0x2d   :  { %2056 = vmatprep.subr.bf16.mxu0 %v2671_v45  ;;  %v2762_v45 = vld [vmem:[%s4015_s1 + $0x590] ss:$8 sps:$4 sm:$0xff]  }
  0x2f   :  { %1885 = vmatpush1.bf16.msra.mxu1 %v2673_v46  ;;  %v2767_v46 = vld [vmem:[%s4015_s1 + $0x1a4] ss:$8 sps:$4 sm:$0xff]  }
  0x30   :  { %2057 = vmatpush1.bf16.msra.mxu0 %v2674_v47  ;;  %1886 = vmatprep.subr.bf16.mxu1 %v2675_v49  ;;  %v2770_v47 = vld [vmem:[%s4015_s1 + $0x5a4] ss:$8 sps:$4 sm:$0xff]   ;;  %v2768_v49 = vld [vmem:[%s4015_s1 + $0x5a0] ss:$8 sps:$4 sm:$0xff]  }
  0x31   :  { %2058 = vmatprep.subr.bf16.mxu0 %v2677_v50  ;;  %v2773_v50 = vld [vmem:[%s4015_s1 + $0x1b4] ss:$8 sps:$4 sm:$0xff]  }
  0x33   :  { %1887 = vmatpush1.bf16.msra.mxu1 %v2679_v52  ;;  %v2771_v52 = vld [vmem:[%s4015_s1 + $0x1b0] ss:$8 sps:$4 sm:$0xff]  }
  0x34   :  { %2059 = vmatpush1.bf16.msra.mxu0 %v2680_v53  ;;  %1888 = vmatprep.subr.bf16.mxu1 %v2681_v54  ;;  %v2774_v53 = vld [vmem:[%s4015_s1 + $0x5b0] ss:$8 sps:$4 sm:$0xff]   ;;  %v2779_v54 = vld [vmem:[%s4015_s1 + $0x1c4] ss:$8 sps:$4 sm:$0xff]  }
  0x35   :  { %2060 = vmatprep.subr.bf16.mxu0 %v2683_v55  ;;  %v2782_v55 = vld [vmem:[%s4015_s1 + $0x5c4] ss:$8 sps:$4 sm:$0xff]  }
  0x37   :  { %1889 = vmatpush1.bf16.msra.mxu1 %v2685_v56  ;;  %v2777_v56 = vld [vmem:[%s4015_s1 + $0x1c0] ss:$8 sps:$4 sm:$0xff]  }
  0x38   :  { %2061 = vmatpush1.bf16.msra.mxu0 %v2686_v57  ;;  %1890 = vmatprep.subr.bf16.mxu1 %v2687_v58  ;;  %v2780_v57 = vld [vmem:[%s4015_s1 + $0x5c0] ss:$8 sps:$4 sm:$0xff]   ;;  %v2785_v58 = vld [vmem:[%s4015_s1 + $0x1d4] ss:$8 sps:$4 sm:$0xff]  }
  0x39   :  { %2062 = vmatprep.subr.bf16.mxu0 %v2689_v59  ;;  %v2788_v59 = vld [vmem:[%s4015_s1 + $0x5d4] ss:$8 sps:$4 sm:$0xff]  }
  0x3b   :  { %1891 = vmatpush1.bf16.msra.mxu1 %v2691_v60  ;;  %v2783_v60 = vld [vmem:[%s4015_s1 + $0x1d0] ss:$8 sps:$4 sm:$0xff]  }
  0x3c   :  { %2063 = vmatpush1.bf16.msra.mxu0 %v2692_v61  ;;  %1892 = vmatprep.subr.bf16.mxu1 %v2693_v62  ;;  %v2786_v61 = vld [vmem:[%s4015_s1 + $0x5d0] ss:$8 sps:$4 sm:$0xff]   ;;  %v2791_v62 = vld [vmem:[%s4015_s1 + $0x1e4] ss:$8 sps:$4 sm:$0xff]  }
  0x3d   :  { %2064 = vmatprep.subr.bf16.mxu0 %v2695_v63  ;;  %v2794_v63 = vld [vmem:[%s4015_s1 + $0x5e4] ss:$8 sps:$4 sm:$0xff]  }
  0x3f   :  { %1893 = vmatpush1.bf16.msra.mxu1 %v2697_v0  ;;  %v2789_v0 = vld [vmem:[%s4015_s1 + $0x1e0] ss:$8 sps:$4 sm:$0xff]  }
  0x40   :  { %2065 = vmatpush1.bf16.msra.mxu0 %v2698_v1  ;;  %1905 = vmatprep.subr.bf16.mxu1 %v2704_v2  ;;  %v2792_v1 = vld [vmem:[%s4015_s1 + $0x5e0] ss:$8 sps:$4 sm:$0xff]   ;;  %v2797_v2 = vld [vmem:[%s4015_s1 + $0x1f4] ss:$8 sps:$4 sm:$0xff]  }
  0x41   :  { %2077 = vmatprep.subr.bf16.mxu0 %v2710_v3  ;;  %v2800_v3 = vld [vmem:[%s4015_s1 + $0x5f4] ss:$8 sps:$4 sm:$0xff]  }
  0x42   :  { %1895 = vmatmul.mubr.bf16.vlgmr.msra.gmra.mrb[0].mxu1 %v2699_v4  ;;  %v2795_v4 = vld [vmem:[%s4015_s1 + $0x1f0] ss:$8 sps:$4 sm:$0xff]  }
  0x43   :  { %2067 = vmatmul.mubr.bf16.vlgmr.msra.gmra.mrb[0].mxu0 %v2705_v6  ;;  %1906 = vmatpush1.bf16.msra.mxu1 %v2702_v5  ;;  %v2798_v5 = vld [vmem:[%s4015_s1 + $0x5f0] ss:$8 sps:$4 sm:$0xff]   ;;  %v2806_v6 = vld [vmem:[%s4015_s1 + $0x204] ss:$8 sps:$4 sm:$0xff]  }
  0x44   :  { %2078 = vmatpush1.bf16.msra.mxu0 %v2708_v7  ;;  %1907 = vmatprep.subr.bf16.mxu1 %v2713_v8  ;;  %v2812_v7 = vld [vmem:[%s4015_s1 + $0x604] ss:$8 sps:$4 sm:$0xff]   ;;  %v2801_v8 = vld [vmem:[%s4016_s0 + $0x8] ss:$72 sps:$4 sm:$0xff]  }
  0x45   :  { %2079 = vmatprep.subr.bf16.mxu0 %v2716_v9  ;;  %1937 = vmatprep.mubr.bf16.mxu1 %v2803_v34  ;;  %v2804_v9 = vld [vmem:[%s4015_s1 + $0x200] ss:$8 sps:$4 sm:$0xff]   ;;  %v2845_v34 = vld [vmem:[%s4015_s1 + $0x264] ss:$8 sps:$4 sm:$0xff]  }
  0x46   :  { %2109 = vmatprep.mubr.bf16.mxu0 %v2809_v37  ;;  %v2846_v37 = vld [vmem:[%s4015_s1 + $0x660] ss:$8 sps:$4 sm:$0xff]  }
  0x47   :  { %1908 = vmatpush1.bf16.msra.mxu1 %v2711_v10  ;;  %v2807_v10 = vld [vmem:[%s4016_s0 + $0x28] ss:$72 sps:$4 sm:$0xff]  }
  0x48   :  { %2080 = vmatpush1.bf16.msra.mxu0 %v2714_v11  ;;  %1909 = vmatprep.subr.bf16.mxu1 %v2719_v12  ;;  %v2810_v11 = vld [vmem:[%s4015_s1 + $0x600] ss:$8 sps:$4 sm:$0xff]   ;;  %v2815_v12 = vld [vmem:[%s4015_s1 + $0x214] ss:$8 sps:$4 sm:$0xff]  }
  0x49   :  { %2081 = vmatprep.subr.bf16.mxu0 %v2722_v13  ;;  %v2818_v13 = vld [vmem:[%s4015_s1 + $0x614] ss:$8 sps:$4 sm:$0xff]  }
  0x4b   :  { %1910 = vmatpush1.bf16.msra.mxu1 %v2717_v14  ;;  %v2813_v14 = vld [vmem:[%s4015_s1 + $0x210] ss:$8 sps:$4 sm:$0xff]  }
  0x4c   :  { %2082 = vmatpush1.bf16.msra.mxu0 %v2720_v15  ;;  %1911 = vmatprep.subr.bf16.mxu1 %v2725_v16  ;;  %v2816_v15 = vld [vmem:[%s4015_s1 + $0x610] ss:$8 sps:$4 sm:$0xff]   ;;  %v2821_v16 = vld [vmem:[%s4015_s1 + $0x224] ss:$8 sps:$4 sm:$0xff]  }
  0x4d   :  { %2083 = vmatprep.subr.bf16.mxu0 %v2728_v17  ;;  %v2824_v17 = vld [vmem:[%s4015_s1 + $0x624] ss:$8 sps:$4 sm:$0xff]  }
  0x4f   :  { %1912 = vmatpush1.bf16.msra.mxu1 %v2723_v18  ;;  %v2819_v18 = vld [vmem:[%s4015_s1 + $0x220] ss:$8 sps:$4 sm:$0xff]  }
  0x50   :  { %2084 = vmatpush1.bf16.msra.mxu0 %v2726_v19  ;;  %1913 = vmatprep.subr.bf16.mxu1 %v2731_v20  ;;  %v2905_v19 = vld [vmem:[%s4016_s0 + $0x14] ss:$72 sps:$4 sm:$0xff]   ;;  %v2822_v20 = vld [vmem:[%s4015_s1 + $0x620] ss:$8 sps:$4 sm:$0xff]  }
  0x51   :  { %2085 = vmatprep.subr.bf16.mxu0 %v2734_v21  ;;  %v2827_v21 = vld [vmem:[%s4015_s1 + $0x234] ss:$8 sps:$4 sm:$0xff]  }
  0x53   :  { %1914 = vmatpush1.bf16.msra.mxu1 %v2729_v22  ;;  %v2830_v22 = vld [vmem:[%s4015_s1 + $0x634] ss:$8 sps:$4 sm:$0xff]  }
  0x54   :  { %2086 = vmatpush1.bf16.msra.mxu0 %v2732_v23  ;;  %1915 = vmatprep.subr.bf16.mxu1 %v2737_v24  ;;  %v2911_v23 = vld [vmem:[%s4016_s0 + $0x34] ss:$72 sps:$4 sm:$0xff]   ;;  %v2825_v24 = vld [vmem:[%s4015_s1 + $0x230] ss:$8 sps:$4 sm:$0xff]  }
  0x55   :  { %2087 = vmatprep.subr.bf16.mxu0 %v2740_v25  ;;  %v2828_v25 = vld [vmem:[%s4015_s1 + $0x630] ss:$8 sps:$4 sm:$0xff]  }
  0x57   :  { %1916 = vmatpush1.bf16.msra.mxu1 %v2735_v26  ;;  %v2833_v26 = vld [vmem:[%s4015_s1 + $0x244] ss:$8 sps:$4 sm:$0xff]  }
  0x58   :  { %2088 = vmatpush1.bf16.msra.mxu0 %v2738_v27  ;;  %1917 = vmatprep.subr.bf16.mxu1 %v2743_v28  ;;  %v2836_v27 = vld [vmem:[%s4015_s1 + $0x644] ss:$8 sps:$4 sm:$0xff]   ;;  %v2831_v28 = vld [vmem:[%s4015_s1 + $0x240] ss:$8 sps:$4 sm:$0xff]  }
  0x59   :  { %2089 = vmatprep.subr.bf16.mxu0 %v2746_v29  ;;  %v2834_v29 = vld [vmem:[%s4015_s1 + $0x640] ss:$8 sps:$4 sm:$0xff]  }
  0x5b   :  { %1918 = vmatpush1.bf16.msra.mxu1 %v2741_v30  ;;  %v2839_v30 = vld [vmem:[%s4015_s1 + $0x254] ss:$8 sps:$4 sm:$0xff]  }
  0x5c   :  { %2090 = vmatpush1.bf16.msra.mxu0 %v2744_v31  ;;  %1919 = vmatprep.subr.bf16.mxu1 %v2749_v32  ;;  %v2842_v31 = vld [vmem:[%s4015_s1 + $0x654] ss:$8 sps:$4 sm:$0xff]   ;;  %v2837_v32 = vld [vmem:[%s4015_s1 + $0x250] ss:$8 sps:$4 sm:$0xff]  }
  0x5d   :  { %2091 = vmatprep.subr.bf16.mxu0 %v2752_v33  ;;  %v2840_v33 = vld [vmem:[%s4015_s1 + $0x650] ss:$8 sps:$4 sm:$0xff]  }
  0x5f   :  { %1920 = vmatpush1.bf16.msra.mxu1 %v2747_v35  ;;  %v2848_v35 = vld [vmem:[%s4015_s1 + $0x664] ss:$8 sps:$4 sm:$0xff]  }
  0x60   :  { %2092 = vmatpush1.bf16.msra.mxu0 %v2750_v36  ;;  %1921 = vmatprep.subr.bf16.mxu1 %v2755_v38  ;;  %v2843_v36 = vld [vmem:[%s4015_s1 + $0x260] ss:$8 sps:$4 sm:$0xff]   ;;  %v2851_v38 = vld [vmem:[%s4015_s1 + $0x274] ss:$8 sps:$4 sm:$0xff]  }
  0x61   :  { %2093 = vmatprep.subr.bf16.mxu0 %v2758_v39  ;;  %v2854_v39 = vld [vmem:[%s4015_s1 + $0x674] ss:$8 sps:$4 sm:$0xff]  }
  0x63   :  { %1922 = vmatpush1.bf16.msra.mxu1 %v2753_v40  ;;  %v2849_v40 = vld [vmem:[%s4015_s1 + $0x270] ss:$8 sps:$4 sm:$0xff]  }
  0x64   :  { %2094 = vmatpush1.bf16.msra.mxu0 %v2756_v41  ;;  %1923 = vmatprep.subr.bf16.mxu1 %v2761_v42  ;;  %v2852_v41 = vld [vmem:[%s4015_s1 + $0x670] ss:$8 sps:$4 sm:$0xff]   ;;  %v2857_v42 = vld [vmem:[%s4015_s1 + $0x284] ss:$8 sps:$4 sm:$0xff]  }
  0x65   :  { %2095 = vmatprep.subr.bf16.mxu0 %v2764_v43  ;;  %v2860_v43 = vld [vmem:[%s4015_s1 + $0x684] ss:$8 sps:$4 sm:$0xff]  }
  0x67   :  { %1924 = vmatpush1.bf16.msra.mxu1 %v2759_v44  ;;  %v2855_v44 = vld [vmem:[%s4015_s1 + $0x280] ss:$8 sps:$4 sm:$0xff]  }
  0x68   :  { %2096 = vmatpush1.bf16.msra.mxu0 %v2762_v45  ;;  %1925 = vmatprep.subr.bf16.mxu1 %v2767_v46  ;;  %v2858_v45 = vld [vmem:[%s4015_s1 + $0x680] ss:$8 sps:$4 sm:$0xff]   ;;  %v2863_v46 = vld [vmem:[%s4015_s1 + $0x294] ss:$8 sps:$4 sm:$0xff]  }
  0x69   :  { %2097 = vmatprep.subr.bf16.mxu0 %v2770_v47  ;;  %v2866_v47 = vld [vmem:[%s4015_s1 + $0x694] ss:$8 sps:$4 sm:$0xff]  }
  0x6b   :  { %1926 = vmatpush1.bf16.msra.mxu1 %v2765_v48  ;;  %v2861_v48 = vld [vmem:[%s4015_s1 + $0x290] ss:$8 sps:$4 sm:$0xff]  }
  0x6c   :  { %2098 = vmatpush1.bf16.msra.mxu0 %v2768_v49  ;;  %1927 = vmatprep.subr.bf16.mxu1 %v2773_v50  ;;  %v2864_v49 = vld [vmem:[%s4015_s1 + $0x690] ss:$8 sps:$4 sm:$0xff]   ;;  %v2869_v50 = vld [vmem:[%s4015_s1 + $0x2a4] ss:$8 sps:$4 sm:$0xff]  }
  0x6d   :  { %2099 = vmatprep.subr.bf16.mxu0 %v2776_v51  ;;  %v2872_v51 = vld [vmem:[%s4015_s1 + $0x6a4] ss:$8 sps:$4 sm:$0xff]  }
  0x6f   :  { %1928 = vmatpush1.bf16.msra.mxu1 %v2771_v52  ;;  %v2867_v52 = vld [vmem:[%s4015_s1 + $0x2a0] ss:$8 sps:$4 sm:$0xff]  }
  0x70   :  { %2100 = vmatpush1.bf16.msra.mxu0 %v2774_v53  ;;  %1929 = vmatprep.subr.bf16.mxu1 %v2779_v54  ;;  %v2870_v53 = vld [vmem:[%s4015_s1 + $0x6a0] ss:$8 sps:$4 sm:$0xff]   ;;  %v2875_v54 = vld [vmem:[%s4015_s1 + $0x2b4] ss:$8 sps:$4 sm:$0xff]  }
  0x71   :  { %2101 = vmatprep.subr.bf16.mxu0 %v2782_v55  ;;  %v2878_v55 = vld [vmem:[%s4015_s1 + $0x6b4] ss:$8 sps:$4 sm:$0xff]  }
  0x73   :  { %1930 = vmatpush1.bf16.msra.mxu1 %v2777_v56  ;;  %v2873_v56 = vld [vmem:[%s4015_s1 + $0x2b0] ss:$8 sps:$4 sm:$0xff]  }
  0x74   :  { %2102 = vmatpush1.bf16.msra.mxu0 %v2780_v57  ;;  %1931 = vmatprep.subr.bf16.mxu1 %v2785_v58  ;;  %v2876_v57 = vld [vmem:[%s4015_s1 + $0x6b0] ss:$8 sps:$4 sm:$0xff]   ;;  %v2881_v58 = vld [vmem:[%s4015_s1 + $0x2c4] ss:$8 sps:$4 sm:$0xff]  }
  0x75   :  { %2103 = vmatprep.subr.bf16.mxu0 %v2788_v59  ;;  %v2884_v59 = vld [vmem:[%s4015_s1 + $0x6c4] ss:$8 sps:$4 sm:$0xff]  }
  0x77   :  { %1932 = vmatpush1.bf16.msra.mxu1 %v2783_v60  ;;  %v2879_v60 = vld [vmem:[%s4015_s1 + $0x2c0] ss:$8 sps:$4 sm:$0xff]  }
  0x78   :  { %2104 = vmatpush1.bf16.msra.mxu0 %v2786_v61  ;;  %1933 = vmatprep.subr.bf16.mxu1 %v2791_v62  ;;  %v2882_v61 = vld [vmem:[%s4015_s1 + $0x6c0] ss:$8 sps:$4 sm:$0xff]   ;;  %v2887_v62 = vld [vmem:[%s4015_s1 + $0x2d4] ss:$8 sps:$4 sm:$0xff]  }
  0x79   :  { %2105 = vmatprep.subr.bf16.mxu0 %v2794_v63  ;;  %v2890_v63 = vld [vmem:[%s4015_s1 + $0x6d4] ss:$8 sps:$4 sm:$0xff]  }
  0x7b   :  { %1934 = vmatpush1.bf16.msra.mxu1 %v2789_v0  ;;  %v2885_v0 = vld [vmem:[%s4015_s1 + $0x2d0] ss:$8 sps:$4 sm:$0xff]  }
  0x7c   :  { %2106 = vmatpush1.bf16.msra.mxu0 %v2792_v1  ;;  %1935 = vmatprep.subr.bf16.mxu1 %v2797_v2  ;;  %v2888_v1 = vld [vmem:[%s4015_s1 + $0x6d0] ss:$8 sps:$4 sm:$0xff]   ;;  %v2893_v2 = vld [vmem:[%s4015_s1 + $0x2e4] ss:$8 sps:$4 sm:$0xff]  }
  0x7d   :  { %2107 = vmatprep.subr.bf16.mxu0 %v2800_v3  ;;  %v2896_v3 = vld [vmem:[%s4015_s1 + $0x6e4] ss:$8 sps:$4 sm:$0xff]  }
  0x7f   :  { %1936 = vmatpush1.bf16.msra.mxu1 %v2795_v4  ;;  %v2891_v4 = vld [vmem:[%s4015_s1 + $0x2e0] ss:$8 sps:$4 sm:$0xff]  }
  0x80   :  { %2108 = vmatpush1.bf16.msra.mxu0 %v2798_v5  ;;  %1948 = vmatprep.subr.bf16.mxu1 %v2806_v6  ;;  %v2894_v5 = vld [vmem:[%s4015_s1 + $0x6e0] ss:$8 sps:$4 sm:$0xff]   ;;  %v2899_v6 = vld [vmem:[%s4015_s1 + $0x2f4] ss:$8 sps:$4 sm:$0xff]  }
  0x81   :  { %2120 = vmatprep.subr.bf16.mxu0 %v2812_v7  ;;  %v2902_v7 = vld [vmem:[%s4015_s1 + $0x6f4] ss:$8 sps:$4 sm:$0xff]  }
  0x82   :  { %1938 = vmatmul.mubr.bf16.vlgmr.msra.gmra.mrb[0].mxu1 %v2801_v8  ;;  %v2897_v8 = vld [vmem:[%s4015_s1 + $0x2f0] ss:$8 sps:$4 sm:$0xff]  }
  0x83   :  { %2110 = vmatmul.mubr.bf16.vlgmr.msra.gmra.mrb[0].mxu0 %v2807_v10  ;;  %1949 = vmatpush1.bf16.msra.mxu1 %v2804_v9  ;;  %v2900_v9 = vld [vmem:[%s4015_s1 + $0x6f0] ss:$8 sps:$4 sm:$0xff]   ;;  %v2908_v10 = vld [vmem:[%s4015_s1 + $0x304] ss:$8 sps:$4 sm:$0xff]  }
  0x84   :  { %2121 = vmatpush1.bf16.msra.mxu0 %v2810_v11  ;;  %1950 = vmatprep.subr.bf16.mxu1 %v2815_v12  ;;  %v2914_v11 = vld [vmem:[%s4015_s1 + $0x704] ss:$8 sps:$4 sm:$0xff]   ;;  %v2903_v12 = vld [vmem:[%s4016_s0 + $0x10] ss:$72 sps:$4 sm:$0xff]  }
  0x85   :  { %2122 = vmatprep.subr.bf16.mxu0 %v2818_v13  ;;  %1980 = vmatprep.mubr.bf16.mxu1 %v2905_v19  ;;  %v2906_v13 = vld [vmem:[%s4015_s1 + $0x300] ss:$8 sps:$4 sm:$0xff]   ;;  %v3010_v19 = vld [vmem:[%s4016_s0 + $0x3c] ss:$72 sps:$4 sm:$0xff]  }
  0x86   :  { %2152 = vmatprep.mubr.bf16.mxu0 %v2911_v23  ;;  %v2926_v23 = vld [vmem:[%s4015_s1 + $0x724] ss:$8 sps:$4 sm:$0xff]  }
  0x87   :  { %1951 = vmatpush1.bf16.msra.mxu1 %v2813_v14  ;;  %v2909_v14 = vld [vmem:[%s4016_s0 + $0x30] ss:$72 sps:$4 sm:$0xff]  }
  0x88   :  { %2123 = vmatpush1.bf16.msra.mxu0 %v2816_v15  ;;  %1952 = vmatprep.subr.bf16.mxu1 %v2821_v16  ;;  %v2912_v15 = vld [vmem:[%s4015_s1 + $0x700] ss:$8 sps:$4 sm:$0xff]   ;;  %v2917_v16 = vld [vmem:[%s4015_s1 + $0x314] ss:$8 sps:$4 sm:$0xff]  }
  0x89   :  { %2124 = vmatprep.subr.bf16.mxu0 %v2824_v17  ;;  %v2920_v17 = vld [vmem:[%s4015_s1 + $0x714] ss:$8 sps:$4 sm:$0xff]  }
  0x8b   :  { %1953 = vmatpush1.bf16.msra.mxu1 %v2819_v18  ;;  %v3007_v18 = vld [vmem:[%s4016_s0 + $0x1c] ss:$72 sps:$4 sm:$0xff]  }
  0x8c   :  { %2125 = vmatpush1.bf16.msra.mxu0 %v2822_v20  ;;  %1954 = vmatprep.subr.bf16.mxu1 %v2827_v21  ;;  %v2915_v20 = vld [vmem:[%s4015_s1 + $0x310] ss:$8 sps:$4 sm:$0xff]  }
  0x8d   :  { %2126 = vmatprep.subr.bf16.mxu0 %v2830_v22  ;;  %v2918_v21 = vld [vmem:[%s4015_s1 + $0x710] ss:$8 sps:$4 sm:$0xff]   ;;  %v2923_v22 = vld [vmem:[%s4015_s1 + $0x324] ss:$8 sps:$4 sm:$0xff]  }
  0x8f   :  { %1955 = vmatpush1.bf16.msra.mxu1 %v2825_v24  ;;  %v2921_v24 = vld [vmem:[%s4015_s1 + $0x320] ss:$8 sps:$4 sm:$0xff]  }
  0x90   :  { %2127 = vmatpush1.bf16.msra.mxu0 %v2828_v25  ;;  %1956 = vmatprep.subr.bf16.mxu1 %v2833_v26  ;;  %v2924_v25 = vld [vmem:[%s4015_s1 + $0x720] ss:$8 sps:$4 sm:$0xff]   ;;  %v2929_v26 = vld [vmem:[%s4015_s1 + $0x334] ss:$8 sps:$4 sm:$0xff]  }
  0x91   :  { %2128 = vmatprep.subr.bf16.mxu0 %v2836_v27  ;;  %v2932_v27 = vld [vmem:[%s4015_s1 + $0x734] ss:$8 sps:$4 sm:$0xff]  }
  0x93   :  { %1957 = vmatpush1.bf16.msra.mxu1 %v2831_v28  ;;  %v2927_v28 = vld [vmem:[%s4015_s1 + $0x330] ss:$8 sps:$4 sm:$0xff]  }
  0x94   :  { %2129 = vmatpush1.bf16.msra.mxu0 %v2834_v29  ;;  %1958 = vmatprep.subr.bf16.mxu1 %v2839_v30  ;;  %v2930_v29 = vld [vmem:[%s4015_s1 + $0x730] ss:$8 sps:$4 sm:$0xff]   ;;  %v2935_v30 = vld [vmem:[%s4015_s1 + $0x344] ss:$8 sps:$4 sm:$0xff]  }
  0x95   :  { %2130 = vmatprep.subr.bf16.mxu0 %v2842_v31  ;;  %v2938_v31 = vld [vmem:[%s4015_s1 + $0x744] ss:$8 sps:$4 sm:$0xff]  }
  0x97   :  { %1959 = vmatpush1.bf16.msra.mxu1 %v2837_v32  ;;  %v2933_v32 = vld [vmem:[%s4015_s1 + $0x340] ss:$8 sps:$4 sm:$0xff]  }
  0x98   :  { %2131 = vmatpush1.bf16.msra.mxu0 %v2840_v33  ;;  %1960 = vmatprep.subr.bf16.mxu1 %v2845_v34  ;;  %v2936_v33 = vld [vmem:[%s4015_s1 + $0x740] ss:$8 sps:$4 sm:$0xff]   ;;  %v2941_v34 = vld [vmem:[%s4015_s1 + $0x354] ss:$8 sps:$4 sm:$0xff]  }
  0x99   :  { %2132 = vmatprep.subr.bf16.mxu0 %v2848_v35  ;;  %v2944_v35 = vld [vmem:[%s4015_s1 + $0x754] ss:$8 sps:$4 sm:$0xff]  }
  0x9b   :  { %1961 = vmatpush1.bf16.msra.mxu1 %v2843_v36  ;;  %v2939_v36 = vld [vmem:[%s4015_s1 + $0x350] ss:$8 sps:$4 sm:$0xff]  }
  0x9c   :  { %2133 = vmatpush1.bf16.msra.mxu0 %v2846_v37  ;;  %1962 = vmatprep.subr.bf16.mxu1 %v2851_v38  ;;  %v2942_v37 = vld [vmem:[%s4015_s1 + $0x750] ss:$8 sps:$4 sm:$0xff]   ;;  %v2947_v38 = vld [vmem:[%s4015_s1 + $0x364] ss:$8 sps:$4 sm:$0xff]  }
  0x9d   :  { %2134 = vmatprep.subr.bf16.mxu0 %v2854_v39  ;;  %v2950_v39 = vld [vmem:[%s4015_s1 + $0x764] ss:$8 sps:$4 sm:$0xff]  }
  0x9f   :  { %1963 = vmatpush1.bf16.msra.mxu1 %v2849_v40  ;;  %v2945_v40 = vld [vmem:[%s4015_s1 + $0x360] ss:$8 sps:$4 sm:$0xff]  }
  0xa0   :  { %2135 = vmatpush1.bf16.msra.mxu0 %v2852_v41  ;;  %1964 = vmatprep.subr.bf16.mxu1 %v2857_v42  ;;  %v2948_v41 = vld [vmem:[%s4015_s1 + $0x760] ss:$8 sps:$4 sm:$0xff]   ;;  %v2953_v42 = vld [vmem:[%s4015_s1 + $0x374] ss:$8 sps:$4 sm:$0xff]  }
  0xa1   :  { %2136 = vmatprep.subr.bf16.mxu0 %v2860_v43  ;;  %v2956_v43 = vld [vmem:[%s4015_s1 + $0x774] ss:$8 sps:$4 sm:$0xff]  }
  0xa3   :  { %1965 = vmatpush1.bf16.msra.mxu1 %v2855_v44  ;;  %v2951_v44 = vld [vmem:[%s4015_s1 + $0x370] ss:$8 sps:$4 sm:$0xff]  }
  0xa4   :  { %2137 = vmatpush1.bf16.msra.mxu0 %v2858_v45  ;;  %1966 = vmatprep.subr.bf16.mxu1 %v2863_v46  ;;  %v2954_v45 = vld [vmem:[%s4015_s1 + $0x770] ss:$8 sps:$4 sm:$0xff]   ;;  %v2959_v46 = vld [vmem:[%s4015_s1 + $0x384] ss:$8 sps:$4 sm:$0xff]  }
  0xa5   :  { %2138 = vmatprep.subr.bf16.mxu0 %v2866_v47  ;;  %v2962_v47 = vld [vmem:[%s4015_s1 + $0x784] ss:$8 sps:$4 sm:$0xff]  }
  0xa7   :  { %1967 = vmatpush1.bf16.msra.mxu1 %v2861_v48  ;;  %v2957_v48 = vld [vmem:[%s4015_s1 + $0x380] ss:$8 sps:$4 sm:$0xff]  }
  0xa8   :  { %2139 = vmatpush1.bf16.msra.mxu0 %v2864_v49  ;;  %1968 = vmatprep.subr.bf16.mxu1 %v2869_v50  ;;  %v2960_v49 = vld [vmem:[%s4015_s1 + $0x780] ss:$8 sps:$4 sm:$0xff]   ;;  %v2965_v50 = vld [vmem:[%s4015_s1 + $0x394] ss:$8 sps:$4 sm:$0xff]  }
  0xa9   :  { %2140 = vmatprep.subr.bf16.mxu0 %v2872_v51  ;;  %v2968_v51 = vld [vmem:[%s4015_s1 + $0x794] ss:$8 sps:$4 sm:$0xff]  }
  0xab   :  { %1969 = vmatpush1.bf16.msra.mxu1 %v2867_v52  ;;  %v2963_v52 = vld [vmem:[%s4015_s1 + $0x390] ss:$8 sps:$4 sm:$0xff]  }
  0xac   :  { %2141 = vmatpush1.bf16.msra.mxu0 %v2870_v53  ;;  %1970 = vmatprep.subr.bf16.mxu1 %v2875_v54  ;;  %v2966_v53 = vld [vmem:[%s4015_s1 + $0x790] ss:$8 sps:$4 sm:$0xff]   ;;  %v2971_v54 = vld [vmem:[%s4015_s1 + $0x3a4] ss:$8 sps:$4 sm:$0xff]  }
  0xad   :  { %2142 = vmatprep.subr.bf16.mxu0 %v2878_v55  ;;  %v2974_v55 = vld [vmem:[%s4015_s1 + $0x7a4] ss:$8 sps:$4 sm:$0xff]  }
  0xaf   :  { %1971 = vmatpush1.bf16.msra.mxu1 %v2873_v56  ;;  %v2969_v56 = vld [vmem:[%s4015_s1 + $0x3a0] ss:$8 sps:$4 sm:$0xff]  }
  0xb0   :  { %2143 = vmatpush1.bf16.msra.mxu0 %v2876_v57  ;;  %1972 = vmatprep.subr.bf16.mxu1 %v2881_v58  ;;  %v2972_v57 = vld [vmem:[%s4015_s1 + $0x7a0] ss:$8 sps:$4 sm:$0xff]   ;;  %v2977_v58 = vld [vmem:[%s4015_s1 + $0x3b4] ss:$8 sps:$4 sm:$0xff]  }
  0xb1   :  { %2144 = vmatprep.subr.bf16.mxu0 %v2884_v59  ;;  %v2980_v59 = vld [vmem:[%s4015_s1 + $0x7b4] ss:$8 sps:$4 sm:$0xff]  }
  0xb3   :  { %1973 = vmatpush1.bf16.msra.mxu1 %v2879_v60  ;;  %v2975_v60 = vld [vmem:[%s4015_s1 + $0x3b0] ss:$8 sps:$4 sm:$0xff]  }
  0xb4   :  { %2145 = vmatpush1.bf16.msra.mxu0 %v2882_v61  ;;  %1974 = vmatprep.subr.bf16.mxu1 %v2887_v62  ;;  %v2978_v61 = vld [vmem:[%s4015_s1 + $0x7b0] ss:$8 sps:$4 sm:$0xff]   ;;  %v2983_v62 = vld [vmem:[%s4015_s1 + $0x3c4] ss:$8 sps:$4 sm:$0xff]  }
  0xb5   :  { %2146 = vmatprep.subr.bf16.mxu0 %v2890_v63  ;;  %v2986_v63 = vld [vmem:[%s4015_s1 + $0x7c4] ss:$8 sps:$4 sm:$0xff]  }
  0xb7   :  { %1975 = vmatpush1.bf16.msra.mxu1 %v2885_v0  ;;  %v2981_v0 = vld [vmem:[%s4015_s1 + $0x3c0] ss:$8 sps:$4 sm:$0xff]  }
  0xb8   :  { %2147 = vmatpush1.bf16.msra.mxu0 %v2888_v1  ;;  %1976 = vmatprep.subr.bf16.mxu1 %v2893_v2  ;;  %v2984_v1 = vld [vmem:[%s4015_s1 + $0x7c0] ss:$8 sps:$4 sm:$0xff]   ;;  %v2989_v2 = vld [vmem:[%s4015_s1 + $0x3d4] ss:$8 sps:$4 sm:$0xff]  }
  0xb9   :  { %2148 = vmatprep.subr.bf16.mxu0 %v2896_v3  ;;  %v2992_v3 = vld [vmem:[%s4015_s1 + $0x7d4] ss:$8 sps:$4 sm:$0xff]  }
  0xbb   :  { %1977 = vmatpush1.bf16.msra.mxu1 %v2891_v4  ;;  %v2987_v4 = vld [vmem:[%s4015_s1 + $0x3d0] ss:$8 sps:$4 sm:$0xff]  }
  0xbc   :  { %2149 = vmatpush1.bf16.msra.mxu0 %v2894_v5  ;;  %1978 = vmatprep.subr.bf16.mxu1 %v2899_v6  ;;  %v2990_v5 = vld [vmem:[%s4015_s1 + $0x7d0] ss:$8 sps:$4 sm:$0xff]   ;;  %v2995_v6 = vld [vmem:[%s4015_s1 + $0x3e4] ss:$8 sps:$4 sm:$0xff]  }
  0xbd   :  { %2150 = vmatprep.subr.bf16.mxu0 %v2902_v7  ;;  %v2998_v7 = vld [vmem:[%s4015_s1 + $0x7e4] ss:$8 sps:$4 sm:$0xff]  }
  0xbf   :  { %1979 = vmatpush1.bf16.msra.mxu1 %v2897_v8  ;;  %v2993_v8 = vld [vmem:[%s4015_s1 + $0x3e0] ss:$8 sps:$4 sm:$0xff]  }
  0xc0   :  { %2151 = vmatpush1.bf16.msra.mxu0 %v2900_v9  ;;  %1991 = vmatprep.subr.bf16.mxu1 %v2908_v10  ;;  %v2996_v9 = vld [vmem:[%s4015_s1 + $0x7e0] ss:$8 sps:$4 sm:$0xff]   ;;  %v3001_v10 = vld [vmem:[%s4015_s1 + $0x3f4] ss:$8 sps:$4 sm:$0xff]  }
  0xc1   :  { %2163 = vmatprep.subr.bf16.mxu0 %v2914_v11  ;;  %v3004_v11 = vld [vmem:[%s4015_s1 + $0x7f4] ss:$8 sps:$4 sm:$0xff]  }
  0xc2   :  { %1981 = vmatmul.mubr.bf16.vlgmr.msra.gmra.mrb[0].mxu1 %v2903_v12  ;;  %v2999_v12 = vld [vmem:[%s4015_s1 + $0x3f0] ss:$8 sps:$4 sm:$0xff]  }
  0xc3   :  { %2153 = vmatmul.mubr.bf16.vlgmr.msra.gmra.mrb[0].mxu0 %v2909_v14  ;;  %1992 = vmatpush1.bf16.msra.mxu1 %v2906_v13  ;;  %v3002_v13 = vld [vmem:[%s4015_s1 + $0x7f0] ss:$8 sps:$4 sm:$0xff]   ;;  %v3013_v14 = vld [vmem:[%s4015_s1 + $0x804] ss:$8 sps:$4 sm:$0xff]  }
  0xc4   :  { %2164 = vmatpush1.bf16.msra.mxu0 %v2912_v15  ;;  %1993 = vmatprep.subr.bf16.mxu1 %v2917_v16  ;;  %v3005_v15 = vld [vmem:[%s4016_s0 + $0x18] ss:$72 sps:$4 sm:$0xff]  }
  0xc5   :  { %2165 = vmatprep.subr.bf16.mxu0 %v2920_v17  ;;  %2023 = vmatprep.mubr.bf16.mxu1 %v3007_v18  ;;  %v3008_v16 = vld [vmem:[%s4016_s0 + $0x38] ss:$72 sps:$4 sm:$0xff]   ;;  %v3061_v18 = vld [vmem:[%s4016_s0 + $0x44] ss:$72 sps:$4 sm:$0xff]  }
  0xc6   :  { %2195 = vmatprep.mubr.bf16.mxu0 %v3010_v19  ;;  %v3011_v17 = vld [vmem:[%s4015_s1 + $0x800] ss:$8 sps:$4 sm:$0xff]   ;;  %v3016_v19 = vld [vmem:[%s4015_s1 + $0x814] ss:$8 sps:$4 sm:$0xff]  }
  0xc7   :  { %1994 = vmatpush1.bf16.msra.mxu1 %v2915_v20  ;;  %v3014_v20 = vld [vmem:[%s4015_s1 + $0x810] ss:$8 sps:$4 sm:$0xff]  }
  0xc8   :  { %2166 = vmatpush1.bf16.msra.mxu0 %v2918_v21  ;;  %1995 = vmatprep.subr.bf16.mxu1 %v2923_v22  ;;  %v3019_v21 = vld [vmem:[%s4015_s1 + $0x824] ss:$8 sps:$4 sm:$0xff]   ;;  %v3017_v22 = vld [vmem:[%s4015_s1 + $0x820] ss:$8 sps:$4 sm:$0xff]  }
  0xc9   :  { %2167 = vmatprep.subr.bf16.mxu0 %v2926_v23  ;;  %v3022_v23 = vld [vmem:[%s4015_s1 + $0x834] ss:$8 sps:$4 sm:$0xff]  }
  0xcb   :  { %1996 = vmatpush1.bf16.msra.mxu1 %v2921_v24  ;;  %v3020_v24 = vld [vmem:[%s4015_s1 + $0x830] ss:$8 sps:$4 sm:$0xff]  }
  0xcc   :  { %2168 = vmatpush1.bf16.msra.mxu0 %v2924_v25  ;;  %1997 = vmatprep.subr.bf16.mxu1 %v2929_v26  ;;  %v3025_v25 = vld [vmem:[%s4015_s1 + $0x844] ss:$8 sps:$4 sm:$0xff]   ;;  %v3023_v26 = vld [vmem:[%s4015_s1 + $0x840] ss:$8 sps:$4 sm:$0xff]  }
  0xcd   :  { %2169 = vmatprep.subr.bf16.mxu0 %v2932_v27  ;;  %v3028_v27 = vld [vmem:[%s4015_s1 + $0x854] ss:$8 sps:$4 sm:$0xff]  }
  0xcf   :  { %1998 = vmatpush1.bf16.msra.mxu1 %v2927_v28  ;;  %v3026_v28 = vld [vmem:[%s4015_s1 + $0x850] ss:$8 sps:$4 sm:$0xff]  }
  0xd0   :  { %2170 = vmatpush1.bf16.msra.mxu0 %v2930_v29  ;;  %1999 = vmatprep.subr.bf16.mxu1 %v2935_v30  ;;  %v3031_v29 = vld [vmem:[%s4015_s1 + $0x864] ss:$8 sps:$4 sm:$0xff]   ;;  %v3029_v30 = vld [vmem:[%s4015_s1 + $0x860] ss:$8 sps:$4 sm:$0xff]  }
  0xd1   :  { %2171 = vmatprep.subr.bf16.mxu0 %v2938_v31  ;;  %v3034_v31 = vld [vmem:[%s4015_s1 + $0x874] ss:$8 sps:$4 sm:$0xff]  }
  0xd3   :  { %2000 = vmatpush1.bf16.msra.mxu1 %v2933_v32  ;;  %v3032_v32 = vld [vmem:[%s4015_s1 + $0x870] ss:$8 sps:$4 sm:$0xff]  }
  0xd4   :  { %2172 = vmatpush1.bf16.msra.mxu0 %v2936_v33  ;;  %2001 = vmatprep.subr.bf16.mxu1 %v2941_v34  ;;  %v3037_v33 = vld [vmem:[%s4015_s1 + $0x884] ss:$8 sps:$4 sm:$0xff]   ;;  %v3035_v34 = vld [vmem:[%s4015_s1 + $0x880] ss:$8 sps:$4 sm:$0xff]  }
  0xd5   :  { %2173 = vmatprep.subr.bf16.mxu0 %v2944_v35  ;;  %v3040_v35 = vld [vmem:[%s4015_s1 + $0x894] ss:$8 sps:$4 sm:$0xff]  }
  0xd7   :  { %2002 = vmatpush1.bf16.msra.mxu1 %v2939_v36  ;;  %v3038_v36 = vld [vmem:[%s4015_s1 + $0x890] ss:$8 sps:$4 sm:$0xff]  }
  0xd8   :  { %2174 = vmatpush1.bf16.msra.mxu0 %v2942_v37  ;;  %2003 = vmatprep.subr.bf16.mxu1 %v2947_v38  ;;  %v3043_v37 = vld [vmem:[%s4015_s1 + $0x8a4] ss:$8 sps:$4 sm:$0xff]   ;;  %v3041_v38 = vld [vmem:[%s4015_s1 + $0x8a0] ss:$8 sps:$4 sm:$0xff]  }
  0xd9   :  { %2175 = vmatprep.subr.bf16.mxu0 %v2950_v39  ;;  %v3046_v39 = vld [vmem:[%s4015_s1 + $0x8b4] ss:$8 sps:$4 sm:$0xff]  }
  0xdb   :  { %2004 = vmatpush1.bf16.msra.mxu1 %v2945_v40  ;;  %v3044_v40 = vld [vmem:[%s4015_s1 + $0x8b0] ss:$8 sps:$4 sm:$0xff]  }
  0xdc   :  { %2176 = vmatpush1.bf16.msra.mxu0 %v2948_v41  ;;  %2005 = vmatprep.subr.bf16.mxu1 %v2953_v42  ;;  %v3049_v41 = vld [vmem:[%s4015_s1 + $0x8c4] ss:$8 sps:$4 sm:$0xff]   ;;  %v3047_v42 = vld [vmem:[%s4015_s1 + $0x8c0] ss:$8 sps:$4 sm:$0xff]  }
  0xdd   :  { %2177 = vmatprep.subr.bf16.mxu0 %v2956_v43  ;;  %v3052_v43 = vld [vmem:[%s4015_s1 + $0x8d4] ss:$8 sps:$4 sm:$0xff]  }
  0xdf   :  { %2006 = vmatpush1.bf16.msra.mxu1 %v2951_v44  ;;  %v3050_v44 = vld [vmem:[%s4015_s1 + $0x8d0] ss:$8 sps:$4 sm:$0xff]  }
  0xe0   :  { %2178 = vmatpush1.bf16.msra.mxu0 %v2954_v45  ;;  %2007 = vmatprep.subr.bf16.mxu1 %v2959_v46  ;;  %v3055_v45 = vld [vmem:[%s4015_s1 + $0x8e4] ss:$8 sps:$4 sm:$0xff]   ;;  %v3053_v46 = vld [vmem:[%s4015_s1 + $0x8e0] ss:$8 sps:$4 sm:$0xff]  }
  0xe1   :  { %2179 = vmatprep.subr.bf16.mxu0 %v2962_v47  ;;  %v3058_v47 = vld [vmem:[%s4015_s1 + $0x8f4] ss:$8 sps:$4 sm:$0xff]  }
  0xe3   :  { %2008 = vmatpush1.bf16.msra.mxu1 %v2957_v48  ;;  %v3056_v48 = vld [vmem:[%s4015_s1 + $0x8f0] ss:$8 sps:$4 sm:$0xff]  }
  0xe4   :  { %2180 = vmatpush1.bf16.msra.mxu0 %v2960_v49  ;;  %2009 = vmatprep.subr.bf16.mxu1 %v2965_v50  ;;  %v3059_v49 = vld [vmem:[%s4016_s0 + $0x40] ss:$72 sps:$4 sm:$0xff]  }
  0xe5   :  { %2181 = vmatprep.subr.bf16.mxu0 %v2968_v51 }
  0xe7   :  { %2010 = vmatpush1.bf16.msra.mxu1 %v2963_v52 }
  0xe8   :  { %2182 = vmatpush1.bf16.msra.mxu0 %v2966_v53  ;;  %2011 = vmatprep.subr.bf16.mxu1 %v2971_v54  ;;  %v322_v54 = vlaneseq }
  0xe9   :  { %2183 = vmatprep.subr.bf16.mxu0 %v2974_v55 }
  0xea   :  { %v323_v55 = vshrl.u32 %v322_v54, 7 }
  0xeb   :  { %2012 = vmatpush1.bf16.msra.mxu1 %v2969_v56 }
  0xec   :  { %2184 = vmatpush1.bf16.msra.mxu0 %v2972_v57  ;;  %2013 = vmatprep.subr.bf16.mxu1 %v2977_v58  ;;  %v324_v56 = vsub.s32 0, %v323_v55  ;;  %v320_v57 = vld [vmem:[%s4017_s2] sm:$0x3]  ;;  %v328_v58 = vsub.s32 1, %v323_v55 }
  0xed   :  { %2185 = vmatprep.subr.bf16.mxu0 %v2980_v59 }
  0xee   :  { %v325_v59 = vrot.slane %v320_v57, %v324_v56 }
  0xef   :  { %2014 = vmatpush1.bf16.msra.mxu1 %v2975_v60  ;;  %v329_v60 = vrot.slane %v320_v57, %v328_v58 }
  0xf0   :  { %2186 = vmatpush1.bf16.msra.mxu0 %v2978_v61  ;;  %2015 = vmatprep.subr.bf16.mxu1 %v2983_v62 }
  0xf1   :  { %2187 = vmatprep.subr.bf16.mxu0 %v2986_v63 }
  0xf3   :  { %2016 = vmatpush1.bf16.msra.mxu1 %v2981_v0 }
  0xf4   :  { %2188 = vmatpush1.bf16.msra.mxu0 %v2984_v1  ;;  %2017 = vmatprep.subr.bf16.mxu1 %v2989_v2 }
  0xf5   :  { %2189 = vmatprep.subr.bf16.mxu0 %v2992_v3 }
  0xf7   :  { %2018 = vmatpush1.bf16.msra.mxu1 %v2987_v4 }
  0xf8   :  { %2190 = vmatpush1.bf16.msra.mxu0 %v2990_v5  ;;  %2019 = vmatprep.subr.bf16.mxu1 %v2995_v6 }
  0xf9   :  { %2191 = vmatprep.subr.bf16.mxu0 %v2998_v7 }
  0xfb   :  { %2020 = vmatpush1.bf16.msra.mxu1 %v2993_v8 }
  0xfc   :  { %2192 = vmatpush1.bf16.msra.mxu0 %v2996_v9  ;;  %2021 = vmatprep.subr.bf16.mxu1 %v3001_v10 }
  0xfd   :  { %2193 = vmatprep.subr.bf16.mxu0 %v3004_v11 }
  0xff   :  { %2022 = vmatpush1.bf16.msra.mxu1 %v2999_v12 }
 0x100   :  { %2194 = vmatpush1.bf16.msra.mxu0 %v3002_v13 }
 0x101   :  { %2206 = vmatprep.subr.bf16.mxu0 %v3013_v14 }
 0x102   :  { %2024 = vmatmul.mubr.bf16.vlgmr.msra.gmra.mrb[0].mxu1 %v3005_v15 }
 0x103   :  { %2196 = vmatmul.mubr.bf16.vlgmr.msra.gmra.mrb[0].mxu0 %v3008_v16 }
 0x104   :  { %2207 = vmatpush1.bf16.msra.mxu0 %v3011_v17  ;;  %2238 = vmatprep.mubr.bf16.mxu0 %v3061_v18 }
 0x105   :  { %2208 = vmatprep.subr.bf16.mxu0 %v3016_v19 }
 0x108   :  { %2209 = vmatpush1.bf16.msra.mxu0 %v3014_v20 }
 0x109   :  { %2210 = vmatprep.subr.bf16.mxu0 %v3019_v21 }
 0x10c   :  { %2211 = vmatpush1.bf16.msra.mxu0 %v3017_v22 }
 0x10d   :  { %2212 = vmatprep.subr.bf16.mxu0 %v3022_v23 }
 0x110   :  { %2213 = vmatpush1.bf16.msra.mxu0 %v3020_v24 }
 0x111   :  { %2214 = vmatprep.subr.bf16.mxu0 %v3025_v25 }
 0x114   :  { %2215 = vmatpush1.bf16.msra.mxu0 %v3023_v26 }
 0x115   :  { %2216 = vmatprep.subr.bf16.mxu0 %v3028_v27 }
 0x118   :  { %2217 = vmatpush1.bf16.msra.mxu0 %v3026_v28 }
 0x119   :  { %2218 = vmatprep.subr.bf16.mxu0 %v3031_v29 }
 0x11c   :  { %2219 = vmatpush1.bf16.msra.mxu0 %v3029_v30 }
 0x11d   :  { %2220 = vmatprep.subr.bf16.mxu0 %v3034_v31 }
 0x120   :  { %2221 = vmatpush1.bf16.msra.mxu0 %v3032_v32 }
 0x121   :  { %2222 = vmatprep.subr.bf16.mxu0 %v3037_v33 }
 0x124   :  { %2223 = vmatpush1.bf16.msra.mxu0 %v3035_v34 }
 0x125   :  { %2224 = vmatprep.subr.bf16.mxu0 %v3040_v35 }
 0x128   :  { %2225 = vmatpush1.bf16.msra.mxu0 %v3038_v36 }
 0x129   :  { %2226 = vmatprep.subr.bf16.mxu0 %v3043_v37 }
 0x12c   :  { %2227 = vmatpush1.bf16.msra.mxu0 %v3041_v38 }
 0x12d   :  { %2228 = vmatprep.subr.bf16.mxu0 %v3046_v39 }
 0x130   :  { %2229 = vmatpush1.bf16.msra.mxu0 %v3044_v40 }
 0x131   :  { %2230 = vmatprep.subr.bf16.mxu0 %v3049_v41 }
 0x134   :  { %2231 = vmatpush1.bf16.msra.mxu0 %v3047_v42 }
 0x135   :  { %2232 = vmatprep.subr.bf16.mxu0 %v3052_v43 }
 0x138   :  { %2233 = vmatpush1.bf16.msra.mxu0 %v3050_v44 }
 0x139   :  { %2234 = vmatprep.subr.bf16.mxu0 %v3055_v45 }
 0x13c   :  { %2235 = vmatpush1.bf16.msra.mxu0 %v3053_v46 }
 0x13d   :  { %2236 = vmatprep.subr.bf16.mxu0 %v3058_v47 }
 0x140   :  { %2237 = vmatpush1.bf16.msra.mxu0 %v3056_v48 }
 0x143   :  { %2239 = vmatmul.mubr.bf16.vlgmr.msra.gmra.mrb[0].mxu0 %v3059_v49 }
 0x1d5   :  { %v2025_v50 = vpop.f32.mrb[0].mxu1 }
 0x1d6   :  { %v2027_v51 = vpop.f32.mrb[1].mxu1  ;;  %v2567_v61 = vadd.f32 %v2025_v50, %v325_v59 }
 0x1d7   :  { %v2029_v52 = vpop.f32.mrb[2].mxu1  ;;  %v2569_v62 = vadd.f32 %v2027_v51, %v329_v60 }
 0x1d8   :  { %v2031_v53 = vpop.f32.mrb[3].mxu1  ;;  %v2571_v0 = vadd.f32 %v2029_v52, %v325_v59 }
 0x1d9   :  { %v2573_v3 = vadd.f32 %v2031_v53, %v329_v60 }
 0x216   :  { %v2240_v63 = vpop.f32.mrb[0].mxu0 }
 0x217   :  { %v2568_v1 = vadd.f32 %v2567_v61, %v2240_v63  ;;  %v2242_v2 = vpop.f32.mrb[1].mxu0 }
 0x218   :  { %v2570_v4 = vadd.f32 %v2569_v62, %v2242_v2  ;;  %v2244_v5 = vpop.f32.mrb[2].mxu0 }
 0x219   :  { %v2249_v6 = vmax.f32 %v2568_v1, 0.0  ;;  %v2572_v7 = vadd.f32 %v2571_v0, %v2244_v5  ;;  %v2246_v8 = vpop.f32.mrb[3].mxu0 }
 0x21a   :  { %v2250_v9 = vmax.f32 %v2570_v4, 0.0  ;;  %v2574_v10 = vadd.f32 %v2573_v3, %v2246_v8 }
 0x21b   :  { %2253 = vst [vmem:[%s4018_s3] sm:$0xff] %v2249_v6  ;;  %v2251_v11 = vmax.f32 %v2572_v7, 0.0 }
 0x21c   :  { %2254 = vst [vmem:[%s4018_s3 + $0x8] sm:$0xff] %v2250_v9  ;;  %v2252_v12 = vmax.f32 %v2574_v10, 0.0 }
 0x21d   :  { %2255 = vst [vmem:[%s4018_s3 + $0x10] sm:$0xff] %v2251_v11 }
 0x21e   :  { %2256 = vst [vmem:[%s4018_s3 + $0x18] sm:$0xff] %v2252_v12 }

// kernel: siamese_forward.26
= control target key start
LH: loop header
LB: loop body
LE: loop exit
PB: predicated region body
PF: predicated region fallthrough
CT: control target
= control target key end

     0   :  { %s4309_s1 = inlined_call_operand.vmem [shape: bf16[2304,256], index: 1, kind: input, shape index: {}]   ;;  %s4310_s0 = inlined_call_operand.vmem [shape: bf16[16,2304], index: 0, kind: input, shape index: {}]   ;;  %s4311_s4 = inlined_call_operand.vmem [shape: bf16[128,256], index: 4, kind: input, shape index: {}]   ;;  %s4312_s3 = inlined_call_operand.vmem [shape: bf16[16,128], index: 3, kind: input, shape index: {}]   ;;  %s4313_s2 = inlined_call_operand.vmem [shape: f32[1,256], index: 2, kind: input, shape index: {}]   ;;  %s4314_s5 = inlined_call_operand.vmem [shape: f32[1,256], index: 5, kind: input, shape index: {}]   ;;  %s4315_s6 = inlined_call_operand.vmem [shape: f32[16,256], index: 6, kind: output, shape index: {}]  }
   0x1   :  { %v2802_v0 = vld [vmem:[%s4309_s1 + $0x4] ss:$8 sps:$4 sm:$0xff]   ;;  %v2806_v2 = vld [vmem:[%s4309_s1] ss:$8 sps:$4 sm:$0xff]   ;;  %v2808_v4 = vld [vmem:[%s4309_s1 + $0x14] ss:$8 sps:$4 sm:$0xff]  }
   0x2   :  { %v2804_v1 = vld [vmem:[%s4309_s1 + $0x504] ss:$8 sps:$4 sm:$0xff]   ;;  %1872 = vmatprep.subr.bf16.mxu1 %v2802_v0  ;;  %v2807_v3 = vld [vmem:[%s4309_s1 + $0x500] ss:$8 sps:$4 sm:$0xff]   ;;  %v2810_v5 = vld [vmem:[%s4309_s1 + $0x514] ss:$8 sps:$4 sm:$0xff]  }
   0x3   :  { %2087 = vmatprep.subr.bf16.mxu0 %v2804_v1  ;;  %1873 = vmatpush1.bf16.msra.mxu1 %v2806_v2  ;;  %v2812_v6 = vld [vmem:[%s4309_s1 + $0x10] ss:$8 sps:$4 sm:$0xff]   ;;  %v2814_v8 = vld [vmem:[%s4309_s1 + $0x24] ss:$8 sps:$4 sm:$0xff]   ;;  %v2818_v10 = vld [vmem:[%s4309_s1 + $0x20] ss:$8 sps:$4 sm:$0xff]  }
   0x4   :  { %2088 = vmatpush1.bf16.msra.mxu0 %v2807_v3  ;;  %1874 = vmatprep.subr.bf16.mxu1 %v2808_v4  ;;  %v2813_v7 = vld [vmem:[%s4309_s1 + $0x510] ss:$8 sps:$4 sm:$0xff]   ;;  %v2816_v9 = vld [vmem:[%s4309_s1 + $0x524] ss:$8 sps:$4 sm:$0xff]   ;;  %v2819_v11 = vld [vmem:[%s4309_s1 + $0x520] ss:$8 sps:$4 sm:$0xff]  }
   0x5   :  { %2089 = vmatprep.subr.bf16.mxu0 %v2810_v5  ;;  %v2820_v12 = vld [vmem:[%s4309_s1 + $0x34] ss:$8 sps:$4 sm:$0xff]   ;;  %v2824_v14 = vld [vmem:[%s4309_s1 + $0x30] ss:$8 sps:$4 sm:$0xff]   ;;  %v2826_v16 = vld [vmem:[%s4309_s1 + $0x44] ss:$8 sps:$4 sm:$0xff]  }
   0x6   :  { %v2822_v13 = vld [vmem:[%s4309_s1 + $0x534] ss:$8 sps:$4 sm:$0xff]   ;;  %v2825_v15 = vld [vmem:[%s4309_s1 + $0x530] ss:$8 sps:$4 sm:$0xff]   ;;  %v2828_v17 = vld [vmem:[%s4309_s1 + $0x544] ss:$8 sps:$4 sm:$0xff]  }
   0x7   :  { %1875 = vmatpush1.bf16.msra.mxu1 %v2812_v6  ;;  %v2830_v18 = vld [vmem:[%s4309_s1 + $0x40] ss:$8 sps:$4 sm:$0xff]   ;;  %v2832_v20 = vld [vmem:[%s4309_s1 + $0x54] ss:$8 sps:$4 sm:$0xff]   ;;  %v2836_v22 = vld [vmem:[%s4309_s1 + $0x50] ss:$8 sps:$4 sm:$0xff]  }
   0x8   :  { %2090 = vmatpush1.bf16.msra.mxu0 %v2813_v7  ;;  %1876 = vmatprep.subr.bf16.mxu1 %v2814_v8  ;;  %v2831_v19 = vld [vmem:[%s4309_s1 + $0x540] ss:$8 sps:$4 sm:$0xff]   ;;  %v2834_v21 = vld [vmem:[%s4309_s1 + $0x554] ss:$8 sps:$4 sm:$0xff]   ;;  %v2837_v23 = vld [vmem:[%s4309_s1 + $0x550] ss:$8 sps:$4 sm:$0xff]  }
   0x9   :  { %2091 = vmatprep.subr.bf16.mxu0 %v2816_v9  ;;  %v2838_v24 = vld [vmem:[%s4309_s1 + $0x64] ss:$8 sps:$4 sm:$0xff]   ;;  %v2842_v26 = vld [vmem:[%s4309_s1 + $0x60] ss:$8 sps:$4 sm:$0xff]   ;;  %v2844_v28 = vld [vmem:[%s4309_s1 + $0x74] ss:$8 sps:$4 sm:$0xff]  }
   0xa   :  { %v2840_v25 = vld [vmem:[%s4309_s1 + $0x564] ss:$8 sps:$4 sm:$0xff]   ;;  %v2843_v27 = vld [vmem:[%s4309_s1 + $0x560] ss:$8 sps:$4 sm:$0xff]   ;;  %v2846_v29 = vld [vmem:[%s4309_s1 + $0x574] ss:$8 sps:$4 sm:$0xff]  }
   0xb   :  { %1877 = vmatpush1.bf16.msra.mxu1 %v2818_v10  ;;  %v2848_v30 = vld [vmem:[%s4309_s1 + $0x70] ss:$8 sps:$4 sm:$0xff]   ;;  %v2850_v32 = vld [vmem:[%s4309_s1 + $0x84] ss:$8 sps:$4 sm:$0xff]   ;;  %v2854_v34 = vld [vmem:[%s4309_s1 + $0x80] ss:$8 sps:$4 sm:$0xff]  }
   0xc   :  { %2092 = vmatpush1.bf16.msra.mxu0 %v2819_v11  ;;  %1878 = vmatprep.subr.bf16.mxu1 %v2820_v12  ;;  %v2849_v31 = vld [vmem:[%s4309_s1 + $0x570] ss:$8 sps:$4 sm:$0xff]   ;;  %v2852_v33 = vld [vmem:[%s4309_s1 + $0x584] ss:$8 sps:$4 sm:$0xff]   ;;  %v2855_v35 = vld [vmem:[%s4309_s1 + $0x580] ss:$8 sps:$4 sm:$0xff]  }
   0xd   :  { %2093 = vmatprep.subr.bf16.mxu0 %v2822_v13  ;;  %v2856_v36 = vld [vmem:[%s4309_s1 + $0x94] ss:$8 sps:$4 sm:$0xff]   ;;  %v2860_v38 = vld [vmem:[%s4309_s1 + $0x90] ss:$8 sps:$4 sm:$0xff]   ;;  %v2862_v40 = vld [vmem:[%s4309_s1 + $0xa4] ss:$8 sps:$4 sm:$0xff]  }
   0xe   :  { %v2858_v37 = vld [vmem:[%s4309_s1 + $0x594] ss:$8 sps:$4 sm:$0xff]   ;;  %v2861_v39 = vld [vmem:[%s4309_s1 + $0x590] ss:$8 sps:$4 sm:$0xff]   ;;  %v2864_v41 = vld [vmem:[%s4309_s1 + $0x5a4] ss:$8 sps:$4 sm:$0xff]  }
   0xf   :  { %1879 = vmatpush1.bf16.msra.mxu1 %v2824_v14  ;;  %v2866_v42 = vld [vmem:[%s4309_s1 + $0xa0] ss:$8 sps:$4 sm:$0xff]   ;;  %v2868_v44 = vld [vmem:[%s4309_s1 + $0xb4] ss:$8 sps:$4 sm:$0xff]   ;;  %v2872_v46 = vld [vmem:[%s4309_s1 + $0xb0] ss:$8 sps:$4 sm:$0xff]  }
  0x10   :  { %2094 = vmatpush1.bf16.msra.mxu0 %v2825_v15  ;;  %1880 = vmatprep.subr.bf16.mxu1 %v2826_v16  ;;  %v2867_v43 = vld [vmem:[%s4309_s1 + $0x5a0] ss:$8 sps:$4 sm:$0xff]   ;;  %v2870_v45 = vld [vmem:[%s4309_s1 + $0x5b4] ss:$8 sps:$4 sm:$0xff]   ;;  %v2873_v47 = vld [vmem:[%s4309_s1 + $0x5b0] ss:$8 sps:$4 sm:$0xff]  }
  0x11   :  { %2095 = vmatprep.subr.bf16.mxu0 %v2828_v17  ;;  %v2900_v48 = vld [vmem:[%s4310_s0 + $0x4] ss:$72 sps:$4 sm:$0xff]   ;;  %v2878_v52 = vld [vmem:[%s4309_s1 + $0xc0] ss:$8 sps:$4 sm:$0xff]   ;;  %v2880_v54 = vld [vmem:[%s4309_s1 + $0xd4] ss:$8 sps:$4 sm:$0xff]  }
  0x12   :  { %v2874_v49 = vld [vmem:[%s4309_s1 + $0xc4] ss:$8 sps:$4 sm:$0xff]   ;;  %1904 = vmatprep.mubr.bf16.mxu1 %v2900_v48  ;;  %v2879_v53 = vld [vmem:[%s4309_s1 + $0x5c0] ss:$8 sps:$4 sm:$0xff]   ;;  %v2882_v55 = vld [vmem:[%s4309_s1 + $0x5d4] ss:$8 sps:$4 sm:$0xff]  }
  0x13   :  { %1881 = vmatpush1.bf16.msra.mxu1 %v2830_v18  ;;  %v2876_v50 = vld [vmem:[%s4309_s1 + $0x5c4] ss:$8 sps:$4 sm:$0xff]   ;;  %v2884_v56 = vld [vmem:[%s4309_s1 + $0xd0] ss:$8 sps:$4 sm:$0xff]   ;;  %v2890_v60 = vld [vmem:[%s4309_s1 + $0xe0] ss:$8 sps:$4 sm:$0xff]  }
  0x14   :  { %2096 = vmatpush1.bf16.msra.mxu0 %v2831_v19  ;;  %1882 = vmatprep.subr.bf16.mxu1 %v2832_v20  ;;  %v2906_v51 = vld [vmem:[%s4310_s0 + $0x2c] ss:$72 sps:$4 sm:$0xff]   ;;  %v2885_v57 = vld [vmem:[%s4309_s1 + $0x5d0] ss:$8 sps:$4 sm:$0xff]   ;;  %v2891_v61 = vld [vmem:[%s4309_s1 + $0x5e0] ss:$8 sps:$4 sm:$0xff]  }
  0x15   :  { %2097 = vmatprep.subr.bf16.mxu0 %v2834_v21  ;;  %2119 = vmatprep.mubr.bf16.mxu0 %v2906_v51  ;;  %v2886_v58 = vld [vmem:[%s4309_s1 + $0xe4] ss:$8 sps:$4 sm:$0xff]   ;;  %v2892_v62 = vld [vmem:[%s4309_s1 + $0xf4] ss:$8 sps:$4 sm:$0xff]   ;;  %v2896_v0 = vld [vmem:[%s4309_s1 + $0xf0] ss:$8 sps:$4 sm:$0xff]  }
  0x16   :  { %v2888_v59 = vld [vmem:[%s4309_s1 + $0x5e4] ss:$8 sps:$4 sm:$0xff]   ;;  %v2894_v63 = vld [vmem:[%s4309_s1 + $0x5f4] ss:$8 sps:$4 sm:$0xff]   ;;  %v2897_v1 = vld [vmem:[%s4309_s1 + $0x5f0] ss:$8 sps:$4 sm:$0xff]  }
  0x17   :  { %1883 = vmatpush1.bf16.msra.mxu1 %v2836_v22  ;;  %v2903_v2 = vld [vmem:[%s4309_s1 + $0x104] ss:$8 sps:$4 sm:$0xff]   ;;  %v2898_v4 = vld [vmem:[%s4310_s0] ss:$72 sps:$4 sm:$0xff]   ;;  %v2912_v8 = vld [vmem:[%s4309_s1 + $0x114] ss:$8 sps:$4 sm:$0xff]  }
  0x18   :  { %2098 = vmatpush1.bf16.msra.mxu0 %v2837_v23  ;;  %1884 = vmatprep.subr.bf16.mxu1 %v2838_v24  ;;  %v2909_v3 = vld [vmem:[%s4309_s1 + $0x604] ss:$8 sps:$4 sm:$0xff]   ;;  %v2901_v5 = vld [vmem:[%s4309_s1 + $0x100] ss:$8 sps:$4 sm:$0xff]   ;;  %v2915_v9 = vld [vmem:[%s4309_s1 + $0x614] ss:$8 sps:$4 sm:$0xff]  }
  0x19   :  { %2099 = vmatprep.subr.bf16.mxu0 %v2840_v25  ;;  %v2904_v6 = vld [vmem:[%s4310_s0 + $0x28] ss:$72 sps:$4 sm:$0xff]   ;;  %v2918_v12 = vld [vmem:[%s4309_s1 + $0x124] ss:$8 sps:$4 sm:$0xff]   ;;  %v2924_v16 = vld [vmem:[%s4309_s1 + $0x134] ss:$8 sps:$4 sm:$0xff]  }
  0x1a   :  { %v2907_v7 = vld [vmem:[%s4309_s1 + $0x600] ss:$8 sps:$4 sm:$0xff]   ;;  %v2910_v10 = vld [vmem:[%s4309_s1 + $0x110] ss:$8 sps:$4 sm:$0xff]   ;;  %v2921_v13 = vld [vmem:[%s4309_s1 + $0x624] ss:$8 sps:$4 sm:$0xff]  }
  0x1b   :  { %1885 = vmatpush1.bf16.msra.mxu1 %v2842_v26  ;;  %v2913_v11 = vld [vmem:[%s4309_s1 + $0x610] ss:$8 sps:$4 sm:$0xff]   ;;  %v2916_v14 = vld [vmem:[%s4309_s1 + $0x120] ss:$8 sps:$4 sm:$0xff]   ;;  %v2927_v17 = vld [vmem:[%s4309_s1 + $0x634] ss:$8 sps:$4 sm:$0xff]  }
  0x1c   :  { %2100 = vmatpush1.bf16.msra.mxu0 %v2843_v27  ;;  %1886 = vmatprep.subr.bf16.mxu1 %v2844_v28  ;;  %v2919_v15 = vld [vmem:[%s4309_s1 + $0x620] ss:$8 sps:$4 sm:$0xff]   ;;  %v2922_v18 = vld [vmem:[%s4309_s1 + $0x130] ss:$8 sps:$4 sm:$0xff]   ;;  %v2930_v20 = vld [vmem:[%s4309_s1 + $0x144] ss:$8 sps:$4 sm:$0xff]  }
  0x1d   :  { %2101 = vmatprep.subr.bf16.mxu0 %v2846_v29  ;;  %v2925_v19 = vld [vmem:[%s4309_s1 + $0x630] ss:$8 sps:$4 sm:$0xff]   ;;  %v2933_v21 = vld [vmem:[%s4309_s1 + $0x644] ss:$8 sps:$4 sm:$0xff]   ;;  %v2928_v22 = vld [vmem:[%s4309_s1 + $0x140] ss:$8 sps:$4 sm:$0xff]  }
  0x1e   :  { %v2931_v23 = vld [vmem:[%s4309_s1 + $0x640] ss:$8 sps:$4 sm:$0xff]   ;;  %v2936_v24 = vld [vmem:[%s4309_s1 + $0x154] ss:$8 sps:$4 sm:$0xff]   ;;  %v2934_v26 = vld [vmem:[%s4309_s1 + $0x150] ss:$8 sps:$4 sm:$0xff]  }
  0x1f   :  { %1887 = vmatpush1.bf16.msra.mxu1 %v2848_v30  ;;  %v2939_v25 = vld [vmem:[%s4309_s1 + $0x654] ss:$8 sps:$4 sm:$0xff]   ;;  %v2937_v27 = vld [vmem:[%s4309_s1 + $0x650] ss:$8 sps:$4 sm:$0xff]   ;;  %v2942_v28 = vld [vmem:[%s4309_s1 + $0x164] ss:$8 sps:$4 sm:$0xff]  }
  0x20   :  { %2102 = vmatpush1.bf16.msra.mxu0 %v2849_v31  ;;  %1888 = vmatprep.subr.bf16.mxu1 %v2850_v32  ;;  %v2945_v29 = vld [vmem:[%s4309_s1 + $0x664] ss:$8 sps:$4 sm:$0xff]   ;;  %v2940_v30 = vld [vmem:[%s4309_s1 + $0x160] ss:$8 sps:$4 sm:$0xff]   ;;  %v2948_v32 = vld [vmem:[%s4309_s1 + $0x174] ss:$8 sps:$4 sm:$0xff]  }
  0x21   :  { %2103 = vmatprep.subr.bf16.mxu0 %v2852_v33  ;;  %v2943_v31 = vld [vmem:[%s4309_s1 + $0x660] ss:$8 sps:$4 sm:$0xff]   ;;  %v2951_v33 = vld [vmem:[%s4309_s1 + $0x674] ss:$8 sps:$4 sm:$0xff]  }
  0x22   :  { %v2964_v48 = vld [vmem:[%s4309_s1 + $0x1a0] ss:$8 sps:$4 sm:$0xff]   ;;  %v2975_v51 = vld [vmem:[%s4309_s1 + $0x6b4] ss:$8 sps:$4 sm:$0xff]  }
  0x23   :  { %1889 = vmatpush1.bf16.msra.mxu1 %v2854_v34  ;;  %v3002_v34 = vld [vmem:[%s4310_s0 + $0xc] ss:$72 sps:$4 sm:$0xff]  }
  0x24   :  { %2104 = vmatpush1.bf16.msra.mxu0 %v2855_v35  ;;  %1890 = vmatprep.subr.bf16.mxu1 %v2856_v36  ;;  %v2946_v35 = vld [vmem:[%s4309_s1 + $0x170] ss:$8 sps:$4 sm:$0xff]  }
  0x25   :  { %2105 = vmatprep.subr.bf16.mxu0 %v2858_v37  ;;  %v2949_v36 = vld [vmem:[%s4309_s1 + $0x670] ss:$8 sps:$4 sm:$0xff]   ;;  %v3008_v37 = vld [vmem:[%s4310_s0 + $0x34] ss:$72 sps:$4 sm:$0xff]  }
  0x27   :  { %1891 = vmatpush1.bf16.msra.mxu1 %v2860_v38  ;;  %v2954_v38 = vld [vmem:[%s4309_s1 + $0x184] ss:$8 sps:$4 sm:$0xff]  }
  0x28   :  { %2106 = vmatpush1.bf16.msra.mxu0 %v2861_v39  ;;  %1892 = vmatprep.subr.bf16.mxu1 %v2862_v40  ;;  %v2957_v39 = vld [vmem:[%s4309_s1 + $0x684] ss:$8 sps:$4 sm:$0xff]   ;;  %v2952_v40 = vld [vmem:[%s4309_s1 + $0x180] ss:$8 sps:$4 sm:$0xff]  }
  0x29   :  { %2107 = vmatprep.subr.bf16.mxu0 %v2864_v41  ;;  %v2955_v41 = vld [vmem:[%s4309_s1 + $0x680] ss:$8 sps:$4 sm:$0xff]  }
  0x2b   :  { %1893 = vmatpush1.bf16.msra.mxu1 %v2866_v42  ;;  %v2960_v42 = vld [vmem:[%s4309_s1 + $0x194] ss:$8 sps:$4 sm:$0xff]  }
  0x2c   :  { %2108 = vmatpush1.bf16.msra.mxu0 %v2867_v43  ;;  %1894 = vmatprep.subr.bf16.mxu1 %v2868_v44  ;;  %v2963_v43 = vld [vmem:[%s4309_s1 + $0x694] ss:$8 sps:$4 sm:$0xff]   ;;  %v2958_v44 = vld [vmem:[%s4309_s1 + $0x190] ss:$8 sps:$4 sm:$0xff]  }
  0x2d   :  { %2109 = vmatprep.subr.bf16.mxu0 %v2870_v45  ;;  %v2961_v45 = vld [vmem:[%s4309_s1 + $0x690] ss:$8 sps:$4 sm:$0xff]  }
  0x2f   :  { %1895 = vmatpush1.bf16.msra.mxu1 %v2872_v46  ;;  %v2966_v46 = vld [vmem:[%s4309_s1 + $0x1a4] ss:$8 sps:$4 sm:$0xff]  }
  0x30   :  { %2110 = vmatpush1.bf16.msra.mxu0 %v2873_v47  ;;  %1896 = vmatprep.subr.bf16.mxu1 %v2874_v49  ;;  %v2969_v47 = vld [vmem:[%s4309_s1 + $0x6a4] ss:$8 sps:$4 sm:$0xff]   ;;  %v2967_v49 = vld [vmem:[%s4309_s1 + $0x6a0] ss:$8 sps:$4 sm:$0xff]  }
  0x31   :  { %2111 = vmatprep.subr.bf16.mxu0 %v2876_v50  ;;  %v2972_v50 = vld [vmem:[%s4309_s1 + $0x1b4] ss:$8 sps:$4 sm:$0xff]  }
  0x33   :  { %1897 = vmatpush1.bf16.msra.mxu1 %v2878_v52  ;;  %v2970_v52 = vld [vmem:[%s4309_s1 + $0x1b0] ss:$8 sps:$4 sm:$0xff]  }
  0x34   :  { %2112 = vmatpush1.bf16.msra.mxu0 %v2879_v53  ;;  %1898 = vmatprep.subr.bf16.mxu1 %v2880_v54  ;;  %v2973_v53 = vld [vmem:[%s4309_s1 + $0x6b0] ss:$8 sps:$4 sm:$0xff]   ;;  %v2978_v54 = vld [vmem:[%s4309_s1 + $0x1c4] ss:$8 sps:$4 sm:$0xff]  }
  0x35   :  { %2113 = vmatprep.subr.bf16.mxu0 %v2882_v55  ;;  %v2981_v55 = vld [vmem:[%s4309_s1 + $0x6c4] ss:$8 sps:$4 sm:$0xff]  }
  0x37   :  { %1899 = vmatpush1.bf16.msra.mxu1 %v2884_v56  ;;  %v2976_v56 = vld [vmem:[%s4309_s1 + $0x1c0] ss:$8 sps:$4 sm:$0xff]  }
  0x38   :  { %2114 = vmatpush1.bf16.msra.mxu0 %v2885_v57  ;;  %1900 = vmatprep.subr.bf16.mxu1 %v2886_v58  ;;  %v2979_v57 = vld [vmem:[%s4309_s1 + $0x6c0] ss:$8 sps:$4 sm:$0xff]   ;;  %v2984_v58 = vld [vmem:[%s4309_s1 + $0x1d4] ss:$8 sps:$4 sm:$0xff]  }
  0x39   :  { %2115 = vmatprep.subr.bf16.mxu0 %v2888_v59  ;;  %v2987_v59 = vld [vmem:[%s4309_s1 + $0x6d4] ss:$8 sps:$4 sm:$0xff]  }
  0x3b   :  { %1901 = vmatpush1.bf16.msra.mxu1 %v2890_v60  ;;  %v2982_v60 = vld [vmem:[%s4309_s1 + $0x1d0] ss:$8 sps:$4 sm:$0xff]  }
  0x3c   :  { %2116 = vmatpush1.bf16.msra.mxu0 %v2891_v61  ;;  %1902 = vmatprep.subr.bf16.mxu1 %v2892_v62  ;;  %v2985_v61 = vld [vmem:[%s4309_s1 + $0x6d0] ss:$8 sps:$4 sm:$0xff]   ;;  %v2990_v62 = vld [vmem:[%s4309_s1 + $0x1e4] ss:$8 sps:$4 sm:$0xff]  }
  0x3d   :  { %2117 = vmatprep.subr.bf16.mxu0 %v2894_v63  ;;  %v2993_v63 = vld [vmem:[%s4309_s1 + $0x6e4] ss:$8 sps:$4 sm:$0xff]  }
  0x3f   :  { %1903 = vmatpush1.bf16.msra.mxu1 %v2896_v0  ;;  %v2988_v0 = vld [vmem:[%s4309_s1 + $0x1e0] ss:$8 sps:$4 sm:$0xff]  }
  0x40   :  { %2118 = vmatpush1.bf16.msra.mxu0 %v2897_v1  ;;  %1915 = vmatprep.subr.bf16.mxu1 %v2903_v2  ;;  %v2991_v1 = vld [vmem:[%s4309_s1 + $0x6e0] ss:$8 sps:$4 sm:$0xff]   ;;  %v2996_v2 = vld [vmem:[%s4309_s1 + $0x1f4] ss:$8 sps:$4 sm:$0xff]  }
  0x41   :  { %2130 = vmatprep.subr.bf16.mxu0 %v2909_v3  ;;  %v2999_v3 = vld [vmem:[%s4309_s1 + $0x6f4] ss:$8 sps:$4 sm:$0xff]  }
  0x42   :  { %1905 = vmatmul.mubr.bf16.vlgmr.msra.gmra.mrb[0].mxu1 %v2898_v4  ;;  %v2994_v4 = vld [vmem:[%s4309_s1 + $0x1f0] ss:$8 sps:$4 sm:$0xff]  }
  0x43   :  { %2120 = vmatmul.mubr.bf16.vlgmr.msra.gmra.mrb[0].mxu0 %v2904_v6  ;;  %1916 = vmatpush1.bf16.msra.mxu1 %v2901_v5  ;;  %v2997_v5 = vld [vmem:[%s4309_s1 + $0x6f0] ss:$8 sps:$4 sm:$0xff]   ;;  %v3005_v6 = vld [vmem:[%s4309_s1 + $0x204] ss:$8 sps:$4 sm:$0xff]  }
  0x44   :  { %2131 = vmatpush1.bf16.msra.mxu0 %v2907_v7  ;;  %1917 = vmatprep.subr.bf16.mxu1 %v2912_v8  ;;  %v3011_v7 = vld [vmem:[%s4309_s1 + $0x704] ss:$8 sps:$4 sm:$0xff]   ;;  %v3000_v8 = vld [vmem:[%s4310_s0 + $0x8] ss:$72 sps:$4 sm:$0xff]  }
  0x45   :  { %2132 = vmatprep.subr.bf16.mxu0 %v2915_v9  ;;  %1947 = vmatprep.mubr.bf16.mxu1 %v3002_v34  ;;  %v3003_v9 = vld [vmem:[%s4309_s1 + $0x200] ss:$8 sps:$4 sm:$0xff]   ;;  %v3044_v34 = vld [vmem:[%s4309_s1 + $0x264] ss:$8 sps:$4 sm:$0xff]  }
  0x46   :  { %2162 = vmatprep.mubr.bf16.mxu0 %v3008_v37  ;;  %v3045_v37 = vld [vmem:[%s4309_s1 + $0x760] ss:$8 sps:$4 sm:$0xff]  }
  0x47   :  { %1918 = vmatpush1.bf16.msra.mxu1 %v2910_v10  ;;  %v3006_v10 = vld [vmem:[%s4310_s0 + $0x30] ss:$72 sps:$4 sm:$0xff]  }
  0x48   :  { %2133 = vmatpush1.bf16.msra.mxu0 %v2913_v11  ;;  %1919 = vmatprep.subr.bf16.mxu1 %v2918_v12  ;;  %v3009_v11 = vld [vmem:[%s4309_s1 + $0x700] ss:$8 sps:$4 sm:$0xff]   ;;  %v3014_v12 = vld [vmem:[%s4309_s1 + $0x214] ss:$8 sps:$4 sm:$0xff]  }
  0x49   :  { %2134 = vmatprep.subr.bf16.mxu0 %v2921_v13  ;;  %v3017_v13 = vld [vmem:[%s4309_s1 + $0x714] ss:$8 sps:$4 sm:$0xff]  }
  0x4b   :  { %1920 = vmatpush1.bf16.msra.mxu1 %v2916_v14  ;;  %v3012_v14 = vld [vmem:[%s4309_s1 + $0x210] ss:$8 sps:$4 sm:$0xff]  }
  0x4c   :  { %2135 = vmatpush1.bf16.msra.mxu0 %v2919_v15  ;;  %1921 = vmatprep.subr.bf16.mxu1 %v2924_v16  ;;  %v3015_v15 = vld [vmem:[%s4309_s1 + $0x710] ss:$8 sps:$4 sm:$0xff]   ;;  %v3020_v16 = vld [vmem:[%s4309_s1 + $0x224] ss:$8 sps:$4 sm:$0xff]  }
  0x4d   :  { %2136 = vmatprep.subr.bf16.mxu0 %v2927_v17  ;;  %v3023_v17 = vld [vmem:[%s4309_s1 + $0x724] ss:$8 sps:$4 sm:$0xff]  }
  0x4f   :  { %1922 = vmatpush1.bf16.msra.mxu1 %v2922_v18  ;;  %v3018_v18 = vld [vmem:[%s4309_s1 + $0x220] ss:$8 sps:$4 sm:$0xff]  }
  0x50   :  { %2137 = vmatpush1.bf16.msra.mxu0 %v2925_v19  ;;  %1923 = vmatprep.subr.bf16.mxu1 %v2930_v20  ;;  %v3104_v19 = vld [vmem:[%s4310_s0 + $0x14] ss:$72 sps:$4 sm:$0xff]   ;;  %v3021_v20 = vld [vmem:[%s4309_s1 + $0x720] ss:$8 sps:$4 sm:$0xff]  }
  0x51   :  { %2138 = vmatprep.subr.bf16.mxu0 %v2933_v21  ;;  %v3026_v21 = vld [vmem:[%s4309_s1 + $0x234] ss:$8 sps:$4 sm:$0xff]  }
  0x53   :  { %1924 = vmatpush1.bf16.msra.mxu1 %v2928_v22  ;;  %v3029_v22 = vld [vmem:[%s4309_s1 + $0x734] ss:$8 sps:$4 sm:$0xff]  }
  0x54   :  { %2139 = vmatpush1.bf16.msra.mxu0 %v2931_v23  ;;  %1925 = vmatprep.subr.bf16.mxu1 %v2936_v24  ;;  %v3110_v23 = vld [vmem:[%s4310_s0 + $0x3c] ss:$72 sps:$4 sm:$0xff]   ;;  %v3024_v24 = vld [vmem:[%s4309_s1 + $0x230] ss:$8 sps:$4 sm:$0xff]  }
  0x55   :  { %2140 = vmatprep.subr.bf16.mxu0 %v2939_v25  ;;  %v3027_v25 = vld [vmem:[%s4309_s1 + $0x730] ss:$8 sps:$4 sm:$0xff]  }
  0x57   :  { %1926 = vmatpush1.bf16.msra.mxu1 %v2934_v26  ;;  %v3032_v26 = vld [vmem:[%s4309_s1 + $0x244] ss:$8 sps:$4 sm:$0xff]  }
  0x58   :  { %2141 = vmatpush1.bf16.msra.mxu0 %v2937_v27  ;;  %1927 = vmatprep.subr.bf16.mxu1 %v2942_v28  ;;  %v3035_v27 = vld [vmem:[%s4309_s1 + $0x744] ss:$8 sps:$4 sm:$0xff]   ;;  %v3030_v28 = vld [vmem:[%s4309_s1 + $0x240] ss:$8 sps:$4 sm:$0xff]  }
  0x59   :  { %2142 = vmatprep.subr.bf16.mxu0 %v2945_v29  ;;  %v3033_v29 = vld [vmem:[%s4309_s1 + $0x740] ss:$8 sps:$4 sm:$0xff]  }
  0x5b   :  { %1928 = vmatpush1.bf16.msra.mxu1 %v2940_v30  ;;  %v3038_v30 = vld [vmem:[%s4309_s1 + $0x254] ss:$8 sps:$4 sm:$0xff]  }
  0x5c   :  { %2143 = vmatpush1.bf16.msra.mxu0 %v2943_v31  ;;  %1929 = vmatprep.subr.bf16.mxu1 %v2948_v32  ;;  %v3041_v31 = vld [vmem:[%s4309_s1 + $0x754] ss:$8 sps:$4 sm:$0xff]   ;;  %v3036_v32 = vld [vmem:[%s4309_s1 + $0x250] ss:$8 sps:$4 sm:$0xff]  }
  0x5d   :  { %2144 = vmatprep.subr.bf16.mxu0 %v2951_v33  ;;  %v3039_v33 = vld [vmem:[%s4309_s1 + $0x750] ss:$8 sps:$4 sm:$0xff]  }
  0x5f   :  { %1930 = vmatpush1.bf16.msra.mxu1 %v2946_v35  ;;  %v3047_v35 = vld [vmem:[%s4309_s1 + $0x764] ss:$8 sps:$4 sm:$0xff]  }
  0x60   :  { %2145 = vmatpush1.bf16.msra.mxu0 %v2949_v36  ;;  %1931 = vmatprep.subr.bf16.mxu1 %v2954_v38  ;;  %v3042_v36 = vld [vmem:[%s4309_s1 + $0x260] ss:$8 sps:$4 sm:$0xff]   ;;  %v3050_v38 = vld [vmem:[%s4309_s1 + $0x274] ss:$8 sps:$4 sm:$0xff]  }
  0x61   :  { %2146 = vmatprep.subr.bf16.mxu0 %v2957_v39  ;;  %v3053_v39 = vld [vmem:[%s4309_s1 + $0x774] ss:$8 sps:$4 sm:$0xff]  }
  0x63   :  { %1932 = vmatpush1.bf16.msra.mxu1 %v2952_v40  ;;  %v3048_v40 = vld [vmem:[%s4309_s1 + $0x270] ss:$8 sps:$4 sm:$0xff]  }
  0x64   :  { %2147 = vmatpush1.bf16.msra.mxu0 %v2955_v41  ;;  %1933 = vmatprep.subr.bf16.mxu1 %v2960_v42  ;;  %v3051_v41 = vld [vmem:[%s4309_s1 + $0x770] ss:$8 sps:$4 sm:$0xff]   ;;  %v3056_v42 = vld [vmem:[%s4309_s1 + $0x284] ss:$8 sps:$4 sm:$0xff]  }
  0x65   :  { %2148 = vmatprep.subr.bf16.mxu0 %v2963_v43  ;;  %v3059_v43 = vld [vmem:[%s4309_s1 + $0x784] ss:$8 sps:$4 sm:$0xff]  }
  0x67   :  { %1934 = vmatpush1.bf16.msra.mxu1 %v2958_v44  ;;  %v3054_v44 = vld [vmem:[%s4309_s1 + $0x280] ss:$8 sps:$4 sm:$0xff]  }
  0x68   :  { %2149 = vmatpush1.bf16.msra.mxu0 %v2961_v45  ;;  %1935 = vmatprep.subr.bf16.mxu1 %v2966_v46  ;;  %v3057_v45 = vld [vmem:[%s4309_s1 + $0x780] ss:$8 sps:$4 sm:$0xff]   ;;  %v3062_v46 = vld [vmem:[%s4309_s1 + $0x294] ss:$8 sps:$4 sm:$0xff]  }
  0x69   :  { %2150 = vmatprep.subr.bf16.mxu0 %v2969_v47  ;;  %v3065_v47 = vld [vmem:[%s4309_s1 + $0x794] ss:$8 sps:$4 sm:$0xff]  }
  0x6b   :  { %1936 = vmatpush1.bf16.msra.mxu1 %v2964_v48  ;;  %v3060_v48 = vld [vmem:[%s4309_s1 + $0x290] ss:$8 sps:$4 sm:$0xff]  }
  0x6c   :  { %2151 = vmatpush1.bf16.msra.mxu0 %v2967_v49  ;;  %1937 = vmatprep.subr.bf16.mxu1 %v2972_v50  ;;  %v3063_v49 = vld [vmem:[%s4309_s1 + $0x790] ss:$8 sps:$4 sm:$0xff]   ;;  %v3068_v50 = vld [vmem:[%s4309_s1 + $0x2a4] ss:$8 sps:$4 sm:$0xff]  }
  0x6d   :  { %2152 = vmatprep.subr.bf16.mxu0 %v2975_v51  ;;  %v3071_v51 = vld [vmem:[%s4309_s1 + $0x7a4] ss:$8 sps:$4 sm:$0xff]  }
  0x6f   :  { %1938 = vmatpush1.bf16.msra.mxu1 %v2970_v52  ;;  %v3066_v52 = vld [vmem:[%s4309_s1 + $0x2a0] ss:$8 sps:$4 sm:$0xff]  }
  0x70   :  { %2153 = vmatpush1.bf16.msra.mxu0 %v2973_v53  ;;  %1939 = vmatprep.subr.bf16.mxu1 %v2978_v54  ;;  %v3069_v53 = vld [vmem:[%s4309_s1 + $0x7a0] ss:$8 sps:$4 sm:$0xff]   ;;  %v3074_v54 = vld [vmem:[%s4309_s1 + $0x2b4] ss:$8 sps:$4 sm:$0xff]  }
  0x71   :  { %2154 = vmatprep.subr.bf16.mxu0 %v2981_v55  ;;  %v3077_v55 = vld [vmem:[%s4309_s1 + $0x7b4] ss:$8 sps:$4 sm:$0xff]  }
  0x73   :  { %1940 = vmatpush1.bf16.msra.mxu1 %v2976_v56  ;;  %v3072_v56 = vld [vmem:[%s4309_s1 + $0x2b0] ss:$8 sps:$4 sm:$0xff]  }
  0x74   :  { %2155 = vmatpush1.bf16.msra.mxu0 %v2979_v57  ;;  %1941 = vmatprep.subr.bf16.mxu1 %v2984_v58  ;;  %v3075_v57 = vld [vmem:[%s4309_s1 + $0x7b0] ss:$8 sps:$4 sm:$0xff]   ;;  %v3080_v58 = vld [vmem:[%s4309_s1 + $0x2c4] ss:$8 sps:$4 sm:$0xff]  }
  0x75   :  { %2156 = vmatprep.subr.bf16.mxu0 %v2987_v59  ;;  %v3083_v59 = vld [vmem:[%s4309_s1 + $0x7c4] ss:$8 sps:$4 sm:$0xff]  }
  0x77   :  { %1942 = vmatpush1.bf16.msra.mxu1 %v2982_v60  ;;  %v3078_v60 = vld [vmem:[%s4309_s1 + $0x2c0] ss:$8 sps:$4 sm:$0xff]  }
  0x78   :  { %2157 = vmatpush1.bf16.msra.mxu0 %v2985_v61  ;;  %1943 = vmatprep.subr.bf16.mxu1 %v2990_v62  ;;  %v3081_v61 = vld [vmem:[%s4309_s1 + $0x7c0] ss:$8 sps:$4 sm:$0xff]   ;;  %v3086_v62 = vld [vmem:[%s4309_s1 + $0x2d4] ss:$8 sps:$4 sm:$0xff]  }
  0x79   :  { %2158 = vmatprep.subr.bf16.mxu0 %v2993_v63  ;;  %v3089_v63 = vld [vmem:[%s4309_s1 + $0x7d4] ss:$8 sps:$4 sm:$0xff]  }
  0x7b   :  { %1944 = vmatpush1.bf16.msra.mxu1 %v2988_v0  ;;  %v3084_v0 = vld [vmem:[%s4309_s1 + $0x2d0] ss:$8 sps:$4 sm:$0xff]  }
  0x7c   :  { %2159 = vmatpush1.bf16.msra.mxu0 %v2991_v1  ;;  %1945 = vmatprep.subr.bf16.mxu1 %v2996_v2  ;;  %v3087_v1 = vld [vmem:[%s4309_s1 + $0x7d0] ss:$8 sps:$4 sm:$0xff]   ;;  %v3092_v2 = vld [vmem:[%s4309_s1 + $0x2e4] ss:$8 sps:$4 sm:$0xff]  }
  0x7d   :  { %2160 = vmatprep.subr.bf16.mxu0 %v2999_v3  ;;  %v3095_v3 = vld [vmem:[%s4309_s1 + $0x7e4] ss:$8 sps:$4 sm:$0xff]  }
  0x7f   :  { %1946 = vmatpush1.bf16.msra.mxu1 %v2994_v4  ;;  %v3090_v4 = vld [vmem:[%s4309_s1 + $0x2e0] ss:$8 sps:$4 sm:$0xff]  }
  0x80   :  { %2161 = vmatpush1.bf16.msra.mxu0 %v2997_v5  ;;  %1958 = vmatprep.subr.bf16.mxu1 %v3005_v6  ;;  %v3093_v5 = vld [vmem:[%s4309_s1 + $0x7e0] ss:$8 sps:$4 sm:$0xff]   ;;  %v3098_v6 = vld [vmem:[%s4309_s1 + $0x2f4] ss:$8 sps:$4 sm:$0xff]  }
  0x81   :  { %2173 = vmatprep.subr.bf16.mxu0 %v3011_v7  ;;  %v3101_v7 = vld [vmem:[%s4309_s1 + $0x7f4] ss:$8 sps:$4 sm:$0xff]  }
  0x82   :  { %1948 = vmatmul.mubr.bf16.vlgmr.msra.gmra.mrb[0].mxu1 %v3000_v8  ;;  %v3096_v8 = vld [vmem:[%s4309_s1 + $0x2f0] ss:$8 sps:$4 sm:$0xff]  }
  0x83   :  { %2163 = vmatmul.mubr.bf16.vlgmr.msra.gmra.mrb[0].mxu0 %v3006_v10  ;;  %1959 = vmatpush1.bf16.msra.mxu1 %v3003_v9  ;;  %v3099_v9 = vld [vmem:[%s4309_s1 + $0x7f0] ss:$8 sps:$4 sm:$0xff]   ;;  %v3107_v10 = vld [vmem:[%s4309_s1 + $0x304] ss:$8 sps:$4 sm:$0xff]  }
  0x84   :  { %2174 = vmatpush1.bf16.msra.mxu0 %v3009_v11  ;;  %1960 = vmatprep.subr.bf16.mxu1 %v3014_v12  ;;  %v3113_v11 = vld [vmem:[%s4309_s1 + $0x804] ss:$8 sps:$4 sm:$0xff]   ;;  %v3102_v12 = vld [vmem:[%s4310_s0 + $0x10] ss:$72 sps:$4 sm:$0xff]  }
  0x85   :  { %2175 = vmatprep.subr.bf16.mxu0 %v3017_v13  ;;  %1990 = vmatprep.mubr.bf16.mxu1 %v3104_v19  ;;  %v3105_v13 = vld [vmem:[%s4309_s1 + $0x300] ss:$8 sps:$4 sm:$0xff]   ;;  %v3212_v19 = vld [vmem:[%s4310_s0 + $0x44] ss:$72 sps:$4 sm:$0xff]  }
  0x86   :  { %2205 = vmatprep.mubr.bf16.mxu0 %v3110_v23  ;;  %v3125_v23 = vld [vmem:[%s4309_s1 + $0x824] ss:$8 sps:$4 sm:$0xff]  }
  0x87   :  { %1961 = vmatpush1.bf16.msra.mxu1 %v3012_v14  ;;  %v3108_v14 = vld [vmem:[%s4310_s0 + $0x38] ss:$72 sps:$4 sm:$0xff]  }
  0x88   :  { %2176 = vmatpush1.bf16.msra.mxu0 %v3015_v15  ;;  %1962 = vmatprep.subr.bf16.mxu1 %v3020_v16  ;;  %v3111_v15 = vld [vmem:[%s4309_s1 + $0x800] ss:$8 sps:$4 sm:$0xff]   ;;  %v3116_v16 = vld [vmem:[%s4309_s1 + $0x314] ss:$8 sps:$4 sm:$0xff]  }
  0x89   :  { %2177 = vmatprep.subr.bf16.mxu0 %v3023_v17  ;;  %v3119_v17 = vld [vmem:[%s4309_s1 + $0x814] ss:$8 sps:$4 sm:$0xff]  }
  0x8b   :  { %1963 = vmatpush1.bf16.msra.mxu1 %v3018_v18  ;;  %v3206_v18 = vld [vmem:[%s4310_s0 + $0x1c] ss:$72 sps:$4 sm:$0xff]  }
  0x8c   :  { %2178 = vmatpush1.bf16.msra.mxu0 %v3021_v20  ;;  %1964 = vmatprep.subr.bf16.mxu1 %v3026_v21  ;;  %v3114_v20 = vld [vmem:[%s4309_s1 + $0x310] ss:$8 sps:$4 sm:$0xff]  }
  0x8d   :  { %2179 = vmatprep.subr.bf16.mxu0 %v3029_v22  ;;  %v3117_v21 = vld [vmem:[%s4309_s1 + $0x810] ss:$8 sps:$4 sm:$0xff]   ;;  %v3122_v22 = vld [vmem:[%s4309_s1 + $0x324] ss:$8 sps:$4 sm:$0xff]  }
  0x8f   :  { %1965 = vmatpush1.bf16.msra.mxu1 %v3024_v24  ;;  %v3120_v24 = vld [vmem:[%s4309_s1 + $0x320] ss:$8 sps:$4 sm:$0xff]  }
  0x90   :  { %2180 = vmatpush1.bf16.msra.mxu0 %v3027_v25  ;;  %1966 = vmatprep.subr.bf16.mxu1 %v3032_v26  ;;  %v3123_v25 = vld [vmem:[%s4309_s1 + $0x820] ss:$8 sps:$4 sm:$0xff]   ;;  %v3128_v26 = vld [vmem:[%s4309_s1 + $0x334] ss:$8 sps:$4 sm:$0xff]  }
  0x91   :  { %2181 = vmatprep.subr.bf16.mxu0 %v3035_v27  ;;  %v3131_v27 = vld [vmem:[%s4309_s1 + $0x834] ss:$8 sps:$4 sm:$0xff]  }
  0x93   :  { %1967 = vmatpush1.bf16.msra.mxu1 %v3030_v28  ;;  %v3126_v28 = vld [vmem:[%s4309_s1 + $0x330] ss:$8 sps:$4 sm:$0xff]  }
  0x94   :  { %2182 = vmatpush1.bf16.msra.mxu0 %v3033_v29  ;;  %1968 = vmatprep.subr.bf16.mxu1 %v3038_v30  ;;  %v3129_v29 = vld [vmem:[%s4309_s1 + $0x830] ss:$8 sps:$4 sm:$0xff]   ;;  %v3134_v30 = vld [vmem:[%s4309_s1 + $0x344] ss:$8 sps:$4 sm:$0xff]  }
  0x95   :  { %2183 = vmatprep.subr.bf16.mxu0 %v3041_v31  ;;  %v3137_v31 = vld [vmem:[%s4309_s1 + $0x844] ss:$8 sps:$4 sm:$0xff]  }
  0x97   :  { %1969 = vmatpush1.bf16.msra.mxu1 %v3036_v32  ;;  %v3132_v32 = vld [vmem:[%s4309_s1 + $0x340] ss:$8 sps:$4 sm:$0xff]  }
  0x98   :  { %2184 = vmatpush1.bf16.msra.mxu0 %v3039_v33  ;;  %1970 = vmatprep.subr.bf16.mxu1 %v3044_v34  ;;  %v3135_v33 = vld [vmem:[%s4309_s1 + $0x840] ss:$8 sps:$4 sm:$0xff]   ;;  %v3140_v34 = vld [vmem:[%s4309_s1 + $0x354] ss:$8 sps:$4 sm:$0xff]  }
  0x99   :  { %2185 = vmatprep.subr.bf16.mxu0 %v3047_v35  ;;  %v3143_v35 = vld [vmem:[%s4309_s1 + $0x854] ss:$8 sps:$4 sm:$0xff]  }
  0x9b   :  { %1971 = vmatpush1.bf16.msra.mxu1 %v3042_v36  ;;  %v3138_v36 = vld [vmem:[%s4309_s1 + $0x350] ss:$8 sps:$4 sm:$0xff]  }
  0x9c   :  { %2186 = vmatpush1.bf16.msra.mxu0 %v3045_v37  ;;  %1972 = vmatprep.subr.bf16.mxu1 %v3050_v38  ;;  %v3141_v37 = vld [vmem:[%s4309_s1 + $0x850] ss:$8 sps:$4 sm:$0xff]   ;;  %v3146_v38 = vld [vmem:[%s4309_s1 + $0x364] ss:$8 sps:$4 sm:$0xff]  }
  0x9d   :  { %2187 = vmatprep.subr.bf16.mxu0 %v3053_v39  ;;  %v3149_v39 = vld [vmem:[%s4309_s1 + $0x864] ss:$8 sps:$4 sm:$0xff]  }
  0x9f   :  { %1973 = vmatpush1.bf16.msra.mxu1 %v3048_v40  ;;  %v3144_v40 = vld [vmem:[%s4309_s1 + $0x360] ss:$8 sps:$4 sm:$0xff]  }
  0xa0   :  { %2188 = vmatpush1.bf16.msra.mxu0 %v3051_v41  ;;  %1974 = vmatprep.subr.bf16.mxu1 %v3056_v42  ;;  %v3147_v41 = vld [vmem:[%s4309_s1 + $0x860] ss:$8 sps:$4 sm:$0xff]   ;;  %v3152_v42 = vld [vmem:[%s4309_s1 + $0x374] ss:$8 sps:$4 sm:$0xff]  }
  0xa1   :  { %2189 = vmatprep.subr.bf16.mxu0 %v3059_v43  ;;  %v3155_v43 = vld [vmem:[%s4309_s1 + $0x874] ss:$8 sps:$4 sm:$0xff]  }
  0xa3   :  { %1975 = vmatpush1.bf16.msra.mxu1 %v3054_v44  ;;  %v3150_v44 = vld [vmem:[%s4309_s1 + $0x370] ss:$8 sps:$4 sm:$0xff]  }
  0xa4   :  { %2190 = vmatpush1.bf16.msra.mxu0 %v3057_v45  ;;  %1976 = vmatprep.subr.bf16.mxu1 %v3062_v46  ;;  %v3153_v45 = vld [vmem:[%s4309_s1 + $0x870] ss:$8 sps:$4 sm:$0xff]   ;;  %v3158_v46 = vld [vmem:[%s4309_s1 + $0x384] ss:$8 sps:$4 sm:$0xff]  }
  0xa5   :  { %2191 = vmatprep.subr.bf16.mxu0 %v3065_v47  ;;  %v3161_v47 = vld [vmem:[%s4309_s1 + $0x884] ss:$8 sps:$4 sm:$0xff]  }
  0xa7   :  { %1977 = vmatpush1.bf16.msra.mxu1 %v3060_v48  ;;  %v3156_v48 = vld [vmem:[%s4309_s1 + $0x380] ss:$8 sps:$4 sm:$0xff]  }
  0xa8   :  { %2192 = vmatpush1.bf16.msra.mxu0 %v3063_v49  ;;  %1978 = vmatprep.subr.bf16.mxu1 %v3068_v50  ;;  %v3159_v49 = vld [vmem:[%s4309_s1 + $0x880] ss:$8 sps:$4 sm:$0xff]   ;;  %v3164_v50 = vld [vmem:[%s4309_s1 + $0x394] ss:$8 sps:$4 sm:$0xff]  }
  0xa9   :  { %2193 = vmatprep.subr.bf16.mxu0 %v3071_v51  ;;  %v3167_v51 = vld [vmem:[%s4309_s1 + $0x894] ss:$8 sps:$4 sm:$0xff]  }
  0xab   :  { %1979 = vmatpush1.bf16.msra.mxu1 %v3066_v52  ;;  %v3162_v52 = vld [vmem:[%s4309_s1 + $0x390] ss:$8 sps:$4 sm:$0xff]  }
  0xac   :  { %2194 = vmatpush1.bf16.msra.mxu0 %v3069_v53  ;;  %1980 = vmatprep.subr.bf16.mxu1 %v3074_v54  ;;  %v3165_v53 = vld [vmem:[%s4309_s1 + $0x890] ss:$8 sps:$4 sm:$0xff]   ;;  %v3170_v54 = vld [vmem:[%s4309_s1 + $0x3a4] ss:$8 sps:$4 sm:$0xff]  }
  0xad   :  { %2195 = vmatprep.subr.bf16.mxu0 %v3077_v55  ;;  %v3173_v55 = vld [vmem:[%s4309_s1 + $0x8a4] ss:$8 sps:$4 sm:$0xff]  }
  0xaf   :  { %1981 = vmatpush1.bf16.msra.mxu1 %v3072_v56  ;;  %v3168_v56 = vld [vmem:[%s4309_s1 + $0x3a0] ss:$8 sps:$4 sm:$0xff]  }
  0xb0   :  { %2196 = vmatpush1.bf16.msra.mxu0 %v3075_v57  ;;  %1982 = vmatprep.subr.bf16.mxu1 %v3080_v58  ;;  %v3171_v57 = vld [vmem:[%s4309_s1 + $0x8a0] ss:$8 sps:$4 sm:$0xff]   ;;  %v3176_v58 = vld [vmem:[%s4309_s1 + $0x3b4] ss:$8 sps:$4 sm:$0xff]  }
  0xb1   :  { %2197 = vmatprep.subr.bf16.mxu0 %v3083_v59  ;;  %v3179_v59 = vld [vmem:[%s4309_s1 + $0x8b4] ss:$8 sps:$4 sm:$0xff]  }
  0xb3   :  { %1983 = vmatpush1.bf16.msra.mxu1 %v3078_v60  ;;  %v3174_v60 = vld [vmem:[%s4309_s1 + $0x3b0] ss:$8 sps:$4 sm:$0xff]  }
  0xb4   :  { %2198 = vmatpush1.bf16.msra.mxu0 %v3081_v61  ;;  %1984 = vmatprep.subr.bf16.mxu1 %v3086_v62  ;;  %v3177_v61 = vld [vmem:[%s4309_s1 + $0x8b0] ss:$8 sps:$4 sm:$0xff]   ;;  %v3182_v62 = vld [vmem:[%s4309_s1 + $0x3c4] ss:$8 sps:$4 sm:$0xff]  }
  0xb5   :  { %2199 = vmatprep.subr.bf16.mxu0 %v3089_v63  ;;  %v3185_v63 = vld [vmem:[%s4309_s1 + $0x8c4] ss:$8 sps:$4 sm:$0xff]  }
  0xb7   :  { %1985 = vmatpush1.bf16.msra.mxu1 %v3084_v0  ;;  %v3180_v0 = vld [vmem:[%s4309_s1 + $0x3c0] ss:$8 sps:$4 sm:$0xff]  }
  0xb8   :  { %2200 = vmatpush1.bf16.msra.mxu0 %v3087_v1  ;;  %1986 = vmatprep.subr.bf16.mxu1 %v3092_v2  ;;  %v3183_v1 = vld [vmem:[%s4309_s1 + $0x8c0] ss:$8 sps:$4 sm:$0xff]   ;;  %v3188_v2 = vld [vmem:[%s4309_s1 + $0x3d4] ss:$8 sps:$4 sm:$0xff]  }
  0xb9   :  { %2201 = vmatprep.subr.bf16.mxu0 %v3095_v3  ;;  %v3191_v3 = vld [vmem:[%s4309_s1 + $0x8d4] ss:$8 sps:$4 sm:$0xff]  }
  0xbb   :  { %1987 = vmatpush1.bf16.msra.mxu1 %v3090_v4  ;;  %v3186_v4 = vld [vmem:[%s4309_s1 + $0x3d0] ss:$8 sps:$4 sm:$0xff]  }
  0xbc   :  { %2202 = vmatpush1.bf16.msra.mxu0 %v3093_v5  ;;  %1988 = vmatprep.subr.bf16.mxu1 %v3098_v6  ;;  %v3189_v5 = vld [vmem:[%s4309_s1 + $0x8d0] ss:$8 sps:$4 sm:$0xff]   ;;  %v3194_v6 = vld [vmem:[%s4309_s1 + $0x3e4] ss:$8 sps:$4 sm:$0xff]  }
  0xbd   :  { %2203 = vmatprep.subr.bf16.mxu0 %v3101_v7  ;;  %v3197_v7 = vld [vmem:[%s4309_s1 + $0x8e4] ss:$8 sps:$4 sm:$0xff]  }
  0xbf   :  { %1989 = vmatpush1.bf16.msra.mxu1 %v3096_v8  ;;  %v3192_v8 = vld [vmem:[%s4309_s1 + $0x3e0] ss:$8 sps:$4 sm:$0xff]  }
  0xc0   :  { %2204 = vmatpush1.bf16.msra.mxu0 %v3099_v9  ;;  %2001 = vmatprep.subr.bf16.mxu1 %v3107_v10  ;;  %v3195_v9 = vld [vmem:[%s4309_s1 + $0x8e0] ss:$8 sps:$4 sm:$0xff]   ;;  %v3200_v10 = vld [vmem:[%s4309_s1 + $0x3f4] ss:$8 sps:$4 sm:$0xff]  }
  0xc1   :  { %2216 = vmatprep.subr.bf16.mxu0 %v3113_v11  ;;  %v3203_v11 = vld [vmem:[%s4309_s1 + $0x8f4] ss:$8 sps:$4 sm:$0xff]  }
  0xc2   :  { %1991 = vmatmul.mubr.bf16.vlgmr.msra.gmra.mrb[0].mxu1 %v3102_v12  ;;  %v3198_v12 = vld [vmem:[%s4309_s1 + $0x3f0] ss:$8 sps:$4 sm:$0xff]  }
  0xc3   :  { %2206 = vmatmul.mubr.bf16.vlgmr.msra.gmra.mrb[0].mxu0 %v3108_v14  ;;  %2002 = vmatpush1.bf16.msra.mxu1 %v3105_v13  ;;  %v3201_v13 = vld [vmem:[%s4309_s1 + $0x8f0] ss:$8 sps:$4 sm:$0xff]   ;;  %v3209_v14 = vld [vmem:[%s4309_s1 + $0x404] ss:$8 sps:$4 sm:$0xff]  }
  0xc4   :  { %2217 = vmatpush1.bf16.msra.mxu0 %v3111_v15  ;;  %2003 = vmatprep.subr.bf16.mxu1 %v3116_v16  ;;  %v3215_v15 = vld [vmem:[%s4311_s4 + $0x4] ss:$8 sps:$4 sm:$0xff]   ;;  %v3204_v16 = vld [vmem:[%s4310_s0 + $0x18] ss:$72 sps:$4 sm:$0xff]  }
  0xc5   :  { %2218 = vmatprep.subr.bf16.mxu0 %v3119_v17  ;;  %2033 = vmatprep.mubr.bf16.mxu1 %v3206_v18  ;;  %v3210_v17 = vld [vmem:[%s4310_s0 + $0x40] ss:$72 sps:$4 sm:$0xff]  }
  0xc6   :  { %2248 = vmatprep.mubr.bf16.mxu0 %v3212_v19  ;;  %v3207_v18 = vld [vmem:[%s4309_s1 + $0x400] ss:$8 sps:$4 sm:$0xff]  }
  0xc7   :  { %2004 = vmatpush1.bf16.msra.mxu1 %v3114_v20  ;;  %v3213_v19 = vld [vmem:[%s4311_s4] ss:$8 sps:$4 sm:$0xff]   ;;  %v3218_v20 = vld [vmem:[%s4309_s1 + $0x414] ss:$8 sps:$4 sm:$0xff]  }
  0xc8   :  { %2219 = vmatpush1.bf16.msra.mxu0 %v3117_v21  ;;  %2005 = vmatprep.subr.bf16.mxu1 %v3122_v22  ;;  %v3221_v21 = vld [vmem:[%s4311_s4 + $0x14] ss:$8 sps:$4 sm:$0xff]   ;;  %v3285_v22 = vld [vmem:[%s4310_s0 + $0x24] ss:$72 sps:$4 sm:$0xff]  }
  0xc9   :  { %2220 = vmatprep.subr.bf16.mxu0 %v3125_v23  ;;  %v3216_v23 = vld [vmem:[%s4309_s1 + $0x410] ss:$8 sps:$4 sm:$0xff]  }
  0xcb   :  { %2006 = vmatpush1.bf16.msra.mxu1 %v3120_v24  ;;  %v3219_v24 = vld [vmem:[%s4311_s4 + $0x10] ss:$8 sps:$4 sm:$0xff]  }
  0xcc   :  { %2221 = vmatpush1.bf16.msra.mxu0 %v3123_v25  ;;  %2007 = vmatprep.subr.bf16.mxu1 %v3128_v26  ;;  %v3224_v25 = vld [vmem:[%s4309_s1 + $0x424] ss:$8 sps:$4 sm:$0xff]  }
  0xcd   :  { %2222 = vmatprep.subr.bf16.mxu0 %v3131_v27  ;;  %v3227_v26 = vld [vmem:[%s4311_s4 + $0x24] ss:$8 sps:$4 sm:$0xff]   ;;  %v3286_v27 = vmov 0  }
  0xcf   :  { %2008 = vmatpush1.bf16.msra.mxu1 %v3126_v28  ;;  %v3222_v28 = vld [vmem:[%s4309_s1 + $0x420] ss:$8 sps:$4 sm:$0xff]  }
  0xd0   :  { %2223 = vmatpush1.bf16.msra.mxu0 %v3129_v29  ;;  %2009 = vmatprep.subr.bf16.mxu1 %v3134_v30  ;;  %v3225_v29 = vld [vmem:[%s4311_s4 + $0x20] ss:$8 sps:$4 sm:$0xff]   ;;  %v3230_v30 = vld [vmem:[%s4309_s1 + $0x434] ss:$8 sps:$4 sm:$0xff]  }
  0xd1   :  { %2224 = vmatprep.subr.bf16.mxu0 %v3137_v31  ;;  %v3233_v31 = vld [vmem:[%s4311_s4 + $0x34] ss:$8 sps:$4 sm:$0xff]  }
  0xd3   :  { %2010 = vmatpush1.bf16.msra.mxu1 %v3132_v32  ;;  %v3228_v32 = vld [vmem:[%s4309_s1 + $0x430] ss:$8 sps:$4 sm:$0xff]  }
  0xd4   :  { %2225 = vmatpush1.bf16.msra.mxu0 %v3135_v33  ;;  %2011 = vmatprep.subr.bf16.mxu1 %v3140_v34  ;;  %v3231_v33 = vld [vmem:[%s4311_s4 + $0x30] ss:$8 sps:$4 sm:$0xff]   ;;  %v3236_v34 = vld [vmem:[%s4309_s1 + $0x444] ss:$8 sps:$4 sm:$0xff]  }
  0xd5   :  { %2226 = vmatprep.subr.bf16.mxu0 %v3143_v35  ;;  %v3239_v35 = vld [vmem:[%s4311_s4 + $0x44] ss:$8 sps:$4 sm:$0xff]  }
  0xd7   :  { %2012 = vmatpush1.bf16.msra.mxu1 %v3138_v36  ;;  %v3234_v36 = vld [vmem:[%s4309_s1 + $0x440] ss:$8 sps:$4 sm:$0xff]  }
  0xd8   :  { %2227 = vmatpush1.bf16.msra.mxu0 %v3141_v37  ;;  %2013 = vmatprep.subr.bf16.mxu1 %v3146_v38  ;;  %v3237_v37 = vld [vmem:[%s4311_s4 + $0x40] ss:$8 sps:$4 sm:$0xff]   ;;  %v3242_v38 = vld [vmem:[%s4309_s1 + $0x454] ss:$8 sps:$4 sm:$0xff]  }
  0xd9   :  { %2228 = vmatprep.subr.bf16.mxu0 %v3149_v39  ;;  %v3245_v39 = vld [vmem:[%s4311_s4 + $0x54] ss:$8 sps:$4 sm:$0xff]  }
  0xdb   :  { %2014 = vmatpush1.bf16.msra.mxu1 %v3144_v40  ;;  %v3240_v40 = vld [vmem:[%s4309_s1 + $0x450] ss:$8 sps:$4 sm:$0xff]  }
  0xdc   :  { %2229 = vmatpush1.bf16.msra.mxu0 %v3147_v41  ;;  %2015 = vmatprep.subr.bf16.mxu1 %v3152_v42  ;;  %v3243_v41 = vld [vmem:[%s4311_s4 + $0x50] ss:$8 sps:$4 sm:$0xff]   ;;  %v3248_v42 = vld [vmem:[%s4309_s1 + $0x464] ss:$8 sps:$4 sm:$0xff]  }
  0xdd   :  { %2230 = vmatprep.subr.bf16.mxu0 %v3155_v43  ;;  %v3251_v43 = vld [vmem:[%s4311_s4 + $0x64] ss:$8 sps:$4 sm:$0xff]  }
  0xdf   :  { %2016 = vmatpush1.bf16.msra.mxu1 %v3150_v44  ;;  %v3246_v44 = vld [vmem:[%s4309_s1 + $0x460] ss:$8 sps:$4 sm:$0xff]  }
  0xe0   :  { %2231 = vmatpush1.bf16.msra.mxu0 %v3153_v45  ;;  %2017 = vmatprep.subr.bf16.mxu1 %v3158_v46  ;;  %v3249_v45 = vld [vmem:[%s4311_s4 + $0x60] ss:$8 sps:$4 sm:$0xff]   ;;  %v3254_v46 = vld [vmem:[%s4309_s1 + $0x474] ss:$8 sps:$4 sm:$0xff]  }
  0xe1   :  { %2232 = vmatprep.subr.bf16.mxu0 %v3161_v47  ;;  %v3257_v47 = vld [vmem:[%s4311_s4 + $0x74] ss:$8 sps:$4 sm:$0xff]  }
  0xe3   :  { %2018 = vmatpush1.bf16.msra.mxu1 %v3156_v48  ;;  %v3252_v48 = vld [vmem:[%s4309_s1 + $0x470] ss:$8 sps:$4 sm:$0xff]  }
  0xe4   :  { %2233 = vmatpush1.bf16.msra.mxu0 %v3159_v49  ;;  %2019 = vmatprep.subr.bf16.mxu1 %v3164_v50  ;;  %v3255_v49 = vld [vmem:[%s4311_s4 + $0x70] ss:$8 sps:$4 sm:$0xff]   ;;  %v3260_v50 = vld [vmem:[%s4309_s1 + $0x484] ss:$8 sps:$4 sm:$0xff]  }
  0xe5   :  { %2234 = vmatprep.subr.bf16.mxu0 %v3167_v51  ;;  %v3261_v51 = vld [vmem:[%s4312_s3] sm:$0xff]  }
  0xe7   :  { %2020 = vmatpush1.bf16.msra.mxu1 %v3162_v52  ;;  %v3258_v52 = vld [vmem:[%s4309_s1 + $0x480] ss:$8 sps:$4 sm:$0xff]  }
  0xe8   :  { %2235 = vmatpush1.bf16.msra.mxu0 %v3165_v53  ;;  %2021 = vmatprep.subr.bf16.mxu1 %v3170_v54  ;;  %v3264_v53 = vld [vmem:[%s4309_s1 + $0x494] ss:$8 sps:$4 sm:$0xff]   ;;  %v3262_v54 = vld [vmem:[%s4309_s1 + $0x490] ss:$8 sps:$4 sm:$0xff]  }
  0xe9   :  { %2236 = vmatprep.subr.bf16.mxu0 %v3173_v55  ;;  %v3267_v55 = vld [vmem:[%s4309_s1 + $0x4a4] ss:$8 sps:$4 sm:$0xff]  }
  0xeb   :  { %2022 = vmatpush1.bf16.msra.mxu1 %v3168_v56  ;;  %v3265_v56 = vld [vmem:[%s4309_s1 + $0x4a0] ss:$8 sps:$4 sm:$0xff]  }
  0xec   :  { %2237 = vmatpush1.bf16.msra.mxu0 %v3171_v57  ;;  %2023 = vmatprep.subr.bf16.mxu1 %v3176_v58  ;;  %v3270_v57 = vld [vmem:[%s4309_s1 + $0x4b4] ss:$8 sps:$4 sm:$0xff]   ;;  %v3268_v58 = vld [vmem:[%s4309_s1 + $0x4b0] ss:$8 sps:$4 sm:$0xff]  }
  0xed   :  { %2238 = vmatprep.subr.bf16.mxu0 %v3179_v59  ;;  %v3273_v59 = vld [vmem:[%s4309_s1 + $0x4c4] ss:$8 sps:$4 sm:$0xff]  }
  0xef   :  { %2024 = vmatpush1.bf16.msra.mxu1 %v3174_v60  ;;  %v3271_v60 = vld [vmem:[%s4309_s1 + $0x4c0] ss:$8 sps:$4 sm:$0xff]  }
  0xf0   :  { %2239 = vmatpush1.bf16.msra.mxu0 %v3177_v61  ;;  %2025 = vmatprep.subr.bf16.mxu1 %v3182_v62  ;;  %v3276_v61 = vld [vmem:[%s4309_s1 + $0x4d4] ss:$8 sps:$4 sm:$0xff]   ;;  %v3274_v62 = vld [vmem:[%s4309_s1 + $0x4d0] ss:$8 sps:$4 sm:$0xff]  }
  0xf1   :  { %2240 = vmatprep.subr.bf16.mxu0 %v3185_v63  ;;  %v3279_v63 = vld [vmem:[%s4309_s1 + $0x4e4] ss:$8 sps:$4 sm:$0xff]  }
  0xf3   :  { %2026 = vmatpush1.bf16.msra.mxu1 %v3180_v0  ;;  %v3277_v0 = vld [vmem:[%s4309_s1 + $0x4e0] ss:$8 sps:$4 sm:$0xff]  }
  0xf4   :  { %2241 = vmatpush1.bf16.msra.mxu0 %v3183_v1  ;;  %2027 = vmatprep.subr.bf16.mxu1 %v3188_v2  ;;  %v3282_v1 = vld [vmem:[%s4309_s1 + $0x4f4] ss:$8 sps:$4 sm:$0xff]   ;;  %v3280_v2 = vld [vmem:[%s4309_s1 + $0x4f0] ss:$8 sps:$4 sm:$0xff]  }
  0xf5   :  { %2242 = vmatprep.subr.bf16.mxu0 %v3191_v3  ;;  %v3283_v3 = vld [vmem:[%s4310_s0 + $0x20] ss:$72 sps:$4 sm:$0xff]  }
  0xf7   :  { %2028 = vmatpush1.bf16.msra.mxu1 %v3186_v4 }
  0xf8   :  { %2243 = vmatpush1.bf16.msra.mxu0 %v3189_v5  ;;  %2029 = vmatprep.subr.bf16.mxu1 %v3194_v6 }
  0xf9   :  { %2244 = vmatprep.subr.bf16.mxu0 %v3197_v7 }
  0xfb   :  { %2030 = vmatpush1.bf16.msra.mxu1 %v3192_v8  ;;  %v332_v8 = vlaneseq }
  0xfc   :  { %2245 = vmatpush1.bf16.msra.mxu0 %v3195_v9  ;;  %2031 = vmatprep.subr.bf16.mxu1 %v3200_v10 }
  0xfd   :  { %2246 = vmatprep.subr.bf16.mxu0 %v3203_v11  ;;  %v333_v9 = vshrl.u32 %v332_v8, 7  ;;  %v330_v11 = vld [vmem:[%s4313_s2] sm:$0x3] }
  0xff   :  { %2032 = vmatpush1.bf16.msra.mxu1 %v3198_v12  ;;  %v334_v10 = vsub.s32 0, %v333_v9  ;;  %v338_v12 = vsub.s32 1, %v333_v9 }
 0x100   :  { %2247 = vmatpush1.bf16.msra.mxu0 %v3201_v13  ;;  %2044 = vmatprep.subr.bf16.mxu1 %v3209_v14  ;;  %v2410_v14 = vld [vmem:[%s4314_s5] sm:$0x3] }
 0x101   :  { %2363 = vmatprep.subr.bf16.mxu0 %v3215_v15  ;;  %v335_v13 = vrot.slane %v330_v11, %v334_v10  ;;  %v339_v15 = vrot.slane %v330_v11, %v338_v12 }
 0x102   :  { %2034 = vmatmul.mubr.bf16.vlgmr.msra.gmra.mrb[0].mxu1 %v3204_v16 }
 0x103   :  { %2249 = vmatmul.mubr.bf16.vlgmr.msra.gmra.mrb[0].mxu0 %v3210_v17  ;;  %2045 = vmatpush1.bf16.msra.mxu1 %v3207_v18  ;;  %v2415_v18 = vrot.slane %v2410_v14, %v334_v10 }
 0x104   :  { %2364 = vmatpush1.bf16.msra.mxu0 %v3213_v19  ;;  %2046 = vmatprep.subr.bf16.mxu1 %v3218_v20 }
 0x105   :  { %2365 = vmatprep.subr.bf16.mxu0 %v3221_v21  ;;  %2395 = vmatprep.mubr.bf16.mxu0 %v3286_v27  ;;  %v2419_v21 = vrot.slane %v2410_v14, %v338_v12 }
 0x106   :  { %2076 = vmatprep.mubr.bf16.mxu1 %v3285_v22 }
 0x107   :  { %2047 = vmatpush1.bf16.msra.mxu1 %v3216_v23 }
 0x108   :  { %2366 = vmatpush1.bf16.msra.mxu0 %v3219_v24  ;;  %2048 = vmatprep.subr.bf16.mxu1 %v3224_v25 }
 0x109   :  { %2367 = vmatprep.subr.bf16.mxu0 %v3227_v26 }
 0x10b   :  { %2049 = vmatpush1.bf16.msra.mxu1 %v3222_v28 }
 0x10c   :  { %2368 = vmatpush1.bf16.msra.mxu0 %v3225_v29  ;;  %2050 = vmatprep.subr.bf16.mxu1 %v3230_v30 }
 0x10d   :  { %2369 = vmatprep.subr.bf16.mxu0 %v3233_v31 }
 0x10f   :  { %2051 = vmatpush1.bf16.msra.mxu1 %v3228_v32 }
 0x110   :  { %2370 = vmatpush1.bf16.msra.mxu0 %v3231_v33  ;;  %2052 = vmatprep.subr.bf16.mxu1 %v3236_v34 }
 0x111   :  { %2371 = vmatprep.subr.bf16.mxu0 %v3239_v35 }
 0x113   :  { %2053 = vmatpush1.bf16.msra.mxu1 %v3234_v36 }
 0x114   :  { %2372 = vmatpush1.bf16.msra.mxu0 %v3237_v37  ;;  %2054 = vmatprep.subr.bf16.mxu1 %v3242_v38 }
 0x115   :  { %2373 = vmatprep.subr.bf16.mxu0 %v3245_v39 }
 0x117   :  { %2055 = vmatpush1.bf16.msra.mxu1 %v3240_v40 }
 0x118   :  { %2374 = vmatpush1.bf16.msra.mxu0 %v3243_v41  ;;  %2056 = vmatprep.subr.bf16.mxu1 %v3248_v42 }
 0x119   :  { %2375 = vmatprep.subr.bf16.mxu0 %v3251_v43 }
 0x11b   :  { %2057 = vmatpush1.bf16.msra.mxu1 %v3246_v44 }
 0x11c   :  { %2376 = vmatpush1.bf16.msra.mxu0 %v3249_v45  ;;  %2058 = vmatprep.subr.bf16.mxu1 %v3254_v46 }
 0x11d   :  { %2377 = vmatprep.subr.bf16.mxu0 %v3257_v47 }
 0x11f   :  { %2059 = vmatpush1.bf16.msra.mxu1 %v3252_v48 }
 0x120   :  { %2378 = vmatpush1.bf16.msra.mxu0 %v3255_v49  ;;  %2060 = vmatprep.subr.bf16.mxu1 %v3260_v50 }
 0x123   :  { %2396 = vmatmul.mubr.bf16.vlgmr.msra.gmra.mrb[0].mxu0 %v3261_v51  ;;  %2061 = vmatpush1.bf16.msra.mxu1 %v3258_v52 }
 0x124   :  { %2062 = vmatprep.subr.bf16.mxu1 %v3264_v53 }
 0x127   :  { %2063 = vmatpush1.bf16.msra.mxu1 %v3262_v54 }
 0x128   :  { %2064 = vmatprep.subr.bf16.mxu1 %v3267_v55 }
 0x12b   :  { %2065 = vmatpush1.bf16.msra.mxu1 %v3265_v56 }
 0x12c   :  { %2066 = vmatprep.subr.bf16.mxu1 %v3270_v57 }
 0x12f   :  { %2067 = vmatpush1.bf16.msra.mxu1 %v3268_v58 }
 0x130   :  { %2068 = vmatprep.subr.bf16.mxu1 %v3273_v59 }
 0x133   :  { %2069 = vmatpush1.bf16.msra.mxu1 %v3271_v60 }
 0x134   :  { %2070 = vmatprep.subr.bf16.mxu1 %v3276_v61 }
 0x137   :  { %2071 = vmatpush1.bf16.msra.mxu1 %v3274_v62 }
 0x138   :  { %2072 = vmatprep.subr.bf16.mxu1 %v3279_v63 }
 0x13b   :  { %2073 = vmatpush1.bf16.msra.mxu1 %v3277_v0 }
 0x13c   :  { %2074 = vmatprep.subr.bf16.mxu1 %v3282_v1 }
 0x13f   :  { %2075 = vmatpush1.bf16.msra.mxu1 %v3280_v2 }
 0x142   :  { %2077 = vmatmul.mubr.bf16.vlgmr.msra.gmra.mrb[0].mxu1 %v3283_v3 }
 0x1f6   :  { %v2397_v4 = vpop.f32.mrb[0].mxu0 }
 0x1f7   :  { %v2399_v5 = vpop.f32.mrb[1].mxu0 }
 0x1f8   :  { %v2401_v6 = vpop.f32.mrb[2].mxu0 }
 0x1f9   :  { %v2403_v7 = vpop.f32.mrb[3].mxu0 }
 0x215   :  { %v2078_v16 = vpop.f32.mrb[0].mxu1 }
 0x216   :  { %v2761_v17 = vadd.f32 %v2078_v16, %v335_v13  ;;  %v2080_v19 = vpop.f32.mrb[1].mxu1 }
 0x217   :  { %v2763_v20 = vadd.f32 %v2080_v19, %v339_v15  ;;  %v2082_v22 = vpop.f32.mrb[2].mxu1 }
 0x218   :  { %v2762_v23 = vadd.f32 %v2761_v17, %v2397_v4  ;;  %v2765_v24 = vadd.f32 %v2082_v22, %v335_v13  ;;  %v2084_v25 = vpop.f32.mrb[3].mxu1 }
 0x219   :  { %v2764_v26 = vadd.f32 %v2763_v20, %v2399_v5  ;;  %v2767_v27 = vadd.f32 %v2084_v25, %v339_v15 }
 0x21a   :  { %v2422_v28 = vadd.f32 %v2762_v23, %v2415_v18  ;;  %v2766_v29 = vadd.f32 %v2765_v24, %v2401_v6 }
 0x21b   :  { %v2423_v30 = vadd.f32 %v2764_v26, %v2419_v21  ;;  %v2768_v31 = vadd.f32 %v2767_v27, %v2403_v7 }
 0x21c   :  { %v2426_v32 = vmax.f32 %v2422_v28, 0.0  ;;  %v2424_v33 = vadd.f32 %v2766_v29, %v2415_v18 }
 0x21d   :  { %v2427_v34 = vmax.f32 %v2423_v30, 0.0  ;;  %v2425_v35 = vadd.f32 %v2768_v31, %v2419_v21 }
 0x21e   :  { %2430 = vst [vmem:[%s4315_s6] sm:$0xff] %v2426_v32  ;;  %v2428_v36 = vmax.f32 %v2424_v33, 0.0 }
 0x21f   :  { %2431 = vst [vmem:[%s4315_s6 + $0x8] sm:$0xff] %v2427_v34  ;;  %v2429_v37 = vmax.f32 %v2425_v35, 0.0 }
 0x220   :  { %2432 = vst [vmem:[%s4315_s6 + $0x10] sm:$0xff] %v2428_v36 }
 0x221   :  { %2433 = vst [vmem:[%s4315_s6 + $0x18] sm:$0xff] %v2429_v37 }

// kernel: siamese_forward.28
= control target key start
LH: loop header
LB: loop body
LE: loop exit
PB: predicated region body
PF: predicated region fallthrough
CT: control target
= control target key end

     0   :  { %s4043_s1 = inlined_call_operand.vmem [shape: bf16[2304,256], index: 1, kind: input, shape index: {}]   ;;  %s4044_s0 = inlined_call_operand.vmem [shape: bf16[16,2304], index: 0, kind: input, shape index: {}]   ;;  %s4045_s2 = inlined_call_operand.vmem [shape: f32[1,256], index: 2, kind: input, shape index: {}]   ;;  %s4046_s3 = inlined_call_operand.vmem [shape: f32[16,256], index: 3, kind: input, shape index: {}]   ;;  %s4047_s4 = inlined_call_operand.vmem [shape: f32[16,256], index: 4, kind: output, shape index: {}]  }
   0x1   :  { %v2614_v0 = vld [vmem:[%s4043_s1 + $0x4] ss:$8 sps:$4 sm:$0xff]   ;;  %v2618_v2 = vld [vmem:[%s4043_s1] ss:$8 sps:$4 sm:$0xff]   ;;  %v2620_v4 = vld [vmem:[%s4043_s1 + $0x14] ss:$8 sps:$4 sm:$0xff]  }
   0x2   :  { %v2616_v1 = vld [vmem:[%s4043_s1 + $0x404] ss:$8 sps:$4 sm:$0xff]   ;;  %1865 = vmatprep.subr.bf16.mxu1 %v2614_v0  ;;  %v2619_v3 = vld [vmem:[%s4043_s1 + $0x400] ss:$8 sps:$4 sm:$0xff]   ;;  %v2622_v5 = vld [vmem:[%s4043_s1 + $0x414] ss:$8 sps:$4 sm:$0xff]  }
   0x3   :  { %2037 = vmatprep.subr.bf16.mxu0 %v2616_v1  ;;  %1866 = vmatpush1.bf16.msra.mxu1 %v2618_v2  ;;  %v2624_v6 = vld [vmem:[%s4043_s1 + $0x10] ss:$8 sps:$4 sm:$0xff]   ;;  %v2626_v8 = vld [vmem:[%s4043_s1 + $0x24] ss:$8 sps:$4 sm:$0xff]   ;;  %v2630_v10 = vld [vmem:[%s4043_s1 + $0x20] ss:$8 sps:$4 sm:$0xff]  }
   0x4   :  { %2038 = vmatpush1.bf16.msra.mxu0 %v2619_v3  ;;  %1867 = vmatprep.subr.bf16.mxu1 %v2620_v4  ;;  %v2625_v7 = vld [vmem:[%s4043_s1 + $0x410] ss:$8 sps:$4 sm:$0xff]   ;;  %v2628_v9 = vld [vmem:[%s4043_s1 + $0x424] ss:$8 sps:$4 sm:$0xff]   ;;  %v2631_v11 = vld [vmem:[%s4043_s1 + $0x420] ss:$8 sps:$4 sm:$0xff]  }
   0x5   :  { %2039 = vmatprep.subr.bf16.mxu0 %v2622_v5  ;;  %v2632_v12 = vld [vmem:[%s4043_s1 + $0x34] ss:$8 sps:$4 sm:$0xff]   ;;  %v2636_v14 = vld [vmem:[%s4043_s1 + $0x30] ss:$8 sps:$4 sm:$0xff]   ;;  %v2638_v16 = vld [vmem:[%s4043_s1 + $0x44] ss:$8 sps:$4 sm:$0xff]  }
   0x6   :  { %v2634_v13 = vld [vmem:[%s4043_s1 + $0x434] ss:$8 sps:$4 sm:$0xff]   ;;  %v2637_v15 = vld [vmem:[%s4043_s1 + $0x430] ss:$8 sps:$4 sm:$0xff]   ;;  %v2640_v17 = vld [vmem:[%s4043_s1 + $0x444] ss:$8 sps:$4 sm:$0xff]  }
   0x7   :  { %1868 = vmatpush1.bf16.msra.mxu1 %v2624_v6  ;;  %v2642_v18 = vld [vmem:[%s4043_s1 + $0x40] ss:$8 sps:$4 sm:$0xff]   ;;  %v2644_v20 = vld [vmem:[%s4043_s1 + $0x54] ss:$8 sps:$4 sm:$0xff]   ;;  %v2648_v22 = vld [vmem:[%s4043_s1 + $0x50] ss:$8 sps:$4 sm:$0xff]  }
   0x8   :  { %2040 = vmatpush1.bf16.msra.mxu0 %v2625_v7  ;;  %1869 = vmatprep.subr.bf16.mxu1 %v2626_v8  ;;  %v2643_v19 = vld [vmem:[%s4043_s1 + $0x440] ss:$8 sps:$4 sm:$0xff]   ;;  %v2646_v21 = vld [vmem:[%s4043_s1 + $0x454] ss:$8 sps:$4 sm:$0xff]   ;;  %v2649_v23 = vld [vmem:[%s4043_s1 + $0x450] ss:$8 sps:$4 sm:$0xff]  }
   0x9   :  { %2041 = vmatprep.subr.bf16.mxu0 %v2628_v9  ;;  %v2650_v24 = vld [vmem:[%s4043_s1 + $0x64] ss:$8 sps:$4 sm:$0xff]   ;;  %v2654_v26 = vld [vmem:[%s4043_s1 + $0x60] ss:$8 sps:$4 sm:$0xff]   ;;  %v2656_v28 = vld [vmem:[%s4043_s1 + $0x74] ss:$8 sps:$4 sm:$0xff]  }
   0xa   :  { %v2652_v25 = vld [vmem:[%s4043_s1 + $0x464] ss:$8 sps:$4 sm:$0xff]   ;;  %v2655_v27 = vld [vmem:[%s4043_s1 + $0x460] ss:$8 sps:$4 sm:$0xff]   ;;  %v2658_v29 = vld [vmem:[%s4043_s1 + $0x474] ss:$8 sps:$4 sm:$0xff]  }
   0xb   :  { %1870 = vmatpush1.bf16.msra.mxu1 %v2630_v10  ;;  %v2660_v30 = vld [vmem:[%s4043_s1 + $0x70] ss:$8 sps:$4 sm:$0xff]   ;;  %v2662_v32 = vld [vmem:[%s4043_s1 + $0x84] ss:$8 sps:$4 sm:$0xff]   ;;  %v2666_v34 = vld [vmem:[%s4043_s1 + $0x80] ss:$8 sps:$4 sm:$0xff]  }
   0xc   :  { %2042 = vmatpush1.bf16.msra.mxu0 %v2631_v11  ;;  %1871 = vmatprep.subr.bf16.mxu1 %v2632_v12  ;;  %v2661_v31 = vld [vmem:[%s4043_s1 + $0x470] ss:$8 sps:$4 sm:$0xff]   ;;  %v2664_v33 = vld [vmem:[%s4043_s1 + $0x484] ss:$8 sps:$4 sm:$0xff]   ;;  %v2667_v35 = vld [vmem:[%s4043_s1 + $0x480] ss:$8 sps:$4 sm:$0xff]  }
   0xd   :  { %2043 = vmatprep.subr.bf16.mxu0 %v2634_v13  ;;  %v2668_v36 = vld [vmem:[%s4043_s1 + $0x94] ss:$8 sps:$4 sm:$0xff]   ;;  %v2672_v38 = vld [vmem:[%s4043_s1 + $0x90] ss:$8 sps:$4 sm:$0xff]   ;;  %v2674_v40 = vld [vmem:[%s4043_s1 + $0xa4] ss:$8 sps:$4 sm:$0xff]  }
   0xe   :  { %v2670_v37 = vld [vmem:[%s4043_s1 + $0x494] ss:$8 sps:$4 sm:$0xff]   ;;  %v2673_v39 = vld [vmem:[%s4043_s1 + $0x490] ss:$8 sps:$4 sm:$0xff]   ;;  %v2676_v41 = vld [vmem:[%s4043_s1 + $0x4a4] ss:$8 sps:$4 sm:$0xff]  }
   0xf   :  { %1872 = vmatpush1.bf16.msra.mxu1 %v2636_v14  ;;  %v2678_v42 = vld [vmem:[%s4043_s1 + $0xa0] ss:$8 sps:$4 sm:$0xff]   ;;  %v2680_v44 = vld [vmem:[%s4043_s1 + $0xb4] ss:$8 sps:$4 sm:$0xff]   ;;  %v2684_v46 = vld [vmem:[%s4043_s1 + $0xb0] ss:$8 sps:$4 sm:$0xff]  }
  0x10   :  { %2044 = vmatpush1.bf16.msra.mxu0 %v2637_v15  ;;  %1873 = vmatprep.subr.bf16.mxu1 %v2638_v16  ;;  %v2679_v43 = vld [vmem:[%s4043_s1 + $0x4a0] ss:$8 sps:$4 sm:$0xff]   ;;  %v2682_v45 = vld [vmem:[%s4043_s1 + $0x4b4] ss:$8 sps:$4 sm:$0xff]   ;;  %v2685_v47 = vld [vmem:[%s4043_s1 + $0x4b0] ss:$8 sps:$4 sm:$0xff]  }
  0x11   :  { %2045 = vmatprep.subr.bf16.mxu0 %v2640_v17  ;;  %v2712_v48 = vld [vmem:[%s4044_s0 + $0x4] ss:$72 sps:$4 sm:$0xff]   ;;  %v2690_v52 = vld [vmem:[%s4043_s1 + $0xc0] ss:$8 sps:$4 sm:$0xff]   ;;  %v2692_v54 = vld [vmem:[%s4043_s1 + $0xd4] ss:$8 sps:$4 sm:$0xff]  }
  0x12   :  { %v2686_v49 = vld [vmem:[%s4043_s1 + $0xc4] ss:$8 sps:$4 sm:$0xff]   ;;  %1897 = vmatprep.mubr.bf16.mxu1 %v2712_v48  ;;  %v2691_v53 = vld [vmem:[%s4043_s1 + $0x4c0] ss:$8 sps:$4 sm:$0xff]   ;;  %v2694_v55 = vld [vmem:[%s4043_s1 + $0x4d4] ss:$8 sps:$4 sm:$0xff]  }
  0x13   :  { %1874 = vmatpush1.bf16.msra.mxu1 %v2642_v18  ;;  %v2688_v50 = vld [vmem:[%s4043_s1 + $0x4c4] ss:$8 sps:$4 sm:$0xff]   ;;  %v2696_v56 = vld [vmem:[%s4043_s1 + $0xd0] ss:$8 sps:$4 sm:$0xff]   ;;  %v2702_v60 = vld [vmem:[%s4043_s1 + $0xe0] ss:$8 sps:$4 sm:$0xff]  }
  0x14   :  { %2046 = vmatpush1.bf16.msra.mxu0 %v2643_v19  ;;  %1875 = vmatprep.subr.bf16.mxu1 %v2644_v20  ;;  %v2718_v51 = vld [vmem:[%s4044_s0 + $0x24] ss:$72 sps:$4 sm:$0xff]   ;;  %v2697_v57 = vld [vmem:[%s4043_s1 + $0x4d0] ss:$8 sps:$4 sm:$0xff]   ;;  %v2703_v61 = vld [vmem:[%s4043_s1 + $0x4e0] ss:$8 sps:$4 sm:$0xff]  }
  0x15   :  { %2047 = vmatprep.subr.bf16.mxu0 %v2646_v21  ;;  %2069 = vmatprep.mubr.bf16.mxu0 %v2718_v51  ;;  %v2698_v58 = vld [vmem:[%s4043_s1 + $0xe4] ss:$8 sps:$4 sm:$0xff]   ;;  %v2704_v62 = vld [vmem:[%s4043_s1 + $0xf4] ss:$8 sps:$4 sm:$0xff]   ;;  %v2708_v0 = vld [vmem:[%s4043_s1 + $0xf0] ss:$8 sps:$4 sm:$0xff]  }
  0x16   :  { %v2700_v59 = vld [vmem:[%s4043_s1 + $0x4e4] ss:$8 sps:$4 sm:$0xff]   ;;  %v2706_v63 = vld [vmem:[%s4043_s1 + $0x4f4] ss:$8 sps:$4 sm:$0xff]   ;;  %v2709_v1 = vld [vmem:[%s4043_s1 + $0x4f0] ss:$8 sps:$4 sm:$0xff]  }
  0x17   :  { %1876 = vmatpush1.bf16.msra.mxu1 %v2648_v22  ;;  %v2715_v2 = vld [vmem:[%s4043_s1 + $0x104] ss:$8 sps:$4 sm:$0xff]   ;;  %v2710_v4 = vld [vmem:[%s4044_s0] ss:$72 sps:$4 sm:$0xff]   ;;  %v2724_v8 = vld [vmem:[%s4043_s1 + $0x114] ss:$8 sps:$4 sm:$0xff]  }
  0x18   :  { %2048 = vmatpush1.bf16.msra.mxu0 %v2649_v23  ;;  %1877 = vmatprep.subr.bf16.mxu1 %v2650_v24  ;;  %v2721_v3 = vld [vmem:[%s4043_s1 + $0x504] ss:$8 sps:$4 sm:$0xff]   ;;  %v2713_v5 = vld [vmem:[%s4043_s1 + $0x100] ss:$8 sps:$4 sm:$0xff]   ;;  %v2727_v9 = vld [vmem:[%s4043_s1 + $0x514] ss:$8 sps:$4 sm:$0xff]  }
  0x19   :  { %2049 = vmatprep.subr.bf16.mxu0 %v2652_v25  ;;  %v2716_v6 = vld [vmem:[%s4044_s0 + $0x20] ss:$72 sps:$4 sm:$0xff]   ;;  %v2722_v10 = vld [vmem:[%s4043_s1 + $0x110] ss:$8 sps:$4 sm:$0xff]   ;;  %v2730_v12 = vld [vmem:[%s4043_s1 + $0x124] ss:$8 sps:$4 sm:$0xff]  }
  0x1a   :  { %v2719_v7 = vld [vmem:[%s4043_s1 + $0x500] ss:$8 sps:$4 sm:$0xff]   ;;  %v2725_v11 = vld [vmem:[%s4043_s1 + $0x510] ss:$8 sps:$4 sm:$0xff]   ;;  %v2733_v13 = vld [vmem:[%s4043_s1 + $0x524] ss:$8 sps:$4 sm:$0xff]  }
  0x1b   :  { %1878 = vmatpush1.bf16.msra.mxu1 %v2654_v26  ;;  %v2728_v14 = vld [vmem:[%s4043_s1 + $0x120] ss:$8 sps:$4 sm:$0xff]   ;;  %v2736_v16 = vld [vmem:[%s4043_s1 + $0x134] ss:$8 sps:$4 sm:$0xff]   ;;  %v2734_v18 = vld [vmem:[%s4043_s1 + $0x130] ss:$8 sps:$4 sm:$0xff]  }
  0x1c   :  { %2050 = vmatpush1.bf16.msra.mxu0 %v2655_v27  ;;  %1879 = vmatprep.subr.bf16.mxu1 %v2656_v28  ;;  %v2731_v15 = vld [vmem:[%s4043_s1 + $0x520] ss:$8 sps:$4 sm:$0xff]   ;;  %v2739_v17 = vld [vmem:[%s4043_s1 + $0x534] ss:$8 sps:$4 sm:$0xff]   ;;  %v2737_v19 = vld [vmem:[%s4043_s1 + $0x530] ss:$8 sps:$4 sm:$0xff]  }
  0x1d   :  { %2051 = vmatprep.subr.bf16.mxu0 %v2658_v29  ;;  %v2742_v20 = vld [vmem:[%s4043_s1 + $0x144] ss:$8 sps:$4 sm:$0xff]   ;;  %v2740_v22 = vld [vmem:[%s4043_s1 + $0x140] ss:$8 sps:$4 sm:$0xff]   ;;  %v2748_v24 = vld [vmem:[%s4043_s1 + $0x154] ss:$8 sps:$4 sm:$0xff]  }
  0x1e   :  { %v2745_v21 = vld [vmem:[%s4043_s1 + $0x544] ss:$8 sps:$4 sm:$0xff]   ;;  %v2743_v23 = vld [vmem:[%s4043_s1 + $0x540] ss:$8 sps:$4 sm:$0xff]   ;;  %v2751_v25 = vld [vmem:[%s4043_s1 + $0x554] ss:$8 sps:$4 sm:$0xff]  }
  0x1f   :  { %1880 = vmatpush1.bf16.msra.mxu1 %v2660_v30  ;;  %v2746_v26 = vld [vmem:[%s4043_s1 + $0x150] ss:$8 sps:$4 sm:$0xff]   ;;  %v2754_v28 = vld [vmem:[%s4043_s1 + $0x164] ss:$8 sps:$4 sm:$0xff]   ;;  %v2752_v30 = vld [vmem:[%s4043_s1 + $0x160] ss:$8 sps:$4 sm:$0xff]  }
  0x20   :  { %2052 = vmatpush1.bf16.msra.mxu0 %v2661_v31  ;;  %1881 = vmatprep.subr.bf16.mxu1 %v2662_v32  ;;  %v2749_v27 = vld [vmem:[%s4043_s1 + $0x550] ss:$8 sps:$4 sm:$0xff]   ;;  %v2757_v29 = vld [vmem:[%s4043_s1 + $0x564] ss:$8 sps:$4 sm:$0xff]   ;;  %v2755_v31 = vld [vmem:[%s4043_s1 + $0x560] ss:$8 sps:$4 sm:$0xff]  }
  0x21   :  { %2053 = vmatprep.subr.bf16.mxu0 %v2664_v33  ;;  %v2760_v32 = vld [vmem:[%s4043_s1 + $0x174] ss:$8 sps:$4 sm:$0xff]   ;;  %v2776_v48 = vld [vmem:[%s4043_s1 + $0x1a0] ss:$8 sps:$4 sm:$0xff]  }
  0x22   :  { %v2763_v33 = vld [vmem:[%s4043_s1 + $0x574] ss:$8 sps:$4 sm:$0xff]  }
  0x23   :  { %1882 = vmatpush1.bf16.msra.mxu1 %v2666_v34  ;;  %v2814_v34 = vld [vmem:[%s4044_s0 + $0xc] ss:$72 sps:$4 sm:$0xff]  }
  0x24   :  { %2054 = vmatpush1.bf16.msra.mxu0 %v2667_v35  ;;  %1883 = vmatprep.subr.bf16.mxu1 %v2668_v36  ;;  %v2758_v35 = vld [vmem:[%s4043_s1 + $0x170] ss:$8 sps:$4 sm:$0xff]   ;;  %v2787_v51 = vld [vmem:[%s4043_s1 + $0x5b4] ss:$8 sps:$4 sm:$0xff]  }
  0x25   :  { %2055 = vmatprep.subr.bf16.mxu0 %v2670_v37  ;;  %v2761_v36 = vld [vmem:[%s4043_s1 + $0x570] ss:$8 sps:$4 sm:$0xff]   ;;  %v2820_v37 = vld [vmem:[%s4044_s0 + $0x2c] ss:$72 sps:$4 sm:$0xff]  }
  0x27   :  { %1884 = vmatpush1.bf16.msra.mxu1 %v2672_v38  ;;  %v2766_v38 = vld [vmem:[%s4043_s1 + $0x184] ss:$8 sps:$4 sm:$0xff]  }
  0x28   :  { %2056 = vmatpush1.bf16.msra.mxu0 %v2673_v39  ;;  %1885 = vmatprep.subr.bf16.mxu1 %v2674_v40  ;;  %v2769_v39 = vld [vmem:[%s4043_s1 + $0x584] ss:$8 sps:$4 sm:$0xff]   ;;  %v2764_v40 = vld [vmem:[%s4043_s1 + $0x180] ss:$8 sps:$4 sm:$0xff]  }
  0x29   :  { %2057 = vmatprep.subr.bf16.mxu0 %v2676_v41  ;;  %v2767_v41 = vld [vmem:[%s4043_s1 + $0x580] ss:$8 sps:$4 sm:$0xff]  }
  0x2b   :  { %1886 = vmatpush1.bf16.msra.mxu1 %v2678_v42  ;;  %v2772_v42 = vld [vmem:[%s4043_s1 + $0x194] ss:$8 sps:$4 sm:$0xff]  }
  0x2c   :  { %2058 = vmatpush1.bf16.msra.mxu0 %v2679_v43  ;;  %1887 = vmatprep.subr.bf16.mxu1 %v2680_v44  ;;  %v2775_v43 = vld [vmem:[%s4043_s1 + $0x594] ss:$8 sps:$4 sm:$0xff]   ;;  %v2770_v44 = vld [vmem:[%s4043_s1 + $0x190] ss:$8 sps:$4 sm:$0xff]  }
  0x2d   :  { %2059 = vmatprep.subr.bf16.mxu0 %v2682_v45  ;;  %v2773_v45 = vld [vmem:[%s4043_s1 + $0x590] ss:$8 sps:$4 sm:$0xff]  }
  0x2f   :  { %1888 = vmatpush1.bf16.msra.mxu1 %v2684_v46  ;;  %v2778_v46 = vld [vmem:[%s4043_s1 + $0x1a4] ss:$8 sps:$4 sm:$0xff]  }
  0x30   :  { %2060 = vmatpush1.bf16.msra.mxu0 %v2685_v47  ;;  %1889 = vmatprep.subr.bf16.mxu1 %v2686_v49  ;;  %v2781_v47 = vld [vmem:[%s4043_s1 + $0x5a4] ss:$8 sps:$4 sm:$0xff]   ;;  %v2779_v49 = vld [vmem:[%s4043_s1 + $0x5a0] ss:$8 sps:$4 sm:$0xff]  }
  0x31   :  { %2061 = vmatprep.subr.bf16.mxu0 %v2688_v50  ;;  %v2784_v50 = vld [vmem:[%s4043_s1 + $0x1b4] ss:$8 sps:$4 sm:$0xff]  }
  0x33   :  { %1890 = vmatpush1.bf16.msra.mxu1 %v2690_v52  ;;  %v2782_v52 = vld [vmem:[%s4043_s1 + $0x1b0] ss:$8 sps:$4 sm:$0xff]  }
  0x34   :  { %2062 = vmatpush1.bf16.msra.mxu0 %v2691_v53  ;;  %1891 = vmatprep.subr.bf16.mxu1 %v2692_v54  ;;  %v2785_v53 = vld [vmem:[%s4043_s1 + $0x5b0] ss:$8 sps:$4 sm:$0xff]   ;;  %v2790_v54 = vld [vmem:[%s4043_s1 + $0x1c4] ss:$8 sps:$4 sm:$0xff]  }
  0x35   :  { %2063 = vmatprep.subr.bf16.mxu0 %v2694_v55  ;;  %v2793_v55 = vld [vmem:[%s4043_s1 + $0x5c4] ss:$8 sps:$4 sm:$0xff]  }
  0x37   :  { %1892 = vmatpush1.bf16.msra.mxu1 %v2696_v56  ;;  %v2788_v56 = vld [vmem:[%s4043_s1 + $0x1c0] ss:$8 sps:$4 sm:$0xff]  }
  0x38   :  { %2064 = vmatpush1.bf16.msra.mxu0 %v2697_v57  ;;  %1893 = vmatprep.subr.bf16.mxu1 %v2698_v58  ;;  %v2791_v57 = vld [vmem:[%s4043_s1 + $0x5c0] ss:$8 sps:$4 sm:$0xff]   ;;  %v2796_v58 = vld [vmem:[%s4043_s1 + $0x1d4] ss:$8 sps:$4 sm:$0xff]  }
  0x39   :  { %2065 = vmatprep.subr.bf16.mxu0 %v2700_v59  ;;  %v2799_v59 = vld [vmem:[%s4043_s1 + $0x5d4] ss:$8 sps:$4 sm:$0xff]  }
  0x3b   :  { %1894 = vmatpush1.bf16.msra.mxu1 %v2702_v60  ;;  %v2794_v60 = vld [vmem:[%s4043_s1 + $0x1d0] ss:$8 sps:$4 sm:$0xff]  }
  0x3c   :  { %2066 = vmatpush1.bf16.msra.mxu0 %v2703_v61  ;;  %1895 = vmatprep.subr.bf16.mxu1 %v2704_v62  ;;  %v2797_v61 = vld [vmem:[%s4043_s1 + $0x5d0] ss:$8 sps:$4 sm:$0xff]   ;;  %v2802_v62 = vld [vmem:[%s4043_s1 + $0x1e4] ss:$8 sps:$4 sm:$0xff]  }
  0x3d   :  { %2067 = vmatprep.subr.bf16.mxu0 %v2706_v63  ;;  %v2805_v63 = vld [vmem:[%s4043_s1 + $0x5e4] ss:$8 sps:$4 sm:$0xff]  }
  0x3f   :  { %1896 = vmatpush1.bf16.msra.mxu1 %v2708_v0  ;;  %v2800_v0 = vld [vmem:[%s4043_s1 + $0x1e0] ss:$8 sps:$4 sm:$0xff]  }
  0x40   :  { %2068 = vmatpush1.bf16.msra.mxu0 %v2709_v1  ;;  %1908 = vmatprep.subr.bf16.mxu1 %v2715_v2  ;;  %v2803_v1 = vld [vmem:[%s4043_s1 + $0x5e0] ss:$8 sps:$4 sm:$0xff]   ;;  %v2808_v2 = vld [vmem:[%s4043_s1 + $0x1f4] ss:$8 sps:$4 sm:$0xff]  }
  0x41   :  { %2080 = vmatprep.subr.bf16.mxu0 %v2721_v3  ;;  %v2811_v3 = vld [vmem:[%s4043_s1 + $0x5f4] ss:$8 sps:$4 sm:$0xff]  }
  0x42   :  { %1898 = vmatmul.mubr.bf16.vlgmr.msra.gmra.mrb[0].mxu1 %v2710_v4  ;;  %v2806_v4 = vld [vmem:[%s4043_s1 + $0x1f0] ss:$8 sps:$4 sm:$0xff]  }
  0x43   :  { %2070 = vmatmul.mubr.bf16.vlgmr.msra.gmra.mrb[0].mxu0 %v2716_v6  ;;  %1909 = vmatpush1.bf16.msra.mxu1 %v2713_v5  ;;  %v2809_v5 = vld [vmem:[%s4043_s1 + $0x5f0] ss:$8 sps:$4 sm:$0xff]   ;;  %v2817_v6 = vld [vmem:[%s4043_s1 + $0x204] ss:$8 sps:$4 sm:$0xff]  }
  0x44   :  { %2081 = vmatpush1.bf16.msra.mxu0 %v2719_v7  ;;  %1910 = vmatprep.subr.bf16.mxu1 %v2724_v8  ;;  %v2823_v7 = vld [vmem:[%s4043_s1 + $0x604] ss:$8 sps:$4 sm:$0xff]   ;;  %v2812_v8 = vld [vmem:[%s4044_s0 + $0x8] ss:$72 sps:$4 sm:$0xff]  }
  0x45   :  { %2082 = vmatprep.subr.bf16.mxu0 %v2727_v9  ;;  %1940 = vmatprep.mubr.bf16.mxu1 %v2814_v34  ;;  %v2815_v9 = vld [vmem:[%s4043_s1 + $0x200] ss:$8 sps:$4 sm:$0xff]   ;;  %v2856_v34 = vld [vmem:[%s4043_s1 + $0x264] ss:$8 sps:$4 sm:$0xff]  }
  0x46   :  { %2112 = vmatprep.mubr.bf16.mxu0 %v2820_v37  ;;  %v2857_v37 = vld [vmem:[%s4043_s1 + $0x660] ss:$8 sps:$4 sm:$0xff]  }
  0x47   :  { %1911 = vmatpush1.bf16.msra.mxu1 %v2722_v10  ;;  %v2818_v10 = vld [vmem:[%s4044_s0 + $0x28] ss:$72 sps:$4 sm:$0xff]  }
  0x48   :  { %2083 = vmatpush1.bf16.msra.mxu0 %v2725_v11  ;;  %1912 = vmatprep.subr.bf16.mxu1 %v2730_v12  ;;  %v2821_v11 = vld [vmem:[%s4043_s1 + $0x600] ss:$8 sps:$4 sm:$0xff]   ;;  %v2826_v12 = vld [vmem:[%s4043_s1 + $0x214] ss:$8 sps:$4 sm:$0xff]  }
  0x49   :  { %2084 = vmatprep.subr.bf16.mxu0 %v2733_v13  ;;  %v2829_v13 = vld [vmem:[%s4043_s1 + $0x614] ss:$8 sps:$4 sm:$0xff]  }
  0x4b   :  { %1913 = vmatpush1.bf16.msra.mxu1 %v2728_v14  ;;  %v2824_v14 = vld [vmem:[%s4043_s1 + $0x210] ss:$8 sps:$4 sm:$0xff]  }
  0x4c   :  { %2085 = vmatpush1.bf16.msra.mxu0 %v2731_v15  ;;  %1914 = vmatprep.subr.bf16.mxu1 %v2736_v16  ;;  %v2827_v15 = vld [vmem:[%s4043_s1 + $0x610] ss:$8 sps:$4 sm:$0xff]   ;;  %v2832_v16 = vld [vmem:[%s4043_s1 + $0x224] ss:$8 sps:$4 sm:$0xff]  }
  0x4d   :  { %2086 = vmatprep.subr.bf16.mxu0 %v2739_v17  ;;  %v2835_v17 = vld [vmem:[%s4043_s1 + $0x624] ss:$8 sps:$4 sm:$0xff]  }
  0x4f   :  { %1915 = vmatpush1.bf16.msra.mxu1 %v2734_v18  ;;  %v2830_v18 = vld [vmem:[%s4043_s1 + $0x220] ss:$8 sps:$4 sm:$0xff]  }
  0x50   :  { %2087 = vmatpush1.bf16.msra.mxu0 %v2737_v19  ;;  %1916 = vmatprep.subr.bf16.mxu1 %v2742_v20  ;;  %v2916_v19 = vld [vmem:[%s4044_s0 + $0x14] ss:$72 sps:$4 sm:$0xff]   ;;  %v2833_v20 = vld [vmem:[%s4043_s1 + $0x620] ss:$8 sps:$4 sm:$0xff]  }
  0x51   :  { %2088 = vmatprep.subr.bf16.mxu0 %v2745_v21  ;;  %v2838_v21 = vld [vmem:[%s4043_s1 + $0x234] ss:$8 sps:$4 sm:$0xff]  }
  0x53   :  { %1917 = vmatpush1.bf16.msra.mxu1 %v2740_v22  ;;  %v2841_v22 = vld [vmem:[%s4043_s1 + $0x634] ss:$8 sps:$4 sm:$0xff]  }
  0x54   :  { %2089 = vmatpush1.bf16.msra.mxu0 %v2743_v23  ;;  %1918 = vmatprep.subr.bf16.mxu1 %v2748_v24  ;;  %v2922_v23 = vld [vmem:[%s4044_s0 + $0x34] ss:$72 sps:$4 sm:$0xff]   ;;  %v2836_v24 = vld [vmem:[%s4043_s1 + $0x230] ss:$8 sps:$4 sm:$0xff]  }
  0x55   :  { %2090 = vmatprep.subr.bf16.mxu0 %v2751_v25  ;;  %v2839_v25 = vld [vmem:[%s4043_s1 + $0x630] ss:$8 sps:$4 sm:$0xff]  }
  0x57   :  { %1919 = vmatpush1.bf16.msra.mxu1 %v2746_v26  ;;  %v2844_v26 = vld [vmem:[%s4043_s1 + $0x244] ss:$8 sps:$4 sm:$0xff]  }
  0x58   :  { %2091 = vmatpush1.bf16.msra.mxu0 %v2749_v27  ;;  %1920 = vmatprep.subr.bf16.mxu1 %v2754_v28  ;;  %v2847_v27 = vld [vmem:[%s4043_s1 + $0x644] ss:$8 sps:$4 sm:$0xff]   ;;  %v2842_v28 = vld [vmem:[%s4043_s1 + $0x240] ss:$8 sps:$4 sm:$0xff]  }
  0x59   :  { %2092 = vmatprep.subr.bf16.mxu0 %v2757_v29  ;;  %v2845_v29 = vld [vmem:[%s4043_s1 + $0x640] ss:$8 sps:$4 sm:$0xff]  }
  0x5b   :  { %1921 = vmatpush1.bf16.msra.mxu1 %v2752_v30  ;;  %v2850_v30 = vld [vmem:[%s4043_s1 + $0x254] ss:$8 sps:$4 sm:$0xff]  }
  0x5c   :  { %2093 = vmatpush1.bf16.msra.mxu0 %v2755_v31  ;;  %1922 = vmatprep.subr.bf16.mxu1 %v2760_v32  ;;  %v2853_v31 = vld [vmem:[%s4043_s1 + $0x654] ss:$8 sps:$4 sm:$0xff]   ;;  %v2848_v32 = vld [vmem:[%s4043_s1 + $0x250] ss:$8 sps:$4 sm:$0xff]  }
  0x5d   :  { %2094 = vmatprep.subr.bf16.mxu0 %v2763_v33  ;;  %v2851_v33 = vld [vmem:[%s4043_s1 + $0x650] ss:$8 sps:$4 sm:$0xff]  }
  0x5f   :  { %1923 = vmatpush1.bf16.msra.mxu1 %v2758_v35  ;;  %v2859_v35 = vld [vmem:[%s4043_s1 + $0x664] ss:$8 sps:$4 sm:$0xff]  }
  0x60   :  { %2095 = vmatpush1.bf16.msra.mxu0 %v2761_v36  ;;  %1924 = vmatprep.subr.bf16.mxu1 %v2766_v38  ;;  %v2854_v36 = vld [vmem:[%s4043_s1 + $0x260] ss:$8 sps:$4 sm:$0xff]   ;;  %v2862_v38 = vld [vmem:[%s4043_s1 + $0x274] ss:$8 sps:$4 sm:$0xff]  }
  0x61   :  { %2096 = vmatprep.subr.bf16.mxu0 %v2769_v39  ;;  %v2865_v39 = vld [vmem:[%s4043_s1 + $0x674] ss:$8 sps:$4 sm:$0xff]  }
  0x63   :  { %1925 = vmatpush1.bf16.msra.mxu1 %v2764_v40  ;;  %v2860_v40 = vld [vmem:[%s4043_s1 + $0x270] ss:$8 sps:$4 sm:$0xff]  }
  0x64   :  { %2097 = vmatpush1.bf16.msra.mxu0 %v2767_v41  ;;  %1926 = vmatprep.subr.bf16.mxu1 %v2772_v42  ;;  %v2863_v41 = vld [vmem:[%s4043_s1 + $0x670] ss:$8 sps:$4 sm:$0xff]   ;;  %v2868_v42 = vld [vmem:[%s4043_s1 + $0x284] ss:$8 sps:$4 sm:$0xff]  }
  0x65   :  { %2098 = vmatprep.subr.bf16.mxu0 %v2775_v43  ;;  %v2871_v43 = vld [vmem:[%s4043_s1 + $0x684] ss:$8 sps:$4 sm:$0xff]  }
  0x67   :  { %1927 = vmatpush1.bf16.msra.mxu1 %v2770_v44  ;;  %v2866_v44 = vld [vmem:[%s4043_s1 + $0x280] ss:$8 sps:$4 sm:$0xff]  }
  0x68   :  { %2099 = vmatpush1.bf16.msra.mxu0 %v2773_v45  ;;  %1928 = vmatprep.subr.bf16.mxu1 %v2778_v46  ;;  %v2869_v45 = vld [vmem:[%s4043_s1 + $0x680] ss:$8 sps:$4 sm:$0xff]   ;;  %v2874_v46 = vld [vmem:[%s4043_s1 + $0x294] ss:$8 sps:$4 sm:$0xff]  }
  0x69   :  { %2100 = vmatprep.subr.bf16.mxu0 %v2781_v47  ;;  %v2877_v47 = vld [vmem:[%s4043_s1 + $0x694] ss:$8 sps:$4 sm:$0xff]  }
  0x6b   :  { %1929 = vmatpush1.bf16.msra.mxu1 %v2776_v48  ;;  %v2872_v48 = vld [vmem:[%s4043_s1 + $0x290] ss:$8 sps:$4 sm:$0xff]  }
  0x6c   :  { %2101 = vmatpush1.bf16.msra.mxu0 %v2779_v49  ;;  %1930 = vmatprep.subr.bf16.mxu1 %v2784_v50  ;;  %v2875_v49 = vld [vmem:[%s4043_s1 + $0x690] ss:$8 sps:$4 sm:$0xff]   ;;  %v2880_v50 = vld [vmem:[%s4043_s1 + $0x2a4] ss:$8 sps:$4 sm:$0xff]  }
  0x6d   :  { %2102 = vmatprep.subr.bf16.mxu0 %v2787_v51  ;;  %v2883_v51 = vld [vmem:[%s4043_s1 + $0x6a4] ss:$8 sps:$4 sm:$0xff]  }
  0x6f   :  { %1931 = vmatpush1.bf16.msra.mxu1 %v2782_v52  ;;  %v2878_v52 = vld [vmem:[%s4043_s1 + $0x2a0] ss:$8 sps:$4 sm:$0xff]  }
  0x70   :  { %2103 = vmatpush1.bf16.msra.mxu0 %v2785_v53  ;;  %1932 = vmatprep.subr.bf16.mxu1 %v2790_v54  ;;  %v2881_v53 = vld [vmem:[%s4043_s1 + $0x6a0] ss:$8 sps:$4 sm:$0xff]   ;;  %v2886_v54 = vld [vmem:[%s4043_s1 + $0x2b4] ss:$8 sps:$4 sm:$0xff]  }
  0x71   :  { %2104 = vmatprep.subr.bf16.mxu0 %v2793_v55  ;;  %v2889_v55 = vld [vmem:[%s4043_s1 + $0x6b4] ss:$8 sps:$4 sm:$0xff]  }
  0x73   :  { %1933 = vmatpush1.bf16.msra.mxu1 %v2788_v56  ;;  %v2884_v56 = vld [vmem:[%s4043_s1 + $0x2b0] ss:$8 sps:$4 sm:$0xff]  }
  0x74   :  { %2105 = vmatpush1.bf16.msra.mxu0 %v2791_v57  ;;  %1934 = vmatprep.subr.bf16.mxu1 %v2796_v58  ;;  %v2887_v57 = vld [vmem:[%s4043_s1 + $0x6b0] ss:$8 sps:$4 sm:$0xff]   ;;  %v2892_v58 = vld [vmem:[%s4043_s1 + $0x2c4] ss:$8 sps:$4 sm:$0xff]  }
  0x75   :  { %2106 = vmatprep.subr.bf16.mxu0 %v2799_v59  ;;  %v2895_v59 = vld [vmem:[%s4043_s1 + $0x6c4] ss:$8 sps:$4 sm:$0xff]  }
  0x77   :  { %1935 = vmatpush1.bf16.msra.mxu1 %v2794_v60  ;;  %v2890_v60 = vld [vmem:[%s4043_s1 + $0x2c0] ss:$8 sps:$4 sm:$0xff]  }
  0x78   :  { %2107 = vmatpush1.bf16.msra.mxu0 %v2797_v61  ;;  %1936 = vmatprep.subr.bf16.mxu1 %v2802_v62  ;;  %v2893_v61 = vld [vmem:[%s4043_s1 + $0x6c0] ss:$8 sps:$4 sm:$0xff]   ;;  %v2898_v62 = vld [vmem:[%s4043_s1 + $0x2d4] ss:$8 sps:$4 sm:$0xff]  }
  0x79   :  { %2108 = vmatprep.subr.bf16.mxu0 %v2805_v63  ;;  %v2901_v63 = vld [vmem:[%s4043_s1 + $0x6d4] ss:$8 sps:$4 sm:$0xff]  }
  0x7b   :  { %1937 = vmatpush1.bf16.msra.mxu1 %v2800_v0  ;;  %v2896_v0 = vld [vmem:[%s4043_s1 + $0x2d0] ss:$8 sps:$4 sm:$0xff]  }
  0x7c   :  { %2109 = vmatpush1.bf16.msra.mxu0 %v2803_v1  ;;  %1938 = vmatprep.subr.bf16.mxu1 %v2808_v2  ;;  %v2899_v1 = vld [vmem:[%s4043_s1 + $0x6d0] ss:$8 sps:$4 sm:$0xff]   ;;  %v2904_v2 = vld [vmem:[%s4043_s1 + $0x2e4] ss:$8 sps:$4 sm:$0xff]  }
  0x7d   :  { %2110 = vmatprep.subr.bf16.mxu0 %v2811_v3  ;;  %v2907_v3 = vld [vmem:[%s4043_s1 + $0x6e4] ss:$8 sps:$4 sm:$0xff]  }
  0x7f   :  { %1939 = vmatpush1.bf16.msra.mxu1 %v2806_v4  ;;  %v2902_v4 = vld [vmem:[%s4043_s1 + $0x2e0] ss:$8 sps:$4 sm:$0xff]  }
  0x80   :  { %2111 = vmatpush1.bf16.msra.mxu0 %v2809_v5  ;;  %1951 = vmatprep.subr.bf16.mxu1 %v2817_v6  ;;  %v2905_v5 = vld [vmem:[%s4043_s1 + $0x6e0] ss:$8 sps:$4 sm:$0xff]   ;;  %v2910_v6 = vld [vmem:[%s4043_s1 + $0x2f4] ss:$8 sps:$4 sm:$0xff]  }
  0x81   :  { %2123 = vmatprep.subr.bf16.mxu0 %v2823_v7  ;;  %v2913_v7 = vld [vmem:[%s4043_s1 + $0x6f4] ss:$8 sps:$4 sm:$0xff]  }
  0x82   :  { %1941 = vmatmul.mubr.bf16.vlgmr.msra.gmra.mrb[0].mxu1 %v2812_v8  ;;  %v2908_v8 = vld [vmem:[%s4043_s1 + $0x2f0] ss:$8 sps:$4 sm:$0xff]  }
  0x83   :  { %2113 = vmatmul.mubr.bf16.vlgmr.msra.gmra.mrb[0].mxu0 %v2818_v10  ;;  %1952 = vmatpush1.bf16.msra.mxu1 %v2815_v9  ;;  %v2911_v9 = vld [vmem:[%s4043_s1 + $0x6f0] ss:$8 sps:$4 sm:$0xff]   ;;  %v2919_v10 = vld [vmem:[%s4043_s1 + $0x304] ss:$8 sps:$4 sm:$0xff]  }
  0x84   :  { %2124 = vmatpush1.bf16.msra.mxu0 %v2821_v11  ;;  %1953 = vmatprep.subr.bf16.mxu1 %v2826_v12  ;;  %v2925_v11 = vld [vmem:[%s4043_s1 + $0x704] ss:$8 sps:$4 sm:$0xff]   ;;  %v2914_v12 = vld [vmem:[%s4044_s0 + $0x10] ss:$72 sps:$4 sm:$0xff]  }
  0x85   :  { %2125 = vmatprep.subr.bf16.mxu0 %v2829_v13  ;;  %1983 = vmatprep.mubr.bf16.mxu1 %v2916_v19  ;;  %v2917_v13 = vld [vmem:[%s4043_s1 + $0x300] ss:$8 sps:$4 sm:$0xff]   ;;  %v3021_v19 = vld [vmem:[%s4044_s0 + $0x3c] ss:$72 sps:$4 sm:$0xff]  }
  0x86   :  { %2155 = vmatprep.mubr.bf16.mxu0 %v2922_v23  ;;  %v2937_v23 = vld [vmem:[%s4043_s1 + $0x724] ss:$8 sps:$4 sm:$0xff]  }
  0x87   :  { %1954 = vmatpush1.bf16.msra.mxu1 %v2824_v14  ;;  %v2920_v14 = vld [vmem:[%s4044_s0 + $0x30] ss:$72 sps:$4 sm:$0xff]  }
  0x88   :  { %2126 = vmatpush1.bf16.msra.mxu0 %v2827_v15  ;;  %1955 = vmatprep.subr.bf16.mxu1 %v2832_v16  ;;  %v2923_v15 = vld [vmem:[%s4043_s1 + $0x700] ss:$8 sps:$4 sm:$0xff]   ;;  %v2928_v16 = vld [vmem:[%s4043_s1 + $0x314] ss:$8 sps:$4 sm:$0xff]  }
  0x89   :  { %2127 = vmatprep.subr.bf16.mxu0 %v2835_v17  ;;  %v2931_v17 = vld [vmem:[%s4043_s1 + $0x714] ss:$8 sps:$4 sm:$0xff]  }
  0x8b   :  { %1956 = vmatpush1.bf16.msra.mxu1 %v2830_v18  ;;  %v3018_v18 = vld [vmem:[%s4044_s0 + $0x1c] ss:$72 sps:$4 sm:$0xff]  }
  0x8c   :  { %2128 = vmatpush1.bf16.msra.mxu0 %v2833_v20  ;;  %1957 = vmatprep.subr.bf16.mxu1 %v2838_v21  ;;  %v2926_v20 = vld [vmem:[%s4043_s1 + $0x310] ss:$8 sps:$4 sm:$0xff]  }
  0x8d   :  { %2129 = vmatprep.subr.bf16.mxu0 %v2841_v22  ;;  %v2929_v21 = vld [vmem:[%s4043_s1 + $0x710] ss:$8 sps:$4 sm:$0xff]   ;;  %v2934_v22 = vld [vmem:[%s4043_s1 + $0x324] ss:$8 sps:$4 sm:$0xff]  }
  0x8f   :  { %1958 = vmatpush1.bf16.msra.mxu1 %v2836_v24  ;;  %v2932_v24 = vld [vmem:[%s4043_s1 + $0x320] ss:$8 sps:$4 sm:$0xff]  }
  0x90   :  { %2130 = vmatpush1.bf16.msra.mxu0 %v2839_v25  ;;  %1959 = vmatprep.subr.bf16.mxu1 %v2844_v26  ;;  %v2935_v25 = vld [vmem:[%s4043_s1 + $0x720] ss:$8 sps:$4 sm:$0xff]   ;;  %v2940_v26 = vld [vmem:[%s4043_s1 + $0x334] ss:$8 sps:$4 sm:$0xff]  }
  0x91   :  { %2131 = vmatprep.subr.bf16.mxu0 %v2847_v27  ;;  %v2943_v27 = vld [vmem:[%s4043_s1 + $0x734] ss:$8 sps:$4 sm:$0xff]  }
  0x93   :  { %1960 = vmatpush1.bf16.msra.mxu1 %v2842_v28  ;;  %v2938_v28 = vld [vmem:[%s4043_s1 + $0x330] ss:$8 sps:$4 sm:$0xff]  }
  0x94   :  { %2132 = vmatpush1.bf16.msra.mxu0 %v2845_v29  ;;  %1961 = vmatprep.subr.bf16.mxu1 %v2850_v30  ;;  %v2941_v29 = vld [vmem:[%s4043_s1 + $0x730] ss:$8 sps:$4 sm:$0xff]   ;;  %v2946_v30 = vld [vmem:[%s4043_s1 + $0x344] ss:$8 sps:$4 sm:$0xff]  }
  0x95   :  { %2133 = vmatprep.subr.bf16.mxu0 %v2853_v31  ;;  %v2949_v31 = vld [vmem:[%s4043_s1 + $0x744] ss:$8 sps:$4 sm:$0xff]  }
  0x97   :  { %1962 = vmatpush1.bf16.msra.mxu1 %v2848_v32  ;;  %v2944_v32 = vld [vmem:[%s4043_s1 + $0x340] ss:$8 sps:$4 sm:$0xff]  }
  0x98   :  { %2134 = vmatpush1.bf16.msra.mxu0 %v2851_v33  ;;  %1963 = vmatprep.subr.bf16.mxu1 %v2856_v34  ;;  %v2947_v33 = vld [vmem:[%s4043_s1 + $0x740] ss:$8 sps:$4 sm:$0xff]   ;;  %v2952_v34 = vld [vmem:[%s4043_s1 + $0x354] ss:$8 sps:$4 sm:$0xff]  }
  0x99   :  { %2135 = vmatprep.subr.bf16.mxu0 %v2859_v35  ;;  %v2955_v35 = vld [vmem:[%s4043_s1 + $0x754] ss:$8 sps:$4 sm:$0xff]  }
  0x9b   :  { %1964 = vmatpush1.bf16.msra.mxu1 %v2854_v36  ;;  %v2950_v36 = vld [vmem:[%s4043_s1 + $0x350] ss:$8 sps:$4 sm:$0xff]  }
  0x9c   :  { %2136 = vmatpush1.bf16.msra.mxu0 %v2857_v37  ;;  %1965 = vmatprep.subr.bf16.mxu1 %v2862_v38  ;;  %v2953_v37 = vld [vmem:[%s4043_s1 + $0x750] ss:$8 sps:$4 sm:$0xff]   ;;  %v2958_v38 = vld [vmem:[%s4043_s1 + $0x364] ss:$8 sps:$4 sm:$0xff]  }
  0x9d   :  { %2137 = vmatprep.subr.bf16.mxu0 %v2865_v39  ;;  %v2961_v39 = vld [vmem:[%s4043_s1 + $0x764] ss:$8 sps:$4 sm:$0xff]  }
  0x9f   :  { %1966 = vmatpush1.bf16.msra.mxu1 %v2860_v40  ;;  %v2956_v40 = vld [vmem:[%s4043_s1 + $0x360] ss:$8 sps:$4 sm:$0xff]  }
  0xa0   :  { %2138 = vmatpush1.bf16.msra.mxu0 %v2863_v41  ;;  %1967 = vmatprep.subr.bf16.mxu1 %v2868_v42  ;;  %v2959_v41 = vld [vmem:[%s4043_s1 + $0x760] ss:$8 sps:$4 sm:$0xff]   ;;  %v2964_v42 = vld [vmem:[%s4043_s1 + $0x374] ss:$8 sps:$4 sm:$0xff]  }
  0xa1   :  { %2139 = vmatprep.subr.bf16.mxu0 %v2871_v43  ;;  %v2967_v43 = vld [vmem:[%s4043_s1 + $0x774] ss:$8 sps:$4 sm:$0xff]  }
  0xa3   :  { %1968 = vmatpush1.bf16.msra.mxu1 %v2866_v44  ;;  %v2962_v44 = vld [vmem:[%s4043_s1 + $0x370] ss:$8 sps:$4 sm:$0xff]  }
  0xa4   :  { %2140 = vmatpush1.bf16.msra.mxu0 %v2869_v45  ;;  %1969 = vmatprep.subr.bf16.mxu1 %v2874_v46  ;;  %v2965_v45 = vld [vmem:[%s4043_s1 + $0x770] ss:$8 sps:$4 sm:$0xff]   ;;  %v2970_v46 = vld [vmem:[%s4043_s1 + $0x384] ss:$8 sps:$4 sm:$0xff]  }
  0xa5   :  { %2141 = vmatprep.subr.bf16.mxu0 %v2877_v47  ;;  %v2973_v47 = vld [vmem:[%s4043_s1 + $0x784] ss:$8 sps:$4 sm:$0xff]  }
  0xa7   :  { %1970 = vmatpush1.bf16.msra.mxu1 %v2872_v48  ;;  %v2968_v48 = vld [vmem:[%s4043_s1 + $0x380] ss:$8 sps:$4 sm:$0xff]  }
  0xa8   :  { %2142 = vmatpush1.bf16.msra.mxu0 %v2875_v49  ;;  %1971 = vmatprep.subr.bf16.mxu1 %v2880_v50  ;;  %v2971_v49 = vld [vmem:[%s4043_s1 + $0x780] ss:$8 sps:$4 sm:$0xff]   ;;  %v2976_v50 = vld [vmem:[%s4043_s1 + $0x394] ss:$8 sps:$4 sm:$0xff]  }
  0xa9   :  { %2143 = vmatprep.subr.bf16.mxu0 %v2883_v51  ;;  %v2979_v51 = vld [vmem:[%s4043_s1 + $0x794] ss:$8 sps:$4 sm:$0xff]  }
  0xab   :  { %1972 = vmatpush1.bf16.msra.mxu1 %v2878_v52  ;;  %v2974_v52 = vld [vmem:[%s4043_s1 + $0x390] ss:$8 sps:$4 sm:$0xff]  }
  0xac   :  { %2144 = vmatpush1.bf16.msra.mxu0 %v2881_v53  ;;  %1973 = vmatprep.subr.bf16.mxu1 %v2886_v54  ;;  %v2977_v53 = vld [vmem:[%s4043_s1 + $0x790] ss:$8 sps:$4 sm:$0xff]   ;;  %v2982_v54 = vld [vmem:[%s4043_s1 + $0x3a4] ss:$8 sps:$4 sm:$0xff]  }
  0xad   :  { %2145 = vmatprep.subr.bf16.mxu0 %v2889_v55  ;;  %v2985_v55 = vld [vmem:[%s4043_s1 + $0x7a4] ss:$8 sps:$4 sm:$0xff]  }
  0xaf   :  { %1974 = vmatpush1.bf16.msra.mxu1 %v2884_v56  ;;  %v2980_v56 = vld [vmem:[%s4043_s1 + $0x3a0] ss:$8 sps:$4 sm:$0xff]  }
  0xb0   :  { %2146 = vmatpush1.bf16.msra.mxu0 %v2887_v57  ;;  %1975 = vmatprep.subr.bf16.mxu1 %v2892_v58  ;;  %v2983_v57 = vld [vmem:[%s4043_s1 + $0x7a0] ss:$8 sps:$4 sm:$0xff]   ;;  %v2988_v58 = vld [vmem:[%s4043_s1 + $0x3b4] ss:$8 sps:$4 sm:$0xff]  }
  0xb1   :  { %2147 = vmatprep.subr.bf16.mxu0 %v2895_v59  ;;  %v2991_v59 = vld [vmem:[%s4043_s1 + $0x7b4] ss:$8 sps:$4 sm:$0xff]  }
  0xb3   :  { %1976 = vmatpush1.bf16.msra.mxu1 %v2890_v60  ;;  %v2986_v60 = vld [vmem:[%s4043_s1 + $0x3b0] ss:$8 sps:$4 sm:$0xff]  }
  0xb4   :  { %2148 = vmatpush1.bf16.msra.mxu0 %v2893_v61  ;;  %1977 = vmatprep.subr.bf16.mxu1 %v2898_v62  ;;  %v2989_v61 = vld [vmem:[%s4043_s1 + $0x7b0] ss:$8 sps:$4 sm:$0xff]   ;;  %v2994_v62 = vld [vmem:[%s4043_s1 + $0x3c4] ss:$8 sps:$4 sm:$0xff]  }
  0xb5   :  { %2149 = vmatprep.subr.bf16.mxu0 %v2901_v63  ;;  %v2997_v63 = vld [vmem:[%s4043_s1 + $0x7c4] ss:$8 sps:$4 sm:$0xff]  }
  0xb7   :  { %1978 = vmatpush1.bf16.msra.mxu1 %v2896_v0  ;;  %v2992_v0 = vld [vmem:[%s4043_s1 + $0x3c0] ss:$8 sps:$4 sm:$0xff]  }
  0xb8   :  { %2150 = vmatpush1.bf16.msra.mxu0 %v2899_v1  ;;  %1979 = vmatprep.subr.bf16.mxu1 %v2904_v2  ;;  %v2995_v1 = vld [vmem:[%s4043_s1 + $0x7c0] ss:$8 sps:$4 sm:$0xff]   ;;  %v3000_v2 = vld [vmem:[%s4043_s1 + $0x3d4] ss:$8 sps:$4 sm:$0xff]  }
  0xb9   :  { %2151 = vmatprep.subr.bf16.mxu0 %v2907_v3  ;;  %v3003_v3 = vld [vmem:[%s4043_s1 + $0x7d4] ss:$8 sps:$4 sm:$0xff]  }
  0xbb   :  { %1980 = vmatpush1.bf16.msra.mxu1 %v2902_v4  ;;  %v2998_v4 = vld [vmem:[%s4043_s1 + $0x3d0] ss:$8 sps:$4 sm:$0xff]  }
  0xbc   :  { %2152 = vmatpush1.bf16.msra.mxu0 %v2905_v5  ;;  %1981 = vmatprep.subr.bf16.mxu1 %v2910_v6  ;;  %v3001_v5 = vld [vmem:[%s4043_s1 + $0x7d0] ss:$8 sps:$4 sm:$0xff]   ;;  %v3006_v6 = vld [vmem:[%s4043_s1 + $0x3e4] ss:$8 sps:$4 sm:$0xff]  }
  0xbd   :  { %2153 = vmatprep.subr.bf16.mxu0 %v2913_v7  ;;  %v3009_v7 = vld [vmem:[%s4043_s1 + $0x7e4] ss:$8 sps:$4 sm:$0xff]  }
  0xbf   :  { %1982 = vmatpush1.bf16.msra.mxu1 %v2908_v8  ;;  %v3004_v8 = vld [vmem:[%s4043_s1 + $0x3e0] ss:$8 sps:$4 sm:$0xff]  }
  0xc0   :  { %2154 = vmatpush1.bf16.msra.mxu0 %v2911_v9  ;;  %1994 = vmatprep.subr.bf16.mxu1 %v2919_v10  ;;  %v3007_v9 = vld [vmem:[%s4043_s1 + $0x7e0] ss:$8 sps:$4 sm:$0xff]   ;;  %v3012_v10 = vld [vmem:[%s4043_s1 + $0x3f4] ss:$8 sps:$4 sm:$0xff]  }
  0xc1   :  { %2166 = vmatprep.subr.bf16.mxu0 %v2925_v11  ;;  %v3015_v11 = vld [vmem:[%s4043_s1 + $0x7f4] ss:$8 sps:$4 sm:$0xff]  }
  0xc2   :  { %1984 = vmatmul.mubr.bf16.vlgmr.msra.gmra.mrb[0].mxu1 %v2914_v12  ;;  %v3010_v12 = vld [vmem:[%s4043_s1 + $0x3f0] ss:$8 sps:$4 sm:$0xff]  }
  0xc3   :  { %2156 = vmatmul.mubr.bf16.vlgmr.msra.gmra.mrb[0].mxu0 %v2920_v14  ;;  %1995 = vmatpush1.bf16.msra.mxu1 %v2917_v13  ;;  %v3013_v13 = vld [vmem:[%s4043_s1 + $0x7f0] ss:$8 sps:$4 sm:$0xff]   ;;  %v3024_v14 = vld [vmem:[%s4043_s1 + $0x804] ss:$8 sps:$4 sm:$0xff]  }
  0xc4   :  { %2167 = vmatpush1.bf16.msra.mxu0 %v2923_v15  ;;  %1996 = vmatprep.subr.bf16.mxu1 %v2928_v16  ;;  %v3016_v15 = vld [vmem:[%s4044_s0 + $0x18] ss:$72 sps:$4 sm:$0xff]  }
  0xc5   :  { %2168 = vmatprep.subr.bf16.mxu0 %v2931_v17  ;;  %2026 = vmatprep.mubr.bf16.mxu1 %v3018_v18  ;;  %v3019_v16 = vld [vmem:[%s4044_s0 + $0x38] ss:$72 sps:$4 sm:$0xff]   ;;  %v3072_v18 = vld [vmem:[%s4044_s0 + $0x44] ss:$72 sps:$4 sm:$0xff]  }
  0xc6   :  { %2198 = vmatprep.mubr.bf16.mxu0 %v3021_v19  ;;  %v3022_v17 = vld [vmem:[%s4043_s1 + $0x800] ss:$8 sps:$4 sm:$0xff]   ;;  %v3027_v19 = vld [vmem:[%s4043_s1 + $0x814] ss:$8 sps:$4 sm:$0xff]  }
  0xc7   :  { %1997 = vmatpush1.bf16.msra.mxu1 %v2926_v20  ;;  %v3025_v20 = vld [vmem:[%s4043_s1 + $0x810] ss:$8 sps:$4 sm:$0xff]  }
  0xc8   :  { %2169 = vmatpush1.bf16.msra.mxu0 %v2929_v21  ;;  %1998 = vmatprep.subr.bf16.mxu1 %v2934_v22  ;;  %v3030_v21 = vld [vmem:[%s4043_s1 + $0x824] ss:$8 sps:$4 sm:$0xff]   ;;  %v3028_v22 = vld [vmem:[%s4043_s1 + $0x820] ss:$8 sps:$4 sm:$0xff]  }
  0xc9   :  { %2170 = vmatprep.subr.bf16.mxu0 %v2937_v23  ;;  %v3033_v23 = vld [vmem:[%s4043_s1 + $0x834] ss:$8 sps:$4 sm:$0xff]  }
  0xcb   :  { %1999 = vmatpush1.bf16.msra.mxu1 %v2932_v24  ;;  %v3031_v24 = vld [vmem:[%s4043_s1 + $0x830] ss:$8 sps:$4 sm:$0xff]  }
  0xcc   :  { %2171 = vmatpush1.bf16.msra.mxu0 %v2935_v25  ;;  %2000 = vmatprep.subr.bf16.mxu1 %v2940_v26  ;;  %v3036_v25 = vld [vmem:[%s4043_s1 + $0x844] ss:$8 sps:$4 sm:$0xff]   ;;  %v3034_v26 = vld [vmem:[%s4043_s1 + $0x840] ss:$8 sps:$4 sm:$0xff]  }
  0xcd   :  { %2172 = vmatprep.subr.bf16.mxu0 %v2943_v27  ;;  %v3039_v27 = vld [vmem:[%s4043_s1 + $0x854] ss:$8 sps:$4 sm:$0xff]  }
  0xcf   :  { %2001 = vmatpush1.bf16.msra.mxu1 %v2938_v28  ;;  %v3037_v28 = vld [vmem:[%s4043_s1 + $0x850] ss:$8 sps:$4 sm:$0xff]  }
  0xd0   :  { %2173 = vmatpush1.bf16.msra.mxu0 %v2941_v29  ;;  %2002 = vmatprep.subr.bf16.mxu1 %v2946_v30  ;;  %v3042_v29 = vld [vmem:[%s4043_s1 + $0x864] ss:$8 sps:$4 sm:$0xff]   ;;  %v3040_v30 = vld [vmem:[%s4043_s1 + $0x860] ss:$8 sps:$4 sm:$0xff]  }
  0xd1   :  { %2174 = vmatprep.subr.bf16.mxu0 %v2949_v31  ;;  %v3045_v31 = vld [vmem:[%s4043_s1 + $0x874] ss:$8 sps:$4 sm:$0xff]  }
  0xd3   :  { %2003 = vmatpush1.bf16.msra.mxu1 %v2944_v32  ;;  %v3043_v32 = vld [vmem:[%s4043_s1 + $0x870] ss:$8 sps:$4 sm:$0xff]  }
  0xd4   :  { %2175 = vmatpush1.bf16.msra.mxu0 %v2947_v33  ;;  %2004 = vmatprep.subr.bf16.mxu1 %v2952_v34  ;;  %v3048_v33 = vld [vmem:[%s4043_s1 + $0x884] ss:$8 sps:$4 sm:$0xff]   ;;  %v3046_v34 = vld [vmem:[%s4043_s1 + $0x880] ss:$8 sps:$4 sm:$0xff]  }
  0xd5   :  { %2176 = vmatprep.subr.bf16.mxu0 %v2955_v35  ;;  %v3051_v35 = vld [vmem:[%s4043_s1 + $0x894] ss:$8 sps:$4 sm:$0xff]  }
  0xd7   :  { %2005 = vmatpush1.bf16.msra.mxu1 %v2950_v36  ;;  %v3049_v36 = vld [vmem:[%s4043_s1 + $0x890] ss:$8 sps:$4 sm:$0xff]  }
  0xd8   :  { %2177 = vmatpush1.bf16.msra.mxu0 %v2953_v37  ;;  %2006 = vmatprep.subr.bf16.mxu1 %v2958_v38  ;;  %v3054_v37 = vld [vmem:[%s4043_s1 + $0x8a4] ss:$8 sps:$4 sm:$0xff]   ;;  %v3052_v38 = vld [vmem:[%s4043_s1 + $0x8a0] ss:$8 sps:$4 sm:$0xff]  }
  0xd9   :  { %2178 = vmatprep.subr.bf16.mxu0 %v2961_v39  ;;  %v3057_v39 = vld [vmem:[%s4043_s1 + $0x8b4] ss:$8 sps:$4 sm:$0xff]  }
  0xdb   :  { %2007 = vmatpush1.bf16.msra.mxu1 %v2956_v40  ;;  %v3055_v40 = vld [vmem:[%s4043_s1 + $0x8b0] ss:$8 sps:$4 sm:$0xff]  }
  0xdc   :  { %2179 = vmatpush1.bf16.msra.mxu0 %v2959_v41  ;;  %2008 = vmatprep.subr.bf16.mxu1 %v2964_v42  ;;  %v3060_v41 = vld [vmem:[%s4043_s1 + $0x8c4] ss:$8 sps:$4 sm:$0xff]   ;;  %v3058_v42 = vld [vmem:[%s4043_s1 + $0x8c0] ss:$8 sps:$4 sm:$0xff]  }
  0xdd   :  { %2180 = vmatprep.subr.bf16.mxu0 %v2967_v43  ;;  %v3063_v43 = vld [vmem:[%s4043_s1 + $0x8d4] ss:$8 sps:$4 sm:$0xff]  }
  0xdf   :  { %2009 = vmatpush1.bf16.msra.mxu1 %v2962_v44  ;;  %v3061_v44 = vld [vmem:[%s4043_s1 + $0x8d0] ss:$8 sps:$4 sm:$0xff]  }
  0xe0   :  { %2181 = vmatpush1.bf16.msra.mxu0 %v2965_v45  ;;  %2010 = vmatprep.subr.bf16.mxu1 %v2970_v46  ;;  %v3066_v45 = vld [vmem:[%s4043_s1 + $0x8e4] ss:$8 sps:$4 sm:$0xff]   ;;  %v3064_v46 = vld [vmem:[%s4043_s1 + $0x8e0] ss:$8 sps:$4 sm:$0xff]  }
  0xe1   :  { %2182 = vmatprep.subr.bf16.mxu0 %v2973_v47  ;;  %v3069_v47 = vld [vmem:[%s4043_s1 + $0x8f4] ss:$8 sps:$4 sm:$0xff]  }
  0xe3   :  { %2011 = vmatpush1.bf16.msra.mxu1 %v2968_v48  ;;  %v3067_v48 = vld [vmem:[%s4043_s1 + $0x8f0] ss:$8 sps:$4 sm:$0xff]  }
  0xe4   :  { %2183 = vmatpush1.bf16.msra.mxu0 %v2971_v49  ;;  %2012 = vmatprep.subr.bf16.mxu1 %v2976_v50  ;;  %v3070_v49 = vld [vmem:[%s4044_s0 + $0x40] ss:$72 sps:$4 sm:$0xff]  }
  0xe5   :  { %2184 = vmatprep.subr.bf16.mxu0 %v2979_v51 }
  0xe7   :  { %2013 = vmatpush1.bf16.msra.mxu1 %v2974_v52 }
  0xe8   :  { %2185 = vmatpush1.bf16.msra.mxu0 %v2977_v53  ;;  %2014 = vmatprep.subr.bf16.mxu1 %v2982_v54  ;;  %v325_v54 = vlaneseq }
  0xe9   :  { %2186 = vmatprep.subr.bf16.mxu0 %v2985_v55 }
  0xea   :  { %v326_v55 = vshrl.u32 %v325_v54, 7 }
  0xeb   :  { %2015 = vmatpush1.bf16.msra.mxu1 %v2980_v56 }
  0xec   :  { %2187 = vmatpush1.bf16.msra.mxu0 %v2983_v57  ;;  %2016 = vmatprep.subr.bf16.mxu1 %v2988_v58  ;;  %v327_v56 = vsub.s32 0, %v326_v55  ;;  %v323_v57 = vld [vmem:[%s4045_s2] sm:$0x3]  ;;  %v331_v58 = vsub.s32 1, %v326_v55 }
  0xed   :  { %2188 = vmatprep.subr.bf16.mxu0 %v2991_v59 }
  0xee   :  { %v328_v59 = vrot.slane %v323_v57, %v327_v56 }
  0xef   :  { %2017 = vmatpush1.bf16.msra.mxu1 %v2986_v60  ;;  %v332_v60 = vrot.slane %v323_v57, %v331_v58 }
  0xf0   :  { %2189 = vmatpush1.bf16.msra.mxu0 %v2989_v61  ;;  %2018 = vmatprep.subr.bf16.mxu1 %v2994_v62 }
  0xf1   :  { %2190 = vmatprep.subr.bf16.mxu0 %v2997_v63 }
  0xf3   :  { %2019 = vmatpush1.bf16.msra.mxu1 %v2992_v0  ;;  %v2252_v0 = vld [vmem:[%s4046_s3] sm:$0xff] }
  0xf4   :  { %2191 = vmatpush1.bf16.msra.mxu0 %v2995_v1  ;;  %2020 = vmatprep.subr.bf16.mxu1 %v3000_v2 }
  0xf5   :  { %2192 = vmatprep.subr.bf16.mxu0 %v3003_v3 }
  0xf7   :  { %2021 = vmatpush1.bf16.msra.mxu1 %v2998_v4  ;;  %v2253_v4 = vld [vmem:[%s4046_s3 + $0x8] sm:$0xff] }
  0xf8   :  { %2193 = vmatpush1.bf16.msra.mxu0 %v3001_v5  ;;  %2022 = vmatprep.subr.bf16.mxu1 %v3006_v6 }
  0xf9   :  { %2194 = vmatprep.subr.bf16.mxu0 %v3009_v7 }
  0xfb   :  { %2023 = vmatpush1.bf16.msra.mxu1 %v3004_v8  ;;  %v2254_v8 = vld [vmem:[%s4046_s3 + $0x10] sm:$0xff] }
  0xfc   :  { %2195 = vmatpush1.bf16.msra.mxu0 %v3007_v9  ;;  %2024 = vmatprep.subr.bf16.mxu1 %v3012_v10 }
  0xfd   :  { %2196 = vmatprep.subr.bf16.mxu0 %v3015_v11 }
  0xff   :  { %2025 = vmatpush1.bf16.msra.mxu1 %v3010_v12  ;;  %v2255_v12 = vld [vmem:[%s4046_s3 + $0x18] sm:$0xff] }
 0x100   :  { %2197 = vmatpush1.bf16.msra.mxu0 %v3013_v13 }
 0x101   :  { %2209 = vmatprep.subr.bf16.mxu0 %v3024_v14 }
 0x102   :  { %2027 = vmatmul.mubr.bf16.vlgmr.msra.gmra.mrb[0].mxu1 %v3016_v15 }
 0x103   :  { %2199 = vmatmul.mubr.bf16.vlgmr.msra.gmra.mrb[0].mxu0 %v3019_v16 }
 0x104   :  { %2210 = vmatpush1.bf16.msra.mxu0 %v3022_v17  ;;  %2241 = vmatprep.mubr.bf16.mxu0 %v3072_v18 }
 0x105   :  { %2211 = vmatprep.subr.bf16.mxu0 %v3027_v19 }
 0x108   :  { %2212 = vmatpush1.bf16.msra.mxu0 %v3025_v20 }
 0x109   :  { %2213 = vmatprep.subr.bf16.mxu0 %v3030_v21 }
 0x10c   :  { %2214 = vmatpush1.bf16.msra.mxu0 %v3028_v22 }
 0x10d   :  { %2215 = vmatprep.subr.bf16.mxu0 %v3033_v23 }
 0x110   :  { %2216 = vmatpush1.bf16.msra.mxu0 %v3031_v24 }
 0x111   :  { %2217 = vmatprep.subr.bf16.mxu0 %v3036_v25 }
 0x114   :  { %2218 = vmatpush1.bf16.msra.mxu0 %v3034_v26 }
 0x115   :  { %2219 = vmatprep.subr.bf16.mxu0 %v3039_v27 }
 0x118   :  { %2220 = vmatpush1.bf16.msra.mxu0 %v3037_v28 }
 0x119   :  { %2221 = vmatprep.subr.bf16.mxu0 %v3042_v29 }
 0x11c   :  { %2222 = vmatpush1.bf16.msra.mxu0 %v3040_v30 }
 0x11d   :  { %2223 = vmatprep.subr.bf16.mxu0 %v3045_v31 }
 0x120   :  { %2224 = vmatpush1.bf16.msra.mxu0 %v3043_v32 }
 0x121   :  { %2225 = vmatprep.subr.bf16.mxu0 %v3048_v33 }
 0x124   :  { %2226 = vmatpush1.bf16.msra.mxu0 %v3046_v34 }
 0x125   :  { %2227 = vmatprep.subr.bf16.mxu0 %v3051_v35 }
 0x128   :  { %2228 = vmatpush1.bf16.msra.mxu0 %v3049_v36 }
 0x129   :  { %2229 = vmatprep.subr.bf16.mxu0 %v3054_v37 }
 0x12c   :  { %2230 = vmatpush1.bf16.msra.mxu0 %v3052_v38 }
 0x12d   :  { %2231 = vmatprep.subr.bf16.mxu0 %v3057_v39 }
 0x130   :  { %2232 = vmatpush1.bf16.msra.mxu0 %v3055_v40 }
 0x131   :  { %2233 = vmatprep.subr.bf16.mxu0 %v3060_v41 }
 0x134   :  { %2234 = vmatpush1.bf16.msra.mxu0 %v3058_v42 }
 0x135   :  { %2235 = vmatprep.subr.bf16.mxu0 %v3063_v43 }
 0x138   :  { %2236 = vmatpush1.bf16.msra.mxu0 %v3061_v44 }
 0x139   :  { %2237 = vmatprep.subr.bf16.mxu0 %v3066_v45 }
 0x13c   :  { %2238 = vmatpush1.bf16.msra.mxu0 %v3064_v46 }
 0x13d   :  { %2239 = vmatprep.subr.bf16.mxu0 %v3069_v47 }
 0x140   :  { %2240 = vmatpush1.bf16.msra.mxu0 %v3067_v48 }
 0x143   :  { %2242 = vmatmul.mubr.bf16.vlgmr.msra.gmra.mrb[0].mxu0 %v3070_v49 }
 0x1d5   :  { %v2028_v50 = vpop.f32.mrb[0].mxu1 }
 0x1d6   :  { %v2030_v51 = vpop.f32.mrb[1].mxu1  ;;  %v2578_v61 = vadd.f32 %v2028_v50, %v328_v59 }
 0x1d7   :  { %v2032_v52 = vpop.f32.mrb[2].mxu1  ;;  %v2580_v62 = vadd.f32 %v2030_v51, %v332_v60 }
 0x1d8   :  { %v2034_v53 = vpop.f32.mrb[3].mxu1  ;;  %v2582_v1 = vadd.f32 %v2032_v52, %v328_v59 }
 0x1d9   :  { %v2584_v5 = vadd.f32 %v2034_v53, %v332_v60 }
 0x216   :  { %v2243_v63 = vpop.f32.mrb[0].mxu0 }
 0x217   :  { %v2579_v2 = vadd.f32 %v2578_v61, %v2243_v63  ;;  %v2245_v3 = vpop.f32.mrb[1].mxu0 }
 0x218   :  { %v2581_v6 = vadd.f32 %v2580_v62, %v2245_v3  ;;  %v2247_v7 = vpop.f32.mrb[2].mxu0 }
 0x219   :  { %v2256_v9 = vadd.f32 %v2579_v2, %v2252_v0  ;;  %v2583_v10 = vadd.f32 %v2582_v1, %v2247_v7  ;;  %v2249_v11 = vpop.f32.mrb[3].mxu0 }
 0x21a   :  { %v2257_v13 = vadd.f32 %v2581_v6, %v2253_v4  ;;  %v2585_v14 = vadd.f32 %v2584_v5, %v2249_v11 }
 0x21b   :  { %v2260_v15 = vmax.f32 %v2256_v9, 0.0  ;;  %v2258_v16 = vadd.f32 %v2583_v10, %v2254_v8 }
 0x21c   :  { %v2261_v17 = vmax.f32 %v2257_v13, 0.0  ;;  %v2259_v18 = vadd.f32 %v2585_v14, %v2255_v12 }
 0x21d   :  { %2264 = vst [vmem:[%s4047_s4] sm:$0xff] %v2260_v15  ;;  %v2262_v19 = vmax.f32 %v2258_v16, 0.0 }
 0x21e   :  { %2265 = vst [vmem:[%s4047_s4 + $0x8] sm:$0xff] %v2261_v17  ;;  %v2263_v20 = vmax.f32 %v2259_v18, 0.0 }
 0x21f   :  { %2266 = vst [vmem:[%s4047_s4 + $0x10] sm:$0xff] %v2262_v19 }
 0x220   :  { %2267 = vst [vmem:[%s4047_s4 + $0x18] sm:$0xff] %v2263_v20 }

// kernel: siamese_forward.29
= control target key start
LH: loop header
LB: loop body
LE: loop exit
PB: predicated region body
PF: predicated region fallthrough
CT: control target
= control target key end

     0   :  { %v1273_v3 = vmov 0.0   ;;  %vm37_vm0 = vcmask 130048   ;;  %vm873_vm1 = vcmask 1041408   ;;  %vm869_vm2 = vcmask 949248   ;;  %s1637_s0 = inlined_call_operand.vmem [shape: f32[16,256], index: 0, kind: input, shape index: {}]   ;;  %s1638_s1 = inlined_call_operand.vmem [shape: f32[4,16], index: 1, kind: input, shape index: {}]   ;;  %s1639_s2 = inlined_call_operand.vmem [shape: bf16[256,500], index: 2, kind: input, shape index: {}]   ;;  %s1640_s4 = inlined_call_operand.vmem [shape: bf16[500,10], index: 4, kind: input, shape index: {}]   ;;  %s1641_s3 = inlined_call_operand.vmem [shape: f32[1,500], index: 3, kind: input, shape index: {}]   ;;  %s1642_s7 = inlined_call_operand.<no memory space> [shape: f32[1,1], index: 7, kind: input, shape index: {}]   ;;  %s1643_s5 = inlined_call_operand.vmem [shape: f32[1,10], index: 5, kind: input, shape index: {}]   ;;  %s1644_s6 = inlined_call_operand.vmem [shape: f32[1,10], index: 6, kind: input, shape index: {}]   ;;  %s1645_s8 = inlined_call_operand.vmem [shape: f32[4,1], index: 8, kind: output, shape index: {}]  }
   0x1   :  { %v34_v0 = vld [vmem:[%s1637_s0 + $0x8] sm:$0xff]  ;;  %v36_v1 = vld [vmem:[%s1637_s0 + $0x18] sm:$0xff]  ;;  %v33_v2 = vld [vmem:[%s1637_s0] sm:$0xff]  ;;  %105 = vmatprep.mubr.f32.mxu0 %v1273_v3  ;;  %vm966_vm3 = vcmask 76800   ;;  %vm984_vm4 = vcmask 3072  }
   0x2   :  { %v1135_v4 = vpack.c.bf16 %v36_v1, %v34_v0  ;;  %v35_v5 = vld [vmem:[%s1637_s0 + $0x10] sm:$0xff]  ;;  %v32_v7 = vld [vmem:[%s1638_s1] sm:$0xf]  ;;  %v1143_v9 = vld [vmem:[%s1639_s2 + $0x8] ss:$16 sps:$4 sm:$0xff]  }
   0x3   :  { %v1137_v6 = vpack.c.bf16 %v35_v5, %v33_v2  ;;  %v1141_v8 = vld [vmem:[%s1639_s2 + $0x4] ss:$16 sps:$4 sm:$0xff]   ;;  %v1145_v10 = vld [vmem:[%s1639_s2 + $0xc] ss:$16 sps:$4 sm:$0xff]   ;;  %v1146_v11 = vld [vmem:[%s1639_s2] ss:$16 sps:$4 sm:$0xff]  }
   0x4   :  { %1136 = vmatprep.subr.bf16.mxu0 %v1135_v4  ;;  %520 = vmatprep.subr.bf16.mxu1 %v1141_v8  ;;  %v1147_v12 = vld [vmem:[%s1639_s2 + $0x24] ss:$16 sps:$4 sm:$0xff]   ;;  %v1151_v13 = vld [vmem:[%s1639_s2 + $0x2c] ss:$16 sps:$4 sm:$0xff]   ;;  %v1152_v14 = vld [vmem:[%s1639_s2 + $0x20] ss:$16 sps:$4 sm:$0xff]  }
   0x5   :  { %1138 = vmatpush1.bf16.msra.mxu0 %v1137_v6  ;;  %521 = vmatpush1.bf16.msra.mxu1 %v1146_v11  ;;  %v1153_v15 = vld [vmem:[%s1639_s2 + $0x44] ss:$16 sps:$4 sm:$0xff]   ;;  %v1149_v16 = vld [vmem:[%s1639_s2 + $0x28] ss:$16 sps:$4 sm:$0xff]   ;;  %v1157_v17 = vld [vmem:[%s1639_s2 + $0x4c] ss:$16 sps:$4 sm:$0xff]  }
   0x6   :  { %561 = vmatprep.subr.bf16.mxu0 %v1145_v10  ;;  %522 = vmatprep.subr.bf16.mxu1 %v1147_v12  ;;  %v1158_v18 = vld [vmem:[%s1639_s2 + $0x40] ss:$16 sps:$4 sm:$0xff]   ;;  %v1159_v19 = vld [vmem:[%s1639_s2 + $0x64] ss:$16 sps:$4 sm:$0xff]   ;;  %v1155_v20 = vld [vmem:[%s1639_s2 + $0x48] ss:$16 sps:$4 sm:$0xff]  }
   0x7   :  { %v1163_v21 = vld [vmem:[%s1639_s2 + $0x6c] ss:$16 sps:$4 sm:$0xff]   ;;  %v1164_v22 = vld [vmem:[%s1639_s2 + $0x60] ss:$16 sps:$4 sm:$0xff]   ;;  %v1165_v23 = vld [vmem:[%s1639_s2 + $0x84] ss:$16 sps:$4 sm:$0xff]  }
   0x8   :  { %990 = vmatmul.mubr.msk.f32.vlgmr.msra.gmra.mrb[0].mxu0 %vm37_vm0, %v32_v7  ;;  %v1161_v24 = vld [vmem:[%s1639_s2 + $0x68] ss:$16 sps:$4 sm:$0xff]   ;;  %v1169_v25 = vld [vmem:[%s1639_s2 + $0x8c] ss:$16 sps:$4 sm:$0xff]   ;;  %v1170_v26 = vld [vmem:[%s1639_s2 + $0x80] ss:$16 sps:$4 sm:$0xff]  }
   0x9   :  { %562 = vmatpush1.bf16.msra.mxu0 %v1143_v9  ;;  %523 = vmatpush1.bf16.msra.mxu1 %v1152_v14  ;;  %v1171_v27 = vld [vmem:[%s1639_s2 + $0xa4] ss:$16 sps:$4 sm:$0xff]   ;;  %v1167_v28 = vld [vmem:[%s1639_s2 + $0x88] ss:$16 sps:$4 sm:$0xff]   ;;  %v1175_v29 = vld [vmem:[%s1639_s2 + $0xac] ss:$16 sps:$4 sm:$0xff]  }
   0xa   :  { %563 = vmatprep.subr.bf16.mxu0 %v1151_v13  ;;  %524 = vmatprep.subr.bf16.mxu1 %v1153_v15  ;;  %v1176_v30 = vld [vmem:[%s1639_s2 + $0xa0] ss:$16 sps:$4 sm:$0xff]   ;;  %v1177_v31 = vld [vmem:[%s1639_s2 + $0xc4] ss:$16 sps:$4 sm:$0xff]   ;;  %v1173_v32 = vld [vmem:[%s1639_s2 + $0xa8] ss:$16 sps:$4 sm:$0xff]  }
   0xb   :  { %v1181_v33 = vld [vmem:[%s1639_s2 + $0xcc] ss:$16 sps:$4 sm:$0xff]   ;;  %v1182_v34 = vld [vmem:[%s1639_s2 + $0xc0] ss:$16 sps:$4 sm:$0xff]   ;;  %v1183_v35 = vld [vmem:[%s1639_s2 + $0xe4] ss:$16 sps:$4 sm:$0xff]  }
   0xc   :  { %v1179_v36 = vld [vmem:[%s1639_s2 + $0xc8] ss:$16 sps:$4 sm:$0xff]   ;;  %v1187_v37 = vld [vmem:[%s1639_s2 + $0xec] ss:$16 sps:$4 sm:$0xff]   ;;  %v1188_v38 = vld [vmem:[%s1639_s2 + $0xe0] ss:$16 sps:$4 sm:$0xff]  }
   0xd   :  { %564 = vmatpush1.bf16.msra.mxu0 %v1149_v16  ;;  %525 = vmatpush1.bf16.msra.mxu1 %v1158_v18  ;;  %v1189_v39 = vld [vmem:[%s1639_s2 + $0x104] ss:$16 sps:$4 sm:$0xff]   ;;  %v1185_v40 = vld [vmem:[%s1639_s2 + $0xe8] ss:$16 sps:$4 sm:$0xff]   ;;  %v1193_v41 = vld [vmem:[%s1639_s2 + $0x10c] ss:$16 sps:$4 sm:$0xff]  }
   0xe   :  { %565 = vmatprep.subr.bf16.mxu0 %v1157_v17  ;;  %526 = vmatprep.subr.bf16.mxu1 %v1159_v19  ;;  %v1194_v42 = vld [vmem:[%s1639_s2 + $0x100] ss:$16 sps:$4 sm:$0xff]   ;;  %v1195_v43 = vld [vmem:[%s1639_s2 + $0x124] ss:$16 sps:$4 sm:$0xff]   ;;  %v1191_v44 = vld [vmem:[%s1639_s2 + $0x108] ss:$16 sps:$4 sm:$0xff]  }
   0xf   :  { %v1199_v45 = vld [vmem:[%s1639_s2 + $0x12c] ss:$16 sps:$4 sm:$0xff]   ;;  %v1200_v46 = vld [vmem:[%s1639_s2 + $0x120] ss:$16 sps:$4 sm:$0xff]   ;;  %v1201_v47 = vld [vmem:[%s1639_s2 + $0x144] ss:$16 sps:$4 sm:$0xff]  }
  0x10   :  { %v1197_v48 = vld [vmem:[%s1639_s2 + $0x128] ss:$16 sps:$4 sm:$0xff]   ;;  %v1205_v49 = vld [vmem:[%s1639_s2 + $0x14c] ss:$16 sps:$4 sm:$0xff]   ;;  %v1206_v50 = vld [vmem:[%s1639_s2 + $0x140] ss:$16 sps:$4 sm:$0xff]  }
  0x11   :  { %566 = vmatpush1.bf16.msra.mxu0 %v1155_v20  ;;  %527 = vmatpush1.bf16.msra.mxu1 %v1164_v22  ;;  %v1207_v51 = vld [vmem:[%s1639_s2 + $0x164] ss:$16 sps:$4 sm:$0xff]   ;;  %v1203_v52 = vld [vmem:[%s1639_s2 + $0x148] ss:$16 sps:$4 sm:$0xff]   ;;  %v1211_v53 = vld [vmem:[%s1639_s2 + $0x16c] ss:$16 sps:$4 sm:$0xff]  }
  0x12   :  { %567 = vmatprep.subr.bf16.mxu0 %v1163_v21  ;;  %528 = vmatprep.subr.bf16.mxu1 %v1165_v23  ;;  %v1212_v54 = vld [vmem:[%s1639_s2 + $0x160] ss:$16 sps:$4 sm:$0xff]   ;;  %v1213_v55 = vld [vmem:[%s1639_s2 + $0x184] ss:$16 sps:$4 sm:$0xff]   ;;  %v1209_v56 = vld [vmem:[%s1639_s2 + $0x168] ss:$16 sps:$4 sm:$0xff]  }
  0x13   :  { %v1217_v57 = vld [vmem:[%s1639_s2 + $0x18c] ss:$16 sps:$4 sm:$0xff]   ;;  %v1218_v58 = vld [vmem:[%s1639_s2 + $0x180] ss:$16 sps:$4 sm:$0xff]   ;;  %v1219_v59 = vld [vmem:[%s1639_s2 + $0x1a4] ss:$16 sps:$4 sm:$0xff]  }
  0x14   :  { %v1215_v60 = vld [vmem:[%s1639_s2 + $0x188] ss:$16 sps:$4 sm:$0xff]   ;;  %v1223_v61 = vld [vmem:[%s1639_s2 + $0x1ac] ss:$16 sps:$4 sm:$0xff]   ;;  %v1224_v62 = vld [vmem:[%s1639_s2 + $0x1a0] ss:$16 sps:$4 sm:$0xff]  }
  0x15   :  { %568 = vmatpush1.bf16.msra.mxu0 %v1161_v24  ;;  %529 = vmatpush1.bf16.msra.mxu1 %v1170_v26  ;;  %v1225_v63 = vld [vmem:[%s1639_s2 + $0x1c4] ss:$16 sps:$4 sm:$0xff]   ;;  %v1221_v0 = vld [vmem:[%s1639_s2 + $0x1a8] ss:$16 sps:$4 sm:$0xff]   ;;  %v1229_v1 = vld [vmem:[%s1639_s2 + $0x1cc] ss:$16 sps:$4 sm:$0xff]  }
  0x16   :  { %569 = vmatprep.subr.bf16.mxu0 %v1169_v25  ;;  %530 = vmatprep.subr.bf16.mxu1 %v1171_v27  ;;  %v1230_v2 = vld [vmem:[%s1639_s2 + $0x1c0] ss:$16 sps:$4 sm:$0xff]   ;;  %v1227_v3 = vld [vmem:[%s1639_s2 + $0x1c8] ss:$16 sps:$4 sm:$0xff]   ;;  %v1231_v4 = vld [vmem:[%s1639_s2 + $0x1e4] ss:$16 sps:$4 sm:$0xff]  }
  0x17   :  { %v1235_v5 = vld [vmem:[%s1639_s2 + $0x1ec] ss:$16 sps:$4 sm:$0xff]   ;;  %v1233_v6 = vld [vmem:[%s1639_s2 + $0x1e8] ss:$16 sps:$4 sm:$0xff]   ;;  %v1236_v7 = vld [vmem:[%s1639_s2 + $0x1e0] ss:$16 sps:$4 sm:$0xff]  }
  0x18   :  { %v1237_v8 = vld [vmem:[%s1640_s4 + $0x40] sm:$0xff]   ;;  %v1241_v16 = vld [vmem:[%s1640_s4 + $0x48] sm:$0xff]   ;;  %v1245_v20 = vld [vmem:[%s1640_s4 + $0x50] sm:$0xff]  }
  0x19   :  { %570 = vmatpush1.bf16.msra.mxu0 %v1167_v28  ;;  %531 = vmatpush1.bf16.msra.mxu1 %v1176_v30  ;;  %v1238_v9 = vld [vmem:[%s1640_s4 + $0xc0] sm:$0xff]   ;;  %v1242_v17 = vld [vmem:[%s1640_s4 + $0xc8] sm:$0xff]   ;;  %v1246_v21 = vld [vmem:[%s1640_s4 + $0xd0] sm:$0xff]  }
  0x1a   :  { %571 = vmatprep.subr.bf16.mxu0 %v1175_v29  ;;  %532 = vmatprep.subr.bf16.mxu1 %v1177_v31  ;;  %v1239_v13 = vld [vmem:[%s1640_s4] sm:$0xff]   ;;  %v1243_v18 = vld [vmem:[%s1640_s4 + $0x8] sm:$0xff]   ;;  %v1247_v22 = vld [vmem:[%s1640_s4 + $0x10] sm:$0xff]  }
  0x1b   :  { %v1240_v14 = vld [vmem:[%s1640_s4 + $0x80] sm:$0xff]   ;;  %v1244_v19 = vld [vmem:[%s1640_s4 + $0x88] sm:$0xff]   ;;  %v1248_v23 = vld [vmem:[%s1640_s4 + $0x90] sm:$0xff]  }
  0x1c   :  { %v1249_v24 = vld [vmem:[%s1640_s4 + $0x58] sm:$0xff]   ;;  %v1253_v28 = vld [vmem:[%s1640_s4 + $0x60] sm:$0xff]  }
  0x1d   :  { %572 = vmatpush1.bf16.msra.mxu0 %v1173_v32  ;;  %533 = vmatpush1.bf16.msra.mxu1 %v1182_v34  ;;  %v1250_v25 = vld [vmem:[%s1640_s4 + $0xd8] sm:$0xff]   ;;  %v1254_v29 = vld [vmem:[%s1640_s4 + $0xe0] sm:$0xff]   ;;  %v1257_v32 = vld [vmem:[%s1640_s4 + $0x68] sm:$0xff]  }
  0x1e   :  { %573 = vmatprep.subr.bf16.mxu0 %v1181_v33  ;;  %534 = vmatprep.subr.bf16.mxu1 %v1183_v35  ;;  %v1251_v26 = vld [vmem:[%s1640_s4 + $0x18] sm:$0xff]   ;;  %v1255_v30 = vld [vmem:[%s1640_s4 + $0x20] sm:$0xff]   ;;  %v1258_v33 = vld [vmem:[%s1640_s4 + $0xe8] sm:$0xff]  }
  0x1f   :  { %v1252_v27 = vld [vmem:[%s1640_s4 + $0x98] sm:$0xff]   ;;  %v1256_v31 = vld [vmem:[%s1640_s4 + $0xa0] sm:$0xff]   ;;  %v1259_v34 = vld [vmem:[%s1640_s4 + $0x28] sm:$0xff]  }
  0x20   :  { %v1260_v35 = vld [vmem:[%s1640_s4 + $0xa8] sm:$0xff]  }
  0x21   :  { %574 = vmatpush1.bf16.msra.mxu0 %v1179_v36  ;;  %535 = vmatpush1.bf16.msra.mxu1 %v1188_v38  ;;  %v1261_v36 = vld [vmem:[%s1640_s4 + $0x70] sm:$0xff]  }
  0x22   :  { %575 = vmatprep.subr.bf16.mxu0 %v1187_v37  ;;  %536 = vmatprep.subr.bf16.mxu1 %v1189_v39  ;;  %v1262_v37 = vld [vmem:[%s1640_s4 + $0xf0] sm:$0xff]  }
  0x23   :  { %v1263_v38 = vld [vmem:[%s1640_s4 + $0x30] sm:$0xff]  }
  0x24   :  { %v1264_v39 = vld [vmem:[%s1640_s4 + $0xb0] sm:$0xff]  }
  0x25   :  { %576 = vmatpush1.bf16.msra.mxu0 %v1185_v40  ;;  %537 = vmatpush1.bf16.msra.mxu1 %v1194_v42  ;;  %v1265_v40 = vld [vmem:[%s1640_s4 + $0x78] sm:$0xff]  }
  0x26   :  { %577 = vmatprep.subr.bf16.mxu0 %v1193_v41  ;;  %538 = vmatprep.subr.bf16.mxu1 %v1195_v43  ;;  %v1266_v41 = vld [vmem:[%s1640_s4 + $0xf8] ss:$0 sps:$4 sm:$0x33]  }
  0x27   :  { %v1267_v42 = vld [vmem:[%s1640_s4 + $0x38] sm:$0xff]  }
  0x28   :  { %v1268_v43 = vld [vmem:[%s1640_s4 + $0xb8] sm:$0xff]  }
  0x29   :  { %578 = vmatpush1.bf16.msra.mxu0 %v1191_v44  ;;  %539 = vmatpush1.bf16.msra.mxu1 %v1200_v46  ;;  %v180_v44 = vlaneseq }
  0x2a   :  { %579 = vmatprep.subr.bf16.mxu0 %v1199_v45  ;;  %540 = vmatprep.subr.bf16.mxu1 %v1201_v47 }
  0x2b   :  { %v181_v45 = vshrl.u32 %v180_v44, 7 }
  0x2d   :  { %580 = vmatpush1.bf16.msra.mxu0 %v1197_v48  ;;  %541 = vmatpush1.bf16.msra.mxu1 %v1206_v50  ;;  %v182_v46 = vsub.s32 0, %v181_v45  ;;  %v190_v47 = vsub.s32 2, %v181_v45  ;;  %v178_v48 = vld [vmem:[%s1641_s3] sm:$0xf]  ;;  %v194_v50 = vsub.s32 3, %v181_v45 }
  0x2e   :  { %581 = vmatprep.subr.bf16.mxu0 %v1205_v49  ;;  %542 = vmatprep.subr.bf16.mxu1 %v1207_v51  ;;  %v186_v49 = vsub.s32 1, %v181_v45 }
  0x2f   :  { %v183_v51 = vrot.slane %v178_v48, %v182_v46 }
  0x31   :  { %582 = vmatpush1.bf16.msra.mxu0 %v1203_v52  ;;  %543 = vmatpush1.bf16.msra.mxu1 %v1212_v54  ;;  %v191_v52 = vrot.slane %v178_v48, %v190_v47  ;;  %v195_v54 = vrot.slane %v178_v48, %v194_v50 }
  0x32   :  { %583 = vmatprep.subr.bf16.mxu0 %v1211_v53  ;;  %544 = vmatprep.subr.bf16.mxu1 %v1213_v55  ;;  %v187_v53 = vrot.slane %v178_v48, %v186_v49 }
  0x35   :  { %584 = vmatpush1.bf16.msra.mxu0 %v1209_v56  ;;  %545 = vmatpush1.bf16.msra.mxu1 %v1218_v58 }
  0x36   :  { %585 = vmatprep.subr.bf16.mxu0 %v1217_v57  ;;  %546 = vmatprep.subr.bf16.mxu1 %v1219_v59 }
  0x39   :  { %586 = vmatpush1.bf16.msra.mxu0 %v1215_v60  ;;  %547 = vmatpush1.bf16.msra.mxu1 %v1224_v62 }
  0x3a   :  { %587 = vmatprep.subr.bf16.mxu0 %v1223_v61  ;;  %548 = vmatprep.subr.bf16.mxu1 %v1225_v63 }
  0x3d   :  { %588 = vmatpush1.bf16.msra.mxu0 %v1221_v0  ;;  %549 = vmatpush1.bf16.msra.mxu1 %v1230_v2 }
  0x3e   :  { %589 = vmatprep.subr.bf16.mxu0 %v1229_v1  ;;  %550 = vmatprep.subr.bf16.mxu1 %v1231_v4 }
  0x41   :  { %590 = vmatpush1.bf16.msra.mxu0 %v1227_v3  ;;  %551 = vmatpush1.bf16.msra.mxu1 %v1236_v7 }
  0x42   :  { %591 = vmatprep.subr.bf16.mxu0 %v1235_v5  ;;  %1091 = vmatprep.subr.bf16.mxu1 %v1237_v8 }
  0x45   :  { %592 = vmatpush1.bf16.msra.mxu0 %v1233_v6 }
  0x46   :  { %1113 = vmatprep.subr.bf16.mxu0 %v1238_v9 }
  0xdb   :  { %v107_v10 = vpop.f32.mrb[0].mxu0 }
  0xdc   :  { %v109_v11 = vpop.f32.mrb[1].mxu0  ;;  %v112_v15 = vpack.c.bf16 %v107_v10, %v107_v10 }
  0xdd   :  { %v113_v12 = vpack.c.bf16 %v109_v11, %v109_v11  ;;  %v13_v11 = vstv %s1642_s7 }
  0xde   :  { %14 = vst [vmem:[#allocation2] sm:$0x1] %v13_v11 }
  0xdf   :  { %552 = vmatprep.mubr.bf16.mxu1 %v113_v12  ;;  %593 = vmatprep.mubr.bf16.mxu0 %v113_v12 }
  0xe0   :  { %553 = vmatmul.mubr.bf16.vlgmr.msra.gmra.mrb[0].mxu1 %v112_v15  ;;  %594 = vmatmul.mubr.bf16.vlgmr.msra.gmra.mrb[4].mxu0 %v112_v15 }
  0xe1   :  { %1092 = vmatpush3.bf16.msra.mxu1 %v1239_v13  ;;  %1114 = vmatpush3.bf16.msra.mxu0 %v1240_v14  ;;  %v1055_v14 = vld [vmem:[%s1643_s5] ss:$0 sm:$0xff] }
  0xe2   :  { %1093 = vmatprep.subr.bf16.mxu1 %v1241_v16  ;;  %1115 = vmatprep.subr.bf16.mxu0 %v1242_v17 }
  0xe5   :  { %1094 = vmatpush3.bf16.msra.mxu1 %v1243_v18  ;;  %1116 = vmatpush3.bf16.msra.mxu0 %v1244_v19 }
  0xe6   :  { %1095 = vmatprep.subr.bf16.mxu1 %v1245_v20  ;;  %1117 = vmatprep.subr.bf16.mxu0 %v1246_v21 }
  0xe9   :  { %1096 = vmatpush3.bf16.msra.mxu1 %v1247_v22  ;;  %1118 = vmatpush3.bf16.msra.mxu0 %v1248_v23 }
  0xea   :  { %1097 = vmatprep.subr.bf16.mxu1 %v1249_v24  ;;  %1119 = vmatprep.subr.bf16.mxu0 %v1250_v25  ;;  %v1089_v25 = vld [vmem:[%s1644_s6] ss:$0 sm:$0xff] }
  0xed   :  { %1098 = vmatpush3.bf16.msra.mxu1 %v1251_v26  ;;  %1120 = vmatpush3.bf16.msra.mxu0 %v1252_v27 }
  0xee   :  { %1099 = vmatprep.subr.bf16.mxu1 %v1253_v28  ;;  %1121 = vmatprep.subr.bf16.mxu0 %v1254_v29  ;;  %v1090_v29 = vld [vmem:[#allocation2] ss:$0 sm:$0xff] }
  0xf1   :  { %1100 = vmatpush3.bf16.msra.mxu1 %v1255_v30  ;;  %1122 = vmatpush3.bf16.msra.mxu0 %v1256_v31 }
  0xf2   :  { %1101 = vmatprep.subr.bf16.mxu1 %v1257_v32  ;;  %1123 = vmatprep.subr.bf16.mxu0 %v1258_v33 }
  0xf5   :  { %1102 = vmatpush3.bf16.msra.mxu1 %v1259_v34  ;;  %1124 = vmatpush3.bf16.msra.mxu0 %v1260_v35 }
  0xf6   :  { %1103 = vmatprep.subr.bf16.mxu1 %v1261_v36  ;;  %1125 = vmatprep.subr.bf16.mxu0 %v1262_v37 }
  0xf9   :  { %1104 = vmatpush3.bf16.msra.mxu1 %v1263_v38  ;;  %1126 = vmatpush3.bf16.msra.mxu0 %v1264_v39 }
  0xfa   :  { %1105 = vmatprep.subr.bf16.mxu1 %v1265_v40  ;;  %1139 = vmatprep.subr.msk.bf16.mxu0 %vm873_vm1, %v1266_v41 }
  0xfd   :  { %1106 = vmatpush3.bf16.msra.mxu1 %v1267_v42  ;;  %1128 = vmatpush3.bf16.msra.mxu0 %v1268_v43 }
 0x1b3   :  { %v554_v55 = vpop.f32.mrb[0].mxu1  ;;  %v595_v56 = vpop.f32.mrb[4].mxu0 }
 0x1b4   :  { %v555_v57 = vadd.f32 %v554_v55, %v183_v51  ;;  %v596_v58 = vadd.f32 %v595_v56, %v191_v52  ;;  %v556_v59 = vpop.f32.mrb[1].mxu1  ;;  %v597_v60 = vpop.f32.mrb[5].mxu0 }
 0x1b5   :  { %v557_v61 = vadd.f32 %v556_v59, %v187_v53  ;;  %v598_v62 = vadd.f32 %v597_v60, %v195_v54  ;;  %v558_v63 = vpop.f32.mrb[2].mxu1  ;;  %v599_v0 = vpop.f32.mrb[6].mxu0 }
 0x1b6   :  { %v602_v1 = vmax.f32 %v555_v57, 0.0  ;;  %v604_v2 = vmax.f32 %v596_v58, 0.0  ;;  %v559_v3 = vpop.f32.mrb[3].mxu1  ;;  %v600_v4 = vpop.f32.mrb[7].mxu0 }
 0x1b7   :  { %v603_v5 = vmax.f32 %v557_v61, 0.0  ;;  %v605_v6 = vmax.f32 %v598_v62, 0.0 }
 0x1b8   :  { %v606_v9 = vpack.c.bf16 %v602_v1, %v602_v1  ;;  %v608_v10 = vpack.c.bf16 %v604_v2, %v604_v2 }
 0x1b9   :  { %v607_v7 = vpack.c.bf16 %v603_v5, %v603_v5  ;;  %v609_v8 = vpack.c.bf16 %v605_v6, %v605_v6 }
 0x1bb   :  { %909 = vmatprep.mubr.bf16.mxu1 %v607_v7  ;;  %1088 = vmatprep.mubr.msk.bf16.mxu0 %vm869_vm2, %v609_v8 }
 0x1bc   :  { %910 = vmatmul.mubr.bf16.vlgmr.msra.gmra.mrb[4].mxu1 %v606_v9  ;;  %950 = vmatmul.mubr.bf16.vlgmr.msra.gmra.mrb[8].mxu0 %v608_v10 }
 0x28f   :  { %v1107_v12 = vpop.f32.mrb[4].mxu1  ;;  %v1129_v13 = vpop.f32.mrb[8].mxu0 }
 0x290   :  { %v1108_v15 = vpop.f32.mrb[5].mxu1  ;;  %v1130_v16 = vpop.f32.mrb[9].mxu0 }
 0x291   :  { %v1109_v17 = vadd.f32 %v1108_v15, %v1107_v12  ;;  %v1131_v18 = vadd.f32 %v1130_v16, %v1129_v13  ;;  %v1110_v19 = vpop.f32.mrb[6].mxu1  ;;  %v1132_v20 = vpop.f32.mrb[10].mxu0 }
 0x292   :  { %v1111_v21 = vpop.f32.mrb[7].mxu1  ;;  %v1133_v22 = vpop.f32.mrb[11].mxu0 }
 0x293   :  { %v912_v23 = vadd.f32 %v1109_v17, %v1055_v14 }
 0x295   :  { %v952_v24 = vadd.f32 %v1131_v18, %v912_v23 }
 0x297   :  { %v957_v26 = vmax.f32 %v952_v24, 0.0 }
 0x299   :  { %v965_v27 = vmul.f32 %v1089_v25, %v957_v26 }
 0x29b   :  { %v967_v28 = vsel %vm966_vm3, %v965_v27, 0.0 }
 0x29c   :  { %968 = vadd.xlane.f32.xlu0 %v967_v28 }
 0x329   :  { %v969_v30 = vpop.xlane.xlu0 %968 }
 0x32a   :  { %v977_v31 = vadd.f32 %v1090_v29, %v969_v30 }
 0x32c   :  { %v978_v32 = vsub.f32 0.0, %v977_v31 }
 0x32e   :  { %v979_v33 = vmul.f32 1.442695, %v978_v32 }
 0x330   :  { %1269 = vpow2.f32 %v979_v33 }
 0x33a   :  { %v1270_v34 = vpop.eup %1269 }
 0x33b   :  { %v981_v35 = vadd.f32 1.0, %v1270_v34 }
 0x33d   :  { %1271 = vrcp.f32 %v981_v35 }
 0x347   :  { %v1272_v36 = vpop.eup %1271 }
 0x348   :  { %985 = vst.msk [vmem:[%s1645_s8] sm:$0xf] %vm984_vm4, %v1272_v36 }

</bundles_post_ra>
